<compile_context>
chip_gen: v5e
topology: v5e:2x2
jax: 0.10.0
libtpu: 0.0.40
codegen_flags: <defaults>
</compile_context>

<pallas_src>
import math

import numpy as np
import jax
import jax.numpy as jnp
from jax.experimental import pallas as pl
from jax.experimental.pallas import tpu as pltpu


# ----------------------------------------------------------------------------
# Tap-validity masks (0/1 floats): valid iff the 3x3 tap reads inside the image
# ----------------------------------------------------------------------------
def _build_masks(H, W):
    P = H * W
    y = np.arange(P) // W
    x = np.arange(P) % W
    m = np.zeros((9, 1, P), np.float32)
    for dy in range(3):
        for dx in range(3):
            ey, ex = dy - 1, dx - 1
            valid = (y + ey >= 0) & (y + ey < H) & (x + ex >= 0) & (x + ex < W)
            m[dy * 3 + dx, 0, :] = valid.astype(np.float32)
    return m


# ----------------------------------------------------------------------------
# Fused kernel: 7 x (3x3 same conv [+ ReLU]) for one batch element.
# ----------------------------------------------------------------------------
def _make_dip7_kernel(H, W, n_layers):
    P = H * W
    base = W + 1          # zero-halo width on each side of the flat row buffer

    def kernel(x_ref, w_ref, b_ref, m_ref, o_ref, buf_ref):
        # x_ref : (1, C, P)                 input image (channels pre-padded to C)
        # w_ref : (L, 9, C, C)              weights  w[l, tap, c_out, c_in]
        # b_ref : (L, C, 1)                 biases
        # m_ref : (9, 1, P)                 tap validity masks (0/1 f32)
        # o_ref : (1, C, P)                 output of layer 7 (no ReLU)
        # buf_ref: (C, P + 2*(W+1)) f32     VMEM scratch, zero halo kept across layers
        C = x_ref.shape[1]

        # Zero once: the flat halo stays zero for every layer (SAME padding of
        # the top/bottom rows); left/right column wrap is handled by the masks.
        buf_ref[...] = jnp.zeros(buf_ref.shape, jnp.float32)
        buf_ref[:, base:base + P] = x_ref[0].astype(jnp.float32)

        # Hoist the 9 masks: loaded once, reused by all layers.
        masks = [m_ref[t] for t in range(9)]                  # each (1, P)

        for layer in range(n_layers):                         # static unroll (7)
            acc = jnp.zeros((C, P), jnp.float32)
            for dy in range(3):
                for dx in range(3):
                    tap = dy * 3 + dx
                    off = base + (dy - 1) * W + (dx - 1)      # static lane offset
                    slab = buf_ref[:, off:off + P] * masks[tap]   # (C, P)
                    acc = acc + jnp.dot(w_ref[layer, tap], slab,
                                        preferred_element_type=jnp.float32)
            y = acc + b_ref[layer]                            # (C, 1) broadcast
            if layer < n_layers - 1:
                y = jnp.maximum(y, 0.0)                       # fused ReLU
                buf_ref[:, base:base + P] = y
            else:
                o_ref[...] = y.reshape(1, C, P).astype(o_ref.dtype)

    return kernel


def _fused_conv_stack(x_ncp, w_stack, b_stack, masks, H, W):
    """All 7 convs in one pallas_call.  x_ncp: (N, C, H*W) f32."""
    N, C, P = x_ncp.shape
    L = w_stack.shape[0]
    kernel = _make_dip7_kernel(H, W, L)

    flops = 2 * N * P * 9 * C * C * L
    bytes_accessed = 4 * (x_ncp.size + w_stack.size + b_stack.size
                          + masks.size + N * C * P)

    return pl.pallas_call(
        kernel,
        out_shape=jax.ShapeDtypeStruct((N, C, P), jnp.float32),
        grid_spec=pltpu.PrefetchScalarGridSpec(
            num_scalar_prefetch=0,
            grid=(N,),
            in_specs=[
                pl.BlockSpec((1, C, P), lambda n: (n, 0, 0)),
                pl.BlockSpec((L, 9, C, C), lambda n: (0, 0, 0, 0)),
                pl.BlockSpec((L, C, 1), lambda n: (0, 0, 0)),
                pl.BlockSpec((9, 1, P), lambda n: (0, 0, 0)),
            ],
            out_specs=pl.BlockSpec((1, C, P), lambda n: (n, 0, 0)),
            scratch_shapes=[pltpu.VMEM((C, P + 2 * (W + 1)), jnp.float32)],
        ),
        compiler_params=pltpu.CompilerParams(
            dimension_semantics=("parallel",)),
        cost_estimate=pl.CostEstimate(
            flops=flops, transcendentals=0, bytes_accessed=bytes_accessed),
    )(x_ncp, w_stack, b_stack, masks)


# ----------------------------------------------------------------------------
# Forward pass (matches PyTorch module: 7 convs, ReLU after layers 1..6)
# ----------------------------------------------------------------------------
@jax.jit
def deep_image_prior_7layer_forward(x_nchw, w_stack, b_stack):
    N, Cin, H, W = x_nchw.shape
    C = w_stack.shape[2]
    x = x_nchw.reshape(N, Cin, H * W).astype(jnp.float32)   # free reshape
    if Cin < C:                   # zero-pad input channels to C (layer 1)
        x = jnp.pad(x, ((0, 0), (0, C - Cin), (0, 0)))
    masks = jnp.asarray(_build_masks(H, W))                 # trace-time constant
    y = _fused_conv_stack(x, w_stack, b_stack, masks, H, W)
    return y.reshape(N, C, H, W)                            # NCHW out


# ----------------------------------------------------------------------------
# Deterministic parameter init (kaiming_uniform-style, like the module's init)
# ----------------------------------------------------------------------------
def _init_conv_params(key, cin, cout, ksize=3):
    kw, kb = jax.random.split(key)
    fan_in = cin * ksize * ksize
    w_bound = math.sqrt(6.0 / fan_in)          # kaiming_uniform_ (a=0, fan_in)
    w = jax.random.uniform(kw, (ksize, ksize, cin, cout),      # HWIO
                           minval=-w_bound, maxval=w_bound, dtype=jnp.float32)
    b_bound = 1.0 / math.sqrt(fan_in)          # default nn.Conv2d bias init
    b = jax.random.uniform(kb, (cout,), minval=-b_bound, maxval=b_bound,
                           dtype=jnp.float32)
    return w, b


def make_params(num_image_channels, n_features, seed=0):
    keys = jax.random.split(jax.random.PRNGKey(seed), 7)
    params = []
    cin = num_image_channels
    for i in range(7):
        params.append(_init_conv_params(keys[i], cin, n_features))
        cin = n_features
    return params


def pack_params(params, n_features):
    """Per-layer HWIO weights -> (L, 9, C, C) [tap, c_out, c_in] + (L, C, 1)."""
    C = n_features
    ws, bs = [], []
    for w, b in params:                        # w: (3,3,cin,C), b: (C,)
        cin = w.shape[2]
        assert cin <= C, "input channels must not exceed feature width"
        if cin < C:    # zero-pad input-channel dim (matches zero-padded act)
            w = jnp.pad(w, ((0, 0), (0, 0), (0, C - cin), (0, 0)))
        # tap = dy*3 + dx (matches the kernel's loop order), stored as (co, ci)
        ws.append(jnp.transpose(w, (0, 1, 3, 2)).reshape(9, C, C))
        bs.append(b.reshape(C, 1))
    return jnp.stack(ws), jnp.stack(bs)


# ----------------------------------------------------------------------------
# Reference (pure JAX) for sanity checking
# ----------------------------------------------------------------------------
def _reference_forward(x_nchw, params):
    x = jnp.transpose(x_nchw, (0, 2, 3, 1)).astype(jnp.float32)
    for i, (w, b) in enumerate(params):
        y = jax.lax.conv_general_dilated(
            x, w, window_strides=(1, 1), padding="SAME",
            dimension_numbers=("NHWC", "HWIO", "NHWC"))
        y = y + b
        if i != len(params) - 1:
            y = jnp.maximum(y, 0.0)
        x = y
    return jnp.transpose(x, (0, 3, 1, 2))


if __name__ == "__main__":
    # batch=2, numberOfImageChannels=4, spatial=16, nFeaturesIntermediateLayers=32
    batch, in_ch, spatial, n_feat = 2, 4, 16, 32

    key = jax.random.PRNGKey(0)
    x = jax.random.normal(key, (batch, in_ch, spatial, spatial),
                          dtype=jnp.float32)

    params = make_params(in_ch, n_feat, seed=0)
    w_stack, b_stack = pack_params(params, n_feat)

    out = deep_image_prior_7layer_forward(x, w_stack, b_stack)
    out = jax.block_until_ready(out)

    ref = _reference_forward(x, params)
    assert out.shape == (batch, n_feat, spatial, spatial), out.shape
    assert jnp.allclose(out, ref, atol=1e-4, rtol=1e-4), (
        float(jnp.max(jnp.abs(out - ref))))

    print("KERNEL_OK")
</pallas_src>

<mosaic_0001>
module attributes {stable_mosaic.version = 11 : i64} {
  func.func @kernel(%arg0: i32, %arg1: memref<1x32x256xf32, #tpu.memory_space<vmem>>, %arg2: memref<7x9x32x32xf32, #tpu.memory_space<vmem>>, %arg3: memref<7x32x1xf32, #tpu.memory_space<vmem>>, %arg4: memref<9x1x256xf32, #tpu.memory_space<vmem>>, %arg5: memref<1x32x256xf32, #tpu.memory_space<vmem>>, %arg6: memref<32x290xf32, #tpu.memory_space<vmem>>) attributes {dimension_semantics = [#tpu.dimension_semantics<parallel>], iteration_bounds = array<i64: 2>, scalar_prefetch = 0 : i64, scratch_operands = 1 : i64, tpu.core_type = #tpu.core_type<tc>, window_params = [{transform_indices = @transform_0, window_bounds = array<i64: 1, 32, 256>}, {pipeline_mode = #tpu.pipeline_mode<synchronous>, transform_indices = @transform_1, window_bounds = array<i64: 7, 9, 32, 32>}, {pipeline_mode = #tpu.pipeline_mode<synchronous>, transform_indices = @transform_2, window_bounds = array<i64: 7, 32, 1>}, {pipeline_mode = #tpu.pipeline_mode<synchronous>, transform_indices = @transform_3, window_bounds = array<i64: 9, 1, 256>}, {transform_indices = @transform_4, window_bounds = array<i64: 1, 32, 256>}]} {
    %cst = arith.constant 0.000000e+00 : f32
    %0 = vector.broadcast %cst : f32 to vector<32x290xf32>
    %c0 = arith.constant 0 : index
    %c0_0 = arith.constant 0 : index
    %1 = vector.load %arg6[%c0, %c0_0] : memref<32x290xf32, #tpu.memory_space<vmem>>, vector<32x290xf32>
    tpu.vector_store %arg6[%c0, %c0_0], %0 {strides = array<i32>} : memref<32x290xf32, #tpu.memory_space<vmem>>, vector<32x290xf32>,
    %c0_1 = arith.constant 0 : index
    %c0_2 = arith.constant 0 : index
    %c0_3 = arith.constant 0 : index
    %2 = vector.load %arg1[%c0_1, %c0_2, %c0_3] : memref<1x32x256xf32, #tpu.memory_space<vmem>>, vector<1x32x256xf32>
    %3 = vector.shape_cast %2 : vector<1x32x256xf32> to vector<32x256xf32>
    %c0_4 = arith.constant 0 : index
    %c17 = arith.constant 17 : index
    %4 = vector.load %arg6[%c0_4, %c17] : memref<32x290xf32, #tpu.memory_space<vmem>>, vector<32x256xf32>
    tpu.vector_store %arg6[%c0_4, %c17], %3 {strides = array<i32>} : memref<32x290xf32, #tpu.memory_space<vmem>>, vector<32x256xf32>,
    %c0_5 = arith.constant 0 : index
    %c0_6 = arith.constant 0 : index
    %c0_7 = arith.constant 0 : index
    %5 = vector.load %arg4[%c0_5, %c0_6, %c0_7] : memref<9x1x256xf32, #tpu.memory_space<vmem>>, vector<1x1x256xf32>
    %6 = vector.shape_cast %5 : vector<1x1x256xf32> to vector<1x256xf32>
    %c1 = arith.constant 1 : index
    %c0_8 = arith.constant 0 : index
    %c0_9 = arith.constant 0 : index
    %7 = vector.load %arg4[%c1, %c0_8, %c0_9] : memref<9x1x256xf32, #tpu.memory_space<vmem>>, vector<1x1x256xf32>
    %8 = vector.shape_cast %7 : vector<1x1x256xf32> to vector<1x256xf32>
    %c2 = arith.constant 2 : index
    %c0_10 = arith.constant 0 : index
    %c0_11 = arith.constant 0 : index
    %9 = vector.load %arg4[%c2, %c0_10, %c0_11] : memref<9x1x256xf32, #tpu.memory_space<vmem>>, vector<1x1x256xf32>
    %10 = vector.shape_cast %9 : vector<1x1x256xf32> to vector<1x256xf32>
    %c3 = arith.constant 3 : index
    %c0_12 = arith.constant 0 : index
    %c0_13 = arith.constant 0 : index
    %11 = vector.load %arg4[%c3, %c0_12, %c0_13] : memref<9x1x256xf32, #tpu.memory_space<vmem>>, vector<1x1x256xf32>
    %12 = vector.shape_cast %11 : vector<1x1x256xf32> to vector<1x256xf32>
    %c4 = arith.constant 4 : index
    %c0_14 = arith.constant 0 : index
    %c0_15 = arith.constant 0 : index
    %13 = vector.load %arg4[%c4, %c0_14, %c0_15] : memref<9x1x256xf32, #tpu.memory_space<vmem>>, vector<1x1x256xf32>
    %14 = vector.shape_cast %13 : vector<1x1x256xf32> to vector<1x256xf32>
    %c5 = arith.constant 5 : index
    %c0_16 = arith.constant 0 : index
    %c0_17 = arith.constant 0 : index
    %15 = vector.load %arg4[%c5, %c0_16, %c0_17] : memref<9x1x256xf32, #tpu.memory_space<vmem>>, vector<1x1x256xf32>
    %16 = vector.shape_cast %15 : vector<1x1x256xf32> to vector<1x256xf32>
    %c6 = arith.constant 6 : index
    %c0_18 = arith.constant 0 : index
    %c0_19 = arith.constant 0 : index
    %17 = vector.load %arg4[%c6, %c0_18, %c0_19] : memref<9x1x256xf32, #tpu.memory_space<vmem>>, vector<1x1x256xf32>
    %18 = vector.shape_cast %17 : vector<1x1x256xf32> to vector<1x256xf32>
    %c7 = arith.constant 7 : index
    %c0_20 = arith.constant 0 : index
    %c0_21 = arith.constant 0 : index
    %19 = vector.load %arg4[%c7, %c0_20, %c0_21] : memref<9x1x256xf32, #tpu.memory_space<vmem>>, vector<1x1x256xf32>
    %20 = vector.shape_cast %19 : vector<1x1x256xf32> to vector<1x256xf32>
    %c8 = arith.constant 8 : index
    %c0_22 = arith.constant 0 : index
    %c0_23 = arith.constant 0 : index
    %21 = vector.load %arg4[%c8, %c0_22, %c0_23] : memref<9x1x256xf32, #tpu.memory_space<vmem>>, vector<1x1x256xf32>
    %22 = vector.shape_cast %21 : vector<1x1x256xf32> to vector<1x256xf32>
    %cst_24 = arith.constant 0.000000e+00 : f32
    %23 = vector.broadcast %cst_24 : f32 to vector<32x256xf32>
    %c0_25 = arith.constant 0 : index
    %c0_26 = arith.constant 0 : index
    %24 = vector.load %arg6[%c0_25, %c0_26] : memref<32x290xf32, #tpu.memory_space<vmem>>, vector<32x256xf32>
    %25 = vector.broadcast %6 : vector<1x256xf32> to vector<32x256xf32>
    %26 = arith.mulf %24, %25 : vector<32x256xf32>
    %c0_27 = arith.constant 0 : index
    %c0_28 = arith.constant 0 : index
    %c0_29 = arith.constant 0 : index
    %c0_30 = arith.constant 0 : index
    %27 = vector.load %arg2[%c0_27, %c0_28, %c0_29, %c0_30] : memref<7x9x32x32xf32, #tpu.memory_space<vmem>>, vector<1x1x32x32xf32>
    %28 = vector.shape_cast %27 : vector<1x1x32x32xf32> to vector<32x32xf32>
    %cst_31 = arith.constant dense<0.000000e+00> : vector<32x256xf32>
    %29 = tpu.matmul %28, %26, %cst_31 {dimension_numbers = #tpu.dot_dimension_numbers<[1], [0], [0], [1], [0, 0, 1, 1], [], []>} : vector<32x32xf32>, vector<32x256xf32>, vector<32x256xf32> -> vector<32x256xf32>
    %30 = arith.addf %23, %29 : vector<32x256xf32>
    %c0_32 = arith.constant 0 : index
    %c1_33 = arith.constant 1 : index
    %31 = vector.load %arg6[%c0_32, %c1_33] : memref<32x290xf32, #tpu.memory_space<vmem>>, vector<32x256xf32>
    %32 = vector.broadcast %8 : vector<1x256xf32> to vector<32x256xf32>
    %33 = arith.mulf %31, %32 : vector<32x256xf32>
    %c0_34 = arith.constant 0 : index
    %c1_35 = arith.constant 1 : index
    %c0_36 = arith.constant 0 : index
    %c0_37 = arith.constant 0 : index
    %34 = vector.load %arg2[%c0_34, %c1_35, %c0_36, %c0_37] : memref<7x9x32x32xf32, #tpu.memory_space<vmem>>, vector<1x1x32x32xf32>
    %35 = vector.shape_cast %34 : vector<1x1x32x32xf32> to vector<32x32xf32>
    %cst_38 = arith.constant dense<0.000000e+00> : vector<32x256xf32>
    %36 = tpu.matmul %35, %33, %cst_38 {dimension_numbers = #tpu.dot_dimension_numbers<[1], [0], [0], [1], [0, 0, 1, 1], [], []>} : vector<32x32xf32>, vector<32x256xf32>, vector<32x256xf32> -> vector<32x256xf32>
    %37 = arith.addf %30, %36 : vector<32x256xf32>
    %c0_39 = arith.constant 0 : index
    %c2_40 = arith.constant 2 : index
    %38 = vector.load %arg6[%c0_39, %c2_40] : memref<32x290xf32, #tpu.memory_space<vmem>>, vector<32x256xf32>
    %39 = vector.broadcast %10 : vector<1x256xf32> to vector<32x256xf32>
    %40 = arith.mulf %38, %39 : vector<32x256xf32>
    %c0_41 = arith.constant 0 : index
    %c2_42 = arith.constant 2 : index
    %c0_43 = arith.constant 0 : index
    %c0_44 = arith.constant 0 : index
    %41 = vector.load %arg2[%c0_41, %c2_42, %c0_43, %c0_44] : memref<7x9x32x32xf32, #tpu.memory_space<vmem>>, vector<1x1x32x32xf32>
    %42 = vector.shape_cast %41 : vector<1x1x32x32xf32> to vector<32x32xf32>
    %cst_45 = arith.constant dense<0.000000e+00> : vector<32x256xf32>
    %43 = tpu.matmul %42, %40, %cst_45 {dimension_numbers = #tpu.dot_dimension_numbers<[1], [0], [0], [1], [0, 0, 1, 1], [], []>} : vector<32x32xf32>, vector<32x256xf32>, vector<32x256xf32> -> vector<32x256xf32>
    %44 = arith.addf %37, %43 : vector<32x256xf32>
    %c0_46 = arith.constant 0 : index
    %c16 = arith.constant 16 : index
    %45 = vector.load %arg6[%c0_46, %c16] : memref<32x290xf32, #tpu.memory_space<vmem>>, vector<32x256xf32>
    %46 = vector.broadcast %12 : vector<1x256xf32> to vector<32x256xf32>
    %47 = arith.mulf %45, %46 : vector<32x256xf32>
    %c0_47 = arith.constant 0 : index
    %c3_48 = arith.constant 3 : index
    %c0_49 = arith.constant 0 : index
    %c0_50 = arith.constant 0 : index
    %48 = vector.load %arg2[%c0_47, %c3_48, %c0_49, %c0_50] : memref<7x9x32x32xf32, #tpu.memory_space<vmem>>, vector<1x1x32x32xf32>
    %49 = vector.shape_cast %48 : vector<1x1x32x32xf32> to vector<32x32xf32>
    %cst_51 = arith.constant dense<0.000000e+00> : vector<32x256xf32>
    %50 = tpu.matmul %49, %47, %cst_51 {dimension_numbers = #tpu.dot_dimension_numbers<[1], [0], [0], [1], [0, 0, 1, 1], [], []>} : vector<32x32xf32>, vector<32x256xf32>, vector<32x256xf32> -> vector<32x256xf32>
    %51 = arith.addf %44, %50 : vector<32x256xf32>
    %c0_52 = arith.constant 0 : index
    %c17_53 = arith.constant 17 : index
    %52 = vector.load %arg6[%c0_52, %c17_53] : memref<32x290xf32, #tpu.memory_space<vmem>>, vector<32x256xf32>
    %53 = vector.broadcast %14 : vector<1x256xf32> to vector<32x256xf32>
    %54 = arith.mulf %52, %53 : vector<32x256xf32>
    %c0_54 = arith.constant 0 : index
    %c4_55 = arith.constant 4 : index
    %c0_56 = arith.constant 0 : index
    %c0_57 = arith.constant 0 : index
    %55 = vector.load %arg2[%c0_54, %c4_55, %c0_56, %c0_57] : memref<7x9x32x32xf32, #tpu.memory_space<vmem>>, vector<1x1x32x32xf32>
    %56 = vector.shape_cast %55 : vector<1x1x32x32xf32> to vector<32x32xf32>
    %cst_58 = arith.constant dense<0.000000e+00> : vector<32x256xf32>
    %57 = tpu.matmul %56, %54, %cst_58 {dimension_numbers = #tpu.dot_dimension_numbers<[1], [0], [0], [1], [0, 0, 1, 1], [], []>} : vector<32x32xf32>, vector<32x256xf32>, vector<32x256xf32> -> vector<32x256xf32>
    %58 = arith.addf %51, %57 : vector<32x256xf32>
    %c0_59 = arith.constant 0 : index
    %c18 = arith.constant 18 : index
    %59 = vector.load %arg6[%c0_59, %c18] : memref<32x290xf32, #tpu.memory_space<vmem>>, vector<32x256xf32>
    %60 = vector.broadcast %16 : vector<1x256xf32> to vector<32x256xf32>
    %61 = arith.mulf %59, %60 : vector<32x256xf32>
    %c0_60 = arith.constant 0 : index
    %c5_61 = arith.constant 5 : index
    %c0_62 = arith.constant 0 : index
    %c0_63 = arith.constant 0 : index
    %62 = vector.load %arg2[%c0_60, %c5_61, %c0_62, %c0_63] : memref<7x9x32x32xf32, #tpu.memory_space<vmem>>, vector<1x1x32x32xf32>
    %63 = vector.shape_cast %62 : vector<1x1x32x32xf32> to vector<32x32xf32>
    %cst_64 = arith.constant dense<0.000000e+00> : vector<32x256xf32>
    %64 = tpu.matmul %63, %61, %cst_64 {dimension_numbers = #tpu.dot_dimension_numbers<[1], [0], [0], [1], [0, 0, 1, 1], [], []>} : vector<32x32xf32>, vector<32x256xf32>, vector<32x256xf32> -> vector<32x256xf32>
    %65 = arith.addf %58, %64 : vector<32x256xf32>
    %c0_65 = arith.constant 0 : index
    %c32 = arith.constant 32 : index
    %66 = vector.load %arg6[%c0_65, %c32] : memref<32x290xf32, #tpu.memory_space<vmem>>, vector<32x256xf32>
    %67 = vector.broadcast %18 : vector<1x256xf32> to vector<32x256xf32>
    %68 = arith.mulf %66, %67 : vector<32x256xf32>
    %c0_66 = arith.constant 0 : index
    %c6_67 = arith.constant 6 : index
    %c0_68 = arith.constant 0 : index
    %c0_69 = arith.constant 0 : index
    %69 = vector.load %arg2[%c0_66, %c6_67, %c0_68, %c0_69] : memref<7x9x32x32xf32, #tpu.memory_space<vmem>>, vector<1x1x32x32xf32>
    %70 = vector.shape_cast %69 : vector<1x1x32x32xf32> to vector<32x32xf32>
    %cst_70 = arith.constant dense<0.000000e+00> : vector<32x256xf32>
    %71 = tpu.matmul %70, %68, %cst_70 {dimension_numbers = #tpu.dot_dimension_numbers<[1], [0], [0], [1], [0, 0, 1, 1], [], []>} : vector<32x32xf32>, vector<32x256xf32>, vector<32x256xf32> -> vector<32x256xf32>
    %72 = arith.addf %65, %71 : vector<32x256xf32>
    %c0_71 = arith.constant 0 : index
    %c33 = arith.constant 33 : index
    %73 = vector.load %arg6[%c0_71, %c33] : memref<32x290xf32, #tpu.memory_space<vmem>>, vector<32x256xf32>
    %74 = vector.broadcast %20 : vector<1x256xf32> to vector<32x256xf32>
    %75 = arith.mulf %73, %74 : vector<32x256xf32>
    %c0_72 = arith.constant 0 : index
    %c7_73 = arith.constant 7 : index
    %c0_74 = arith.constant 0 : index
    %c0_75 = arith.constant 0 : index
    %76 = vector.load %arg2[%c0_72, %c7_73, %c0_74, %c0_75] : memref<7x9x32x32xf32, #tpu.memory_space<vmem>>, vector<1x1x32x32xf32>
    %77 = vector.shape_cast %76 : vector<1x1x32x32xf32> to vector<32x32xf32>
    %cst_76 = arith.constant dense<0.000000e+00> : vector<32x256xf32>
    %78 = tpu.matmul %77, %75, %cst_76 {dimension_numbers = #tpu.dot_dimension_numbers<[1], [0], [0], [1], [0, 0, 1, 1], [], []>} : vector<32x32xf32>, vector<32x256xf32>, vector<32x256xf32> -> vector<32x256xf32>
    %79 = arith.addf %72, %78 : vector<32x256xf32>
    %c0_77 = arith.constant 0 : index
    %c34 = arith.constant 34 : index
    %80 = vector.load %arg6[%c0_77, %c34] : memref<32x290xf32, #tpu.memory_space<vmem>>, vector<32x256xf32>
    %81 = vector.broadcast %22 : vector<1x256xf32> to vector<32x256xf32>
    %82 = arith.mulf %80, %81 : vector<32x256xf32>
    %c0_78 = arith.constant 0 : index
    %c8_79 = arith.constant 8 : index
    %c0_80 = arith.constant 0 : index
    %c0_81 = arith.constant 0 : index
    %83 = vector.load %arg2[%c0_78, %c8_79, %c0_80, %c0_81] : memref<7x9x32x32xf32, #tpu.memory_space<vmem>>, vector<1x1x32x32xf32>
    %84 = vector.shape_cast %83 : vector<1x1x32x32xf32> to vector<32x32xf32>
    %cst_82 = arith.constant dense<0.000000e+00> : vector<32x256xf32>
    %85 = tpu.matmul %84, %82, %cst_82 {dimension_numbers = #tpu.dot_dimension_numbers<[1], [0], [0], [1], [0, 0, 1, 1], [], []>} : vector<32x32xf32>, vector<32x256xf32>, vector<32x256xf32> -> vector<32x256xf32>
    %86 = arith.addf %79, %85 : vector<32x256xf32>
    %c0_83 = arith.constant 0 : index
    %c0_84 = arith.constant 0 : index
    %c0_85 = arith.constant 0 : index
    %87 = vector.load %arg3[%c0_83, %c0_84, %c0_85] : memref<7x32x1xf32, #tpu.memory_space<vmem>>, vector<1x32x1xf32>
    %88 = vector.shape_cast %87 : vector<1x32x1xf32> to vector<32x1xf32>
    %89 = vector.broadcast %88 : vector<32x1xf32> to vector<32x256xf32>
    %90 = arith.addf %86, %89 : vector<32x256xf32>
    %cst_86 = arith.constant 0.000000e+00 : f32
    %91 = vector.broadcast %cst_86 : f32 to vector<32x256xf32>
    %92 = arith.maximumf %90, %91 : vector<32x256xf32>
    %c0_87 = arith.constant 0 : index
    %c17_88 = arith.constant 17 : index
    %93 = vector.load %arg6[%c0_87, %c17_88] : memref<32x290xf32, #tpu.memory_space<vmem>>, vector<32x256xf32>
    tpu.vector_store %arg6[%c0_87, %c17_88], %92 {strides = array<i32>} : memref<32x290xf32, #tpu.memory_space<vmem>>, vector<32x256xf32>,
    %cst_89 = arith.constant 0.000000e+00 : f32
    %94 = vector.broadcast %cst_89 : f32 to vector<32x256xf32>
    %c0_90 = arith.constant 0 : index
    %c0_91 = arith.constant 0 : index
    %95 = vector.load %arg6[%c0_90, %c0_91] : memref<32x290xf32, #tpu.memory_space<vmem>>, vector<32x256xf32>
    %96 = vector.broadcast %6 : vector<1x256xf32> to vector<32x256xf32>
    %97 = arith.mulf %95, %96 : vector<32x256xf32>
    %c1_92 = arith.constant 1 : index
    %c0_93 = arith.constant 0 : index
    %c0_94 = arith.constant 0 : index
    %c0_95 = arith.constant 0 : index
    %98 = vector.load %arg2[%c1_92, %c0_93, %c0_94, %c0_95] : memref<7x9x32x32xf32, #tpu.memory_space<vmem>>, vector<1x1x32x32xf32>
    %99 = vector.shape_cast %98 : vector<1x1x32x32xf32> to vector<32x32xf32>
    %cst_96 = arith.constant dense<0.000000e+00> : vector<32x256xf32>
    %100 = tpu.matmul %99, %97, %cst_96 {dimension_numbers = #tpu.dot_dimension_numbers<[1], [0], [0], [1], [0, 0, 1, 1], [], []>} : vector<32x32xf32>, vector<32x256xf32>, vector<32x256xf32> -> vector<32x256xf32>
    %101 = arith.addf %94, %100 : vector<32x256xf32>
    %c0_97 = arith.constant 0 : index
    %c1_98 = arith.constant 1 : index
    %102 = vector.load %arg6[%c0_97, %c1_98] : memref<32x290xf32, #tpu.memory_space<vmem>>, vector<32x256xf32>
    %103 = vector.broadcast %8 : vector<1x256xf32> to vector<32x256xf32>
    %104 = arith.mulf %102, %103 : vector<32x256xf32>
    %c1_99 = arith.constant 1 : index
    %c1_100 = arith.constant 1 : index
    %c0_101 = arith.constant 0 : index
    %c0_102 = arith.constant 0 : index
    %105 = vector.load %arg2[%c1_99, %c1_100, %c0_101, %c0_102] : memref<7x9x32x32xf32, #tpu.memory_space<vmem>>, vector<1x1x32x32xf32>
    %106 = vector.shape_cast %105 : vector<1x1x32x32xf32> to vector<32x32xf32>
    %cst_103 = arith.constant dense<0.000000e+00> : vector<32x256xf32>
    %107 = tpu.matmul %106, %104, %cst_103 {dimension_numbers = #tpu.dot_dimension_numbers<[1], [0], [0], [1], [0, 0, 1, 1], [], []>} : vector<32x32xf32>, vector<32x256xf32>, vector<32x256xf32> -> vector<32x256xf32>
    %108 = arith.addf %101, %107 : vector<32x256xf32>
    %c0_104 = arith.constant 0 : index
    %c2_105 = arith.constant 2 : index
    %109 = vector.load %arg6[%c0_104, %c2_105] : memref<32x290xf32, #tpu.memory_space<vmem>>, vector<32x256xf32>
    %110 = vector.broadcast %10 : vector<1x256xf32> to vector<32x256xf32>
    %111 = arith.mulf %109, %110 : vector<32x256xf32>
    %c1_106 = arith.constant 1 : index
    %c2_107 = arith.constant 2 : index
    %c0_108 = arith.constant 0 : index
    %c0_109 = arith.constant 0 : index
    %112 = vector.load %arg2[%c1_106, %c2_107, %c0_108, %c0_109] : memref<7x9x32x32xf32, #tpu.memory_space<vmem>>, vector<1x1x32x32xf32>
    %113 = vector.shape_cast %112 : vector<1x1x32x32xf32> to vector<32x32xf32>
    %cst_110 = arith.constant dense<0.000000e+00> : vector<32x256xf32>
    %114 = tpu.matmul %113, %111, %cst_110 {dimension_numbers = #tpu.dot_dimension_numbers<[1], [0], [0], [1], [0, 0, 1, 1], [], []>} : vector<32x32xf32>, vector<32x256xf32>, vector<32x256xf32> -> vector<32x256xf32>
    %115 = arith.addf %108, %114 : vector<32x256xf32>
    %c0_111 = arith.constant 0 : index
    %c16_112 = arith.constant 16 : index
    %116 = vector.load %arg6[%c0_111, %c16_112] : memref<32x290xf32, #tpu.memory_space<vmem>>, vector<32x256xf32>
    %117 = vector.broadcast %12 : vector<1x256xf32> to vector<32x256xf32>
    %118 = arith.mulf %116, %117 : vector<32x256xf32>
    %c1_113 = arith.constant 1 : index
    %c3_114 = arith.constant 3 : index
    %c0_115 = arith.constant 0 : index
    %c0_116 = arith.constant 0 : index
    %119 = vector.load %arg2[%c1_113, %c3_114, %c0_115, %c0_116] : memref<7x9x32x32xf32, #tpu.memory_space<vmem>>, vector<1x1x32x32xf32>
    %120 = vector.shape_cast %119 : vector<1x1x32x32xf32> to vector<32x32xf32>
    %cst_117 = arith.constant dense<0.000000e+00> : vector<32x256xf32>
    %121 = tpu.matmul %120, %118, %cst_117 {dimension_numbers = #tpu.dot_dimension_numbers<[1], [0], [0], [1], [0, 0, 1, 1], [], []>} : vector<32x32xf32>, vector<32x256xf32>, vector<32x256xf32> -> vector<32x256xf32>
    %122 = arith.addf %115, %121 : vector<32x256xf32>
    %c0_118 = arith.constant 0 : index
    %c17_119 = arith.constant 17 : index
    %123 = vector.load %arg6[%c0_118, %c17_119] : memref<32x290xf32, #tpu.memory_space<vmem>>, vector<32x256xf32>
    %124 = vector.broadcast %14 : vector<1x256xf32> to vector<32x256xf32>
    %125 = arith.mulf %123, %124 : vector<32x256xf32>
    %c1_120 = arith.constant 1 : index
    %c4_121 = arith.constant 4 : index
    %c0_122 = arith.constant 0 : index
    %c0_123 = arith.constant 0 : index
    %126 = vector.load %arg2[%c1_120, %c4_121, %c0_122, %c0_123] : memref<7x9x32x32xf32, #tpu.memory_space<vmem>>, vector<1x1x32x32xf32>
    %127 = vector.shape_cast %126 : vector<1x1x32x32xf32> to vector<32x32xf32>
    %cst_124 = arith.constant dense<0.000000e+00> : vector<32x256xf32>
    %128 = tpu.matmul %127, %125, %cst_124 {dimension_numbers = #tpu.dot_dimension_numbers<[1], [0], [0], [1], [0, 0, 1, 1], [], []>} : vector<32x32xf32>, vector<32x256xf32>, vector<32x256xf32> -> vector<32x256xf32>
    %129 = arith.addf %122, %128 : vector<32x256xf32>
    %c0_125 = arith.constant 0 : index
    %c18_126 = arith.constant 18 : index
    %130 = vector.load %arg6[%c0_125, %c18_126] : memref<32x290xf32, #tpu.memory_space<vmem>>, vector<32x256xf32>
    %131 = vector.broadcast %16 : vector<1x256xf32> to vector<32x256xf32>
    %132 = arith.mulf %130, %131 : vector<32x256xf32>
    %c1_127 = arith.constant 1 : index
    %c5_128 = arith.constant 5 : index
    %c0_129 = arith.constant 0 : index
    %c0_130 = arith.constant 0 : index
    %133 = vector.load %arg2[%c1_127, %c5_128, %c0_129, %c0_130] : memref<7x9x32x32xf32, #tpu.memory_space<vmem>>, vector<1x1x32x32xf32>
    %134 = vector.shape_cast %133 : vector<1x1x32x32xf32> to vector<32x32xf32>
    %cst_131 = arith.constant dense<0.000000e+00> : vector<32x256xf32>
    %135 = tpu.matmul %134, %132, %cst_131 {dimension_numbers = #tpu.dot_dimension_numbers<[1], [0], [0], [1], [0, 0, 1, 1], [], []>} : vector<32x32xf32>, vector<32x256xf32>, vector<32x256xf32> -> vector<32x256xf32>
    %136 = arith.addf %129, %135 : vector<32x256xf32>
    %c0_132 = arith.constant 0 : index
    %c32_133 = arith.constant 32 : index
    %137 = vector.load %arg6[%c0_132, %c32_133] : memref<32x290xf32, #tpu.memory_space<vmem>>, vector<32x256xf32>
    %138 = vector.broadcast %18 : vector<1x256xf32> to vector<32x256xf32>
    %139 = arith.mulf %137, %138 : vector<32x256xf32>
    %c1_134 = arith.constant 1 : index
    %c6_135 = arith.constant 6 : index
    %c0_136 = arith.constant 0 : index
    %c0_137 = arith.constant 0 : index
    %140 = vector.load %arg2[%c1_134, %c6_135, %c0_136, %c0_137] : memref<7x9x32x32xf32, #tpu.memory_space<vmem>>, vector<1x1x32x32xf32>
    %141 = vector.shape_cast %140 : vector<1x1x32x32xf32> to vector<32x32xf32>
    %cst_138 = arith.constant dense<0.000000e+00> : vector<32x256xf32>
    %142 = tpu.matmul %141, %139, %cst_138 {dimension_numbers = #tpu.dot_dimension_numbers<[1], [0], [0], [1], [0, 0, 1, 1], [], []>} : vector<32x32xf32>, vector<32x256xf32>, vector<32x256xf32> -> vector<32x256xf32>
    %143 = arith.addf %136, %142 : vector<32x256xf32>
    %c0_139 = arith.constant 0 : index
    %c33_140 = arith.constant 33 : index
    %144 = vector.load %arg6[%c0_139, %c33_140] : memref<32x290xf32, #tpu.memory_space<vmem>>, vector<32x256xf32>
    %145 = vector.broadcast %20 : vector<1x256xf32> to vector<32x256xf32>
    %146 = arith.mulf %144, %145 : vector<32x256xf32>
    %c1_141 = arith.constant 1 : index
    %c7_142 = arith.constant 7 : index
    %c0_143 = arith.constant 0 : index
    %c0_144 = arith.constant 0 : index
    %147 = vector.load %arg2[%c1_141, %c7_142, %c0_143, %c0_144] : memref<7x9x32x32xf32, #tpu.memory_space<vmem>>, vector<1x1x32x32xf32>
    %148 = vector.shape_cast %147 : vector<1x1x32x32xf32> to vector<32x32xf32>
    %cst_145 = arith.constant dense<0.000000e+00> : vector<32x256xf32>
    %149 = tpu.matmul %148, %146, %cst_145 {dimension_numbers = #tpu.dot_dimension_numbers<[1], [0], [0], [1], [0, 0, 1, 1], [], []>} : vector<32x32xf32>, vector<32x256xf32>, vector<32x256xf32> -> vector<32x256xf32>
    %150 = arith.addf %143, %149 : vector<32x256xf32>
    %c0_146 = arith.constant 0 : index
    %c34_147 = arith.constant 34 : index
    %151 = vector.load %arg6[%c0_146, %c34_147] : memref<32x290xf32, #tpu.memory_space<vmem>>, vector<32x256xf32>
    %152 = vector.broadcast %22 : vector<1x256xf32> to vector<32x256xf32>
    %153 = arith.mulf %151, %152 : vector<32x256xf32>
    %c1_148 = arith.constant 1 : index
    %c8_149 = arith.constant 8 : index
    %c0_150 = arith.constant 0 : index
    %c0_151 = arith.constant 0 : index
    %154 = vector.load %arg2[%c1_148, %c8_149, %c0_150, %c0_151] : memref<7x9x32x32xf32, #tpu.memory_space<vmem>>, vector<1x1x32x32xf32>
    %155 = vector.shape_cast %154 : vector<1x1x32x32xf32> to vector<32x32xf32>
    %cst_152 = arith.constant dense<0.000000e+00> : vector<32x256xf32>
    %156 = tpu.matmul %155, %153, %cst_152 {dimension_numbers = #tpu.dot_dimension_numbers<[1], [0], [0], [1], [0, 0, 1, 1], [], []>} : vector<32x32xf32>, vector<32x256xf32>, vector<32x256xf32> -> vector<32x256xf32>
    %157 = arith.addf %150, %156 : vector<32x256xf32>
    %c1_153 = arith.constant 1 : index
    %c0_154 = arith.constant 0 : index
    %c0_155 = arith.constant 0 : index
    %158 = vector.load %arg3[%c1_153, %c0_154, %c0_155] : memref<7x32x1xf32, #tpu.memory_space<vmem>>, vector<1x32x1xf32>
    %159 = vector.shape_cast %158 : vector<1x32x1xf32> to vector<32x1xf32>
    %160 = vector.broadcast %159 : vector<32x1xf32> to vector<32x256xf32>
    %161 = arith.addf %157, %160 : vector<32x256xf32>
    %cst_156 = arith.constant 0.000000e+00 : f32
    %162 = vector.broadcast %cst_156 : f32 to vector<32x256xf32>
    %163 = arith.maximumf %161, %162 : vector<32x256xf32>
    %c0_157 = arith.constant 0 : index
    %c17_158 = arith.constant 17 : index
    %164 = vector.load %arg6[%c0_157, %c17_158] : memref<32x290xf32, #tpu.memory_space<vmem>>, vector<32x256xf32>
    tpu.vector_store %arg6[%c0_157, %c17_158], %163 {strides = array<i32>} : memref<32x290xf32, #tpu.memory_space<vmem>>, vector<32x256xf32>,
    %cst_159 = arith.constant 0.000000e+00 : f32
    %165 = vector.broadcast %cst_159 : f32 to vector<32x256xf32>
    %c0_160 = arith.constant 0 : index
    %c0_161 = arith.constant 0 : index
    %166 = vector.load %arg6[%c0_160, %c0_161] : memref<32x290xf32, #tpu.memory_space<vmem>>, vector<32x256xf32>
    %167 = vector.broadcast %6 : vector<1x256xf32> to vector<32x256xf32>
    %168 = arith.mulf %166, %167 : vector<32x256xf32>
    %c2_162 = arith.constant 2 : index
    %c0_163 = arith.constant 0 : index
    %c0_164 = arith.constant 0 : index
    %c0_165 = arith.constant 0 : index
    %169 = vector.load %arg2[%c2_162, %c0_163, %c0_164, %c0_165] : memref<7x9x32x32xf32, #tpu.memory_space<vmem>>, vector<1x1x32x32xf32>
    %170 = vector.shape_cast %169 : vector<1x1x32x32xf32> to vector<32x32xf32>
    %cst_166 = arith.constant dense<0.000000e+00> : vector<32x256xf32>
    %171 = tpu.matmul %170, %168, %cst_166 {dimension_numbers = #tpu.dot_dimension_numbers<[1], [0], [0], [1], [0, 0, 1, 1], [], []>} : vector<32x32xf32>, vector<32x256xf32>, vector<32x256xf32> -> vector<32x256xf32>
    %172 = arith.addf %165, %171 : vector<32x256xf32>
    %c0_167 = arith.constant 0 : index
    %c1_168 = arith.constant 1 : index
    %173 = vector.load %arg6[%c0_167, %c1_168] : memref<32x290xf32, #tpu.memory_space<vmem>>, vector<32x256xf32>
    %174 = vector.broadcast %8 : vector<1x256xf32> to vector<32x256xf32>
    %175 = arith.mulf %173, %174 : vector<32x256xf32>
    %c2_169 = arith.constant 2 : index
    %c1_170 = arith.constant 1 : index
    %c0_171 = arith.constant 0 : index
    %c0_172 = arith.constant 0 : index
    %176 = vector.load %arg2[%c2_169, %c1_170, %c0_171, %c0_172] : memref<7x9x32x32xf32, #tpu.memory_space<vmem>>, vector<1x1x32x32xf32>
    %177 = vector.shape_cast %176 : vector<1x1x32x32xf32> to vector<32x32xf32>
    %cst_173 = arith.constant dense<0.000000e+00> : vector<32x256xf32>
    %178 = tpu.matmul %177, %175, %cst_173 {dimension_numbers = #tpu.dot_dimension_numbers<[1], [0], [0], [1], [0, 0, 1, 1], [], []>} : vector<32x32xf32>, vector<32x256xf32>, vector<32x256xf32> -> vector<32x256xf32>
    %179 = arith.addf %172, %178 : vector<32x256xf32>
    %c0_174 = arith.constant 0 : index
    %c2_175 = arith.constant 2 : index
    %180 = vector.load %arg6[%c0_174, %c2_175] : memref<32x290xf32, #tpu.memory_space<vmem>>, vector<32x256xf32>
    %181 = vector.broadcast %10 : vector<1x256xf32> to vector<32x256xf32>
    %182 = arith.mulf %180, %181 : vector<32x256xf32>
    %c2_176 = arith.constant 2 : index
    %c2_177 = arith.constant 2 : index
    %c0_178 = arith.constant 0 : index
    %c0_179 = arith.constant 0 : index
    %183 = vector.load %arg2[%c2_176, %c2_177, %c0_178, %c0_179] : memref<7x9x32x32xf32, #tpu.memory_space<vmem>>, vector<1x1x32x32xf32>
    %184 = vector.shape_cast %183 : vector<1x1x32x32xf32> to vector<32x32xf32>
    %cst_180 = arith.constant dense<0.000000e+00> : vector<32x256xf32>
    %185 = tpu.matmul %184, %182, %cst_180 {dimension_numbers = #tpu.dot_dimension_numbers<[1], [0], [0], [1], [0, 0, 1, 1], [], []>} : vector<32x32xf32>, vector<32x256xf32>, vector<32x256xf32> -> vector<32x256xf32>
    %186 = arith.addf %179, %185 : vector<32x256xf32>
    %c0_181 = arith.constant 0 : index
    %c16_182 = arith.constant 16 : index
    %187 = vector.load %arg6[%c0_181, %c16_182] : memref<32x290xf32, #tpu.memory_space<vmem>>, vector<32x256xf32>
    %188 = vector.broadcast %12 : vector<1x256xf32> to vector<32x256xf32>
    %189 = arith.mulf %187, %188 : vector<32x256xf32>
    %c2_183 = arith.constant 2 : index
    %c3_184 = arith.constant 3 : index
    %c0_185 = arith.constant 0 : index
    %c0_186 = arith.constant 0 : index
    %190 = vector.load %arg2[%c2_183, %c3_184, %c0_185, %c0_186] : memref<7x9x32x32xf32, #tpu.memory_space<vmem>>, vector<1x1x32x32xf32>
    %191 = vector.shape_cast %190 : vector<1x1x32x32xf32> to vector<32x32xf32>
    %cst_187 = arith.constant dense<0.000000e+00> : vector<32x256xf32>
    %192 = tpu.matmul %191, %189, %cst_187 {dimension_numbers = #tpu.dot_dimension_numbers<[1], [0], [0], [1], [0, 0, 1, 1], [], []>} : vector<32x32xf32>, vector<32x256xf32>, vector<32x256xf32> -> vector<32x256xf32>
    %193 = arith.addf %186, %192 : vector<32x256xf32>
    %c0_188 = arith.constant 0 : index
    %c17_189 = arith.constant 17 : index
    %194 = vector.load %arg6[%c0_188, %c17_189] : memref<32x290xf32, #tpu.memory_space<vmem>>, vector<32x256xf32>
    %195 = vector.broadcast %14 : vector<1x256xf32> to vector<32x256xf32>
    %196 = arith.mulf %194, %195 : vector<32x256xf32>
    %c2_190 = arith.constant 2 : index
    %c4_191 = arith.constant 4 : index
    %c0_192 = arith.constant 0 : index
    %c0_193 = arith.constant 0 : index
    %197 = vector.load %arg2[%c2_190, %c4_191, %c0_192, %c0_193] : memref<7x9x32x32xf32, #tpu.memory_space<vmem>>, vector<1x1x32x32xf32>
    %198 = vector.shape_cast %197 : vector<1x1x32x32xf32> to vector<32x32xf32>
    %cst_194 = arith.constant dense<0.000000e+00> : vector<32x256xf32>
    %199 = tpu.matmul %198, %196, %cst_194 {dimension_numbers = #tpu.dot_dimension_numbers<[1], [0], [0], [1], [0, 0, 1, 1], [], []>} : vector<32x32xf32>, vector<32x256xf32>, vector<32x256xf32> -> vector<32x256xf32>
    %200 = arith.addf %193, %199 : vector<32x256xf32>
    %c0_195 = arith.constant 0 : index
    %c18_196 = arith.constant 18 : index
    %201 = vector.load %arg6[%c0_195, %c18_196] : memref<32x290xf32, #tpu.memory_space<vmem>>, vector<32x256xf32>
    %202 = vector.broadcast %16 : vector<1x256xf32> to vector<32x256xf32>
    %203 = arith.mulf %201, %202 : vector<32x256xf32>
    %c2_197 = arith.constant 2 : index
    %c5_198 = arith.constant 5 : index
    %c0_199 = arith.constant 0 : index
    %c0_200 = arith.constant 0 : index
    %204 = vector.load %arg2[%c2_197, %c5_198, %c0_199, %c0_200] : memref<7x9x32x32xf32, #tpu.memory_space<vmem>>, vector<1x1x32x32xf32>
    %205 = vector.shape_cast %204 : vector<1x1x32x32xf32> to vector<32x32xf32>
    %cst_201 = arith.constant dense<0.000000e+00> : vector<32x256xf32>
    %206 = tpu.matmul %205, %203, %cst_201 {dimension_numbers = #tpu.dot_dimension_numbers<[1], [0], [0], [1], [0, 0, 1, 1], [], []>} : vector<32x32xf32>, vector<32x256xf32>, vector<32x256xf32> -> vector<32x256xf32>
    %207 = arith.addf %200, %206 : vector<32x256xf32>
    %c0_202 = arith.constant 0 : index
    %c32_203 = arith.constant 32 : index
    %208 = vector.load %arg6[%c0_202, %c32_203] : memref<32x290xf32, #tpu.memory_space<vmem>>, vector<32x256xf32>
    %209 = vector.broadcast %18 : vector<1x256xf32> to vector<32x256xf32>
    %210 = arith.mulf %208, %209 : vector<32x256xf32>
    %c2_204 = arith.constant 2 : index
    %c6_205 = arith.constant 6 : index
    %c0_206 = arith.constant 0 : index
    %c0_207 = arith.constant 0 : index
    %211 = vector.load %arg2[%c2_204, %c6_205, %c0_206, %c0_207] : memref<7x9x32x32xf32, #tpu.memory_space<vmem>>, vector<1x1x32x32xf32>
    %212 = vector.shape_cast %211 : vector<1x1x32x32xf32> to vector<32x32xf32>
    %cst_208 = arith.constant dense<0.000000e+00> : vector<32x256xf32>
    %213 = tpu.matmul %212, %210, %cst_208 {dimension_numbers = #tpu.dot_dimension_numbers<[1], [0], [0], [1], [0, 0, 1, 1], [], []>} : vector<32x32xf32>, vector<32x256xf32>, vector<32x256xf32> -> vector<32x256xf32>
    %214 = arith.addf %207, %213 : vector<32x256xf32>
    %c0_209 = arith.constant 0 : index
    %c33_210 = arith.constant 33 : index
    %215 = vector.load %arg6[%c0_209, %c33_210] : memref<32x290xf32, #tpu.memory_space<vmem>>, vector<32x256xf32>
    %216 = vector.broadcast %20 : vector<1x256xf32> to vector<32x256xf32>
    %217 = arith.mulf %215, %216 : vector<32x256xf32>
    %c2_211 = arith.constant 2 : index
    %c7_212 = arith.constant 7 : index
    %c0_213 = arith.constant 0 : index
    %c0_214 = arith.constant 0 : index
    %218 = vector.load %arg2[%c2_211, %c7_212, %c0_213, %c0_214] : memref<7x9x32x32xf32, #tpu.memory_space<vmem>>, vector<1x1x32x32xf32>
    %219 = vector.shape_cast %218 : vector<1x1x32x32xf32> to vector<32x32xf32>
    %cst_215 = arith.constant dense<0.000000e+00> : vector<32x256xf32>
    %220 = tpu.matmul %219, %217, %cst_215 {dimension_numbers = #tpu.dot_dimension_numbers<[1], [0], [0], [1], [0, 0, 1, 1], [], []>} : vector<32x32xf32>, vector<32x256xf32>, vector<32x256xf32> -> vector<32x256xf32>
    %221 = arith.addf %214, %220 : vector<32x256xf32>
    %c0_216 = arith.constant 0 : index
    %c34_217 = arith.constant 34 : index
    %222 = vector.load %arg6[%c0_216, %c34_217] : memref<32x290xf32, #tpu.memory_space<vmem>>, vector<32x256xf32>
    %223 = vector.broadcast %22 : vector<1x256xf32> to vector<32x256xf32>
    %224 = arith.mulf %222, %223 : vector<32x256xf32>
    %c2_218 = arith.constant 2 : index
    %c8_219 = arith.constant 8 : index
    %c0_220 = arith.constant 0 : index
    %c0_221 = arith.constant 0 : index
    %225 = vector.load %arg2[%c2_218, %c8_219, %c0_220, %c0_221] : memref<7x9x32x32xf32, #tpu.memory_space<vmem>>, vector<1x1x32x32xf32>
    %226 = vector.shape_cast %225 : vector<1x1x32x32xf32> to vector<32x32xf32>
    %cst_222 = arith.constant dense<0.000000e+00> : vector<32x256xf32>
    %227 = tpu.matmul %226, %224, %cst_222 {dimension_numbers = #tpu.dot_dimension_numbers<[1], [0], [0], [1], [0, 0, 1, 1], [], []>} : vector<32x32xf32>, vector<32x256xf32>, vector<32x256xf32> -> vector<32x256xf32>
    %228 = arith.addf %221, %227 : vector<32x256xf32>
    %c2_223 = arith.constant 2 : index
    %c0_224 = arith.constant 0 : index
    %c0_225 = arith.constant 0 : index
    %229 = vector.load %arg3[%c2_223, %c0_224, %c0_225] : memref<7x32x1xf32, #tpu.memory_space<vmem>>, vector<1x32x1xf32>
    %230 = vector.shape_cast %229 : vector<1x32x1xf32> to vector<32x1xf32>
    %231 = vector.broadcast %230 : vector<32x1xf32> to vector<32x256xf32>
    %232 = arith.addf %228, %231 : vector<32x256xf32>
    %cst_226 = arith.constant 0.000000e+00 : f32
    %233 = vector.broadcast %cst_226 : f32 to vector<32x256xf32>
    %234 = arith.maximumf %232, %233 : vector<32x256xf32>
    %c0_227 = arith.constant 0 : index
    %c17_228 = arith.constant 17 : index
    %235 = vector.load %arg6[%c0_227, %c17_228] : memref<32x290xf32, #tpu.memory_space<vmem>>, vector<32x256xf32>
    tpu.vector_store %arg6[%c0_227, %c17_228], %234 {strides = array<i32>} : memref<32x290xf32, #tpu.memory_space<vmem>>, vector<32x256xf32>,
    %cst_229 = arith.constant 0.000000e+00 : f32
    %236 = vector.broadcast %cst_229 : f32 to vector<32x256xf32>
    %c0_230 = arith.constant 0 : index
    %c0_231 = arith.constant 0 : index
    %237 = vector.load %arg6[%c0_230, %c0_231] : memref<32x290xf32, #tpu.memory_space<vmem>>, vector<32x256xf32>
    %238 = vector.broadcast %6 : vector<1x256xf32> to vector<32x256xf32>
    %239 = arith.mulf %237, %238 : vector<32x256xf32>
    %c3_232 = arith.constant 3 : index
    %c0_233 = arith.constant 0 : index
    %c0_234 = arith.constant 0 : index
    %c0_235 = arith.constant 0 : index
    %240 = vector.load %arg2[%c3_232, %c0_233, %c0_234, %c0_235] : memref<7x9x32x32xf32, #tpu.memory_space<vmem>>, vector<1x1x32x32xf32>
    %241 = vector.shape_cast %240 : vector<1x1x32x32xf32> to vector<32x32xf32>
    %cst_236 = arith.constant dense<0.000000e+00> : vector<32x256xf32>
    %242 = tpu.matmul %241, %239, %cst_236 {dimension_numbers = #tpu.dot_dimension_numbers<[1], [0], [0], [1], [0, 0, 1, 1], [], []>} : vector<32x32xf32>, vector<32x256xf32>, vector<32x256xf32> -> vector<32x256xf32>
    %243 = arith.addf %236, %242 : vector<32x256xf32>
    %c0_237 = arith.constant 0 : index
    %c1_238 = arith.constant 1 : index
    %244 = vector.load %arg6[%c0_237, %c1_238] : memref<32x290xf32, #tpu.memory_space<vmem>>, vector<32x256xf32>
    %245 = vector.broadcast %8 : vector<1x256xf32> to vector<32x256xf32>
    %246 = arith.mulf %244, %245 : vector<32x256xf32>
    %c3_239 = arith.constant 3 : index
    %c1_240 = arith.constant 1 : index
    %c0_241 = arith.constant 0 : index
    %c0_242 = arith.constant 0 : index
    %247 = vector.load %arg2[%c3_239, %c1_240, %c0_241, %c0_242] : memref<7x9x32x32xf32, #tpu.memory_space<vmem>>, vector<1x1x32x32xf32>
    %248 = vector.shape_cast %247 : vector<1x1x32x32xf32> to vector<32x32xf32>
    %cst_243 = arith.constant dense<0.000000e+00> : vector<32x256xf32>
    %249 = tpu.matmul %248, %246, %cst_243 {dimension_numbers = #tpu.dot_dimension_numbers<[1], [0], [0], [1], [0, 0, 1, 1], [], []>} : vector<32x32xf32>, vector<32x256xf32>, vector<32x256xf32> -> vector<32x256xf32>
    %250 = arith.addf %243, %249 : vector<32x256xf32>
    %c0_244 = arith.constant 0 : index
    %c2_245 = arith.constant 2 : index
    %251 = vector.load %arg6[%c0_244, %c2_245] : memref<32x290xf32, #tpu.memory_space<vmem>>, vector<32x256xf32>
    %252 = vector.broadcast %10 : vector<1x256xf32> to vector<32x256xf32>
    %253 = arith.mulf %251, %252 : vector<32x256xf32>
    %c3_246 = arith.constant 3 : index
    %c2_247 = arith.constant 2 : index
    %c0_248 = arith.constant 0 : index
    %c0_249 = arith.constant 0 : index
    %254 = vector.load %arg2[%c3_246, %c2_247, %c0_248, %c0_249] : memref<7x9x32x32xf32, #tpu.memory_space<vmem>>, vector<1x1x32x32xf32>
    %255 = vector.shape_cast %254 : vector<1x1x32x32xf32> to vector<32x32xf32>
    %cst_250 = arith.constant dense<0.000000e+00> : vector<32x256xf32>
    %256 = tpu.matmul %255, %253, %cst_250 {dimension_numbers = #tpu.dot_dimension_numbers<[1], [0], [0], [1], [0, 0, 1, 1], [], []>} : vector<32x32xf32>, vector<32x256xf32>, vector<32x256xf32> -> vector<32x256xf32>
    %257 = arith.addf %250, %256 : vector<32x256xf32>
    %c0_251 = arith.constant 0 : index
    %c16_252 = arith.constant 16 : index
    %258 = vector.load %arg6[%c0_251, %c16_252] : memref<32x290xf32, #tpu.memory_space<vmem>>, vector<32x256xf32>
    %259 = vector.broadcast %12 : vector<1x256xf32> to vector<32x256xf32>
    %260 = arith.mulf %258, %259 : vector<32x256xf32>
    %c3_253 = arith.constant 3 : index
    %c3_254 = arith.constant 3 : index
    %c0_255 = arith.constant 0 : index
    %c0_256 = arith.constant 0 : index
    %261 = vector.load %arg2[%c3_253, %c3_254, %c0_255, %c0_256] : memref<7x9x32x32xf32, #tpu.memory_space<vmem>>, vector<1x1x32x32xf32>
    %262 = vector.shape_cast %261 : vector<1x1x32x32xf32> to vector<32x32xf32>
    %cst_257 = arith.constant dense<0.000000e+00> : vector<32x256xf32>
    %263 = tpu.matmul %262, %260, %cst_257 {dimension_numbers = #tpu.dot_dimension_numbers<[1], [0], [0], [1], [0, 0, 1, 1], [], []>} : vector<32x32xf32>, vector<32x256xf32>, vector<32x256xf32> -> vector<32x256xf32>
    %264 = arith.addf %257, %263 : vector<32x256xf32>
    %c0_258 = arith.constant 0 : index
    %c17_259 = arith.constant 17 : index
    %265 = vector.load %arg6[%c0_258, %c17_259] : memref<32x290xf32, #tpu.memory_space<vmem>>, vector<32x256xf32>
    %266 = vector.broadcast %14 : vector<1x256xf32> to vector<32x256xf32>
    %267 = arith.mulf %265, %266 : vector<32x256xf32>
    %c3_260 = arith.constant 3 : index
    %c4_261 = arith.constant 4 : index
    %c0_262 = arith.constant 0 : index
    %c0_263 = arith.constant 0 : index
    %268 = vector.load %arg2[%c3_260, %c4_261, %c0_262, %c0_263] : memref<7x9x32x32xf32, #tpu.memory_space<vmem>>, vector<1x1x32x32xf32>
    %269 = vector.shape_cast %268 : vector<1x1x32x32xf32> to vector<32x32xf32>
    %cst_264 = arith.constant dense<0.000000e+00> : vector<32x256xf32>
    %270 = tpu.matmul %269, %267, %cst_264 {dimension_numbers = #tpu.dot_dimension_numbers<[1], [0], [0], [1], [0, 0, 1, 1], [], []>} : vector<32x32xf32>, vector<32x256xf32>, vector<32x256xf32> -> vector<32x256xf32>
    %271 = arith.addf %264, %270 : vector<32x256xf32>
    %c0_265 = arith.constant 0 : index
    %c18_266 = arith.constant 18 : index
    %272 = vector.load %arg6[%c0_265, %c18_266] : memref<32x290xf32, #tpu.memory_space<vmem>>, vector<32x256xf32>
    %273 = vector.broadcast %16 : vector<1x256xf32> to vector<32x256xf32>
    %274 = arith.mulf %272, %273 : vector<32x256xf32>
    %c3_267 = arith.constant 3 : index
    %c5_268 = arith.constant 5 : index
    %c0_269 = arith.constant 0 : index
    %c0_270 = arith.constant 0 : index
    %275 = vector.load %arg2[%c3_267, %c5_268, %c0_269, %c0_270] : memref<7x9x32x32xf32, #tpu.memory_space<vmem>>, vector<1x1x32x32xf32>
    %276 = vector.shape_cast %275 : vector<1x1x32x32xf32> to vector<32x32xf32>
    %cst_271 = arith.constant dense<0.000000e+00> : vector<32x256xf32>
    %277 = tpu.matmul %276, %274, %cst_271 {dimension_numbers = #tpu.dot_dimension_numbers<[1], [0], [0], [1], [0, 0, 1, 1], [], []>} : vector<32x32xf32>, vector<32x256xf32>, vector<32x256xf32> -> vector<32x256xf32>
    %278 = arith.addf %271, %277 : vector<32x256xf32>
    %c0_272 = arith.constant 0 : index
    %c32_273 = arith.constant 32 : index
    %279 = vector.load %arg6[%c0_272, %c32_273] : memref<32x290xf32, #tpu.memory_space<vmem>>, vector<32x256xf32>
    %280 = vector.broadcast %18 : vector<1x256xf32> to vector<32x256xf32>
    %281 = arith.mulf %279, %280 : vector<32x256xf32>
    %c3_274 = arith.constant 3 : index
    %c6_275 = arith.constant 6 : index
    %c0_276 = arith.constant 0 : index
    %c0_277 = arith.constant 0 : index
    %282 = vector.load %arg2[%c3_274, %c6_275, %c0_276, %c0_277] : memref<7x9x32x32xf32, #tpu.memory_space<vmem>>, vector<1x1x32x32xf32>
    %283 = vector.shape_cast %282 : vector<1x1x32x32xf32> to vector<32x32xf32>
    %cst_278 = arith.constant dense<0.000000e+00> : vector<32x256xf32>
    %284 = tpu.matmul %283, %281, %cst_278 {dimension_numbers = #tpu.dot_dimension_numbers<[1], [0], [0], [1], [0, 0, 1, 1], [], []>} : vector<32x32xf32>, vector<32x256xf32>, vector<32x256xf32> -> vector<32x256xf32>
    %285 = arith.addf %278, %284 : vector<32x256xf32>
    %c0_279 = arith.constant 0 : index
    %c33_280 = arith.constant 33 : index
    %286 = vector.load %arg6[%c0_279, %c33_280] : memref<32x290xf32, #tpu.memory_space<vmem>>, vector<32x256xf32>
    %287 = vector.broadcast %20 : vector<1x256xf32> to vector<32x256xf32>
    %288 = arith.mulf %286, %287 : vector<32x256xf32>
    %c3_281 = arith.constant 3 : index
    %c7_282 = arith.constant 7 : index
    %c0_283 = arith.constant 0 : index
    %c0_284 = arith.constant 0 : index
    %289 = vector.load %arg2[%c3_281, %c7_282, %c0_283, %c0_284] : memref<7x9x32x32xf32, #tpu.memory_space<vmem>>, vector<1x1x32x32xf32>
    %290 = vector.shape_cast %289 : vector<1x1x32x32xf32> to vector<32x32xf32>
    %cst_285 = arith.constant dense<0.000000e+00> : vector<32x256xf32>
    %291 = tpu.matmul %290, %288, %cst_285 {dimension_numbers = #tpu.dot_dimension_numbers<[1], [0], [0], [1], [0, 0, 1, 1], [], []>} : vector<32x32xf32>, vector<32x256xf32>, vector<32x256xf32> -> vector<32x256xf32>
    %292 = arith.addf %285, %291 : vector<32x256xf32>
    %c0_286 = arith.constant 0 : index
    %c34_287 = arith.constant 34 : index
    %293 = vector.load %arg6[%c0_286, %c34_287] : memref<32x290xf32, #tpu.memory_space<vmem>>, vector<32x256xf32>
    %294 = vector.broadcast %22 : vector<1x256xf32> to vector<32x256xf32>
    %295 = arith.mulf %293, %294 : vector<32x256xf32>
    %c3_288 = arith.constant 3 : index
    %c8_289 = arith.constant 8 : index
    %c0_290 = arith.constant 0 : index
    %c0_291 = arith.constant 0 : index
    %296 = vector.load %arg2[%c3_288, %c8_289, %c0_290, %c0_291] : memref<7x9x32x32xf32, #tpu.memory_space<vmem>>, vector<1x1x32x32xf32>
    %297 = vector.shape_cast %296 : vector<1x1x32x32xf32> to vector<32x32xf32>
    %cst_292 = arith.constant dense<0.000000e+00> : vector<32x256xf32>
    %298 = tpu.matmul %297, %295, %cst_292 {dimension_numbers = #tpu.dot_dimension_numbers<[1], [0], [0], [1], [0, 0, 1, 1], [], []>} : vector<32x32xf32>, vector<32x256xf32>, vector<32x256xf32> -> vector<32x256xf32>
    %299 = arith.addf %292, %298 : vector<32x256xf32>
    %c3_293 = arith.constant 3 : index
    %c0_294 = arith.constant 0 : index
    %c0_295 = arith.constant 0 : index
    %300 = vector.load %arg3[%c3_293, %c0_294, %c0_295] : memref<7x32x1xf32, #tpu.memory_space<vmem>>, vector<1x32x1xf32>
    %301 = vector.shape_cast %300 : vector<1x32x1xf32> to vector<32x1xf32>
    %302 = vector.broadcast %301 : vector<32x1xf32> to vector<32x256xf32>
    %303 = arith.addf %299, %302 : vector<32x256xf32>
    %cst_296 = arith.constant 0.000000e+00 : f32
    %304 = vector.broadcast %cst_296 : f32 to vector<32x256xf32>
    %305 = arith.maximumf %303, %304 : vector<32x256xf32>
    %c0_297 = arith.constant 0 : index
    %c17_298 = arith.constant 17 : index
    %306 = vector.load %arg6[%c0_297, %c17_298] : memref<32x290xf32, #tpu.memory_space<vmem>>, vector<32x256xf32>
    tpu.vector_store %arg6[%c0_297, %c17_298], %305 {strides = array<i32>} : memref<32x290xf32, #tpu.memory_space<vmem>>, vector<32x256xf32>,
    %cst_299 = arith.constant 0.000000e+00 : f32
    %307 = vector.broadcast %cst_299 : f32 to vector<32x256xf32>
    %c0_300 = arith.constant 0 : index
    %c0_301 = arith.constant 0 : index
    %308 = vector.load %arg6[%c0_300, %c0_301] : memref<32x290xf32, #tpu.memory_space<vmem>>, vector<32x256xf32>
    %309 = vector.broadcast %6 : vector<1x256xf32> to vector<32x256xf32>
    %310 = arith.mulf %308, %309 : vector<32x256xf32>
    %c4_302 = arith.constant 4 : index
    %c0_303 = arith.constant 0 : index
    %c0_304 = arith.constant 0 : index
    %c0_305 = arith.constant 0 : index
    %311 = vector.load %arg2[%c4_302, %c0_303, %c0_304, %c0_305] : memref<7x9x32x32xf32, #tpu.memory_space<vmem>>, vector<1x1x32x32xf32>
    %312 = vector.shape_cast %311 : vector<1x1x32x32xf32> to vector<32x32xf32>
    %cst_306 = arith.constant dense<0.000000e+00> : vector<32x256xf32>
    %313 = tpu.matmul %312, %310, %cst_306 {dimension_numbers = #tpu.dot_dimension_numbers<[1], [0], [0], [1], [0, 0, 1, 1], [], []>} : vector<32x32xf32>, vector<32x256xf32>, vector<32x256xf32> -> vector<32x256xf32>
    %314 = arith.addf %307, %313 : vector<32x256xf32>
    %c0_307 = arith.constant 0 : index
    %c1_308 = arith.constant 1 : index
    %315 = vector.load %arg6[%c0_307, %c1_308] : memref<32x290xf32, #tpu.memory_space<vmem>>, vector<32x256xf32>
    %316 = vector.broadcast %8 : vector<1x256xf32> to vector<32x256xf32>
    %317 = arith.mulf %315, %316 : vector<32x256xf32>
    %c4_309 = arith.constant 4 : index
    %c1_310 = arith.constant 1 : index
    %c0_311 = arith.constant 0 : index
    %c0_312 = arith.constant 0 : index
    %318 = vector.load %arg2[%c4_309, %c1_310, %c0_311, %c0_312] : memref<7x9x32x32xf32, #tpu.memory_space<vmem>>, vector<1x1x32x32xf32>
    %319 = vector.shape_cast %318 : vector<1x1x32x32xf32> to vector<32x32xf32>
    %cst_313 = arith.constant dense<0.000000e+00> : vector<32x256xf32>
    %320 = tpu.matmul %319, %317, %cst_313 {dimension_numbers = #tpu.dot_dimension_numbers<[1], [0], [0], [1], [0, 0, 1, 1], [], []>} : vector<32x32xf32>, vector<32x256xf32>, vector<32x256xf32> -> vector<32x256xf32>
    %321 = arith.addf %314, %320 : vector<32x256xf32>
    %c0_314 = arith.constant 0 : index
    %c2_315 = arith.constant 2 : index
    %322 = vector.load %arg6[%c0_314, %c2_315] : memref<32x290xf32, #tpu.memory_space<vmem>>, vector<32x256xf32>
    %323 = vector.broadcast %10 : vector<1x256xf32> to vector<32x256xf32>
    %324 = arith.mulf %322, %323 : vector<32x256xf32>
    %c4_316 = arith.constant 4 : index
    %c2_317 = arith.constant 2 : index
    %c0_318 = arith.constant 0 : index
    %c0_319 = arith.constant 0 : index
    %325 = vector.load %arg2[%c4_316, %c2_317, %c0_318, %c0_319] : memref<7x9x32x32xf32, #tpu.memory_space<vmem>>, vector<1x1x32x32xf32>
    %326 = vector.shape_cast %325 : vector<1x1x32x32xf32> to vector<32x32xf32>
    %cst_320 = arith.constant dense<0.000000e+00> : vector<32x256xf32>
    %327 = tpu.matmul %326, %324, %cst_320 {dimension_numbers = #tpu.dot_dimension_numbers<[1], [0], [0], [1], [0, 0, 1, 1], [], []>} : vector<32x32xf32>, vector<32x256xf32>, vector<32x256xf32> -> vector<32x256xf32>
    %328 = arith.addf %321, %327 : vector<32x256xf32>
    %c0_321 = arith.constant 0 : index
    %c16_322 = arith.constant 16 : index
    %329 = vector.load %arg6[%c0_321, %c16_322] : memref<32x290xf32, #tpu.memory_space<vmem>>, vector<32x256xf32>
    %330 = vector.broadcast %12 : vector<1x256xf32> to vector<32x256xf32>
    %331 = arith.mulf %329, %330 : vector<32x256xf32>
    %c4_323 = arith.constant 4 : index
    %c3_324 = arith.constant 3 : index
    %c0_325 = arith.constant 0 : index
    %c0_326 = arith.constant 0 : index
    %332 = vector.load %arg2[%c4_323, %c3_324, %c0_325, %c0_326] : memref<7x9x32x32xf32, #tpu.memory_space<vmem>>, vector<1x1x32x32xf32>
    %333 = vector.shape_cast %332 : vector<1x1x32x32xf32> to vector<32x32xf32>
    %cst_327 = arith.constant dense<0.000000e+00> : vector<32x256xf32>
    %334 = tpu.matmul %333, %331, %cst_327 {dimension_numbers = #tpu.dot_dimension_numbers<[1], [0], [0], [1], [0, 0, 1, 1], [], []>} : vector<32x32xf32>, vector<32x256xf32>, vector<32x256xf32> -> vector<32x256xf32>
    %335 = arith.addf %328, %334 : vector<32x256xf32>
    %c0_328 = arith.constant 0 : index
    %c17_329 = arith.constant 17 : index
    %336 = vector.load %arg6[%c0_328, %c17_329] : memref<32x290xf32, #tpu.memory_space<vmem>>, vector<32x256xf32>
    %337 = vector.broadcast %14 : vector<1x256xf32> to vector<32x256xf32>
    %338 = arith.mulf %336, %337 : vector<32x256xf32>
    %c4_330 = arith.constant 4 : index
    %c4_331 = arith.constant 4 : index
    %c0_332 = arith.constant 0 : index
    %c0_333 = arith.constant 0 : index
    %339 = vector.load %arg2[%c4_330, %c4_331, %c0_332, %c0_333] : memref<7x9x32x32xf32, #tpu.memory_space<vmem>>, vector<1x1x32x32xf32>
    %340 = vector.shape_cast %339 : vector<1x1x32x32xf32> to vector<32x32xf32>
    %cst_334 = arith.constant dense<0.000000e+00> : vector<32x256xf32>
    %341 = tpu.matmul %340, %338, %cst_334 {dimension_numbers = #tpu.dot_dimension_numbers<[1], [0], [0], [1], [0, 0, 1, 1], [], []>} : vector<32x32xf32>, vector<32x256xf32>, vector<32x256xf32> -> vector<32x256xf32>
    %342 = arith.addf %335, %341 : vector<32x256xf32>
    %c0_335 = arith.constant 0 : index
    %c18_336 = arith.constant 18 : index
    %343 = vector.load %arg6[%c0_335, %c18_336] : memref<32x290xf32, #tpu.memory_space<vmem>>, vector<32x256xf32>
    %344 = vector.broadcast %16 : vector<1x256xf32> to vector<32x256xf32>
    %345 = arith.mulf %343, %344 : vector<32x256xf32>
    %c4_337 = arith.constant 4 : index
    %c5_338 = arith.constant 5 : index
    %c0_339 = arith.constant 0 : index
    %c0_340 = arith.constant 0 : index
    %346 = vector.load %arg2[%c4_337, %c5_338, %c0_339, %c0_340] : memref<7x9x32x32xf32, #tpu.memory_space<vmem>>, vector<1x1x32x32xf32>
    %347 = vector.shape_cast %346 : vector<1x1x32x32xf32> to vector<32x32xf32>
    %cst_341 = arith.constant dense<0.000000e+00> : vector<32x256xf32>
    %348 = tpu.matmul %347, %345, %cst_341 {dimension_numbers = #tpu.dot_dimension_numbers<[1], [0], [0], [1], [0, 0, 1, 1], [], []>} : vector<32x32xf32>, vector<32x256xf32>, vector<32x256xf32> -> vector<32x256xf32>
    %349 = arith.addf %342, %348 : vector<32x256xf32>
    %c0_342 = arith.constant 0 : index
    %c32_343 = arith.constant 32 : index
    %350 = vector.load %arg6[%c0_342, %c32_343] : memref<32x290xf32, #tpu.memory_space<vmem>>, vector<32x256xf32>
    %351 = vector.broadcast %18 : vector<1x256xf32> to vector<32x256xf32>
    %352 = arith.mulf %350, %351 : vector<32x256xf32>
    %c4_344 = arith.constant 4 : index
    %c6_345 = arith.constant 6 : index
    %c0_346 = arith.constant 0 : index
    %c0_347 = arith.constant 0 : index
    %353 = vector.load %arg2[%c4_344, %c6_345, %c0_346, %c0_347] : memref<7x9x32x32xf32, #tpu.memory_space<vmem>>, vector<1x1x32x32xf32>
    %354 = vector.shape_cast %353 : vector<1x1x32x32xf32> to vector<32x32xf32>
    %cst_348 = arith.constant dense<0.000000e+00> : vector<32x256xf32>
    %355 = tpu.matmul %354, %352, %cst_348 {dimension_numbers = #tpu.dot_dimension_numbers<[1], [0], [0], [1], [0, 0, 1, 1], [], []>} : vector<32x32xf32>, vector<32x256xf32>, vector<32x256xf32> -> vector<32x256xf32>
    %356 = arith.addf %349, %355 : vector<32x256xf32>
    %c0_349 = arith.constant 0 : index
    %c33_350 = arith.constant 33 : index
    %357 = vector.load %arg6[%c0_349, %c33_350] : memref<32x290xf32, #tpu.memory_space<vmem>>, vector<32x256xf32>
    %358 = vector.broadcast %20 : vector<1x256xf32> to vector<32x256xf32>
    %359 = arith.mulf %357, %358 : vector<32x256xf32>
    %c4_351 = arith.constant 4 : index
    %c7_352 = arith.constant 7 : index
    %c0_353 = arith.constant 0 : index
    %c0_354 = arith.constant 0 : index
    %360 = vector.load %arg2[%c4_351, %c7_352, %c0_353, %c0_354] : memref<7x9x32x32xf32, #tpu.memory_space<vmem>>, vector<1x1x32x32xf32>
    %361 = vector.shape_cast %360 : vector<1x1x32x32xf32> to vector<32x32xf32>
    %cst_355 = arith.constant dense<0.000000e+00> : vector<32x256xf32>
    %362 = tpu.matmul %361, %359, %cst_355 {dimension_numbers = #tpu.dot_dimension_numbers<[1], [0], [0], [1], [0, 0, 1, 1], [], []>} : vector<32x32xf32>, vector<32x256xf32>, vector<32x256xf32> -> vector<32x256xf32>
    %363 = arith.addf %356, %362 : vector<32x256xf32>
    %c0_356 = arith.constant 0 : index
    %c34_357 = arith.constant 34 : index
    %364 = vector.load %arg6[%c0_356, %c34_357] : memref<32x290xf32, #tpu.memory_space<vmem>>, vector<32x256xf32>
    %365 = vector.broadcast %22 : vector<1x256xf32> to vector<32x256xf32>
    %366 = arith.mulf %364, %365 : vector<32x256xf32>
    %c4_358 = arith.constant 4 : index
    %c8_359 = arith.constant 8 : index
    %c0_360 = arith.constant 0 : index
    %c0_361 = arith.constant 0 : index
    %367 = vector.load %arg2[%c4_358, %c8_359, %c0_360, %c0_361] : memref<7x9x32x32xf32, #tpu.memory_space<vmem>>, vector<1x1x32x32xf32>
    %368 = vector.shape_cast %367 : vector<1x1x32x32xf32> to vector<32x32xf32>
    %cst_362 = arith.constant dense<0.000000e+00> : vector<32x256xf32>
    %369 = tpu.matmul %368, %366, %cst_362 {dimension_numbers = #tpu.dot_dimension_numbers<[1], [0], [0], [1], [0, 0, 1, 1], [], []>} : vector<32x32xf32>, vector<32x256xf32>, vector<32x256xf32> -> vector<32x256xf32>
    %370 = arith.addf %363, %369 : vector<32x256xf32>
    %c4_363 = arith.constant 4 : index
    %c0_364 = arith.constant 0 : index
    %c0_365 = arith.constant 0 : index
    %371 = vector.load %arg3[%c4_363, %c0_364, %c0_365] : memref<7x32x1xf32, #tpu.memory_space<vmem>>, vector<1x32x1xf32>
    %372 = vector.shape_cast %371 : vector<1x32x1xf32> to vector<32x1xf32>
    %373 = vector.broadcast %372 : vector<32x1xf32> to vector<32x256xf32>
    %374 = arith.addf %370, %373 : vector<32x256xf32>
    %cst_366 = arith.constant 0.000000e+00 : f32
    %375 = vector.broadcast %cst_366 : f32 to vector<32x256xf32>
    %376 = arith.maximumf %374, %375 : vector<32x256xf32>
    %c0_367 = arith.constant 0 : index
    %c17_368 = arith.constant 17 : index
    %377 = vector.load %arg6[%c0_367, %c17_368] : memref<32x290xf32, #tpu.memory_space<vmem>>, vector<32x256xf32>
    tpu.vector_store %arg6[%c0_367, %c17_368], %376 {strides = array<i32>} : memref<32x290xf32, #tpu.memory_space<vmem>>, vector<32x256xf32>,
    %cst_369 = arith.constant 0.000000e+00 : f32
    %378 = vector.broadcast %cst_369 : f32 to vector<32x256xf32>
    %c0_370 = arith.constant 0 : index
    %c0_371 = arith.constant 0 : index
    %379 = vector.load %arg6[%c0_370, %c0_371] : memref<32x290xf32, #tpu.memory_space<vmem>>, vector<32x256xf32>
    %380 = vector.broadcast %6 : vector<1x256xf32> to vector<32x256xf32>
    %381 = arith.mulf %379, %380 : vector<32x256xf32>
    %c5_372 = arith.constant 5 : index
    %c0_373 = arith.constant 0 : index
    %c0_374 = arith.constant 0 : index
    %c0_375 = arith.constant 0 : index
    %382 = vector.load %arg2[%c5_372, %c0_373, %c0_374, %c0_375] : memref<7x9x32x32xf32, #tpu.memory_space<vmem>>, vector<1x1x32x32xf32>
    %383 = vector.shape_cast %382 : vector<1x1x32x32xf32> to vector<32x32xf32>
    %cst_376 = arith.constant dense<0.000000e+00> : vector<32x256xf32>
    %384 = tpu.matmul %383, %381, %cst_376 {dimension_numbers = #tpu.dot_dimension_numbers<[1], [0], [0], [1], [0, 0, 1, 1], [], []>} : vector<32x32xf32>, vector<32x256xf32>, vector<32x256xf32> -> vector<32x256xf32>
    %385 = arith.addf %378, %384 : vector<32x256xf32>
    %c0_377 = arith.constant 0 : index
    %c1_378 = arith.constant 1 : index
    %386 = vector.load %arg6[%c0_377, %c1_378] : memref<32x290xf32, #tpu.memory_space<vmem>>, vector<32x256xf32>
    %387 = vector.broadcast %8 : vector<1x256xf32> to vector<32x256xf32>
    %388 = arith.mulf %386, %387 : vector<32x256xf32>
    %c5_379 = arith.constant 5 : index
    %c1_380 = arith.constant 1 : index
    %c0_381 = arith.constant 0 : index
    %c0_382 = arith.constant 0 : index
    %389 = vector.load %arg2[%c5_379, %c1_380, %c0_381, %c0_382] : memref<7x9x32x32xf32, #tpu.memory_space<vmem>>, vector<1x1x32x32xf32>
    %390 = vector.shape_cast %389 : vector<1x1x32x32xf32> to vector<32x32xf32>
    %cst_383 = arith.constant dense<0.000000e+00> : vector<32x256xf32>
    %391 = tpu.matmul %390, %388, %cst_383 {dimension_numbers = #tpu.dot_dimension_numbers<[1], [0], [0], [1], [0, 0, 1, 1], [], []>} : vector<32x32xf32>, vector<32x256xf32>, vector<32x256xf32> -> vector<32x256xf32>
    %392 = arith.addf %385, %391 : vector<32x256xf32>
    %c0_384 = arith.constant 0 : index
    %c2_385 = arith.constant 2 : index
    %393 = vector.load %arg6[%c0_384, %c2_385] : memref<32x290xf32, #tpu.memory_space<vmem>>, vector<32x256xf32>
    %394 = vector.broadcast %10 : vector<1x256xf32> to vector<32x256xf32>
    %395 = arith.mulf %393, %394 : vector<32x256xf32>
    %c5_386 = arith.constant 5 : index
    %c2_387 = arith.constant 2 : index
    %c0_388 = arith.constant 0 : index
    %c0_389 = arith.constant 0 : index
    %396 = vector.load %arg2[%c5_386, %c2_387, %c0_388, %c0_389] : memref<7x9x32x32xf32, #tpu.memory_space<vmem>>, vector<1x1x32x32xf32>
    %397 = vector.shape_cast %396 : vector<1x1x32x32xf32> to vector<32x32xf32>
    %cst_390 = arith.constant dense<0.000000e+00> : vector<32x256xf32>
    %398 = tpu.matmul %397, %395, %cst_390 {dimension_numbers = #tpu.dot_dimension_numbers<[1], [0], [0], [1], [0, 0, 1, 1], [], []>} : vector<32x32xf32>, vector<32x256xf32>, vector<32x256xf32> -> vector<32x256xf32>
    %399 = arith.addf %392, %398 : vector<32x256xf32>
    %c0_391 = arith.constant 0 : index
    %c16_392 = arith.constant 16 : index
    %400 = vector.load %arg6[%c0_391, %c16_392] : memref<32x290xf32, #tpu.memory_space<vmem>>, vector<32x256xf32>
    %401 = vector.broadcast %12 : vector<1x256xf32> to vector<32x256xf32>
    %402 = arith.mulf %400, %401 : vector<32x256xf32>
    %c5_393 = arith.constant 5 : index
    %c3_394 = arith.constant 3 : index
    %c0_395 = arith.constant 0 : index
    %c0_396 = arith.constant 0 : index
    %403 = vector.load %arg2[%c5_393, %c3_394, %c0_395, %c0_396] : memref<7x9x32x32xf32, #tpu.memory_space<vmem>>, vector<1x1x32x32xf32>
    %404 = vector.shape_cast %403 : vector<1x1x32x32xf32> to vector<32x32xf32>
    %cst_397 = arith.constant dense<0.000000e+00> : vector<32x256xf32>
    %405 = tpu.matmul %404, %402, %cst_397 {dimension_numbers = #tpu.dot_dimension_numbers<[1], [0], [0], [1], [0, 0, 1, 1], [], []>} : vector<32x32xf32>, vector<32x256xf32>, vector<32x256xf32> -> vector<32x256xf32>
    %406 = arith.addf %399, %405 : vector<32x256xf32>
    %c0_398 = arith.constant 0 : index
    %c17_399 = arith.constant 17 : index
    %407 = vector.load %arg6[%c0_398, %c17_399] : memref<32x290xf32, #tpu.memory_space<vmem>>, vector<32x256xf32>
    %408 = vector.broadcast %14 : vector<1x256xf32> to vector<32x256xf32>
    %409 = arith.mulf %407, %408 : vector<32x256xf32>
    %c5_400 = arith.constant 5 : index
    %c4_401 = arith.constant 4 : index
    %c0_402 = arith.constant 0 : index
    %c0_403 = arith.constant 0 : index
    %410 = vector.load %arg2[%c5_400, %c4_401, %c0_402, %c0_403] : memref<7x9x32x32xf32, #tpu.memory_space<vmem>>, vector<1x1x32x32xf32>
    %411 = vector.shape_cast %410 : vector<1x1x32x32xf32> to vector<32x32xf32>
    %cst_404 = arith.constant dense<0.000000e+00> : vector<32x256xf32>
    %412 = tpu.matmul %411, %409, %cst_404 {dimension_numbers = #tpu.dot_dimension_numbers<[1], [0], [0], [1], [0, 0, 1, 1], [], []>} : vector<32x32xf32>, vector<32x256xf32>, vector<32x256xf32> -> vector<32x256xf32>
    %413 = arith.addf %406, %412 : vector<32x256xf32>
    %c0_405 = arith.constant 0 : index
    %c18_406 = arith.constant 18 : index
    %414 = vector.load %arg6[%c0_405, %c18_406] : memref<32x290xf32, #tpu.memory_space<vmem>>, vector<32x256xf32>
    %415 = vector.broadcast %16 : vector<1x256xf32> to vector<32x256xf32>
    %416 = arith.mulf %414, %415 : vector<32x256xf32>
    %c5_407 = arith.constant 5 : index
    %c5_408 = arith.constant 5 : index
    %c0_409 = arith.constant 0 : index
    %c0_410 = arith.constant 0 : index
    %417 = vector.load %arg2[%c5_407, %c5_408, %c0_409, %c0_410] : memref<7x9x32x32xf32, #tpu.memory_space<vmem>>, vector<1x1x32x32xf32>
    %418 = vector.shape_cast %417 : vector<1x1x32x32xf32> to vector<32x32xf32>
    %cst_411 = arith.constant dense<0.000000e+00> : vector<32x256xf32>
    %419 = tpu.matmul %418, %416, %cst_411 {dimension_numbers = #tpu.dot_dimension_numbers<[1], [0], [0], [1], [0, 0, 1, 1], [], []>} : vector<32x32xf32>, vector<32x256xf32>, vector<32x256xf32> -> vector<32x256xf32>
    %420 = arith.addf %413, %419 : vector<32x256xf32>
    %c0_412 = arith.constant 0 : index
    %c32_413 = arith.constant 32 : index
    %421 = vector.load %arg6[%c0_412, %c32_413] : memref<32x290xf32, #tpu.memory_space<vmem>>, vector<32x256xf32>
    %422 = vector.broadcast %18 : vector<1x256xf32> to vector<32x256xf32>
    %423 = arith.mulf %421, %422 : vector<32x256xf32>
    %c5_414 = arith.constant 5 : index
    %c6_415 = arith.constant 6 : index
    %c0_416 = arith.constant 0 : index
    %c0_417 = arith.constant 0 : index
    %424 = vector.load %arg2[%c5_414, %c6_415, %c0_416, %c0_417] : memref<7x9x32x32xf32, #tpu.memory_space<vmem>>, vector<1x1x32x32xf32>
    %425 = vector.shape_cast %424 : vector<1x1x32x32xf32> to vector<32x32xf32>
    %cst_418 = arith.constant dense<0.000000e+00> : vector<32x256xf32>
    %426 = tpu.matmul %425, %423, %cst_418 {dimension_numbers = #tpu.dot_dimension_numbers<[1], [0], [0], [1], [0, 0, 1, 1], [], []>} : vector<32x32xf32>, vector<32x256xf32>, vector<32x256xf32> -> vector<32x256xf32>
    %427 = arith.addf %420, %426 : vector<32x256xf32>
    %c0_419 = arith.constant 0 : index
    %c33_420 = arith.constant 33 : index
    %428 = vector.load %arg6[%c0_419, %c33_420] : memref<32x290xf32, #tpu.memory_space<vmem>>, vector<32x256xf32>
    %429 = vector.broadcast %20 : vector<1x256xf32> to vector<32x256xf32>
    %430 = arith.mulf %428, %429 : vector<32x256xf32>
    %c5_421 = arith.constant 5 : index
    %c7_422 = arith.constant 7 : index
    %c0_423 = arith.constant 0 : index
    %c0_424 = arith.constant 0 : index
    %431 = vector.load %arg2[%c5_421, %c7_422, %c0_423, %c0_424] : memref<7x9x32x32xf32, #tpu.memory_space<vmem>>, vector<1x1x32x32xf32>
    %432 = vector.shape_cast %431 : vector<1x1x32x32xf32> to vector<32x32xf32>
    %cst_425 = arith.constant dense<0.000000e+00> : vector<32x256xf32>
    %433 = tpu.matmul %432, %430, %cst_425 {dimension_numbers = #tpu.dot_dimension_numbers<[1], [0], [0], [1], [0, 0, 1, 1], [], []>} : vector<32x32xf32>, vector<32x256xf32>, vector<32x256xf32> -> vector<32x256xf32>
    %434 = arith.addf %427, %433 : vector<32x256xf32>
    %c0_426 = arith.constant 0 : index
    %c34_427 = arith.constant 34 : index
    %435 = vector.load %arg6[%c0_426, %c34_427] : memref<32x290xf32, #tpu.memory_space<vmem>>, vector<32x256xf32>
    %436 = vector.broadcast %22 : vector<1x256xf32> to vector<32x256xf32>
    %437 = arith.mulf %435, %436 : vector<32x256xf32>
    %c5_428 = arith.constant 5 : index
    %c8_429 = arith.constant 8 : index
    %c0_430 = arith.constant 0 : index
    %c0_431 = arith.constant 0 : index
    %438 = vector.load %arg2[%c5_428, %c8_429, %c0_430, %c0_431] : memref<7x9x32x32xf32, #tpu.memory_space<vmem>>, vector<1x1x32x32xf32>
    %439 = vector.shape_cast %438 : vector<1x1x32x32xf32> to vector<32x32xf32>
    %cst_432 = arith.constant dense<0.000000e+00> : vector<32x256xf32>
    %440 = tpu.matmul %439, %437, %cst_432 {dimension_numbers = #tpu.dot_dimension_numbers<[1], [0], [0], [1], [0, 0, 1, 1], [], []>} : vector<32x32xf32>, vector<32x256xf32>, vector<32x256xf32> -> vector<32x256xf32>
    %441 = arith.addf %434, %440 : vector<32x256xf32>
    %c5_433 = arith.constant 5 : index
    %c0_434 = arith.constant 0 : index
    %c0_435 = arith.constant 0 : index
    %442 = vector.load %arg3[%c5_433, %c0_434, %c0_435] : memref<7x32x1xf32, #tpu.memory_space<vmem>>, vector<1x32x1xf32>
    %443 = vector.shape_cast %442 : vector<1x32x1xf32> to vector<32x1xf32>
    %444 = vector.broadcast %443 : vector<32x1xf32> to vector<32x256xf32>
    %445 = arith.addf %441, %444 : vector<32x256xf32>
    %cst_436 = arith.constant 0.000000e+00 : f32
    %446 = vector.broadcast %cst_436 : f32 to vector<32x256xf32>
    %447 = arith.maximumf %445, %446 : vector<32x256xf32>
    %c0_437 = arith.constant 0 : index
    %c17_438 = arith.constant 17 : index
    %448 = vector.load %arg6[%c0_437, %c17_438] : memref<32x290xf32, #tpu.memory_space<vmem>>, vector<32x256xf32>
    tpu.vector_store %arg6[%c0_437, %c17_438], %447 {strides = array<i32>} : memref<32x290xf32, #tpu.memory_space<vmem>>, vector<32x256xf32>,
    %cst_439 = arith.constant 0.000000e+00 : f32
    %449 = vector.broadcast %cst_439 : f32 to vector<32x256xf32>
    %c0_440 = arith.constant 0 : index
    %c0_441 = arith.constant 0 : index
    %450 = vector.load %arg6[%c0_440, %c0_441] : memref<32x290xf32, #tpu.memory_space<vmem>>, vector<32x256xf32>
    %451 = vector.broadcast %6 : vector<1x256xf32> to vector<32x256xf32>
    %452 = arith.mulf %450, %451 : vector<32x256xf32>
    %c6_442 = arith.constant 6 : index
    %c0_443 = arith.constant 0 : index
    %c0_444 = arith.constant 0 : index
    %c0_445 = arith.constant 0 : index
    %453 = vector.load %arg2[%c6_442, %c0_443, %c0_444, %c0_445] : memref<7x9x32x32xf32, #tpu.memory_space<vmem>>, vector<1x1x32x32xf32>
    %454 = vector.shape_cast %453 : vector<1x1x32x32xf32> to vector<32x32xf32>
    %cst_446 = arith.constant dense<0.000000e+00> : vector<32x256xf32>
    %455 = tpu.matmul %454, %452, %cst_446 {dimension_numbers = #tpu.dot_dimension_numbers<[1], [0], [0], [1], [0, 0, 1, 1], [], []>} : vector<32x32xf32>, vector<32x256xf32>, vector<32x256xf32> -> vector<32x256xf32>
    %456 = arith.addf %449, %455 : vector<32x256xf32>
    %c0_447 = arith.constant 0 : index
    %c1_448 = arith.constant 1 : index
    %457 = vector.load %arg6[%c0_447, %c1_448] : memref<32x290xf32, #tpu.memory_space<vmem>>, vector<32x256xf32>
    %458 = vector.broadcast %8 : vector<1x256xf32> to vector<32x256xf32>
    %459 = arith.mulf %457, %458 : vector<32x256xf32>
    %c6_449 = arith.constant 6 : index
    %c1_450 = arith.constant 1 : index
    %c0_451 = arith.constant 0 : index
    %c0_452 = arith.constant 0 : index
    %460 = vector.load %arg2[%c6_449, %c1_450, %c0_451, %c0_452] : memref<7x9x32x32xf32, #tpu.memory_space<vmem>>, vector<1x1x32x32xf32>
    %461 = vector.shape_cast %460 : vector<1x1x32x32xf32> to vector<32x32xf32>
    %cst_453 = arith.constant dense<0.000000e+00> : vector<32x256xf32>
    %462 = tpu.matmul %461, %459, %cst_453 {dimension_numbers = #tpu.dot_dimension_numbers<[1], [0], [0], [1], [0, 0, 1, 1], [], []>} : vector<32x32xf32>, vector<32x256xf32>, vector<32x256xf32> -> vector<32x256xf32>
    %463 = arith.addf %456, %462 : vector<32x256xf32>
    %c0_454 = arith.constant 0 : index
    %c2_455 = arith.constant 2 : index
    %464 = vector.load %arg6[%c0_454, %c2_455] : memref<32x290xf32, #tpu.memory_space<vmem>>, vector<32x256xf32>
    %465 = vector.broadcast %10 : vector<1x256xf32> to vector<32x256xf32>
    %466 = arith.mulf %464, %465 : vector<32x256xf32>
    %c6_456 = arith.constant 6 : index
    %c2_457 = arith.constant 2 : index
    %c0_458 = arith.constant 0 : index
    %c0_459 = arith.constant 0 : index
    %467 = vector.load %arg2[%c6_456, %c2_457, %c0_458, %c0_459] : memref<7x9x32x32xf32, #tpu.memory_space<vmem>>, vector<1x1x32x32xf32>
    %468 = vector.shape_cast %467 : vector<1x1x32x32xf32> to vector<32x32xf32>
    %cst_460 = arith.constant dense<0.000000e+00> : vector<32x256xf32>
    %469 = tpu.matmul %468, %466, %cst_460 {dimension_numbers = #tpu.dot_dimension_numbers<[1], [0], [0], [1], [0, 0, 1, 1], [], []>} : vector<32x32xf32>, vector<32x256xf32>, vector<32x256xf32> -> vector<32x256xf32>
    %470 = arith.addf %463, %469 : vector<32x256xf32>
    %c0_461 = arith.constant 0 : index
    %c16_462 = arith.constant 16 : index
    %471 = vector.load %arg6[%c0_461, %c16_462] : memref<32x290xf32, #tpu.memory_space<vmem>>, vector<32x256xf32>
    %472 = vector.broadcast %12 : vector<1x256xf32> to vector<32x256xf32>
    %473 = arith.mulf %471, %472 : vector<32x256xf32>
    %c6_463 = arith.constant 6 : index
    %c3_464 = arith.constant 3 : index
    %c0_465 = arith.constant 0 : index
    %c0_466 = arith.constant 0 : index
    %474 = vector.load %arg2[%c6_463, %c3_464, %c0_465, %c0_466] : memref<7x9x32x32xf32, #tpu.memory_space<vmem>>, vector<1x1x32x32xf32>
    %475 = vector.shape_cast %474 : vector<1x1x32x32xf32> to vector<32x32xf32>
    %cst_467 = arith.constant dense<0.000000e+00> : vector<32x256xf32>
    %476 = tpu.matmul %475, %473, %cst_467 {dimension_numbers = #tpu.dot_dimension_numbers<[1], [0], [0], [1], [0, 0, 1, 1], [], []>} : vector<32x32xf32>, vector<32x256xf32>, vector<32x256xf32> -> vector<32x256xf32>
    %477 = arith.addf %470, %476 : vector<32x256xf32>
    %c0_468 = arith.constant 0 : index
    %c17_469 = arith.constant 17 : index
    %478 = vector.load %arg6[%c0_468, %c17_469] : memref<32x290xf32, #tpu.memory_space<vmem>>, vector<32x256xf32>
    %479 = vector.broadcast %14 : vector<1x256xf32> to vector<32x256xf32>
    %480 = arith.mulf %478, %479 : vector<32x256xf32>
    %c6_470 = arith.constant 6 : index
    %c4_471 = arith.constant 4 : index
    %c0_472 = arith.constant 0 : index
    %c0_473 = arith.constant 0 : index
    %481 = vector.load %arg2[%c6_470, %c4_471, %c0_472, %c0_473] : memref<7x9x32x32xf32, #tpu.memory_space<vmem>>, vector<1x1x32x32xf32>
    %482 = vector.shape_cast %481 : vector<1x1x32x32xf32> to vector<32x32xf32>
    %cst_474 = arith.constant dense<0.000000e+00> : vector<32x256xf32>
    %483 = tpu.matmul %482, %480, %cst_474 {dimension_numbers = #tpu.dot_dimension_numbers<[1], [0], [0], [1], [0, 0, 1, 1], [], []>} : vector<32x32xf32>, vector<32x256xf32>, vector<32x256xf32> -> vector<32x256xf32>
    %484 = arith.addf %477, %483 : vector<32x256xf32>
    %c0_475 = arith.constant 0 : index
    %c18_476 = arith.constant 18 : index
    %485 = vector.load %arg6[%c0_475, %c18_476] : memref<32x290xf32, #tpu.memory_space<vmem>>, vector<32x256xf32>
    %486 = vector.broadcast %16 : vector<1x256xf32> to vector<32x256xf32>
    %487 = arith.mulf %485, %486 : vector<32x256xf32>
    %c6_477 = arith.constant 6 : index
    %c5_478 = arith.constant 5 : index
    %c0_479 = arith.constant 0 : index
    %c0_480 = arith.constant 0 : index
    %488 = vector.load %arg2[%c6_477, %c5_478, %c0_479, %c0_480] : memref<7x9x32x32xf32, #tpu.memory_space<vmem>>, vector<1x1x32x32xf32>
    %489 = vector.shape_cast %488 : vector<1x1x32x32xf32> to vector<32x32xf32>
    %cst_481 = arith.constant dense<0.000000e+00> : vector<32x256xf32>
    %490 = tpu.matmul %489, %487, %cst_481 {dimension_numbers = #tpu.dot_dimension_numbers<[1], [0], [0], [1], [0, 0, 1, 1], [], []>} : vector<32x32xf32>, vector<32x256xf32>, vector<32x256xf32> -> vector<32x256xf32>
    %491 = arith.addf %484, %490 : vector<32x256xf32>
    %c0_482 = arith.constant 0 : index
    %c32_483 = arith.constant 32 : index
    %492 = vector.load %arg6[%c0_482, %c32_483] : memref<32x290xf32, #tpu.memory_space<vmem>>, vector<32x256xf32>
    %493 = vector.broadcast %18 : vector<1x256xf32> to vector<32x256xf32>
    %494 = arith.mulf %492, %493 : vector<32x256xf32>
    %c6_484 = arith.constant 6 : index
    %c6_485 = arith.constant 6 : index
    %c0_486 = arith.constant 0 : index
    %c0_487 = arith.constant 0 : index
    %495 = vector.load %arg2[%c6_484, %c6_485, %c0_486, %c0_487] : memref<7x9x32x32xf32, #tpu.memory_space<vmem>>, vector<1x1x32x32xf32>
    %496 = vector.shape_cast %495 : vector<1x1x32x32xf32> to vector<32x32xf32>
    %cst_488 = arith.constant dense<0.000000e+00> : vector<32x256xf32>
    %497 = tpu.matmul %496, %494, %cst_488 {dimension_numbers = #tpu.dot_dimension_numbers<[1], [0], [0], [1], [0, 0, 1, 1], [], []>} : vector<32x32xf32>, vector<32x256xf32>, vector<32x256xf32> -> vector<32x256xf32>
    %498 = arith.addf %491, %497 : vector<32x256xf32>
    %c0_489 = arith.constant 0 : index
    %c33_490 = arith.constant 33 : index
    %499 = vector.load %arg6[%c0_489, %c33_490] : memref<32x290xf32, #tpu.memory_space<vmem>>, vector<32x256xf32>
    %500 = vector.broadcast %20 : vector<1x256xf32> to vector<32x256xf32>
    %501 = arith.mulf %499, %500 : vector<32x256xf32>
    %c6_491 = arith.constant 6 : index
    %c7_492 = arith.constant 7 : index
    %c0_493 = arith.constant 0 : index
    %c0_494 = arith.constant 0 : index
    %502 = vector.load %arg2[%c6_491, %c7_492, %c0_493, %c0_494] : memref<7x9x32x32xf32, #tpu.memory_space<vmem>>, vector<1x1x32x32xf32>
    %503 = vector.shape_cast %502 : vector<1x1x32x32xf32> to vector<32x32xf32>
    %cst_495 = arith.constant dense<0.000000e+00> : vector<32x256xf32>
    %504 = tpu.matmul %503, %501, %cst_495 {dimension_numbers = #tpu.dot_dimension_numbers<[1], [0], [0], [1], [0, 0, 1, 1], [], []>} : vector<32x32xf32>, vector<32x256xf32>, vector<32x256xf32> -> vector<32x256xf32>
    %505 = arith.addf %498, %504 : vector<32x256xf32>
    %c0_496 = arith.constant 0 : index
    %c34_497 = arith.constant 34 : index
    %506 = vector.load %arg6[%c0_496, %c34_497] : memref<32x290xf32, #tpu.memory_space<vmem>>, vector<32x256xf32>
    %507 = vector.broadcast %22 : vector<1x256xf32> to vector<32x256xf32>
    %508 = arith.mulf %506, %507 : vector<32x256xf32>
    %c6_498 = arith.constant 6 : index
    %c8_499 = arith.constant 8 : index
    %c0_500 = arith.constant 0 : index
    %c0_501 = arith.constant 0 : index
    %509 = vector.load %arg2[%c6_498, %c8_499, %c0_500, %c0_501] : memref<7x9x32x32xf32, #tpu.memory_space<vmem>>, vector<1x1x32x32xf32>
    %510 = vector.shape_cast %509 : vector<1x1x32x32xf32> to vector<32x32xf32>
    %cst_502 = arith.constant dense<0.000000e+00> : vector<32x256xf32>
    %511 = tpu.matmul %510, %508, %cst_502 {dimension_numbers = #tpu.dot_dimension_numbers<[1], [0], [0], [1], [0, 0, 1, 1], [], []>} : vector<32x32xf32>, vector<32x256xf32>, vector<32x256xf32> -> vector<32x256xf32>
    %512 = arith.addf %505, %511 : vector<32x256xf32>
    %c6_503 = arith.constant 6 : index
    %c0_504 = arith.constant 0 : index
    %c0_505 = arith.constant 0 : index
    %513 = vector.load %arg3[%c6_503, %c0_504, %c0_505] : memref<7x32x1xf32, #tpu.memory_space<vmem>>, vector<1x32x1xf32>
    %514 = vector.shape_cast %513 : vector<1x32x1xf32> to vector<32x1xf32>
    %515 = vector.broadcast %514 : vector<32x1xf32> to vector<32x256xf32>
    %516 = arith.addf %512, %515 : vector<32x256xf32>
    %517 = vector.shape_cast %516 : vector<32x256xf32> to vector<1x32x256xf32>
    %c0_506 = arith.constant 0 : index
    %c0_507 = arith.constant 0 : index
    %c0_508 = arith.constant 0 : index
    %518 = vector.load %arg5[%c0_506, %c0_507, %c0_508] : memref<1x32x256xf32, #tpu.memory_space<vmem>>, vector<1x32x256xf32>
    tpu.vector_store %arg5[%c0_506, %c0_507, %c0_508], %517 {strides = array<i32>} : memref<1x32x256xf32, #tpu.memory_space<vmem>>, vector<1x32x256xf32>,
    return
  }
  func.func @transform_0(%arg0: i32) -> (i32, i32, i32) {
    %c0_i32 = arith.constant 0 : i32
    %c0_i32_0 = arith.constant 0 : i32
    %c0_i32_1 = arith.constant 0 : i32
    return %arg0, %c0_i32, %c0_i32_0 : i32, i32, i32
  }
  func.func @transform_1(%arg0: i32) -> (i32, i32, i32, i32) {
    %c0_i32 = arith.constant 0 : i32
    %c0_i32_0 = arith.constant 0 : i32
    %c0_i32_1 = arith.constant 0 : i32
    %c0_i32_2 = arith.constant 0 : i32
    %c0_i32_3 = arith.constant 0 : i32
    return %c0_i32, %c0_i32_0, %c0_i32_1, %c0_i32_2 : i32, i32, i32, i32
  }
  func.func @transform_2(%arg0: i32) -> (i32, i32, i32) {
    %c0_i32 = arith.constant 0 : i32
    %c0_i32_0 = arith.constant 0 : i32
    %c0_i32_1 = arith.constant 0 : i32
    %c0_i32_2 = arith.constant 0 : i32
    return %c0_i32, %c0_i32_0, %c0_i32_1 : i32, i32, i32
  }
  func.func @transform_3(%arg0: i32) -> (i32, i32, i32) {
    %c0_i32 = arith.constant 0 : i32
    %c0_i32_0 = arith.constant 0 : i32
    %c0_i32_1 = arith.constant 0 : i32
    %c0_i32_2 = arith.constant 0 : i32
    return %c0_i32, %c0_i32_0, %c0_i32_1 : i32, i32, i32
  }
  func.func @transform_4(%arg0: i32) -> (i32, i32, i32) {
    %c0_i32 = arith.constant 0 : i32
    %c0_i32_0 = arith.constant 0 : i32
    %c0_i32_1 = arith.constant 0 : i32
    return %arg0, %c0_i32, %c0_i32_0 : i32, i32, i32
  }
}

</mosaic_0001>

<bundles_post_ra>
// kernel: deep_image_prior_7layer_forward.1
= control target key start
LH: loop header
LB: loop body
LE: loop exit
PB: predicated region body
PF: predicated region fallthrough
CT: control target
= control target key end

     0   :  { %9 = vsyncpa [#allocation4], 0  ;;  %s12288_s15 = smov 0   ;;  %s16803_s0 = inlined_call_operand.vmem [shape: f32[2,32,256], index: 0, kind: input, shape index: {}]   ;;  %s16804_s1 = inlined_call_operand.hbm [shape: f32[7,9,32,32], index: 1, kind: input, shape index: {}]   ;;  %s16805_s2 = inlined_call_operand.vmem [shape: f32[7,32,1], index: 2, kind: input, shape index: {}]   ;;  %s16806_s3 = inlined_call_operand.vmem [shape: f32[9,1,256], index: 3, kind: input, shape index: {}]   ;;  %s16807_s4 = inlined_call_operand.vmem [shape: f32[2,32,256], index: 4, kind: output, shape index: {}]  }
   0x1 LB: > { %s146_s18 = sshll.u32 %s16804_s1, 4  ;;  %s9919_s19 = sadd.s32 4294967295, %s12240_s15   ;;  %s12240_s15 = sphi %s12288_s15, %s15_s15   ;;  %s147_s18 = int_to_ptr.hbm [resolvable:$true] %s146_s18 }
   0x2   : > { %p9921_p0 = scmp.ge.s32.totalorder %s12240_s15, 1  ;;  %p135_p1 = scmp.lt.s32.totalorder %s12240_s15, 3 }
   0x3   : > { %p10486_p2 = scmp.eq.s32.totalorder %s9919_s19, 0  ;;  %s12242_s20 = smov [#allocation3]  }
   0x4   : > { %p136_p3 = pnand %p9921_p0, %p135_p1  ;;  %s148_s21 = sshll.u32 %s12242_s20, 4  ;;  %s149_s21 = int_to_ptr.vmem [resolvable:$true] %s148_s21 }
   0x5   : > { %s12243_s22 = smov 128   ;;  %s12244_s23 = smov 8  }
   0x6   : > { %p10482_p4 = pneg %p136_p3  ;;  %178 = sbr.rel (%p136_p3) target bundleno = 3906 (0xf42), region = 36 }
   0x8   : > { %p10483_p5 = pnand %p10486_p2, %p10482_p4 }
   0xa   : > { %10485 = dma.hbm_to_vmem [thread:$0]  (!%p10483_p5), %s147_s18, 32256, %s149_s21, [#allocation4], %s12243_s22, %s12243_s22, %s12244_s23  }
   0xb   : > { %12235 = dma.done.wait (%p10486_p2), [#allocation4], 32256  }
   0xc   : > { %12237 = vsyncadd (%p10486_p2), [#allocation4], 4294935040  ;;  %p205_p6 = scmp.lt.s32.totalorder %s9919_s19, 1  ;;  %s12245_s28 = smov 17   ;;  %v12246_v6 = vmov 0.0   ;;  %vm217_vm0 = vcmask 277504  }
   0xd   : > { %219 = vst [vmem:[#allocation2 + $0x18] sm:$0xff] %v12246_v6  ;;  %v9930_v7 = vld [vmem:[%s16806_s3 + $0x2] sm:$0x3]  ;;  %s12247_s5 = smov 1   ;;  %v9931_v11 = vld [vmem:[%s16806_s3 + $0x4] sm:$0x3] }
   0xe   : > { %s17375_s19 = smov (!%p205_p6, %s9919_s19), 1  ;;  %215 = vst [vmem:[#allocation2] sm:$0xff] %v12246_v6  ;;  %v337_v8 = vperm.slane %v9930_v7, 0  ;;  %v560_v12 = vperm.slane %v9931_v11, 0  ;;  %v338_v13 = vperm.slane %v9930_v7, 1  ;;  %v561_v14 = vperm.slane %v9931_v11, 1 }
   0xf   : > { %s10468_s24 = sshll.u32 %s17375_s19, 6  ;;  %222 = vst [vmem:[#allocation2 + $0x30] sm:$0xff] %v12246_v6  ;;  %s12248_s8 = smov 2   ;;  %v9932_v15 = vld [vmem:[%s16806_s3 + $0x6] sm:$0x3]  ;;  %vm277_vm1 = vcmask 1047688  }
  0x10   : > { %s209_s27 = scalar_lea.vmem %s16803_s0, %s10468_s24  ;;  %225 = vst [vmem:[#allocation2 + $0x48] sm:$0xff] %v12246_v6  ;;  %v9933_v16 = vld [vmem:[%s16806_s3 + $0x8] sm:$0x3]  ;;  %v721_v17 = vperm.slane %v9932_v15, 1  ;;  %v720_v18 = vperm.slane %v9932_v15, 0  ;;  %s12249_s13 = smov 16  }
  0x11   : > { %v234_v0 = vld [vmem:[%s209_s27 + $0x30] sm:$0xff]  ;;  %v232_v1 = vld [vmem:[%s209_s27 + $0x20] sm:$0xff]  ;;  %v235_v3 = vld [vmem:[%s209_s27 + $0x38] sm:$0xff]  ;;  %v880_v19 = vperm.slane %v9933_v16, 0  ;;  %v881_v22 = vperm.slane %v9933_v16, 1  ;;  %s12250_s17 = smov 18  }
  0x12   : > { %v230_v2 = vld [vmem:[%s209_s27 + $0x10] sm:$0xff]  ;;  %256 = vrot.lane.b32.xlu0 %v234_v0, %s12245_s28  ;;  %252 = vrot.lane.b32.xlu1 %v232_v1, %s12245_s28  ;;  %v233_v4 = vld [vmem:[%s209_s27 + $0x28] sm:$0xff]  ;;  %221 = vst.msk [vmem:[#allocation2 + $0x28] sm:$0xff] %vm217_vm0, %v12246_v6  ;;  %vm260_vm2 = vcmask 138240   ;;  %vm343_vm3 = vcmask 7168   ;;  %s12251_s18 = smov 126  }
  0x13   : > { %248 = vrot.lane.b32.xlu2 %v230_v2, %s12245_s28  ;;  %v231_v5 = vld [vmem:[%s209_s27 + $0x18] sm:$0xff]  ;;  %v229_v9 = vld [vmem:[%s209_s27 + $0x8] sm:$0xff]  ;;  %v228_v10 = vld [vmem:[%s209_s27] sm:$0xff]  ;;  %218 = vst.msk [vmem:[#allocation2 + $0x10] sm:$0xff] %vm217_vm0, %v12246_v6  ;;  %s12252_s20 = smov 127   ;;  %vm566_vm4 = vcmask 15360   ;;  %s16778_s27 = scalar_lea.vmem %s16807_s4, %s10468_s24 }
  0x14   : > { %v12331_v20 = vld [vmem:[%s16806_s3 + $0xa] sm:$0x3]  ;;  %224 = vst.msk [vmem:[#allocation2 + $0x40] sm:$0xff] %vm217_vm0, %v12246_v6  ;;  %v9935_v0 = vld [vmem:[%s16806_s3 + $0xc] sm:$0x3]  ;;  %s12253_s23 = smov 32  }
  0x15   : > { %v1039_v21 = vperm.slane %v12331_v20, 0  ;;  %227 = vst.msk [vmem:[#allocation2 + $0x58] sm:$0xff] %vm217_vm0, %v12246_v6  ;;  %s12254_s25 = smov 112   ;;  %vm726_vm5 = vcmask 130048   ;;  %s12256_s6 = smov 34   ;;  %vm401_vm6 = vcmask 1039360  }
  0x16   : > { %s12257_s7 = smov 111   ;;  %vm1045_vm7 = vcmask 146432   ;;  %s12258_s10 = smov 110   ;;  %vm418_vm8 = vcmask 261120   ;;  %vm624_vm9 = vcmask 1031168   ;;  %vm784_vm10 = vcmask 916480  }
  0x17   : > { %s12259_s11 = smov 96   ;;  %vm943_vm11 = vcmask 908288   ;;  %vm1364_vm12 = vcmask 269312   ;;  %s12260_s12 = smov 95   ;;  %vm1103_vm13 = vcmask 900096   ;;  %vm1262_vm14 = vcmask 785408  }
  0x18   : > { %vm1422_vm15 = vcmask 777216  }
  0x1a   : > { %258 = vrot.lane.b32.xlu0 %v235_v3, %s12245_s28  ;;  %254 = vrot.lane.b32.xlu1 %v233_v4, %s12245_s28  ;;  %v1200_v3 = vperm.slane %v9935_v0, 1  ;;  %v1199_v4 = vperm.slane %v9935_v0, 0 }
  0x1b   : > { %250 = vrot.lane.b32.xlu2 %v231_v5, %s12245_s28 }
  0x22   : > { %246 = vrot.lane.b32.xlu1 %v229_v9, %s12245_s28  ;;  %244 = vrot.lane.b32.xlu0 %v228_v10, %s12245_s28 }
  0x23   : > { %339 = vrot.lane.b32.xlu2 %v337_v8, %s12247_s5 }
  0x2a   : > { %562 = vrot.lane.b32.xlu1 %v560_v12, %s12248_s8  ;;  %341 = vrot.lane.b32.xlu0 %v338_v13, %s12247_s5  ;;  %s12255_s5 = smov 33  }
  0x2b   : > { %564 = vrot.lane.b32.xlu2 %v561_v14, %s12248_s8 }
  0x32   : > { %724 = vrot.lane.b32.xlu1 %v721_v17, %s12249_s13  ;;  %722 = vrot.lane.b32.xlu0 %v720_v18, %s12249_s13  ;;  %s12261_s13 = smov 94  }
  0x33   : > { %882 = vrot.lane.b32.xlu2 %v880_v19, %s12245_s28 }
  0x3a   : > { %1041 = vrot.lane.b32.xlu1 %v1039_v21, %s12250_s17  ;;  %884 = vrot.lane.b32.xlu0 %v881_v22, %s12245_s28 }
  0x6d   : > { %v249_v23 = vpop.permute.xlu2 %248 }
  0x6e   : > { %281 = vst.msk [vmem:[#allocation2 + $0x18] sm:$0xff] %vm277_vm1, %v249_v23 }
  0x75   : > { %v251_v24 = vpop.permute.xlu2 %250  ;;  %v12399_v56 = vld [vmem:[#allocation2 + $0x18] sm:$0xff] }
  0x76   : > { %283 = vst.msk [vmem:[#allocation2 + $0x28] sm:$0xff] %vm260_vm2, %v251_v24  ;;  %v12388_v51 = vsel %vm260_vm2, %v249_v23, %v251_v24 }
  0x7d   : > { %v12346_v29 = vpop.permute.xlu2 %339  ;;  %v12383_v50 = vld [vmem:[#allocation2 + $0x28] sm:$0xff] }
  0x7e   : > { %17006 = vst [vmem:[#allocation6_spill] sm:$0xff] %v12346_v29  ;;  %v351_v58 = vmul.f32 %v12346_v29, %v12399_v56 }
  0x84   : > { %v257_v25 = vpop.permute.xlu0 %256  ;;  %v253_v26 = vpop.permute.xlu1 %252 }
  0x85   : > { %287 = vst.msk [vmem:[#allocation2 + $0x48] sm:$0xff] %vm277_vm1, %v257_v25  ;;  %v12354_v34 = vpop.permute.xlu2 %564 }
  0x86   : > { %284 = vst.msk [vmem:[#allocation2 + $0x30] sm:$0xff] %vm277_vm1, %v253_v26  ;;  %v576_v53 = vmul.f32 %v12354_v34, %v12383_v50 }
  0x87   : > { %17007 = vst [vmem:[#allocation7_spill] sm:$0xff] %v12354_v34 }
  0x8c   : > { %v259_v27 = vpop.permute.xlu0 %258  ;;  %v255_v28 = vpop.permute.xlu1 %254  ;;  %v12358_v36 = vld [vmem:[#allocation2 + $0x48] sm:$0xff] }
  0x8d   : > { %289 = vst.msk [vmem:[#allocation2 + $0x58] sm:$0xff] %vm260_vm2, %v259_v27  ;;  %v12350_v32 = vld [vmem:[#allocation2 + $0x30] sm:$0xff]  ;;  %v12361_v37 = vsel %vm260_vm2, %v257_v25, %v259_v27  ;;  %v357_v44 = vmul.f32 %v12346_v29, %v12358_v36  ;;  %v12410_v63 = vsel %vm260_vm2, %v253_v26, %v255_v28  ;;  %v1040_v25 = vperm.slane %v12331_v20, 1 }
  0x8e   : > { %286 = vst.msk [vmem:[#allocation2 + $0x40] sm:$0xff] %vm260_vm2, %v255_v28  ;;  %v354_v35 = vmul.f32 %v12346_v29, %v12350_v32  ;;  %v12464_v28 = vld [vmem:[%s16806_s3 + $0xe] sm:$0x3] }
  0x94   : > { %v247_v30 = vpop.permute.xlu1 %246  ;;  %v245_v31 = vpop.permute.xlu0 %244  ;;  %v12352_v33 = vld [vmem:[#allocation2 + $0x58] sm:$0xff] }
  0x95   : > { %280 = vst.msk [vmem:[#allocation2 + $0x10] sm:$0xff] %vm260_vm2, %v247_v30  ;;  %v582_v41 = vmul.f32 %v12354_v34, %v12352_v33  ;;  %v12405_v62 = vld [vmem:[#allocation2 + $0x40] sm:$0xff]  ;;  %v12432_v10 = vsel %vm260_vm2, %v245_v31, %v247_v30  ;;  %v12469_v30 = vld [vmem:[%s16806_s3 + $0x10] sm:$0x3] }
  0x96   : > { %278 = vst.msk [vmem:[#allocation2] sm:$0xff] %vm277_vm1, %v245_v31  ;;  %v579_v24 = vmul.f32 %v12354_v34, %v12405_v62 }
  0x9c   : > { %v12363_v38 = vpop.permute.xlu1 %562  ;;  %v12365_v39 = vpop.permute.xlu0 %341  ;;  %v12420_v6 = vld [vmem:[#allocation2 + $0x10] sm:$0xff] }
  0x9d   : > { %17008 = vst [vmem:[#allocation8_spill] sm:$0xff] %v12363_v38  ;;  %v577_v40 = vmul.f32 %v12363_v38, %v12350_v32  ;;  %v359_v42 = vmul.f32 %v12365_v39, %v12352_v33  ;;  %v12375_v43 = vsel %vm343_vm3, %v12346_v29, %v12365_v39  ;;  %v12381_v49 = vld [vmem:[#allocation2] sm:$0xff]  ;;  %v353_v55 = vmul.f32 %v12365_v39, %v12383_v50 }
  0x9e   : > { %17009 = vst [vmem:[#allocation9_spill] sm:$0xff] %v12365_v39  ;;  %v358_v45 = vmul.f32 %v12375_v43, %v12361_v37  ;;  %v571_v52 = vmul.f32 %v12363_v38, %v12381_v49  ;;  %v348_v54 = vmul.f32 %v12346_v29, %v12381_v49  ;;  %v352_v57 = vmul.f32 %v12375_v43, %v12388_v51 }
  0x9f   : > { %17010 = vst [vmem:[#allocation10_spill] sm:$0xff] %v12375_v43  ;;  %v10527_v46 = vpack.i.bf16 %v577_v40, %v582_v41  ;;  %v10517_v47 = vpack.i.bf16 %v354_v35, %v359_v42  ;;  %v355_v1 = vmul.f32 %v12375_v43, %v12410_v63  ;;  %v356_v2 = vmul.f32 %v12365_v39, %v12405_v62 }
  0xa0   : > { %v10537_v48 = vpack.i.bf16 %v358_v45, %v357_v44  ;;  %v10532_v59 = vpack.i.bf16 %v571_v52, %v576_v53  ;;  %v10522_v60 = vpack.i.bf16 %v348_v54, %v353_v55  ;;  %v10547_v61 = vpack.i.bf16 %v352_v57, %v351_v58 }
  0xa1   : > { %10528 = vrot.lane.b32.xlu2 %v10527_v46, %s12251_s18  ;;  %10518 = vrot.lane.b32.xlu1 %v10517_v47, %s12252_s20  ;;  %v10542_v5 = vpack.i.bf16 %v356_v2, %v355_v1  ;;  %v12424_v7 = vsel %vm566_vm4, %v12363_v38, %v12354_v34  ;;  %v349_v11 = vmul.f32 %v12375_v43, %v12432_v10  ;;  %v1358_v35 = vperm.slane %v12464_v28, 0  ;;  %v12511_v1 = vpop.permute.xlu2 %882 }
  0xa2   : > { %10538 = vrot.lane.b32.xlu0 %v10537_v48, %s12252_s20  ;;  %17011 = vst [vmem:[#allocation11_spill] sm:$0xff] %v12424_v7  ;;  %v350_v12 = vmul.f32 %v12365_v39, %v12420_v6  ;;  %v580_v13 = vmul.f32 %v12363_v38, %v12358_v36  ;;  %v581_v14 = vmul.f32 %v12424_v7, %v12361_v37  ;;  %v1518_v40 = vperm.slane %v12469_v30, 0 }
  0xa3   : > { %v574_v21 = vmul.f32 %v12363_v38, %v12399_v56  ;;  %v575_v22 = vmul.f32 %v12424_v7, %v12388_v51  ;;  %v578_v23 = vmul.f32 %v12424_v7, %v12410_v63  ;;  %v572_v20 = vmul.f32 %v12424_v7, %v12432_v10  ;;  %17016 = vst [vmem:[#allocation16_spill] sm:$0xff] %v12511_v1 }
  0xa4   : > { %v12426_v8 = vpop.permute.xlu1 %724  ;;  %v12428_v9 = vpop.permute.xlu0 %722  ;;  %v10552_v17 = vpack.i.bf16 %v350_v12, %v349_v11  ;;  %v10562_v18 = vpack.i.bf16 %v581_v14, %v580_v13  ;;  %v573_v31 = vmul.f32 %v12354_v34, %v12420_v6  ;;  %v896_v2 = vmul.f32 %v12511_v1, %v12350_v32 }
  0xa5   : > { %17012 = vst [vmem:[#allocation12_spill] sm:$0xff] %v12426_v8  ;;  %v737_v15 = vmul.f32 %v12428_v9, %v12350_v32  ;;  %v742_v16 = vmul.f32 %v12426_v8, %v12352_v33  ;;  %v10572_v26 = vpack.i.bf16 %v575_v22, %v574_v21  ;;  %v10567_v27 = vpack.i.bf16 %v579_v24, %v578_v23 }
  0xa6   : > { %17013 = vst [vmem:[#allocation13_spill] sm:$0xff] %v12428_v9  ;;  %v10577_v41 = vpack.i.bf16 %v573_v31, %v572_v20  ;;  %v12479_v42 = vsel %vm726_vm5, %v12428_v9, %v12426_v8  ;;  %v740_v44 = vmul.f32 %v12428_v9, %v12358_v36  ;;  %v739_v47 = vmul.f32 %v12426_v8, %v12405_v62 }
  0xa7   : > { %v10557_v19 = vpack.i.bf16 %v737_v15, %v742_v16  ;;  %17014 = vst [vmem:[#allocation14_spill] sm:$0xff] %v12479_v42  ;;  %v741_v45 = vmul.f32 %v12479_v42, %v12361_v37  ;;  %v738_v46 = vmul.f32 %v12479_v42, %v12410_v63  ;;  %v731_v48 = vmul.f32 %v12428_v9, %v12381_v49 }
  0xa8   : > { %v736_v52 = vmul.f32 %v12426_v8, %v12383_v50  ;;  %v734_v58 = vmul.f32 %v12428_v9, %v12399_v56  ;;  %v899_v16 = vmul.f32 %v12511_v1, %v12358_v36  ;;  %v1519_v31 = vperm.slane %v12469_v30, 1 }
  0xa9   : > { %10533 = vrot.lane.b32.xlu2 %v10532_v59, %s12251_s18  ;;  %10523 = vrot.lane.b32.xlu1 %v10522_v60, %s12252_s20  ;;  %v10597_v53 = vpack.i.bf16 %v741_v45, %v740_v44  ;;  %v10602_v54 = vpack.i.bf16 %v739_v47, %v738_v46  ;;  %v735_v59 = vmul.f32 %v12479_v42, %v12388_v51 }
  0xaa   : > { %10548 = vrot.lane.b32.xlu0 %v10547_v61, %s12252_s20  ;;  %v10582_v55 = vpack.i.bf16 %v731_v48, %v736_v52  ;;  %v732_v60 = vmul.f32 %v12479_v42, %v12432_v10  ;;  %v733_v61 = vmul.f32 %v12426_v8, %v12420_v6 }
  0xac   : > { %v12496_v57 = vpop.permute.xlu0 %884 }
  0xad   : > { %17015 = vst [vmem:[#allocation15_spill] sm:$0xff] %v12496_v57  ;;  %v901_v0 = vmul.f32 %v12496_v57, %v12352_v33  ;;  %v12518_v11 = vsel %vm260_vm2, %v12511_v1, %v12496_v57  ;;  %v898_v14 = vmul.f32 %v12496_v57, %v12405_v62  ;;  %v895_v15 = vmul.f32 %v12496_v57, %v12383_v50 }
  0xae   : > { %17017 = vst [vmem:[#allocation17_spill] sm:$0xff] %v12518_v11  ;;  %v900_v12 = vmul.f32 %v12518_v11, %v12361_v37  ;;  %v897_v13 = vmul.f32 %v12518_v11, %v12410_v63  ;;  %v894_v22 = vmul.f32 %v12518_v11, %v12388_v51  ;;  %v891_v23 = vmul.f32 %v12518_v11, %v12432_v10 }
  0xaf   : > { %v892_v24 = vmul.f32 %v12496_v57, %v12420_v6 }
  0xb1   : > { %10543 = vrot.lane.b32.xlu2 %v10542_v5, %s12252_s20  ;;  %1203 = vrot.lane.b32.xlu1 %v1200_v3, %s12253_s23  ;;  %v10607_v3 = vpack.i.bf16 %v735_v59, %v734_v58  ;;  %v10587_v5 = vpack.i.bf16 %v896_v2, %v901_v0  ;;  %v10632_v20 = vpack.i.bf16 %v892_v24, %v891_v23  ;;  %v290_v59 = vld [vmem:[%s16806_s3] sm:$0x3] }
  0xb2   : > { %1201 = vrot.lane.b32.xlu0 %v1199_v4, %s12253_s23  ;;  %v10612_v4 = vpack.i.bf16 %v733_v61, %v732_v60 }
  0xb9   : > { %10553 = vrot.lane.b32.xlu2 %v10552_v17, %s12252_s20  ;;  %10563 = vrot.lane.b32.xlu1 %v10562_v18, %s12251_s18  ;;  %v890_v17 = vmul.f32 %v12511_v1, %v12381_v49  ;;  %v10617_v18 = vpack.i.bf16 %v900_v12, %v899_v16 }
  0xba   : > { %10558 = vrot.lane.b32.xlu0 %v10557_v19, %s12254_s25  ;;  %v10622_v19 = vpack.i.bf16 %v898_v14, %v897_v13 }
  0xbb   : > { %v10592_v21 = vpack.i.bf16 %v890_v17, %v895_v15 }
  0xc1   : > { %1043 = vrot.lane.b32.xlu2 %v1040_v25, %s12250_s17  ;;  %10573 = vrot.lane.b32.xlu1 %v10572_v26, %s12251_s18  ;;  %v893_v25 = vmul.f32 %v12511_v1, %v12399_v56  ;;  %v1359_v26 = vperm.slane %v12464_v28, 1 }
  0xc2   : > { %10568 = vrot.lane.b32.xlu0 %v10567_v27, %s12251_s18 }
  0xc3   : > { %v10627_v27 = vpack.i.bf16 %v894_v22, %v893_v25 }
  0xc9   : > { %1360 = vrot.lane.b32.xlu2 %v1358_v35, %s12255_s5  ;;  %1520 = vrot.lane.b32.xlu1 %v1518_v40, %s12256_s6 }
  0xca   : > { %10578 = vrot.lane.b32.xlu0 %v10577_v41, %s12251_s18  ;;  %v12556_v41 = vpop.permute.xlu1 %1041 }
  0xcb   : > { %17018 = vst [vmem:[#allocation18_spill] sm:$0xff] %v12556_v41  ;;  %v1059_v15 = vmul.f32 %v12556_v41, %v12358_v36 }
  0xd1   : > { %10598 = vrot.lane.b32.xlu2 %v10597_v53, %s12254_s25  ;;  %10603 = vrot.lane.b32.xlu1 %v10602_v54, %s12254_s25 }
  0xd2   : > { %10583 = vrot.lane.b32.xlu0 %v10582_v55, %s12254_s25 }
  0xd9   : > { %10608 = vrot.lane.b32.xlu2 %v10607_v3, %s12254_s25  ;;  %10613 = vrot.lane.b32.xlu1 %v10612_v4, %s12254_s25  ;;  %v1056_v3 = vmul.f32 %v12556_v41, %v12350_v32  ;;  %v12569_v4 = vperm.slane %v290_v59, 0 }
  0xda   : > { %10588 = vrot.lane.b32.xlu0 %v10587_v5, %s12257_s7 }
  0xdb   : > { %17020 = vst [vmem:[#allocation20_spill] sm:$0xff] %v12569_v4 }
  0xe1   : > { %10618 = vrot.lane.b32.xlu2 %v10617_v18, %s12257_s7  ;;  %10623 = vrot.lane.b32.xlu1 %v10622_v19, %s12257_s7 }
  0xe2   : > { %10593 = vrot.lane.b32.xlu0 %v10592_v21, %s12257_s7 }
  0xe9   : > { %10628 = vrot.lane.b32.xlu2 %v10627_v27, %s12257_s7  ;;  %10633 = vrot.lane.b32.xlu1 %v10632_v20, %s12257_s7 }
  0xea   : > { %1362 = vrot.lane.b32.xlu0 %v1359_v26, %s12255_s5 }
  0xf1   : > { %1522 = vrot.lane.b32.xlu2 %v1519_v31, %s12256_s6 }
  0xfb   : > { %v12552_v35 = vpop.permute.xlu2 %10528 }
 0x103   : > { %v12554_v40 = vpop.permute.xlu2 %10533 }
 0x10b   : > { %v10544_v44 = vpop.permute.xlu2 %10543 }
 0x10c   : > { %v10546_v54 = vunpack.i.h.bf16 %v10544_v44  ;;  %v10545_v55 = vunpack.i.l.bf16 %v10544_v44  ;;  %v12587_v44 = vperm.slane %v290_v59, 1  ;;  %v1050_v59 = vmul.f32 %v12556_v41, %v12381_v49 }
 0x10e   : > { %v407_v61 = vsel %vm401_vm6, %v10545_v55, %v10546_v54  ;;  %17022 = vst [vmem:[#allocation22_spill] sm:$0xff] %v12587_v44  ;;  %v327_v54 = vmul.f32 %v12587_v44, %v12361_v37 }
 0x113   : > { %v10519_v28 = vpop.permute.xlu1 %10518  ;;  %v10554_v45 = vpop.permute.xlu2 %10553 }
 0x114   : > { %v10520_v46 = vunpack.i.l.bf16 %v10519_v28  ;;  %v10539_v47 = vpop.permute.xlu0 %10538  ;;  %v10521_v48 = vunpack.i.h.bf16 %v10519_v28  ;;  %v10556_v21 = vunpack.i.h.bf16 %v10554_v45  ;;  %v10555_v25 = vunpack.i.l.bf16 %v10554_v45 }
 0x115   : > { %v10541_v52 = vunpack.i.h.bf16 %v10539_v47  ;;  %v10540_v53 = vunpack.i.l.bf16 %v10539_v47 }
 0x116   : > { %v406_v60 = vsel %vm401_vm6, %v10521_v48, %v10545_v55  ;;  %v403_v45 = vsel %vm401_vm6, %v10555_v25, %v10556_v21  ;;  %v326_v48 = vmul.f32 %v12569_v4, %v12358_v36  ;;  %v10530_v21 = vunpack.i.l.bf16 %v12552_v35 }
 0x117   : > { %v408_v30 = vsel %vm401_vm6, %v10540_v53, %v10541_v52  ;;  %v409_v58 = vsel %vm401_vm6, %v10541_v52, %v10520_v46  ;;  %v363_v53 = vld [vmem:[#allocation3 + $0x30] sm:$0xff] }
 0x118   : > { %443 = vmatpush.msra.mxu0 %v408_v30  ;;  %10470 = vmatpush.msra.mxu2 %v408_v30  ;;  %v324_v30 = vmul.f32 %v12569_v4, %v12350_v32 }
 0x119   : > { %472 = vmatpush.msra.mxu1 %v409_v58  ;;  %10474 = vmatpush.msra.mxu3 %v409_v58 }
 0x11a   : > { %444 = vmatpush.msra.mxu0 %v406_v60  ;;  %10471 = vmatpush.msra.mxu2 %v406_v60 }
 0x11b   : > { %473 = vmatpush.msra.mxu1 %v407_v61  ;;  %10475 = vmatpush.msra.mxu3 %v407_v61  ;;  %v12565_v0 = vpop.permute.xlu2 %1043  ;;  %v10524_v2 = vpop.permute.xlu1 %10523 }
 0x11c   : > { %17019 = vst [vmem:[#allocation19_spill] sm:$0xff] %v12565_v0  ;;  %v10525_v5 = vunpack.i.l.bf16 %v10524_v2  ;;  %v10549_v12 = vpop.permute.xlu0 %10548  ;;  %v1061_v13 = vmul.f32 %v12565_v0, %v12352_v33  ;;  %v12575_v14 = vsel %vm1045_vm7, %v12556_v41, %v12565_v0  ;;  %v10526_v22 = vunpack.i.h.bf16 %v10524_v2 }
 0x11d   : > { %17021 = vst [vmem:[#allocation21_spill] sm:$0xff] %v12575_v14  ;;  %v10551_v16 = vunpack.i.h.bf16 %v10549_v12  ;;  %v10550_v17 = vunpack.i.l.bf16 %v10549_v12  ;;  %v1060_v18 = vmul.f32 %v12575_v14, %v12361_v37  ;;  %v1057_v19 = vmul.f32 %v12575_v14, %v12410_v63 }
 0x11e   : > { %v10637_v23 = vpack.i.bf16 %v1056_v3, %v1061_v13  ;;  %v1058_v24 = vmul.f32 %v12565_v0, %v12405_v62  ;;  %v402_v28 = vsel %vm401_vm6, %v10526_v22, %v10555_v25  ;;  %v1055_v52 = vmul.f32 %v12565_v0, %v12383_v50 }
 0x11f   : > { %v404_v26 = vsel %vm401_vm6, %v10550_v17, %v10551_v16  ;;  %v405_v27 = vsel %vm401_vm6, %v10551_v16, %v10525_v5  ;;  %v10642_v20 = vpack.i.bf16 %v1060_v18, %v1059_v15  ;;  %v1054_v58 = vmul.f32 %v12575_v14, %v12388_v51 }
 0x120   : > { %445 = vmatpush.msra.mxu0 %v404_v26  ;;  %10472 = vmatpush.msra.mxu2 %v404_v26  ;;  %v10647_v31 = vpack.i.bf16 %v1058_v24, %v1057_v19  ;;  %v1051_v60 = vmul.f32 %v12575_v14, %v12432_v10  ;;  %v1052_v61 = vmul.f32 %v12565_v0, %v12420_v6  ;;  %v361_v19 = vld [vmem:[#allocation3 + $0x20] sm:$0xff] }
 0x121   : > { %10638 = vrot.lane.b32.xlu1 %v10637_v23, %s12258_s10  ;;  %474 = vmatpush.msra.mxu1 %v405_v27  ;;  %v325_v2 = vmul.f32 %v12587_v44, %v12410_v63  ;;  %v1053_v3 = vmul.f32 %v12556_v41, %v12399_v56  ;;  %v322_v5 = vmul.f32 %v12569_v4, %v12399_v56 }
 0x122   : > { %10476 = vmatpush.msra.mxu3 %v405_v27  ;;  %10643 = vrot.lane.b32.xlu0 %v10642_v20, %s12258_s10  ;;  %v10657_v12 = vpack.i.bf16 %v1050_v59, %v1055_v52  ;;  %v323_v13 = vmul.f32 %v12587_v44, %v12388_v51  ;;  %v10662_v17 = vpack.i.bf16 %v1052_v61, %v1051_v60 }
 0x123   : > { %10648 = vrot.lane.b32.xlu2 %v10647_v31, %s12258_s10  ;;  %446 = vmatpush.msra.mxu0 %v402_v28  ;;  %v12594_v46 = vpop.permute.xlu2 %1360  ;;  %v12596_v47 = vpop.permute.xlu1 %1203  ;;  %v10652_v15 = vpack.i.bf16 %v1054_v58, %v1053_v3  ;;  %v320_v18 = vmul.f32 %v12569_v4, %v12381_v49  ;;  %v321_v22 = vmul.f32 %v12587_v44, %v12432_v10 }
 0x124   : > { %17023 = vst [vmem:[#allocation23_spill] sm:$0xff] %v12594_v46  ;;  %10473 = vmatpush.msra.mxu2 %v402_v28  ;;  %475 = vmatpush.msra.mxu1 %v403_v45  ;;  %v12604_v55 = vpop.permute.xlu0 %1201  ;;  %v1220_v23 = vmul.f32 %v12596_v47, %v12352_v33  ;;  %v1217_v3 = vmul.f32 %v12596_v47, %v12405_v62 }
 0x125   : > { %17024 = vst [vmem:[#allocation24_spill] sm:$0xff] %v12596_v47  ;;  %10477 = vmatpush.msra.mxu3 %v403_v45  ;;  %9940 = vmatmul.msk.f32.vlgmr.msra.gmra.mxu2 %vm418_vm8, %v363_v53  ;;  %v12629_v16 = vsel %vm418_vm8, %v12604_v55, %v12596_v47  ;;  %v1215_v26 = vmul.f32 %v12604_v55, %v12350_v32 }
 0x126   : > { %17025 = vst [vmem:[#allocation25_spill] sm:$0xff] %v12604_v55  ;;  %513 = vmatpush.msrb.mxu2 %v326_v48  ;;  %9944 = vmatmul.msk.f32.vlgmr.msra.gmra.mxu3 %vm418_vm8, %v363_v53  ;;  %v1218_v27 = vmul.f32 %v12604_v55, %v12358_v36  ;;  %v1219_v20 = vmul.f32 %v12629_v16, %v12361_v37 }
 0x127   : > { %542 = vmatpush.msrb.mxu3 %v327_v54  ;;  %17026 = vst [vmem:[#allocation26_spill] sm:$0xff] %v12629_v16  ;;  %9938 = vmatmul.msk.f32.vlgmr.msra.gmra.mxu0 %vm418_vm8, %v361_v19  ;;  %v1216_v54 = vmul.f32 %v12629_v16, %v12410_v63  ;;  %v10672_v61 = vpack.i.bf16 %v1215_v26, %v1220_v23 }
 0x128   : > { %514 = vmatpush.msrb.mxu2 %v324_v30  ;;  %9942 = vmatmul.msk.f32.vlgmr.msra.gmra.mxu1 %vm418_vm8, %v361_v19  ;;  %v364_v30 = vld [vmem:[#allocation3 + $0x38] sm:$0xff]  ;;  %v1214_v19 = vmul.f32 %v12596_v47, %v12383_v50  ;;  %v1212_v23 = vmul.f32 %v12604_v55, %v12399_v56 }
 0x129   : > { %543 = vmatpush.msrb.mxu3 %v325_v2  ;;  %10658 = vrot.lane.b32.xlu1 %v10657_v12, %s12258_s10  ;;  %v10677_v12 = vpack.i.bf16 %v1217_v3, %v1216_v54  ;;  %v10535_v54 = vunpack.i.l.bf16 %v12554_v40 }
 0x12a   : > { %515 = vmatpush.msrb.mxu2 %v322_v5  ;;  %10653 = vrot.lane.b32.xlu0 %v10652_v15, %s12258_s10  ;;  %v10667_v5 = vpack.i.bf16 %v1219_v20, %v1218_v27 }
 0x12b   : > { %544 = vmatpush.msrb.mxu3 %v323_v13  ;;  %10663 = vrot.lane.b32.xlu2 %v10662_v17, %s12258_s10  ;;  %v10599_v24 = vpop.permute.xlu2 %10598  ;;  %v10564_v25 = vpop.permute.xlu1 %10563  ;;  %v362_v13 = vld [vmem:[#allocation3 + $0x28] sm:$0xff] }
 0x12c   : > { %516 = vmatpush.msrb.mxu2 %v320_v18  ;;  %v10601_v31 = vunpack.i.h.bf16 %v10599_v24  ;;  %v10600_v28 = vunpack.i.l.bf16 %v10599_v24  ;;  %v10566_v45 = vunpack.i.h.bf16 %v10564_v25  ;;  %v10565_v48 = vunpack.i.l.bf16 %v10564_v25  ;;  %v12647_v52 = vpop.permute.xlu0 %10558 }
 0x12d   : > { %545 = vmatpush.msrb.mxu3 %v321_v22  ;;  %v10560_v53 = vunpack.i.l.bf16 %v12647_v52  ;;  %9941 = vmatmul.msk.f32.gmra.mxu2 %vm418_vm8, %v364_v30  ;;  %v1209_v18 = vmul.f32 %v12604_v55, %v12381_v49  ;;  %v1213_v24 = vmul.f32 %v12629_v16, %v12388_v51  ;;  %v1210_v25 = vmul.f32 %v12629_v16, %v12432_v10 }
 0x12e   : > { %v631_v58 = vsel %vm624_vm9, %v10565_v48, %v10566_v45  ;;  %v632_v59 = vsel %vm624_vm9, %v10566_v45, %v10530_v21  ;;  %v791_v60 = vsel %vm784_vm10, %v10600_v28, %v10601_v31  ;;  %9945 = vmatmul.msk.f32.gmra.mxu3 %vm418_vm8, %v364_v30  ;;  %v10531_v21 = vunpack.i.h.bf16 %v12552_v35  ;;  %v328_v28 = vld [vmem:[#allocation3] sm:$0xff] }
 0x12f   : > { %665 = vmatpush.msrb.mxu0 %v631_v58  ;;  %694 = vmatpush.msrb.mxu1 %v632_v59  ;;  %v792_v2 = vsel %vm784_vm10, %v10601_v31, %v10560_v53  ;;  %v10687_v35 = vpack.i.bf16 %v1209_v18, %v1214_v19  ;;  %v1211_v53 = vmul.f32 %v12596_v47, %v12420_v6  ;;  %v329_v19 = vld [vmem:[#allocation3 + $0x8] sm:$0xff] }
 0x130   : > { %825 = vmatpush.msra.mxu2 %v791_v60  ;;  %854 = vmatpush.msra.mxu3 %v792_v2  ;;  %v10682_v30 = vpack.i.bf16 %v1213_v24, %v1212_v23  ;;  %v584_v23 = vld [vmem:[#allocation3 + $0x40] sm:$0xff] }
 0x131   : > { %10673 = vrot.lane.b32.xlu1 %v10672_v61, %s12259_s11  ;;  %9939 = vmatmul.msk.f32.gmra.mxu0 %vm418_vm8, %v362_v13  ;;  %v10692_v58 = vpack.i.bf16 %v1211_v53, %v1210_v25 }
 0x132   : > { %10668 = vrot.lane.b32.xlu0 %v10667_v5, %s12259_s11  ;;  %9943 = vmatmul.msk.f32.gmra.mxu1 %vm418_vm8, %v362_v13  ;;  %v10536_v13 = vunpack.i.h.bf16 %v12554_v40  ;;  %v10561_v40 = vunpack.i.h.bf16 %v12647_v52 }
 0x133   : > { %10678 = vrot.lane.b32.xlu2 %v10677_v12, %s12259_s11  ;;  %v12665_v15 = vpop.permute.xlu2 %10608  ;;  %v10574_v17 = vpop.permute.xlu1 %10573 }
 0x134   : > { %v10569_v22 = vpop.permute.xlu0 %10568  ;;  %v10576_v26 = vunpack.i.h.bf16 %v10574_v17  ;;  %v10575_v27 = vunpack.i.l.bf16 %v10574_v17 }
 0x135   : > { %v10571_v20 = vunpack.i.h.bf16 %v10569_v22  ;;  %v10570_v31 = vunpack.i.l.bf16 %v10569_v22  ;;  %9946 = vmatmul.msk.f32.vlgmr.msrb.gmra.mxu2 %vm418_vm8, %v328_v28 }
 0x136   : > { %v627_v59 = vsel %vm624_vm9, %v10575_v27, %v10576_v26  ;;  %9950 = vmatmul.msk.f32.vlgmr.msrb.gmra.mxu3 %vm418_vm8, %v328_v28  ;;  %v628_v60 = vsel %vm624_vm9, %v10576_v26, %v10535_v54  ;;  %v10611_v26 = vunpack.i.h.bf16 %v12665_v15  ;;  %v10610_v27 = vunpack.i.l.bf16 %v12665_v15  ;;  %v585_v54 = vld [vmem:[#allocation3 + $0x48] sm:$0xff] }
 0x137   : > { %v629_v45 = vsel %vm624_vm9, %v10531_v21, %v10570_v31  ;;  %v630_v48 = vsel %vm624_vm9, %v10570_v31, %v10571_v20 }
 0x138   : > { %666 = vmatpush.msrb.mxu0 %v629_v45  ;;  %695 = vmatpush.msrb.mxu1 %v630_v48  ;;  %v330_v45 = vld [vmem:[#allocation3 + $0x10] sm:$0xff] }
 0x139   : > { %10688 = vrot.lane.b32.xlu1 %v10687_v35, %s12259_s11 }
 0x13a   : > { %10683 = vrot.lane.b32.xlu0 %v10682_v30, %s12259_s11  ;;  %667 = vmatpush.msrb.mxu0 %v627_v59  ;;  %v787_v30 = vsel %vm784_vm10, %v10610_v27, %v10611_v26 }
 0x13b   : > { %10693 = vrot.lane.b32.xlu2 %v10692_v58, %s12259_s11  ;;  %696 = vmatpush.msrb.mxu1 %v628_v60  ;;  %v10619_v61 = vpop.permute.xlu2 %10618  ;;  %v12692_v2 = vpop.permute.xlu1 %1520 }
 0x13c   : > { %17027 = vst [vmem:[#allocation27_spill] sm:$0xff] %v12692_v2  ;;  %v10621_v3 = vunpack.i.h.bf16 %v10619_v61  ;;  %v10620_v5 = vunpack.i.l.bf16 %v10619_v61  ;;  %v10579_v12 = vpop.permute.xlu0 %10578 }
 0x13d   : > { %v10581_v17 = vunpack.i.h.bf16 %v10579_v12  ;;  %v10580_v18 = vunpack.i.l.bf16 %v10579_v12  ;;  %9947 = vmatmul.msk.f32.gmra.mxu2 %vm418_vm8, %v329_v19  ;;  %v331_v12 = vld [vmem:[#allocation3 + $0x18] sm:$0xff] }
 0x13e   : > { %v950_v24 = vsel %vm943_vm11, %v10620_v5, %v10621_v3  ;;  %9951 = vmatmul.msk.f32.gmra.mxu3 %vm418_vm8, %v329_v19  ;;  %v586_v19 = vld [vmem:[#allocation3 + $0x50] sm:$0xff] }
 0x13f   : > { %v625_v21 = vsel %vm624_vm9, %v10536_v13, %v10580_v18  ;;  %v626_v22 = vsel %vm624_vm9, %v10580_v18, %v10581_v17 }
 0x140   : > { %668 = vmatpush.msrb.mxu0 %v625_v21  ;;  %697 = vmatpush.msrb.mxu1 %v626_v22 }
 0x141   : > { %9958 = vmatmul.msk.f32.vlgmr.msrb.gmra.mxu1 %vm418_vm8, %v584_v23  ;;  %9954 = vmatmul.msk.f32.vlgmr.msrb.gmra.mxu0 %vm418_vm8, %v584_v23 }
 0x142   : > { %984 = vmatpush.msra.mxu0 %v950_v24 }
 0x143   : > { %v10604_v25 = vpop.permute.xlu1 %10603  ;;  %v10629_v21 = vpop.permute.xlu2 %10628 }
 0x144   : > { %v10606_v20 = vunpack.i.h.bf16 %v10604_v25  ;;  %v10605_v31 = vunpack.i.l.bf16 %v10604_v25  ;;  %v10584_v28 = vpop.permute.xlu0 %10583  ;;  %v10631_v22 = vunpack.i.h.bf16 %v10629_v21  ;;  %v10630_v24 = vunpack.i.l.bf16 %v10629_v21 }
 0x145   : > { %v10585_v35 = vunpack.i.l.bf16 %v10584_v28  ;;  %9948 = vmatmul.msk.f32.gmra.mxu2 %vm418_vm8, %v330_v45  ;;  %v10586_v58 = vunpack.i.h.bf16 %v10584_v28 }
 0x146   : > { %v789_v48 = vsel %vm784_vm10, %v10561_v40, %v10605_v31  ;;  %v790_v53 = vsel %vm784_vm10, %v10605_v31, %v10606_v20  ;;  %9952 = vmatmul.msk.f32.gmra.mxu3 %vm418_vm8, %v330_v45  ;;  %v744_v31 = vld [vmem:[#allocation3 + $0x60] sm:$0xff]  ;;  %v587_v45 = vld [vmem:[#allocation3 + $0x58] sm:$0xff] }
 0x147   : > { %826 = vmatpush.msra.mxu2 %v789_v48  ;;  %855 = vmatpush.msra.mxu3 %v790_v53  ;;  %v788_v52 = vsel %vm784_vm10, %v10611_v26, %v10585_v35  ;;  %v946_v48 = vsel %vm943_vm11, %v10630_v24, %v10631_v22  ;;  %v903_v24 = vld [vmem:[#allocation3 + $0x80] sm:$0xff] }
 0x149   : > { %827 = vmatpush.msra.mxu2 %v787_v30  ;;  %856 = vmatpush.msra.mxu3 %v788_v52 }
 0x14a   : > { %9959 = vmatmul.msk.f32.gmra.mxu1 %vm418_vm8, %v585_v54  ;;  %9955 = vmatmul.msk.f32.gmra.mxu0 %vm418_vm8, %v585_v54 }
 0x14b   : > { %v10614_v15 = vpop.permute.xlu1 %10613 }
 0x14c   : > { %v10616_v59 = vunpack.i.h.bf16 %v10614_v15  ;;  %v10615_v60 = vunpack.i.l.bf16 %v10614_v15  ;;  %v10589_v61 = vpop.permute.xlu0 %10588 }
 0x14d   : > { %v10590_v5 = vunpack.i.l.bf16 %v10589_v61  ;;  %9949 = vmatmul.msk.f32.gmra.mxu2 %vm418_vm8, %v331_v12  ;;  %v10591_v40 = vunpack.i.h.bf16 %v10589_v61  ;;  %v1378_v61 = vmul.f32 %v12594_v46, %v12358_v36 }
 0x14e   : > { %v785_v13 = vsel %vm784_vm10, %v10586_v58, %v10615_v60  ;;  %v786_v17 = vsel %vm784_vm10, %v10615_v60, %v10616_v59  ;;  %9953 = vmatmul.msk.f32.gmra.mxu3 %vm418_vm8, %v331_v12  ;;  %v1375_v58 = vmul.f32 %v12594_v46, %v12350_v32  ;;  %v745_v12 = vld [vmem:[#allocation3 + $0x68] sm:$0xff] }
 0x14f   : > { %828 = vmatpush.msra.mxu2 %v785_v13  ;;  %857 = vmatpush.msra.mxu3 %v786_v17  ;;  %v951_v18 = vsel %vm943_vm11, %v10621_v3, %v10590_v5 }
 0x150   : > { %1013 = vmatpush.msra.mxu1 %v951_v18 }
 0x152   : > { %9960 = vmatmul.msk.f32.gmra.mxu1 %vm418_vm8, %v586_v19  ;;  %9956 = vmatmul.msk.f32.gmra.mxu0 %vm418_vm8, %v586_v19 }
 0x153   : > { %v10624_v23 = vpop.permute.xlu1 %10623 }
 0x154   : > { %v10626_v25 = vunpack.i.h.bf16 %v10624_v23  ;;  %v10625_v26 = vunpack.i.l.bf16 %v10624_v23  ;;  %v10594_v27 = vpop.permute.xlu0 %10593 }
 0x155   : > { %v10595_v20 = vunpack.i.l.bf16 %v10594_v27  ;;  %9962 = vmatmul.msk.f32.vlgmr.msra.gmra.mxu2 %vm418_vm8, %v744_v31  ;;  %v10596_v52 = vunpack.i.h.bf16 %v10594_v27 }
 0x156   : > { %v948_v3 = vsel %vm943_vm11, %v10591_v40, %v10625_v26  ;;  %v949_v28 = vsel %vm943_vm11, %v10625_v26, %v10626_v25  ;;  %9966 = vmatmul.msk.f32.vlgmr.msra.gmra.mxu3 %vm418_vm8, %v744_v31  ;;  %v746_v31 = vld [vmem:[#allocation3 + $0x70] sm:$0xff] }
 0x157   : > { %985 = vmatpush.msra.mxu0 %v948_v3  ;;  %1014 = vmatpush.msra.mxu1 %v949_v28  ;;  %v947_v35 = vsel %vm943_vm11, %v10631_v22, %v10595_v20  ;;  %v1369_v20 = vmul.f32 %v12594_v46, %v12381_v49  ;;  %v12765_v3 = vpop.permute.xlu2 %1522  ;;  %v1372_v28 = vmul.f32 %v12594_v46, %v12399_v56 }
 0x158   : > { %17030 = vst [vmem:[#allocation30_spill] sm:$0xff] %v12765_v3 }
 0x159   : > { %986 = vmatpush.msra.mxu0 %v946_v48  ;;  %1015 = vmatpush.msra.mxu1 %v947_v35 }
 0x15a   : > { %9961 = vmatmul.msk.f32.gmra.mxu1 %vm418_vm8, %v587_v45  ;;  %9957 = vmatmul.msk.f32.gmra.mxu0 %vm418_vm8, %v587_v45 }
 0x15b   : > { %v10634_v53 = vpop.permute.xlu1 %10633 }
 0x15c   : > { %v10636_v54 = vunpack.i.h.bf16 %v10634_v53  ;;  %v10635_v30 = vunpack.i.l.bf16 %v10634_v53  ;;  %v12728_v15 = vpop.permute.xlu0 %1362  ;;  %v904_v53 = vld [vmem:[#allocation3 + $0x88] sm:$0xff] }
 0x15d   : > { %17028 = vst [vmem:[#allocation28_spill] sm:$0xff] %v12728_v15  ;;  %v1380_v59 = vmul.f32 %v12728_v15, %v12352_v33  ;;  %v12736_v60 = vsel %vm1364_vm12, %v12594_v46, %v12728_v15  ;;  %v1377_v5 = vmul.f32 %v12728_v15, %v12405_v62  ;;  %9963 = vmatmul.msk.f32.gmra.mxu2 %vm418_vm8, %v745_v12 }
 0x15e   : > { %17029 = vst [vmem:[#allocation29_spill] sm:$0xff] %v12736_v60  ;;  %v944_v13 = vsel %vm943_vm11, %v10596_v52, %v10635_v30  ;;  %v945_v17 = vsel %vm943_vm11, %v10635_v30, %v10636_v54  ;;  %v1379_v18 = vmul.f32 %v12736_v60, %v12361_v37  ;;  %v1376_v19 = vmul.f32 %v12736_v60, %v12410_v63 }
 0x15f   : > { %987 = vmatpush.msra.mxu0 %v944_v13  ;;  %1016 = vmatpush.msra.mxu1 %v945_v17  ;;  %v10702_v21 = vpack.i.bf16 %v1375_v58, %v1380_v59  ;;  %v1374_v40 = vmul.f32 %v12728_v15, %v12383_v50  ;;  %v1373_v25 = vmul.f32 %v12736_v60, %v12388_v51  ;;  %v905_v17 = vld [vmem:[#allocation3 + $0x90] sm:$0xff] }
 0x160   : > { %v10697_v22 = vpack.i.bf16 %v1379_v18, %v1378_v61  ;;  %v10707_v23 = vpack.i.bf16 %v1377_v5, %v1376_v19  ;;  %9967 = vmatmul.msk.f32.gmra.mxu3 %vm418_vm8, %v745_v12  ;;  %v1370_v26 = vmul.f32 %v12736_v60, %v12432_v10  ;;  %v1371_v27 = vmul.f32 %v12728_v15, %v12420_v6  ;;  %v747_v5 = vld [vmem:[#allocation3 + $0x78] sm:$0xff] }
 0x161   : > { %10703 = vrot.lane.b32.xlu1 %v10702_v21, %s12260_s12  ;;  %v10717_v35 = vpack.i.bf16 %v1369_v20, %v1374_v40  ;;  %v10712_v45 = vpack.i.bf16 %v1373_v25, %v1372_v28  ;;  %v12774_v52 = vsel %vm217_vm0, %v12692_v2, %v12765_v3  ;;  %v1539_v54 = vmul.f32 %v12765_v3, %v12352_v33 }
 0x162   : > { %10698 = vrot.lane.b32.xlu0 %v10697_v22, %s12260_s12  ;;  %10708 = vrot.lane.b32.xlu2 %v10707_v23, %s12260_s12  ;;  %v10722_v48 = vpack.i.bf16 %v1371_v27, %v1370_v26  ;;  %17031 = vst [vmem:[#allocation31_spill] sm:$0xff] %v12774_v52  ;;  %v1538_v30 = vmul.f32 %v12774_v52, %v12361_v37  ;;  %v906_v23 = vld [vmem:[#allocation3 + $0x98] sm:$0xff]  ;;  %vm1581_vm0 = vcmask 769024  }
 0x163   : > { %9974 = vmatmul.msk.f32.vlgmr.msra.gmra.mxu1 %vm418_vm8, %v903_v24  ;;  %9970 = vmatmul.msk.f32.vlgmr.msra.gmra.mxu0 %vm418_vm8, %v903_v24  ;;  %v1535_v58 = vmul.f32 %v12774_v52, %v12410_v63  ;;  %v1536_v59 = vmul.f32 %v12765_v3, %v12405_v62  ;;  %v1534_v61 = vmul.f32 %v12692_v2, %v12350_v32 }
 0x164   : > { %v1537_v33 = vmul.f32 %v12692_v2, %v12358_v36  ;;  %v1533_v32 = vmul.f32 %v12765_v3, %v12383_v50  ;;  %v1532_v36 = vmul.f32 %v12774_v52, %v12388_v51  ;;  %v1529_v62 = vmul.f32 %v12774_v52, %v12432_v10 }
 0x165   : > { %9964 = vmatmul.msk.f32.gmra.mxu2 %vm418_vm8, %v746_v31  ;;  %v10732_v12 = vpack.i.bf16 %v1534_v61, %v1539_v54  ;;  %v10737_v37 = vpack.i.bf16 %v1536_v59, %v1535_v58  ;;  %v1530_v63 = vmul.f32 %v12765_v3, %v12420_v6  ;;  %v1528_v18 = vmul.f32 %v12692_v2, %v12381_v49 }
 0x166   : > { %v10727_v13 = vpack.i.bf16 %v1538_v30, %v1537_v33  ;;  %v1531_v50 = vmul.f32 %v12692_v2, %v12399_v56 }
 0x167   : > { %v10747_v19 = vpack.i.bf16 %v1528_v18, %v1533_v32  ;;  %v10752_v22 = vpack.i.bf16 %v1530_v63, %v1529_v62 }
 0x168   : > { %9968 = vmatmul.msk.f32.gmra.mxu3 %vm418_vm8, %v746_v31  ;;  %v10742_v21 = vpack.i.bf16 %v1532_v36, %v1531_v50 }
 0x169   : > { %10718 = vrot.lane.b32.xlu1 %v10717_v35, %s12260_s12 }
 0x16a   : > { %10713 = vrot.lane.b32.xlu0 %v10712_v45, %s12260_s12  ;;  %10723 = vrot.lane.b32.xlu2 %v10722_v48, %s12260_s12 }
 0x16b   : > { %9975 = vmatmul.msk.f32.gmra.mxu1 %vm418_vm8, %v904_v53  ;;  %9971 = vmatmul.msk.f32.gmra.mxu0 %vm418_vm8, %v904_v53 }
 0x16d   : > { %9965 = vmatmul.msk.f32.gmra.mxu2 %vm418_vm8, %v747_v5 }
 0x170   : > { %9969 = vmatmul.msk.f32.gmra.mxu3 %vm418_vm8, %v747_v5 }
 0x171   : > { %10733 = vrot.lane.b32.xlu1 %v10732_v12, %s12261_s13 }
 0x172   : > { %10728 = vrot.lane.b32.xlu0 %v10727_v13, %s12261_s13  ;;  %10738 = vrot.lane.b32.xlu2 %v10737_v37, %s12261_s13  ;;  %v1063_v13 = vld [vmem:[#allocation3 + $0xa0] sm:$0xff] }
 0x173   : > { %9976 = vmatmul.msk.f32.gmra.mxu1 %vm418_vm8, %v905_v17  ;;  %9972 = vmatmul.msk.f32.gmra.mxu0 %vm418_vm8, %v905_v17 }
 0x179   : > { %10748 = vrot.lane.b32.xlu1 %v10747_v19, %s12261_s13 }
 0x17a   : > { %10743 = vrot.lane.b32.xlu0 %v10742_v21, %s12261_s13  ;;  %10753 = vrot.lane.b32.xlu2 %v10752_v22, %s12261_s13 }
 0x17b   : > { %9977 = vmatmul.msk.f32.gmra.mxu1 %vm418_vm8, %v906_v23  ;;  %9973 = vmatmul.msk.f32.gmra.mxu0 %vm418_vm8, %v906_v23 }
 0x17d   : > { %v10649_v51 = vpop.permute.xlu2 %10648 }
 0x17e   : > { %v10651_v49 = vunpack.i.h.bf16 %v10649_v51  ;;  %v10650_v56 = vunpack.i.l.bf16 %v10649_v51  ;;  %v1064_v51 = vld [vmem:[#allocation3 + $0xa8] sm:$0xff] }
 0x180   : > { %v1109_v35 = vsel %vm1103_vm13, %v10650_v56, %v10651_v49 }
 0x185   : > { %v10664_v40 = vpop.permute.xlu2 %10663 }
 0x186   : > { %v10666_v48 = vunpack.i.h.bf16 %v10664_v40  ;;  %v10665_v30 = vunpack.i.l.bf16 %v10664_v40 }
 0x188   : > { %v1105_v17 = vsel %vm1103_vm13, %v10665_v30, %v10666_v48 }
 0x18d   : > { %v10679_v5 = vpop.permute.xlu2 %10678 }
 0x18e   : > { %v10681_v36 = vunpack.i.h.bf16 %v10679_v5  ;;  %v10680_v18 = vunpack.i.l.bf16 %v10679_v5 }
 0x193   : > { %v10639_v6 = vpop.permute.xlu1 %10638 }
 0x194   : > { %v10640_v10 = vunpack.i.l.bf16 %v10639_v6  ;;  %v10644_v24 = vpop.permute.xlu0 %10643  ;;  %v10641_v25 = vunpack.i.h.bf16 %v10639_v6 }
 0x195   : > { %v10646_v26 = vunpack.i.h.bf16 %v10644_v24  ;;  %v10645_v27 = vunpack.i.l.bf16 %v10644_v24  ;;  %v10694_v6 = vpop.permute.xlu2 %10693 }
 0x196   : > { %v1108_v28 = vsel %vm1103_vm13, %v10641_v25, %v10650_v56  ;;  %v10696_v56 = vunpack.i.h.bf16 %v10694_v6 }
 0x197   : > { %v1110_v20 = vsel %vm1103_vm13, %v10645_v27, %v10646_v26  ;;  %v1111_v31 = vsel %vm1103_vm13, %v10646_v26, %v10640_v10  ;;  %v1268_v10 = vsel %vm1262_vm14, %v10680_v18, %v10681_v36  ;;  %v10695_v26 = vunpack.i.l.bf16 %v10694_v6 }
 0x198   : > { %1144 = vmatpush.msrb.mxu2 %v1110_v20  ;;  %1173 = vmatpush.msrb.mxu3 %v1111_v31 }
 0x19a   : > { %1145 = vmatpush.msrb.mxu2 %v1108_v28  ;;  %1174 = vmatpush.msrb.mxu3 %v1109_v35 }
 0x19b   : > { %v10659_v45 = vpop.permute.xlu1 %10658 }
 0x19c   : > { %v10660_v53 = vunpack.i.l.bf16 %v10659_v45  ;;  %v10654_v54 = vpop.permute.xlu0 %10653  ;;  %v10661_v58 = vunpack.i.h.bf16 %v10659_v45  ;;  %v1065_v45 = vld [vmem:[#allocation3 + $0xb0] sm:$0xff] }
 0x19d   : > { %v10656_v59 = vunpack.i.h.bf16 %v10654_v54  ;;  %v10655_v61 = vunpack.i.l.bf16 %v10654_v54  ;;  %v1222_v54 = vld [vmem:[#allocation3 + $0xc0] sm:$0xff] }
 0x19e   : > { %v1104_v37 = vsel %vm1103_vm13, %v10661_v58, %v10665_v30  ;;  %v1066_v30 = vld [vmem:[#allocation3 + $0xb8] sm:$0xff]  ;;  %v1223_v58 = vld [vmem:[#allocation3 + $0xc8] sm:$0xff] }
 0x19f   : > { %v1106_v33 = vsel %vm1103_vm13, %v10655_v61, %v10656_v59  ;;  %v1107_v12 = vsel %vm1103_vm13, %v10656_v59, %v10660_v53  ;;  %v1264_v53 = vsel %vm1262_vm14, %v10695_v26, %v10696_v56  ;;  %v1224_v59 = vld [vmem:[#allocation3 + $0xd0] sm:$0xff]  ;;  %v1225_v61 = vld [vmem:[#allocation3 + $0xd8] sm:$0xff] }
 0x1a0   : > { %1146 = vmatpush.msrb.mxu2 %v1106_v33  ;;  %1175 = vmatpush.msrb.mxu3 %v1107_v12 }
 0x1a2   : > { %1147 = vmatpush.msrb.mxu2 %v1104_v37  ;;  %1176 = vmatpush.msrb.mxu3 %v1105_v17  ;;  %v1678_v17 = vld [vmem:[%s16805_s2 + $0x10] sm:$0xff] }
 0x1a3   : > { %v10674_v32 = vpop.permute.xlu1 %10673  ;;  %9978 = vmatmul.msk.f32.vlgmr.msrb.gmra.mxu2 %vm418_vm8, %v1063_v13  ;;  %9982 = vmatmul.msk.f32.vlgmr.msrb.gmra.mxu3 %vm418_vm8, %v1063_v13 }
 0x1a4   : > { %v10675_v62 = vunpack.i.l.bf16 %v10674_v32  ;;  %v10669_v63 = vpop.permute.xlu0 %10668  ;;  %v10676_v50 = vunpack.i.h.bf16 %v10674_v32 }
 0x1a5   : > { %v10671_v19 = vunpack.i.h.bf16 %v10669_v63  ;;  %v10670_v21 = vunpack.i.l.bf16 %v10669_v63 }
 0x1a6   : > { %v1267_v49 = vsel %vm1262_vm14, %v10676_v50, %v10680_v18  ;;  %v12262_v50 = vmov 0  }
 0x1a7   : > { %v1269_v22 = vsel %vm1262_vm14, %v10670_v21, %v10671_v19  ;;  %v1270_v23 = vsel %vm1262_vm14, %v10671_v19, %v10675_v62  ;;  %10758 = vset.pattern.permute.xlu1 %v12262_v50  ;;  %10757 = vset.pattern.permute.xlu0 %v12262_v50 }
 0x1a8   : > { %1303 = vmatpush.msrb.mxu0 %v1269_v22  ;;  %1332 = vmatpush.msrb.mxu1 %v1270_v23 }
 0x1a9   : > { %1692 = vperm.xlu1 %10758, %v1678_v17   ;;  %10759 = vset.pattern.permute.xlu2 %v12262_v50 }
 0x1aa   : > { %1304 = vmatpush.msrb.mxu0 %v1267_v49  ;;  %1333 = vmatpush.msrb.mxu1 %v1268_v10 }
 0x1ab   : > { %v10689_v24 = vpop.permute.xlu1 %10688  ;;  %9979 = vmatmul.msk.f32.gmra.mxu2 %vm418_vm8, %v1064_v51  ;;  %9983 = vmatmul.msk.f32.gmra.mxu3 %vm418_vm8, %v1064_v51 }
 0x1ac   : > { %v10690_v40 = vunpack.i.l.bf16 %v10689_v24  ;;  %v10684_v25 = vpop.permute.xlu0 %10683  ;;  %v10691_v27 = vunpack.i.h.bf16 %v10689_v24  ;;  %v1676_v24 = vld [vmem:[%s16805_s2] sm:$0xff] }
 0x1ad   : > { %v10686_v20 = vunpack.i.h.bf16 %v10684_v25  ;;  %v10685_v31 = vunpack.i.l.bf16 %v10684_v25 }
 0x1ae   : > { %v1263_v48 = vsel %vm1262_vm14, %v10691_v27, %v10695_v26  ;;  %v12859_v27 = vpop.f32.mrf.mxu3 }
 0x1af   : > { %v1265_v28 = vsel %vm1262_vm14, %v10685_v31, %v10686_v20  ;;  %v1266_v35 = vsel %vm1262_vm14, %v10686_v20, %v10690_v40  ;;  %v12861_v20 = vpop.f32.mrf.mxu2 }
 0x1b0   : > { %1305 = vmatpush.msrb.mxu0 %v1265_v28  ;;  %1334 = vmatpush.msrb.mxu1 %v1266_v35 }
 0x1b1   : > { %1682 = vperm.xlu1 %10758, %v1676_v24  }
 0x1b2   : > { %1306 = vmatpush.msrb.mxu0 %v1263_v48  ;;  %1335 = vmatpush.msrb.mxu1 %v1264_v53 }
 0x1b3   : > { %9980 = vmatmul.msk.f32.gmra.mxu2 %vm418_vm8, %v1065_v45  ;;  %9984 = vmatmul.msk.f32.gmra.mxu3 %vm418_vm8, %v1065_v45  ;;  %v1382_v45 = vld [vmem:[#allocation3 + $0xe0] sm:$0xff] }
 0x1b4   : > { %9986 = vmatmul.msk.f32.vlgmr.msrb.gmra.mxu0 %vm418_vm8, %v1222_v54  ;;  %9990 = vmatmul.msk.f32.vlgmr.msrb.gmra.mxu1 %vm418_vm8, %v1222_v54 }
 0x1bb   : > { %9981 = vmatmul.msk.f32.gmra.mxu2 %vm418_vm8, %v1066_v30  ;;  %9985 = vmatmul.msk.f32.gmra.mxu3 %vm418_vm8, %v1066_v30 }
 0x1bc   : > { %9987 = vmatmul.msk.f32.gmra.mxu0 %vm418_vm8, %v1223_v58  ;;  %9991 = vmatmul.msk.f32.gmra.mxu1 %vm418_vm8, %v1223_v58  ;;  %v10709_v5 = vpop.permute.xlu2 %10708 }
 0x1bd   : > { %v10711_v12 = vunpack.i.h.bf16 %v10709_v5  ;;  %v10710_v32 = vunpack.i.l.bf16 %v10709_v5 }
 0x1bf   : > { %v1428_v23 = vsel %vm1422_vm15, %v10710_v32, %v10711_v12 }
 0x1c4   : > { %9988 = vmatmul.msk.f32.gmra.mxu0 %vm418_vm8, %v1224_v59  ;;  %9992 = vmatmul.msk.f32.gmra.mxu1 %vm418_vm8, %v1224_v59  ;;  %v10724_v36 = vpop.permute.xlu2 %10723 }
 0x1c5   : > { %v10726_v6 = vunpack.i.h.bf16 %v10724_v36  ;;  %v10725_v56 = vunpack.i.l.bf16 %v10724_v36  ;;  %v12875_v36 = vpop.f32.mrf.mxu2 }
 0x1c7   : > { %v1424_v53 = vsel %vm1422_vm15, %v10725_v56, %v10726_v6  ;;  %v1679_v6 = vld [vmem:[%s16805_s2 + $0x18] sm:$0xff] }
 0x1c8   : > { %1697 = vperm.xlu0 %10757, %v1679_v6  }
 0x1cc   : > { %9989 = vmatmul.msk.f32.gmra.mxu0 %vm418_vm8, %v1225_v61  ;;  %9993 = vmatmul.msk.f32.gmra.mxu1 %vm418_vm8, %v1225_v61  ;;  %v10739_v31 = vpop.permute.xlu2 %10738 }
 0x1cd   : > { %v10741_v30 = vunpack.i.h.bf16 %v10739_v31  ;;  %v10740_v61 = vunpack.i.l.bf16 %v10739_v31  ;;  %v1384_v31 = vld [vmem:[#allocation3 + $0xf0] sm:$0xff] }
 0x1d3   : > { %v10704_v33 = vpop.permute.xlu1 %10703 }
 0x1d4   : > { %v10705_v13 = vunpack.i.l.bf16 %v10704_v33  ;;  %v10699_v37 = vpop.permute.xlu0 %10698  ;;  %v10706_v62 = vunpack.i.h.bf16 %v10704_v33 }
 0x1d5   : > { %v10701_v63 = vunpack.i.h.bf16 %v10699_v37  ;;  %v10700_v18 = vunpack.i.l.bf16 %v10699_v37 }
 0x1d6   : > { %v1427_v22 = vsel %vm1422_vm15, %v10706_v62, %v10710_v32  ;;  %v12873_v32 = vpop.f32.mrf.mxu3  ;;  %v1383_v62 = vld [vmem:[#allocation3 + $0xe8] sm:$0xff] }
 0x1d7   : > { %v1429_v19 = vsel %vm1422_vm15, %v10700_v18, %v10701_v63  ;;  %v1430_v21 = vsel %vm1422_vm15, %v10701_v63, %v10705_v13  ;;  %v12869_v13 = vpop.f32.mrf.mxu1  ;;  %v12877_v63 = vpop.f32.mrf.mxu0 }
 0x1d8   : > { %1463 = vmatpush.msra.mxu2 %v1429_v19  ;;  %1492 = vmatpush.msra.mxu3 %v1430_v21  ;;  %v10754_v18 = vpop.permute.xlu2 %10753  ;;  %v1587_v19 = vsel %vm1581_vm0, %v10740_v61, %v10741_v30 }
 0x1da   : > { %1464 = vmatpush.msra.mxu2 %v1427_v22  ;;  %1493 = vmatpush.msra.mxu3 %v1428_v23  ;;  %v10756_v22 = vunpack.i.h.bf16 %v10754_v18 }
 0x1db   : > { %v10719_v51 = vpop.permute.xlu1 %10718 }
 0x1dc   : > { %v10720_v49 = vunpack.i.l.bf16 %v10719_v51  ;;  %v10714_v10 = vpop.permute.xlu0 %10713  ;;  %v10721_v40 = vunpack.i.h.bf16 %v10719_v51 }
 0x1dd   : > { %v10716_v25 = vunpack.i.h.bf16 %v10714_v10  ;;  %v10715_v26 = vunpack.i.l.bf16 %v10714_v10  ;;  %v10755_v10 = vunpack.i.l.bf16 %v10754_v18 }
 0x1de   : > { %v1423_v48 = vsel %vm1422_vm15, %v10721_v40, %v10725_v56 }
 0x1df   : > { %v1425_v28 = vsel %vm1422_vm15, %v10715_v26, %v10716_v25  ;;  %v1426_v35 = vsel %vm1422_vm15, %v10716_v25, %v10720_v49  ;;  %v1677_v49 = vld [vmem:[%s16805_s2 + $0x8] sm:$0xff]  ;;  %v451_v30 = vpop.f32.mrf.mxu0 }
 0x1e0   : > { %1465 = vmatpush.msra.mxu2 %v1425_v28  ;;  %1494 = vmatpush.msra.mxu3 %v1426_v35  ;;  %v1583_v35 = vsel %vm1581_vm0, %v10755_v10, %v10756_v22 }
 0x1e1   : > { %1687 = vperm.xlu2 %10759, %v1677_v49  }
 0x1e2   : > { %1466 = vmatpush.msra.mxu2 %v1423_v48  ;;  %1495 = vmatpush.msra.mxu3 %v1424_v53  ;;  %v12893_v48 = vpop.f32.mrf.mxu3  ;;  %v12895_v53 = vpop.f32.mrf.mxu2 }
 0x1e3   : > { %v10734_v54 = vpop.permute.xlu1 %10733  ;;  %9994 = vmatmul.msk.f32.vlgmr.msra.gmra.mxu2 %vm418_vm8, %v1382_v45  ;;  %9998 = vmatmul.msk.f32.vlgmr.msra.gmra.mxu3 %vm418_vm8, %v1382_v45  ;;  %v1541_v45 = vld [vmem:[#allocation3 + $0x100] sm:$0xff] }
 0x1e4   : > { %v10735_v58 = vunpack.i.l.bf16 %v10734_v54  ;;  %v10729_v59 = vpop.permute.xlu0 %10728  ;;  %v10736_v5 = vunpack.i.h.bf16 %v10734_v54  ;;  %v12897_v54 = vpop.f32.mrf.mxu1 }
 0x1e5   : > { %v10731_v33 = vunpack.i.h.bf16 %v10729_v59  ;;  %v10730_v12 = vunpack.i.l.bf16 %v10729_v59  ;;  %v1542_v59 = vld [vmem:[#allocation3 + $0x108] sm:$0xff] }
 0x1e6   : > { %v1586_v50 = vsel %vm1581_vm0, %v10736_v5, %v10740_v61 }
 0x1e7   : > { %v1588_v37 = vsel %vm1581_vm0, %v10730_v12, %v10731_v33  ;;  %v1589_v17 = vsel %vm1581_vm0, %v10731_v33, %v10735_v58  ;;  %v1385_v58 = vld [vmem:[#allocation3 + $0xf8] sm:$0xff]  ;;  %v12911_v12 = vpop.f32.mrf.mxu0 }
 0x1e8   : > { %1622 = vmatpush.msra.mxu0 %v1588_v37  ;;  %1651 = vmatpush.msra.mxu1 %v1589_v17  ;;  %v1543_v37 = vld [vmem:[#allocation3 + $0x110] sm:$0xff] }
 0x1ea   : > { %1623 = vmatpush.msra.mxu0 %v1586_v50  ;;  %1652 = vmatpush.msra.mxu1 %v1587_v19  ;;  %v12905_v61 = vpop.f32.mrf.mxu3  ;;  %v521_v5 = vpop.f32.mrf.mxu2  ;;  %v1544_v19 = vld [vmem:[#allocation3 + $0x118] sm:$0xff] }
 0x1eb   : > { %v10749_v21 = vpop.permute.xlu1 %10748  ;;  %9995 = vmatmul.msk.f32.gmra.mxu2 %vm418_vm8, %v1383_v62  ;;  %9999 = vmatmul.msk.f32.gmra.mxu3 %vm418_vm8, %v1383_v62  ;;  %v522_v1 = vadd.f32 %v521_v5, %v451_v30 }
 0x1ec   : > { %v10750_v23 = vunpack.i.l.bf16 %v10749_v21  ;;  %v10744_v51 = vpop.permute.xlu0 %10743  ;;  %v10751_v24 = vunpack.i.h.bf16 %v10749_v21  ;;  %v12909_v33 = vpop.f32.mrf.mxu1 }
 0x1ed   : > { %v10746_v56 = vunpack.i.h.bf16 %v10744_v51  ;;  %v10745_v40 = vunpack.i.l.bf16 %v10744_v51 }
 0x1ee   : > { %v1582_v28 = vsel %vm1581_vm0, %v10751_v24, %v10755_v10 }
 0x1ef   : > { %v1584_v25 = vsel %vm1581_vm0, %v10745_v40, %v10746_v56  ;;  %v1585_v26 = vsel %vm1581_vm0, %v10746_v56, %v10750_v23  ;;  %v673_v50 = vpop.f32.mrf.mxu0 }
 0x1f0   : > { %1624 = vmatpush.msra.mxu0 %v1584_v25  ;;  %1653 = vmatpush.msra.mxu1 %v1585_v26  ;;  %v713_v29 = vadd.f32 %v673_v50, %v522_v1 }
 0x1f2   : > { %1625 = vmatpush.msra.mxu0 %v1582_v28  ;;  %1654 = vmatpush.msra.mxu1 %v1583_v35  ;;  %v553_v17 = vpop.f32.mrf.mxu3  ;;  %v524_v62 = vpop.f32.mrf.mxu2 }
 0x1f3   : > { %9996 = vmatmul.msk.f32.gmra.mxu2 %vm418_vm8, %v1384_v31  ;;  %10000 = vmatmul.msk.f32.gmra.mxu3 %vm418_vm8, %v1384_v31  ;;  %v554_v44 = vadd.f32 %v553_v17, %v12859_v27  ;;  %v525_v39 = vadd.f32 %v524_v62, %v12861_v20 }
 0x1f4   : > { %10002 = vmatmul.msk.f32.vlgmr.msra.gmra.mxu0 %vm418_vm8, %v1541_v45  ;;  %10006 = vmatmul.msk.f32.vlgmr.msra.gmra.mxu1 %vm418_vm8, %v1541_v45  ;;  %v702_v18 = vpop.f32.mrf.mxu1 }
 0x1f7   : > { %v676_v51 = vpop.f32.mrf.mxu0 }
 0x1fa   : > { %v556_v21 = vpop.f32.mrf.mxu3  ;;  %v527_v22 = vpop.f32.mrf.mxu2 }
 0x1fb   : > { %9997 = vmatmul.msk.f32.gmra.mxu2 %vm418_vm8, %v1385_v58  ;;  %10001 = vmatmul.msk.f32.gmra.mxu3 %vm418_vm8, %v1385_v58  ;;  %v528_v1 = vadd.f32 %v527_v22, %v12875_v36  ;;  %v557_v27 = vadd.f32 %v556_v21, %v12873_v32 }
 0x1fc   : > { %10003 = vmatmul.msk.f32.gmra.mxu0 %vm418_vm8, %v1542_v59  ;;  %10007 = vmatmul.msk.f32.gmra.mxu1 %vm418_vm8, %v1542_v59  ;;  %v705_v23 = vpop.f32.mrf.mxu1 }
 0x1ff   : > { %v679_v24 = vpop.f32.mrf.mxu0 }
 0x202   : > { %v12917_v6 = vpop.f32.mrf.mxu3  ;;  %v12919_v49 = vpop.f32.mrf.mxu2 }
 0x204   : > { %10004 = vmatmul.msk.f32.gmra.mxu0 %vm418_vm8, %v1543_v37  ;;  %10008 = vmatmul.msk.f32.gmra.mxu1 %vm418_vm8, %v1543_v37  ;;  %v708_v10 = vpop.f32.mrf.mxu1 }
 0x207   : > { %v12923_v26 = vpop.f32.mrf.mxu0 }
 0x20a   : > { %v862_v56 = vpop.f32.mrf.mxu3  ;;  %v833_v40 = vpop.f32.mrf.mxu2 }
 0x20b   : > { %v873_v43 = vadd.f32 %v833_v40, %v713_v29 }
 0x20c   : > { %10005 = vmatmul.msk.f32.gmra.mxu0 %vm418_vm8, %v1544_v19  ;;  %10009 = vmatmul.msk.f32.gmra.mxu1 %vm418_vm8, %v1544_v19  ;;  %v12921_v25 = vpop.f32.mrf.mxu1 }
 0x20d   : > { %17032 = vst [vmem:[#allocation32_spill] sm:$0xff] %v12921_v25 }
 0x20f   : > { %v992_v45 = vpop.f32.mrf.mxu0 }
 0x212   : > { %v865_v31 = vpop.f32.mrf.mxu3  ;;  %v836_v28 = vpop.f32.mrf.mxu2 }
 0x214   : > { %v12925_v35 = vpop.f32.mrf.mxu1 }
 0x217   : > { %v995_v19 = vpop.f32.mrf.mxu0 }
 0x21a   : > { %v12927_v58 = vpop.f32.mrf.mxu3  ;;  %v839_v59 = vpop.f32.mrf.mxu2 }
 0x21c   : > { %v1024_v37 = vpop.f32.mrf.mxu1 }
 0x21f   : > { %v12935_v52 = vpop.f32.mrf.mxu0 }
 0x224   : > { %v12933_v15 = vpop.f32.mrf.mxu1 }
 0x226   : > { %v12929_v46 = vpop.f32.mrf.mxu2  ;;  %v12931_v60 = vpop.f32.mrf.mxu3 }
 0x227   : > { %17033 = vst [vmem:[#allocation33_spill] sm:$0xff] %v12929_v46 }
 0x228   : > { %17034 = vst [vmem:[#allocation34_spill] sm:$0xff] %v12931_v60  ;;  %v1032_v60 = vadd.f32 %v992_v45, %v873_v43 }
 0x22e   : > { %v1152_v2 = vpop.f32.mrf.mxu2  ;;  %v1181_v3 = vpop.f32.mrf.mxu3 }
 0x22f   : > { %v1192_v46 = vadd.f32 %v1152_v2, %v1032_v60  ;;  %v548_v60 = vadd.f32 %v12893_v48, %v12869_v13 }
 0x231   : > { %v12937_v41 = vpop.f32.mrf.mxu0  ;;  %v12939_v14 = vpop.f32.mrf.mxu1 }
 0x232   : > { %17035 = vst [vmem:[#allocation35_spill] sm:$0xff] %v12937_v41  ;;  %v551_v41 = vadd.f32 %v12905_v61, %v12897_v54  ;;  %v519_v54 = vadd.f32 %v12895_v53, %v12877_v63  ;;  %v717_v61 = vadd.f32 %v679_v24, %v528_v1 }
 0x233   : > { %17036 = vst [vmem:[#allocation36_spill] sm:$0xff] %v12939_v14 }
 0x234   : > { %v714_v25 = vadd.f32 %v702_v18, %v551_v41  ;;  %v877_v63 = vadd.f32 %v839_v59, %v717_v61 }
 0x236   : > { %v1155_v0 = vpop.f32.mrf.mxu2  ;;  %v1184_v16 = vpop.f32.mrf.mxu3  ;;  %v874_v40 = vadd.f32 %v862_v56, %v714_v25 }
 0x238   : > { %v1033_v36 = vadd.f32 %v12925_v35, %v874_v40 }
 0x239   : > { %v1311_v55 = vpop.f32.mrf.mxu0  ;;  %v12941_v47 = vpop.f32.mrf.mxu1 }
 0x23a   : > { %v1351_v17 = vadd.f32 %v1311_v55, %v1192_v46  ;;  %v711_v55 = vadd.f32 %v12911_v12, %v519_v54  ;;  %v17044_v40 = vld [vmem:[#allocation36_spill] sm:$0xff] }
 0x23b   : > { %v1688_v50 = vpop.permute.xlu2 %1687 }
 0x23e   : > { %v12943_v9 = vpop.f32.mrf.mxu2  ;;  %v12945_v42 = vpop.f32.mrf.mxu3 }
 0x241   : > { %v1314_v8 = vpop.f32.mrf.mxu0  ;;  %v1343_v11 = vpop.f32.mrf.mxu1 }
 0x249   : > { %v12951_v38 = vpop.f32.mrf.mxu0  ;;  %v12953_v7 = vpop.f32.mrf.mxu1 }
 0x266   : > { %v12947_v57 = vpop.f32.mrf.mxu2  ;;  %v12949_v34 = vpop.f32.mrf.mxu3 }
 0x267   : > { %17037 = vst [vmem:[#allocation37_spill] sm:$0xff] %v12947_v57  ;;  %v715_v57 = vadd.f32 %v676_v51, %v525_v39  ;;  %v718_v39 = vadd.f32 %v708_v10, %v557_v27  ;;  %v1193_v51 = vadd.f32 %v1181_v3, %v1033_v36 }
 0x268   : > { %17038 = vst [vmem:[#allocation38_spill] sm:$0xff] %v12949_v34  ;;  %v716_v34 = vadd.f32 %v705_v23, %v554_v44  ;;  %v712_v23 = vadd.f32 %v12909_v33, %v548_v60  ;;  %v1693_v33 = vpop.permute.xlu1 %1692 }
 0x269   : > { %v875_v29 = vadd.f32 %v836_v28, %v715_v57  ;;  %v878_v53 = vadd.f32 %v12927_v58, %v718_v39  ;;  %v1352_v56 = vadd.f32 %v12941_v47, %v1193_v51 }
 0x26a   : > { %v876_v20 = vadd.f32 %v865_v31, %v716_v34  ;;  %v872_v25 = vadd.f32 %v12917_v6, %v712_v23  ;;  %v17040_v6 = vld [vmem:[#allocation32_spill] sm:$0xff] }
 0x26b   : > { %v1034_v2 = vadd.f32 %v995_v19, %v875_v29  ;;  %v1037_v24 = vadd.f32 %v12933_v15, %v878_v53 }
 0x26c   : > { %v1035_v43 = vadd.f32 %v1024_v37, %v876_v20 }
 0x26d   : > { %v1194_v57 = vadd.f32 %v1155_v0, %v1034_v2  ;;  %v871_v0 = vadd.f32 %v12919_v49, %v711_v55  ;;  %v1197_v31 = vadd.f32 %v12945_v42, %v1037_v24  ;;  %v17049_v24 = vld [vmem:[#allocation10_spill] sm:$0xff] }
 0x26e   : > { %v1471_v4 = vpop.f32.mrf.mxu2  ;;  %v1500_v14 = vpop.f32.mrf.mxu3  ;;  %v1195_v46 = vadd.f32 %v1184_v16, %v1035_v43  ;;  %v1036_v16 = vadd.f32 %v12935_v52, %v877_v63  ;;  %v17045_v39 = vld [vmem:[#allocation37_spill] sm:$0xff] }
 0x26f   : > { %v1511_v62 = vadd.f32 %v1471_v4, %v1351_v17  ;;  %v1353_v18 = vadd.f32 %v1314_v8, %v1194_v57  ;;  %v1512_v28 = vadd.f32 %v1500_v14, %v1352_v56  ;;  %v1030_v52 = vadd.f32 %v12923_v26, %v871_v0  ;;  %v1698_v14 = vpop.permute.xlu0 %1697  ;;  %v17042_v26 = vld [vmem:[#allocation34_spill] sm:$0xff]  ;;  %v17043_v17 = vld [vmem:[#allocation35_spill] sm:$0xff] }
 0x270   : > { %v1354_v21 = vadd.f32 %v1343_v11, %v1195_v46  ;;  %v1196_v3 = vadd.f32 %v12943_v9, %v1036_v16  ;;  %v1356_v47 = vadd.f32 %v12953_v7, %v1197_v31  ;;  %v17041_v9 = vld [vmem:[#allocation33_spill] sm:$0xff]  ;;  %v17046_v60 = vld [vmem:[#allocation38_spill] sm:$0xff]  ;;  %v1683_v63 = vpop.permute.xlu1 %1682 }
 0x271   : > { %v12959_v30 = vpop.f32.mrf.mxu0  ;;  %v12961_v5 = vpop.f32.mrf.mxu1  ;;  %v1190_v1 = vadd.f32 %v17041_v9, %v1030_v52 }
 0x272   : > { %17039 = vst [vmem:[#allocation39_spill] sm:$0xff] %v12961_v5  ;;  %v1355_v45 = vadd.f32 %v12951_v38, %v1196_v3 }
 0x273   : > { %v1349_v7 = vadd.f32 %v17043_v17, %v1190_v1 }
 0x275   : > { %v1509_v43 = vadd.f32 %v17045_v39, %v1349_v7 }
 0x276   : > { %v1474_v32 = vpop.f32.mrf.mxu2  ;;  %v1503_v34 = vpop.f32.mrf.mxu3 }
 0x277   : > { %v1513_v10 = vadd.f32 %v1474_v32, %v1353_v18  ;;  %v1514_v13 = vadd.f32 %v1503_v34, %v1354_v21  ;;  %v1668_v34 = vadd.f32 %v12959_v30, %v1509_v43 }
 0x279   : > { %v1630_v5 = vpop.f32.mrf.mxu0  ;;  %v1659_v44 = vpop.f32.mrf.mxu1  ;;  %v17047_v55 = vld [vmem:[#allocation39_spill] sm:$0xff] }
 0x27a   : > { %v1670_v41 = vadd.f32 %v1630_v5, %v1511_v62  ;;  %v1671_v59 = vadd.f32 %v1659_v44, %v1512_v28  ;;  %v1031_v5 = vadd.f32 %v17040_v6, %v872_v25 }
 0x27c   : > { %v1702_v4 = vadd.f32 %v1688_v50, %v1670_v41  ;;  %v1191_v38 = vadd.f32 %v17042_v26, %v1031_v5  ;;  %v1703_v62 = vadd.f32 %v1688_v50, %v1671_v59  ;;  %v1700_v50 = vadd.f32 %v1683_v63, %v1668_v34 }
 0x27e   : > { %v1710_v22 = vmax.f32 %v1702_v4, 0.0  ;;  %v1477_v58 = vpop.f32.mrf.mxu2  ;;  %v1506_v15 = vpop.f32.mrf.mxu3  ;;  %v1350_v44 = vadd.f32 %v17044_v40, %v1191_v38  ;;  %v1711_v46 = vmax.f32 %v1703_v62, 0.0  ;;  %v1708_v18 = vmax.f32 %v1700_v50, 0.0 }
 0x27f   : > { %v1515_v27 = vadd.f32 %v1477_v58, %v1355_v45  ;;  %v1516_v42 = vadd.f32 %v1506_v15, %v1356_v47  ;;  %v17051_v58 = vld [vmem:[#allocation22_spill] sm:$0xff] }
 0x280   : > { %1728 = vrot.lane.b32.xlu0 %v1710_v22, %s12245_s28  ;;  %v1510_v32 = vadd.f32 %v17046_v60, %v1350_v44  ;;  %v17052_v47 = vld [vmem:[#allocation6_spill] sm:$0xff]  ;;  %v17053_v44 = vld [vmem:[#allocation11_spill] sm:$0xff]  ;;  %v17054_v60 = vld [vmem:[#allocation8_spill] sm:$0xff] }
 0x281   : > { %v1633_v48 = vpop.f32.mrf.mxu0  ;;  %v1662_v12 = vpop.f32.mrf.mxu1 }
 0x282   : > { %v1672_v8 = vadd.f32 %v1633_v48, %v1513_v10  ;;  %v1673_v11 = vadd.f32 %v1662_v12, %v1514_v13  ;;  %v1669_v36 = vadd.f32 %v17047_v55, %v1510_v32  ;;  %v17048_v13 = vld [vmem:[#allocation20_spill] sm:$0xff] }
 0x284   : > { %v1704_v35 = vadd.f32 %v1693_v33, %v1672_v8  ;;  %v1705_v49 = vadd.f32 %v1693_v33, %v1673_v11  ;;  %v1701_v53 = vadd.f32 %v1683_v63, %v1669_v36  ;;  %v17050_v8 = vld [vmem:[#allocation9_spill] sm:$0xff] }
 0x286   : > { %v1713_v37 = vmax.f32 %v1705_v49, 0.0  ;;  %v1712_v19 = vmax.f32 %v1704_v35, 0.0  ;;  %v1709_v21 = vmax.f32 %v1701_v53, 0.0 }
 0x288   : > { %1734 = vrot.lane.b32.xlu2 %v1713_v37, %s12245_s28  ;;  %1732 = vrot.lane.b32.xlu1 %v1712_v19, %s12245_s28 }
 0x289   : > { %v1636_v20 = vpop.f32.mrf.mxu0  ;;  %v1665_v29 = vpop.f32.mrf.mxu1 }
 0x28a   : > { %v1674_v54 = vadd.f32 %v1636_v20, %v1515_v27  ;;  %v1675_v61 = vadd.f32 %v1665_v29, %v1516_v42 }
 0x28c   : > { %v1706_v2 = vadd.f32 %v1698_v14, %v1674_v54  ;;  %v1707_v41 = vadd.f32 %v1698_v14, %v1675_v61 }
 0x28e   : > { %v1714_v57 = vmax.f32 %v1706_v2, 0.0  ;;  %v1715_v4 = vmax.f32 %v1707_v41, 0.0 }
 0x290   : > { %1736 = vrot.lane.b32.xlu2 %v1714_v57, %s12245_s28  ;;  %1730 = vrot.lane.b32.xlu1 %v1711_v46, %s12245_s28 }
 0x291   : > { %1738 = vrot.lane.b32.xlu0 %v1715_v4, %s12245_s28  ;;  %v17055_v4 = vld [vmem:[#allocation7_spill] sm:$0xff] }
 0x298   : > { %1724 = vrot.lane.b32.xlu2 %v1708_v18, %s12245_s28 }
 0x299   : > { %1726 = vrot.lane.b32.xlu0 %v1709_v21, %s12245_s28 }
 0x2e2   : > { %v1735_v30 = vpop.permute.xlu2 %1734 }
 0x2e3   : > { %1764 = vst.msk [vmem:[#allocation2 + $0x40] sm:$0xff] %vm260_vm2, %v1735_v30 }
 0x2ea   : > { %v1737_v22 = vpop.permute.xlu2 %1736  ;;  %v13008_v16 = vld [vmem:[#allocation2 + $0x40] sm:$0xff] }
 0x2eb   : > { %1765 = vst.msk [vmem:[#allocation2 + $0x48] sm:$0xff] %vm277_vm1, %v1737_v22  ;;  %v1801_v11 = vmul.f32 %v13008_v16, %v17050_v8  ;;  %v2010_v53 = vmul.f32 %v13008_v16, %v17055_v4 }
 0x2f2   : > { %v1729_v23 = vpop.permute.xlu0 %1728  ;;  %v1725_v51 = vpop.permute.xlu2 %1724  ;;  %v13002_v10 = vld [vmem:[#allocation2 + $0x48] sm:$0xff] }
 0x2f3   : > { %1759 = vst.msk [vmem:[#allocation2 + $0x18] sm:$0xff] %vm277_vm1, %v1729_v23  ;;  %v1782_v0 = vmul.f32 %v13002_v10, %v17048_v13  ;;  %v1802_v59 = vmul.f32 %v13002_v10, %v17052_v47  ;;  %v2011_v32 = vmul.f32 %v13002_v10, %v17054_v60 }
 0x2f4   : > { %1756 = vst.msk [vmem:[#allocation2] sm:$0xff] %vm277_vm1, %v1725_v51 }
 0x2f5   : > { %1956 = vmatpush.msrb.mxu0 %v1782_v0  ;;  %v17056_v0 = vld [vmem:[#allocation15_spill] sm:$0xff] }
 0x2fa   : > { %v1733_v48 = vpop.permute.xlu1 %1732  ;;  %v13021_v31 = vld [vmem:[#allocation2 + $0x18] sm:$0xff] }
 0x2fb   : > { %v13011_v12 = vsel %vm260_vm2, %v1733_v48, %v1735_v30  ;;  %1762 = vst.msk [vmem:[#allocation2 + $0x30] sm:$0xff] %vm277_vm1, %v1733_v48  ;;  %v13030_v52 = vld [vmem:[#allocation2] sm:$0xff]  ;;  %v1778_v45 = vmul.f32 %v13021_v31, %v17048_v13  ;;  %v1796_v17 = vmul.f32 %v13021_v31, %v17052_v47  ;;  %v2005_v18 = vmul.f32 %v13021_v31, %v17054_v60 }
 0x2fc   : > { %v1800_v56 = vmul.f32 %v13011_v12, %v17049_v24  ;;  %v1776_v6 = vmul.f32 %v13030_v52, %v17048_v13  ;;  %v1781_v9 = vmul.f32 %v13011_v12, %v17051_v58  ;;  %v1793_v43 = vmul.f32 %v13030_v52, %v17052_v47 }
 0x2fd   : > { %v2009_v36 = vmul.f32 %v13011_v12, %v17053_v44 }
 0x2fe   : > { %v10760_v25 = vpack.i.bf16 %v1801_v11, %v1800_v56  ;;  %v2002_v56 = vmul.f32 %v13030_v52, %v17054_v60 }
 0x2ff   : > { %v10795_v30 = vpack.i.bf16 %v2010_v53, %v2009_v36 }
 0x300   : > { %10761 = vrot.lane.b32.xlu0 %v10760_v25, %s12252_s20  ;;  %v17057_v25 = vld [vmem:[#allocation16_spill] sm:$0xff] }
 0x302   : > { %v1731_v3 = vpop.permute.xlu1 %1730  ;;  %v13019_v33 = vld [vmem:[#allocation2 + $0x30] sm:$0xff] }
 0x303   : > { %1761 = vst.msk [vmem:[#allocation2 + $0x28] sm:$0xff] %vm260_vm2, %v1731_v3  ;;  %v1739_v28 = vpop.permute.xlu0 %1738  ;;  %v1780_v35 = vmul.f32 %v13019_v33, %v17048_v13  ;;  %v13041_v19 = vsel %vm260_vm2, %v1729_v23, %v1731_v3  ;;  %v1799_v38 = vmul.f32 %v13019_v33, %v17052_v47  ;;  %v2008_v50 = vmul.f32 %v13019_v33, %v17054_v60 }
 0x304   : > { %v13027_v49 = vsel %vm260_vm2, %v1737_v22, %v1739_v28  ;;  %1767 = vst.msk [vmem:[#allocation2 + $0x58] sm:$0xff] %vm260_vm2, %v1739_v28  ;;  %v1779_v1 = vmul.f32 %v13041_v19, %v17051_v58  ;;  %v1797_v14 = vmul.f32 %v13041_v19, %v17049_v24  ;;  %v2006_v63 = vmul.f32 %v13041_v19, %v17053_v44 }
 0x305   : > { %1957 = vmatpush.msrb.mxu0 %v1780_v35  ;;  %v1783_v15 = vmul.f32 %v13027_v49, %v17051_v58  ;;  %v1803_v37 = vmul.f32 %v13027_v49, %v17049_v24  ;;  %v2012_v39 = vmul.f32 %v13027_v49, %v17053_v44  ;;  %v2296_v3 = vmul.f32 %v13030_v52, %v17057_v25 }
 0x306   : > { %v10775_v54 = vpack.i.bf16 %v1797_v14, %v1796_v17  ;;  %v10805_v22 = vpack.i.bf16 %v2006_v63, %v2005_v18 }
 0x307   : > { %1958 = vmatpush.msrb.mxu0 %v1778_v45  ;;  %1985 = vmatpush.msrb.mxu1 %v1783_v15  ;;  %v10770_v5 = vpack.i.bf16 %v1803_v37, %v1802_v59  ;;  %v10800_v46 = vpack.i.bf16 %v2012_v39, %v2011_v32  ;;  %v17058_v59 = vld [vmem:[#allocation17_spill] sm:$0xff] }
 0x308   : > { %v2303_v37 = vmul.f32 %v13011_v12, %v17058_v59  ;;  %v2300_v17 = vmul.f32 %v13041_v19, %v17058_v59 }
 0x309   : > { %1959 = vmatpush.msrb.mxu0 %v1776_v6  ;;  %10771 = vrot.lane.b32.xlu1 %v10770_v5, %s12252_s20  ;;  %v2306_v6 = vmul.f32 %v13027_v49, %v17058_v59  ;;  %v2302_v5 = vmul.f32 %v13019_v33, %v17057_v25 }
 0x30a   : > { %1986 = vmatpush.msrb.mxu1 %v1781_v9  ;;  %v13066_v62 = vld [vmem:[#allocation2 + $0x28] sm:$0xff]  ;;  %v2304_v9 = vmul.f32 %v13008_v16, %v17056_v0 }
 0x30b   : > { %v1727_v27 = vpop.permute.xlu0 %1726  ;;  %v13050_v42 = vld [vmem:[#allocation2 + $0x58] sm:$0xff]  ;;  %v1798_v61 = vmul.f32 %v13066_v62, %v17050_v8  ;;  %v2007_v23 = vmul.f32 %v13066_v62, %v17055_v4  ;;  %v2301_v48 = vmul.f32 %v13066_v62, %v17056_v0 }
 0x30c   : > { %v13055_v26 = vsel %vm260_vm2, %v1725_v51, %v1727_v27  ;;  %1758 = vst.msk [vmem:[#allocation2 + $0x10] sm:$0xff] %vm260_vm2, %v1727_v27  ;;  %v1804_v20 = vmul.f32 %v13050_v42, %v17050_v8  ;;  %1987 = vmatpush.msrb.mxu1 %v1779_v1  ;;  %v2013_v55 = vmul.f32 %v13050_v42, %v17055_v4 }
 0x30d   : > { %v1777_v29 = vmul.f32 %v13055_v26, %v17051_v58  ;;  %v1794_v2 = vmul.f32 %v13055_v26, %v17049_v24  ;;  %v10780_v34 = vpack.i.bf16 %v1793_v43, %v1798_v61  ;;  %v2003_v11 = vmul.f32 %v13055_v26, %v17053_v44  ;;  %v17061_v61 = vld [vmem:[#allocation13_spill] sm:$0xff] }
 0x30e   : > { %v10765_v7 = vpack.i.bf16 %v1799_v38, %v1804_v20  ;;  %v10790_v21 = vpack.i.bf16 %v2008_v50, %v2013_v55  ;;  %v10810_v28 = vpack.i.bf16 %v2002_v56, %v2007_v23  ;;  %v10840_v45 = vpack.i.bf16 %v2296_v3, %v2301_v48  ;;  %v17059_v20 = vld [vmem:[#allocation12_spill] sm:$0xff] }
 0x30f   : > { %1988 = vmatpush.msrb.mxu1 %v1777_v29  ;;  %v2307_v15 = vmul.f32 %v13050_v42, %v17056_v0  ;;  %v2305_v1 = vmul.f32 %v13002_v10, %v17057_v25  ;;  %v10825_v14 = vpack.i.bf16 %v2304_v9, %v2303_v37  ;;  %v2160_v29 = vmul.f32 %v13050_v42, %v17059_v20  ;;  %v17062_v23 = vld [vmem:[#allocation24_spill] sm:$0xff]  ;;  %v17064_v37 = vld [vmem:[#allocation26_spill] sm:$0xff] }
 0x310   : > { %10766 = vrot.lane.b32.xlu2 %v10765_v7, %s12252_s20  ;;  %v17060_v7 = vld [vmem:[#allocation14_spill] sm:$0xff]  ;;  %v2155_v39 = vmul.f32 %v13019_v33, %v17061_v61  ;;  %v2299_v43 = vmul.f32 %v13021_v31, %v17057_v25  ;;  %v2157_v36 = vmul.f32 %v13008_v16, %v17059_v20  ;;  %v2297_v63 = vmul.f32 %v13055_v26, %v17058_v59 }
 0x311   : > { %10776 = vrot.lane.b32.xlu1 %v10775_v54, %s12252_s20  ;;  %v10820_v27 = vpack.i.bf16 %v2302_v5, %v2307_v15  ;;  %v10855_v38 = vpack.i.bf16 %v2306_v6, %v2305_v1  ;;  %v2159_v54 = vmul.f32 %v13027_v49, %v17060_v7  ;;  %v2153_v55 = vmul.f32 %v13041_v19, %v17060_v7 }
 0x312   : > { %v10835_v32 = vpack.i.bf16 %v2300_v17, %v2299_v43  ;;  %v2152_v50 = vmul.f32 %v13021_v31, %v17061_v61  ;;  %v2149_v48 = vmul.f32 %v13030_v52, %v17061_v61  ;;  %v2150_v56 = vmul.f32 %v13055_v26, %v17060_v7  ;;  %v17065_v17 = vld [vmem:[#allocation19_spill] sm:$0xff]  ;;  %v17066_v43 = vld [vmem:[#allocation21_spill] sm:$0xff] }
 0x313   : > { %v13072_v40 = vld [vmem:[#allocation2 + $0x10] sm:$0xff]  ;;  %v2601_v15 = vmul.f32 %v13050_v42, %v17062_v23  ;;  %v2597_v6 = vmul.f32 %v13011_v12, %v17064_v37  ;;  %v2600_v5 = vmul.f32 %v13027_v49, %v17064_v37  ;;  %v2598_v1 = vmul.f32 %v13008_v16, %v17062_v23 }
 0x314   : > { %v1795_v41 = vmul.f32 %v13072_v40, %v17050_v8  ;;  %v2004_v51 = vmul.f32 %v13072_v40, %v17055_v4 }
 0x316   : > { %v10785_v57 = vpack.i.bf16 %v1795_v41, %v1794_v2  ;;  %v10815_v35 = vpack.i.bf16 %v2004_v51, %v2003_v11  ;;  %v2158_v2 = vmul.f32 %v13002_v10, %v17061_v61  ;;  %v10830_v41 = vpack.i.bf16 %v2155_v39, %v2160_v29  ;;  %v17063_v11 = vld [vmem:[#allocation25_spill] sm:$0xff] }
 0x317   : > { %v2595_v51 = vmul.f32 %v13066_v62, %v17062_v23  ;;  %v2590_v3 = vmul.f32 %v13030_v52, %v17063_v11  ;;  %v2596_v9 = vmul.f32 %v13019_v33, %v17063_v11  ;;  %v2594_v39 = vmul.f32 %v13041_v19, %v17064_v37 }
 0x318   : > { %10781 = vrot.lane.b32.xlu2 %v10780_v34, %s12252_s20  ;;  %10786 = vrot.lane.b32.xlu0 %v10785_v57, %s12252_s20  ;;  %v10860_v34 = vpack.i.bf16 %v2159_v54, %v2158_v2  ;;  %v2156_v57 = vmul.f32 %v13011_v12, %v17060_v7  ;;  %v2454_v54 = vmul.f32 %v13050_v42, %v17065_v17 }
 0x319   : > { %10801 = vrot.lane.b32.xlu1 %v10800_v46, %s12251_s18  ;;  %v2298_v46 = vmul.f32 %v13072_v40, %v17056_v0  ;;  %v2453_v2 = vmul.f32 %v13027_v49, %v17066_v43 }
 0x31a   : > { %v10845_v53 = vpack.i.bf16 %v2157_v36, %v2156_v57 }
 0x31b   : > { %v10850_v18 = vpack.i.bf16 %v2298_v46, %v2297_v63  ;;  %v2450_v63 = vmul.f32 %v13011_v12, %v17066_v43 }
 0x320   : > { %10791 = vrot.lane.b32.xlu2 %v10790_v21, %s12251_s18  ;;  %10796 = vrot.lane.b32.xlu0 %v10795_v30, %s12251_s18  ;;  %v10865_v21 = vpack.i.bf16 %v2153_v55, %v2152_v50  ;;  %v2154_v30 = vmul.f32 %v13066_v62, %v17059_v20  ;;  %v2592_v50 = vmul.f32 %v13072_v40, %v17062_v23 }
 0x321   : > { %10806 = vrot.lane.b32.xlu1 %v10805_v22, %s12251_s18  ;;  %v2151_v22 = vmul.f32 %v13072_v40, %v17059_v20 }
 0x328   : > { %10811 = vrot.lane.b32.xlu2 %v10810_v28, %s12251_s18  ;;  %10816 = vrot.lane.b32.xlu0 %v10815_v35, %s12251_s18  ;;  %v10870_v28 = vpack.i.bf16 %v2149_v48, %v2154_v30  ;;  %v10875_v35 = vpack.i.bf16 %v2151_v22, %v2150_v56  ;;  %v2448_v56 = vmul.f32 %v13066_v62, %v17065_v17 }
 0x329   : > { %10841 = vrot.lane.b32.xlu1 %v10840_v45, %s12257_s7  ;;  %v10900_v45 = vpack.i.bf16 %v2590_v3, %v2595_v51  ;;  %v2445_v3 = vmul.f32 %v13072_v40, %v17065_v17 }
 0x330   : > { %10821 = vrot.lane.b32.xlu2 %v10820_v27, %s12257_s7  ;;  %10826 = vrot.lane.b32.xlu0 %v10825_v14, %s12257_s7  ;;  %v2599_v27 = vmul.f32 %v13002_v10, %v17063_v11  ;;  %v10880_v14 = vpack.i.bf16 %v2596_v9, %v2601_v15  ;;  %v2444_v15 = vmul.f32 %v13055_v26, %v17066_v43 }
 0x331   : > { %10856 = vrot.lane.b32.xlu1 %v10855_v38, %s12257_s7  ;;  %v10885_v38 = vpack.i.bf16 %v2598_v1, %v2597_v6  ;;  %v17069_v6 = vld [vmem:[#allocation27_spill] sm:$0xff] }
 0x332   : > { %v10915_v29 = vpack.i.bf16 %v2600_v5, %v2599_v27  ;;  %v2884_v5 = vmul.f32 %v13030_v52, %v17069_v6  ;;  %v10935_v1 = vpack.i.bf16 %v2445_v3, %v2444_v15 }
 0x338   : > { %10831 = vrot.lane.b32.xlu2 %v10830_v41, %s12254_s25  ;;  %10836 = vrot.lane.b32.xlu0 %v10835_v32, %s12257_s7  ;;  %v17067_v41 = vld [vmem:[#allocation18_spill] sm:$0xff] }
 0x339   : > { %10861 = vrot.lane.b32.xlu1 %v10860_v34, %s12254_s25  ;;  %v2449_v32 = vmul.f32 %v13019_v33, %v17067_v41  ;;  %v2593_v34 = vmul.f32 %v13021_v31, %v17063_v11  ;;  %v2452_v57 = vmul.f32 %v13002_v10, %v17067_v41  ;;  %v2446_v30 = vmul.f32 %v13021_v31, %v17067_v41 }
 0x33b   : > { %v10890_v46 = vpack.i.bf16 %v2449_v32, %v2454_v54  ;;  %v10895_v55 = vpack.i.bf16 %v2594_v39, %v2593_v34  ;;  %v10920_v36 = vpack.i.bf16 %v2453_v2, %v2452_v57  ;;  %v2890_v2 = vmul.f32 %v13019_v33, %v17069_v6 }
 0x33c   : > { %v2893_v34 = vmul.f32 %v13002_v10, %v17069_v6 }
 0x340   : > { %10846 = vrot.lane.b32.xlu2 %v10845_v53, %s12254_s25  ;;  %10851 = vrot.lane.b32.xlu0 %v10850_v18, %s12257_s7  ;;  %v2447_v53 = vmul.f32 %v13041_v19, %v17066_v43  ;;  %v2451_v18 = vmul.f32 %v13008_v16, %v17065_v17 }
 0x341   : > { %10866 = vrot.lane.b32.xlu1 %v10865_v21, %s12254_s25  ;;  %v2591_v21 = vmul.f32 %v13055_v26, %v17064_v37 }
 0x342   : > { %v10905_v22 = vpack.i.bf16 %v2451_v18, %v2450_v63  ;;  %v10925_v48 = vpack.i.bf16 %v2447_v53, %v2446_v30  ;;  %v17071_v63 = vld [vmem:[#allocation28_spill] sm:$0xff]  ;;  %v17072_v18 = vld [vmem:[#allocation29_spill] sm:$0xff]  ;;  %v1785_v30 = vld [vmem:[#allocation3 + $0x120] sm:$0xff] }
 0x343   : > { %v10910_v51 = vpack.i.bf16 %v2592_v50, %v2591_v21  ;;  %v2748_v50 = vmul.f32 %v13050_v42, %v17071_v63  ;;  %v2747_v21 = vmul.f32 %v13027_v49, %v17072_v18  ;;  %10022 = vmatmul.msk.f32.vlgmr.msrb.gmra.mxu1 %vm418_vm8, %v1785_v30  ;;  %10018 = vmatmul.msk.f32.vlgmr.msrb.gmra.mxu0 %vm418_vm8, %v1785_v30 }
 0x348   : > { %10871 = vrot.lane.b32.xlu2 %v10870_v28, %s12254_s25  ;;  %10876 = vrot.lane.b32.xlu0 %v10875_v35, %s12254_s25  ;;  %v17068_v28 = vld [vmem:[#allocation30_spill] sm:$0xff] }
 0x349   : > { %10901 = vrot.lane.b32.xlu1 %v10900_v45, %s12259_s11  ;;  %v2889_v35 = vmul.f32 %v13066_v62, %v17068_v28  ;;  %v2443_v45 = vmul.f32 %v13030_v52, %v17067_v41  ;;  %v2892_v32 = vmul.f32 %v13008_v16, %v17068_v28  ;;  %v2886_v15 = vmul.f32 %v13072_v40, %v17068_v28 }
 0x34b   : > { %v10930_v9 = vpack.i.bf16 %v2443_v45, %v2448_v56  ;;  %v10960_v27 = vpack.i.bf16 %v2884_v5, %v2889_v35 }
 0x350   : > { %10881 = vrot.lane.b32.xlu2 %v10880_v14, %s12259_s11  ;;  %10886 = vrot.lane.b32.xlu0 %v10885_v38, %s12259_s11  ;;  %v2895_v38 = vmul.f32 %v13050_v42, %v17068_v28 }
 0x351   : > { %10916 = vrot.lane.b32.xlu1 %v10915_v29, %s12259_s11  ;;  %v17070_v29 = vld [vmem:[#allocation31_spill] sm:$0xff] }
 0x352   : > { %v2891_v54 = vmul.f32 %v13011_v12, %v17070_v29  ;;  %v2894_v39 = vmul.f32 %v13027_v49, %v17070_v29  ;;  %v10940_v57 = vpack.i.bf16 %v2890_v2, %v2895_v38  ;;  %v2888_v53 = vmul.f32 %v13041_v19, %v17070_v29 }
 0x353   : > { %v2885_v5 = vmul.f32 %v13055_v26, %v17070_v29 }
 0x358   : > { %10891 = vrot.lane.b32.xlu2 %v10890_v46, %s12258_s10  ;;  %10896 = vrot.lane.b32.xlu0 %v10895_v55, %s12259_s11  ;;  %v10945_v46 = vpack.i.bf16 %v2892_v32, %v2891_v54  ;;  %v10975_v55 = vpack.i.bf16 %v2894_v39, %v2893_v34 }
 0x359   : > { %10921 = vrot.lane.b32.xlu1 %v10920_v36, %s12258_s10 }
 0x360   : > { %10906 = vrot.lane.b32.xlu2 %v10905_v22, %s12258_s10  ;;  %10911 = vrot.lane.b32.xlu0 %v10910_v51, %s12259_s11  ;;  %v17073_v22 = vld [vmem:[#allocation23_spill] sm:$0xff] }
 0x361   : > { %10926 = vrot.lane.b32.xlu1 %v10925_v48, %s12258_s10  ;;  %v2743_v51 = vmul.f32 %v13019_v33, %v17073_v22  ;;  %v2887_v48 = vmul.f32 %v13021_v31, %v17069_v6  ;;  %v2746_v42 = vmul.f32 %v13002_v10, %v17073_v22  ;;  %v2744_v33 = vmul.f32 %v13011_v12, %v17072_v18 }
 0x362   : > { %v2745_v10 = vmul.f32 %v13008_v16, %v17071_v63  ;;  %v2740_v16 = vmul.f32 %v13021_v31, %v17073_v22  ;;  %v2737_v30 = vmul.f32 %v13030_v52, %v17073_v22  ;;  %v10085_v52 = vld [vmem:[%s16805_s2 + $0x38] sm:$0xff] }
 0x363   : > { %v10950_v56 = vpack.i.bf16 %v2743_v51, %v2748_v50  ;;  %v10955_v3 = vpack.i.bf16 %v2888_v53, %v2887_v48  ;;  %v10980_v35 = vpack.i.bf16 %v2747_v21, %v2746_v42  ;;  %v2742_v53 = vmul.f32 %v13066_v62, %v17071_v63  ;;  %v1787_v48 = vld [vmem:[#allocation3 + $0x130] sm:$0xff] }
 0x364   : > { %v10965_v32 = vpack.i.bf16 %v2745_v10, %v2744_v33  ;;  %v2739_v21 = vmul.f32 %v13072_v40, %v17071_v63 }
 0x365   : > { %v10990_v62 = vpack.i.bf16 %v2737_v30, %v2742_v53 }
 0x368   : > { %10931 = vrot.lane.b32.xlu2 %v10930_v9, %s12258_s10  ;;  %10936 = vrot.lane.b32.xlu0 %v10935_v1, %s12258_s10  ;;  %v2741_v1 = vmul.f32 %v13041_v19, %v17072_v18 }
 0x369   : > { %10961 = vrot.lane.b32.xlu1 %v10960_v27, %s12261_s13  ;;  %v1786_v27 = vld [vmem:[#allocation3 + $0x128] sm:$0xff] }
 0x36a   : > { %v10767_v14 = vpop.permute.xlu2 %10766  ;;  %10023 = vmatmul.msk.f32.gmra.mxu1 %vm418_vm8, %v1786_v27  ;;  %10019 = vmatmul.msk.f32.gmra.mxu0 %vm418_vm8, %v1786_v27  ;;  %v1788_v27 = vld [vmem:[#allocation3 + $0x138] sm:$0xff] }
 0x36b   : > { %v10768_v38 = vunpack.i.l.bf16 %v10767_v14  ;;  %v10769_v34 = vunpack.i.h.bf16 %v10767_v14 }
 0x370   : > { %10941 = vrot.lane.b32.xlu2 %v10940_v57, %s12261_s13  ;;  %10946 = vrot.lane.b32.xlu0 %v10945_v46, %s12261_s13  ;;  %v10970_v57 = vpack.i.bf16 %v2886_v15, %v2885_v5 }
 0x371   : > { %10976 = vrot.lane.b32.xlu1 %v10975_v55, %s12261_s13  ;;  %v10985_v55 = vpack.i.bf16 %v2741_v1, %v2740_v16 }
 0x372   : > { %v13252_v36 = vpop.permute.xlu2 %10781  ;;  %v10762_v49 = vpop.permute.xlu0 %10761  ;;  %10024 = vmatmul.msk.f32.gmra.mxu1 %vm418_vm8, %v1787_v48  ;;  %10020 = vmatmul.msk.f32.gmra.mxu0 %vm418_vm8, %v1787_v48 }
 0x373   : > { %v10763_v12 = vunpack.i.l.bf16 %v10762_v49  ;;  %v10764_v2 = vunpack.i.h.bf16 %v10762_v49  ;;  %v10783_v42 = vunpack.i.l.bf16 %v13252_v36  ;;  %v10784_v10 = vunpack.i.h.bf16 %v13252_v36  ;;  %v10083_v36 = vld [vmem:[%s16805_s2 + $0x28] sm:$0xff] }
 0x375   : > { %v1850_v50 = vsel %vm401_vm6, %v10769_v34, %v10763_v12  ;;  %v1851_v31 = vsel %vm401_vm6, %v10763_v12, %v10764_v2  ;;  %v1806_v12 = vld [vmem:[#allocation3 + $0x140] sm:$0xff]  ;;  %v10084_v2 = vld [vmem:[%s16805_s2 + $0x30] sm:$0xff] }
 0x378   : > { %10951 = vrot.lane.b32.xlu2 %v10950_v56, %s12260_s12  ;;  %10956 = vrot.lane.b32.xlu0 %v10955_v3, %s12261_s13  ;;  %v2738_v56 = vmul.f32 %v13055_v26, %v17072_v18 }
 0x379   : > { %10981 = vrot.lane.b32.xlu1 %v10980_v35, %s12260_s12 }
 0x37a   : > { %v13273_v45 = vpop.permute.xlu2 %10791  ;;  %v10995_v49 = vpack.i.bf16 %v2739_v21, %v2738_v56  ;;  %10025 = vmatmul.msk.f32.gmra.mxu1 %vm418_vm8, %v1788_v27  ;;  %10021 = vmatmul.msk.f32.gmra.mxu0 %vm418_vm8, %v1788_v27 }
 0x37b   : > { %v10772_v9 = vpop.permute.xlu1 %10771 }
 0x37c   : > { %v10774_v54 = vunpack.i.h.bf16 %v10772_v9  ;;  %v10773_v39 = vunpack.i.l.bf16 %v10772_v9 }
 0x37e   : > { %v1852_v46 = vsel %vm401_vm6, %v10773_v39, %v10774_v54  ;;  %v1853_v19 = vsel %vm401_vm6, %v10774_v54, %v10768_v38  ;;  %v10793_v38 = vunpack.i.l.bf16 %v13273_v45 }
 0x37f   : > { %1886 = vmatpush.msrb.mxu2 %v1852_v46  ;;  %1915 = vmatpush.msrb.mxu3 %v1853_v19  ;;  %v10082_v46 = vld [vmem:[%s16805_s2 + $0x20] sm:$0xff] }
 0x380   : > { %10966 = vrot.lane.b32.xlu2 %v10965_v32, %s12260_s12  ;;  %10971 = vrot.lane.b32.xlu0 %v10970_v57, %s12261_s13 }
 0x381   : > { %10986 = vrot.lane.b32.xlu1 %v10985_v55, %s12260_s12  ;;  %1887 = vmatpush.msrb.mxu2 %v1850_v50  ;;  %v10794_v50 = vunpack.i.h.bf16 %v13273_v45 }
 0x382   : > { %v13294_v14 = vpop.permute.xlu2 %10811  ;;  %1916 = vmatpush.msrb.mxu3 %v1851_v31 }
 0x383   : > { %v10777_v51 = vpop.permute.xlu1 %10776  ;;  %v10813_v30 = vunpack.i.l.bf16 %v13294_v14 }
 0x384   : > { %v10779_v3 = vunpack.i.h.bf16 %v10777_v51  ;;  %v10778_v35 = vunpack.i.l.bf16 %v10777_v51  ;;  %v1807_v51 = vld [vmem:[#allocation3 + $0x148] sm:$0xff] }
 0x386   : > { %v1848_v40 = vsel %vm401_vm6, %v10778_v35, %v10779_v3  ;;  %v1849_v33 = vsel %vm401_vm6, %v10779_v3, %v10783_v42 }
 0x387   : > { %1888 = vmatpush.msrb.mxu2 %v1848_v40  ;;  %1917 = vmatpush.msrb.mxu3 %v1849_v33  ;;  %v10814_v40 = vunpack.i.h.bf16 %v13294_v14 }
 0x388   : > { %10991 = vrot.lane.b32.xlu2 %v10990_v62, %s12260_s12  ;;  %10996 = vrot.lane.b32.xlu0 %v10995_v49, %s12260_s12 }
 0x389   : > { %3053 = vperm.xlu1 %10758, %v10085_v52  }
 0x38a   : > { %v13314_v26 = vpop.permute.xlu2 %10821  ;;  %v10787_v15 = vpop.permute.xlu0 %10786 }
 0x38b   : > { %v10789_v5 = vunpack.i.h.bf16 %v10787_v15  ;;  %v10788_v9 = vunpack.i.l.bf16 %v10787_v15  ;;  %v10802_v1 = vpop.permute.xlu1 %10801  ;;  %v10823_v14 = vunpack.i.l.bf16 %v13314_v26 }
 0x38c   : > { %v10804_v54 = vunpack.i.h.bf16 %v10802_v1  ;;  %v10803_v39 = vunpack.i.l.bf16 %v10802_v1 }
 0x38d   : > { %v1846_v32 = vsel %vm401_vm6, %v10784_v10, %v10788_v9  ;;  %v1847_v16 = vsel %vm401_vm6, %v10788_v9, %v10789_v5  ;;  %v1808_v10 = vld [vmem:[#allocation3 + $0x150] sm:$0xff] }
 0x38e   : > { %1889 = vmatpush.msrb.mxu2 %v1846_v32  ;;  %1918 = vmatpush.msrb.mxu3 %v1847_v16  ;;  %v2061_v34 = vsel %vm624_vm9, %v10803_v39, %v10804_v54  ;;  %v2062_v57 = vsel %vm624_vm9, %v10804_v54, %v10793_v38 }
 0x38f   : > { %10010 = vmatmul.msk.f32.vlgmr.msrb.gmra.mxu2 %vm418_vm8, %v1806_v12  ;;  %10014 = vmatmul.msk.f32.vlgmr.msrb.gmra.mxu3 %vm418_vm8, %v1806_v12  ;;  %v1809_v12 = vld [vmem:[#allocation3 + $0x158] sm:$0xff] }
 0x390   : > { %3048 = vperm.xlu2 %10759, %v10084_v2   ;;  %3043 = vperm.xlu0 %10757, %v10083_v36  }
 0x391   : > { %2095 = vmatpush.msra.mxu2 %v2061_v34  ;;  %2124 = vmatpush.msra.mxu3 %v2062_v57  ;;  %v10824_v34 = vunpack.i.h.bf16 %v13314_v26 }
 0x392   : > { %v13335_v19 = vpop.permute.xlu2 %10831  ;;  %v10797_v55 = vpop.permute.xlu0 %10796  ;;  %3038 = vperm.xlu1 %10758, %v10082_v46  }
 0x393   : > { %v10799_v31 = vunpack.i.h.bf16 %v10797_v55  ;;  %v10798_v53 = vunpack.i.l.bf16 %v10797_v55  ;;  %v10807_v21 = vpop.permute.xlu1 %10806 }
 0x394   : > { %v10809_v48 = vunpack.i.h.bf16 %v10807_v21  ;;  %v10808_v42 = vunpack.i.l.bf16 %v10807_v21 }
 0x395   : > { %v2059_v56 = vsel %vm624_vm9, %v10794_v50, %v10798_v53  ;;  %v2060_v3 = vsel %vm624_vm9, %v10798_v53, %v10799_v31 }
 0x396   : > { %2096 = vmatpush.msra.mxu2 %v2059_v56  ;;  %2125 = vmatpush.msra.mxu3 %v2060_v3  ;;  %v2057_v35 = vsel %vm624_vm9, %v10808_v42, %v10809_v48  ;;  %v2058_v62 = vsel %vm624_vm9, %v10809_v48, %v10813_v30  ;;  %v10833_v30 = vunpack.i.l.bf16 %v13335_v19 }
 0x397   : > { %10011 = vmatmul.msk.f32.gmra.mxu2 %vm418_vm8, %v1807_v51  ;;  %10015 = vmatmul.msk.f32.gmra.mxu3 %vm418_vm8, %v1807_v51  ;;  %v2015_v51 = vld [vmem:[#allocation3 + $0x160] sm:$0xff] }
 0x398   : > { %2097 = vmatpush.msra.mxu2 %v2057_v35  ;;  %2126 = vmatpush.msra.mxu3 %v2058_v62 }
 0x39a   : > { %v10847_v45 = vpop.permute.xlu2 %10846  ;;  %v10817_v49 = vpop.permute.xlu0 %10816 }
 0x39b   : > { %v10819_v33 = vunpack.i.h.bf16 %v10817_v49  ;;  %v10818_v52 = vunpack.i.l.bf16 %v10817_v49  ;;  %v13346_v15 = vpop.permute.xlu1 %10841  ;;  %v10849_v56 = vunpack.i.h.bf16 %v10847_v45  ;;  %v10848_v3 = vunpack.i.l.bf16 %v10847_v45 }
 0x39c   : > { %v10843_v50 = vunpack.i.l.bf16 %v13346_v15 }
 0x39d   : > { %v2055_v5 = vsel %vm624_vm9, %v10814_v40, %v10818_v52  ;;  %v2056_v9 = vsel %vm624_vm9, %v10818_v52, %v10819_v33  ;;  %v10834_v33 = vunpack.i.h.bf16 %v13335_v19  ;;  %v2207_v52 = vsel %vm784_vm10, %v10848_v3, %v10849_v56 }
 0x39e   : > { %2098 = vmatpush.msra.mxu2 %v2055_v5  ;;  %2127 = vmatpush.msra.mxu3 %v2056_v9  ;;  %v10844_v5 = vunpack.i.h.bf16 %v13346_v15 }
 0x39f   : > { %10012 = vmatmul.msk.f32.gmra.mxu2 %vm418_vm8, %v1808_v10  ;;  %10016 = vmatmul.msk.f32.gmra.mxu3 %vm418_vm8, %v1808_v10  ;;  %v2206_v45 = vsel %vm784_vm10, %v10834_v33, %v10848_v3 }
 0x3a2   : > { %v13352_v1 = vpop.permute.xlu2 %10871  ;;  %v10827_v27 = vpop.permute.xlu0 %10826 }
 0x3a3   : > { %v10857_v38 = vpop.permute.xlu1 %10856  ;;  %v10829_v2 = vunpack.i.h.bf16 %v10827_v27  ;;  %v10828_v36 = vunpack.i.l.bf16 %v10827_v27  ;;  %v10873_v19 = vunpack.i.l.bf16 %v13352_v1 }
 0x3a4   : > { %v10859_v54 = vunpack.i.h.bf16 %v10857_v38  ;;  %v10858_v39 = vunpack.i.l.bf16 %v10857_v38 }
 0x3a5   : > { %v2353_v57 = vsel %vm943_vm11, %v10824_v34, %v10828_v36  ;;  %v2354_v46 = vsel %vm943_vm11, %v10828_v36, %v10829_v2  ;;  %v10874_v34 = vunpack.i.h.bf16 %v13352_v1 }
 0x3a6   : > { %v2355_v32 = vsel %vm943_vm11, %v10858_v39, %v10859_v54  ;;  %v2356_v16 = vsel %vm943_vm11, %v10859_v54, %v10823_v14  ;;  %v2016_v14 = vld [vmem:[#allocation3 + $0x168] sm:$0xff] }
 0x3a7   : > { %10013 = vmatmul.msk.f32.gmra.mxu2 %vm418_vm8, %v1809_v12  ;;  %10017 = vmatmul.msk.f32.gmra.mxu3 %vm418_vm8, %v1809_v12 }
 0x3a8   : > { %2389 = vmatpush.msrb.mxu2 %v2355_v32  ;;  %2418 = vmatpush.msrb.mxu3 %v2356_v16 }
 0x3aa   : > { %v10837_v55 = vpop.permute.xlu0 %10836  ;;  %2390 = vmatpush.msrb.mxu2 %v2353_v57  ;;  %2419 = vmatpush.msrb.mxu3 %v2354_v46  ;;  %v13363_v31 = vpop.permute.xlu2 %10881 }
 0x3ab   : > { %v10839_v53 = vunpack.i.h.bf16 %v10837_v55  ;;  %v10838_v21 = vunpack.i.l.bf16 %v10837_v55  ;;  %v10862_v26 = vpop.permute.xlu1 %10861 }
 0x3ac   : > { %v10864_v48 = vunpack.i.h.bf16 %v10862_v26  ;;  %v10863_v42 = vunpack.i.l.bf16 %v10862_v26  ;;  %v2162_v26 = vld [vmem:[#allocation3 + $0x180] sm:$0xff] }
 0x3ad   : > { %v2351_v35 = vsel %vm943_vm11, %v10838_v21, %v10839_v53  ;;  %v2352_v62 = vsel %vm943_vm11, %v10839_v53, %v10843_v50  ;;  %v2017_v50 = vld [vmem:[#allocation3 + $0x170] sm:$0xff] }
 0x3ae   : > { %2391 = vmatpush.msrb.mxu2 %v2351_v35  ;;  %2420 = vmatpush.msrb.mxu3 %v2352_v62  ;;  %v2208_v49 = vsel %vm784_vm10, %v10863_v42, %v10864_v48  ;;  %v2209_v40 = vsel %vm784_vm10, %v10864_v48, %v10833_v30  ;;  %v10883_v48 = vunpack.i.l.bf16 %v13363_v31  ;;  %v2018_v42 = vld [vmem:[#allocation3 + $0x178] sm:$0xff]  ;;  %v2163_v35 = vld [vmem:[#allocation3 + $0x188] sm:$0xff] }
 0x3af   : > { %10026 = vmatmul.msk.f32.vlgmr.msra.gmra.mxu2 %vm418_vm8, %v2015_v51  ;;  %10030 = vmatmul.msk.f32.vlgmr.msra.gmra.mxu3 %vm418_vm8, %v2015_v51 }
 0x3b0   : > { %2242 = vmatpush.msra.mxu0 %v2208_v49  ;;  %2271 = vmatpush.msra.mxu1 %v2209_v40 }
 0x3b2   : > { %v10852_v10 = vpop.permute.xlu0 %10851  ;;  %2243 = vmatpush.msra.mxu0 %v2206_v45  ;;  %2272 = vmatpush.msra.mxu1 %v2207_v52  ;;  %v13377_v39 = vpop.permute.xlu2 %10891  ;;  %v10884_v45 = vunpack.i.h.bf16 %v13363_v31 }
 0x3b3   : > { %v10854_v9 = vunpack.i.h.bf16 %v10852_v10  ;;  %v10853_v27 = vunpack.i.l.bf16 %v10852_v10  ;;  %v10867_v38 = vpop.permute.xlu1 %10866 }
 0x3b4   : > { %v10869_v12 = vunpack.i.h.bf16 %v10867_v38  ;;  %v10868_v54 = vunpack.i.l.bf16 %v10867_v38 }
 0x3b5   : > { %v2349_v2 = vsel %vm943_vm11, %v10844_v5, %v10853_v27  ;;  %v2350_v36 = vsel %vm943_vm11, %v10853_v27, %v10854_v9 }
 0x3b6   : > { %2392 = vmatpush.msrb.mxu2 %v2349_v2  ;;  %2421 = vmatpush.msrb.mxu3 %v2350_v36  ;;  %v2204_v32 = vsel %vm784_vm10, %v10868_v54, %v10869_v12  ;;  %v2205_v15 = vsel %vm784_vm10, %v10869_v12, %v10873_v19  ;;  %v2309_v12 = vld [vmem:[#allocation3 + $0x1a0] sm:$0xff]  ;;  %v2164_v36 = vld [vmem:[#allocation3 + $0x190] sm:$0xff] }
 0x3b7   : > { %10027 = vmatmul.msk.f32.gmra.mxu2 %vm418_vm8, %v2016_v14  ;;  %10031 = vmatmul.msk.f32.gmra.mxu3 %vm418_vm8, %v2016_v14  ;;  %v10893_v14 = vunpack.i.l.bf16 %v13377_v39 }
 0x3b8   : > { %2244 = vmatpush.msra.mxu0 %v2204_v32  ;;  %2273 = vmatpush.msra.mxu1 %v2205_v15 }
 0x3ba   : > { %v10877_v16 = vpop.permute.xlu0 %10876  ;;  %v10907_v30 = vpop.permute.xlu2 %10906 }
 0x3bb   : > { %v10879_v57 = vunpack.i.h.bf16 %v10877_v16  ;;  %v10878_v46 = vunpack.i.l.bf16 %v10877_v16  ;;  %v13386_v55 = vpop.permute.xlu1 %10901  ;;  %v10909_v16 = vunpack.i.h.bf16 %v10907_v30 }
 0x3bc   : > { %v10903_v27 = vunpack.i.l.bf16 %v13386_v55 }
 0x3bd   : > { %v2202_v53 = vsel %vm784_vm10, %v10874_v34, %v10878_v46  ;;  %v2203_v21 = vsel %vm784_vm10, %v10878_v46, %v10879_v57  ;;  %v10908_v34 = vunpack.i.l.bf16 %v10907_v30  ;;  %v10904_v30 = vunpack.i.h.bf16 %v13386_v55 }
 0x3be   : > { %2245 = vmatpush.msra.mxu0 %v2202_v53  ;;  %2274 = vmatpush.msra.mxu1 %v2203_v21 }
 0x3bf   : > { %10028 = vmatmul.msk.f32.gmra.mxu2 %vm418_vm8, %v2017_v50  ;;  %10032 = vmatmul.msk.f32.gmra.mxu3 %vm418_vm8, %v2017_v50  ;;  %v10894_v50 = vunpack.i.h.bf16 %v13377_v39 }
 0x3c0   : > { %10034 = vmatmul.msk.f32.vlgmr.msra.gmra.mxu0 %vm418_vm8, %v2162_v26  ;;  %10038 = vmatmul.msk.f32.vlgmr.msra.gmra.mxu1 %vm418_vm8, %v2162_v26  ;;  %v2501_v26 = vsel %vm1103_vm13, %v10908_v34, %v10909_v16  ;;  %v2457_v16 = vld [vmem:[#allocation3 + $0x1c8] sm:$0xff] }
 0x3c1   : > { %v2500_v21 = vsel %vm1103_vm13, %v10894_v50, %v10908_v34 }
 0x3c2   : > { %v10887_v1 = vpop.permute.xlu0 %10886  ;;  %v13402_v52 = vpop.permute.xlu2 %10931 }
 0x3c3   : > { %v10917_v51 = vpop.permute.xlu1 %10916  ;;  %v10889_v62 = vunpack.i.h.bf16 %v10887_v1  ;;  %v10888_v49 = vunpack.i.l.bf16 %v10887_v1  ;;  %v10933_v39 = vunpack.i.l.bf16 %v13402_v52 }
 0x3c4   : > { %v10919_v56 = vunpack.i.h.bf16 %v10917_v51  ;;  %v10918_v3 = vunpack.i.l.bf16 %v10917_v51 }
 0x3c5   : > { %v2647_v5 = vsel %vm1262_vm14, %v10884_v45, %v10888_v49  ;;  %v2648_v9 = vsel %vm1262_vm14, %v10888_v49, %v10889_v62 }
 0x3c6   : > { %v2649_v40 = vsel %vm1262_vm14, %v10918_v3, %v10919_v56  ;;  %v2650_v33 = vsel %vm1262_vm14, %v10919_v56, %v10883_v48  ;;  %v2310_v56 = vld [vmem:[#allocation3 + $0x1a8] sm:$0xff] }
 0x3c7   : > { %10029 = vmatmul.msk.f32.gmra.mxu2 %vm418_vm8, %v2018_v42  ;;  %10033 = vmatmul.msk.f32.gmra.mxu3 %vm418_vm8, %v2018_v42 }
 0x3c8   : > { %10035 = vmatmul.msk.f32.gmra.mxu0 %vm418_vm8, %v2163_v35  ;;  %10039 = vmatmul.msk.f32.gmra.mxu1 %vm418_vm8, %v2163_v35 }
 0x3c9   : > { %2683 = vmatpush.msra.mxu2 %v2649_v40  ;;  %2712 = vmatpush.msra.mxu3 %v2650_v33  ;;  %v2165_v40 = vld [vmem:[#allocation3 + $0x198] sm:$0xff] }
 0x3ca   : > { %v10897_v10 = vpop.permute.xlu0 %10896  ;;  %v10942_v1 = vpop.permute.xlu2 %10941 }
 0x3cb   : > { %v10899_v38 = vunpack.i.h.bf16 %v10897_v10  ;;  %v10898_v19 = vunpack.i.l.bf16 %v10897_v10  ;;  %2684 = vmatpush.msra.mxu2 %v2647_v5  ;;  %2713 = vmatpush.msra.mxu3 %v2648_v9  ;;  %v10922_v31 = vpop.permute.xlu1 %10921  ;;  %v10934_v10 = vunpack.i.h.bf16 %v13402_v52 }
 0x3cc   : > { %v10924_v54 = vunpack.i.h.bf16 %v10922_v31  ;;  %v10923_v2 = vunpack.i.l.bf16 %v10922_v31 }
 0x3cd   : > { %v2645_v32 = vsel %vm1262_vm14, %v10898_v19, %v10899_v38  ;;  %v2646_v15 = vsel %vm1262_vm14, %v10899_v38, %v10903_v27  ;;  %v2311_v38 = vld [vmem:[#allocation3 + $0x1b0] sm:$0xff] }
 0x3ce   : > { %2685 = vmatpush.msra.mxu2 %v2645_v32  ;;  %2714 = vmatpush.msra.mxu3 %v2646_v15  ;;  %v2502_v57 = vsel %vm1103_vm13, %v10923_v2, %v10924_v54  ;;  %v2503_v46 = vsel %vm1103_vm13, %v10924_v54, %v10893_v14  ;;  %v10943_v2 = vunpack.i.l.bf16 %v10942_v1 }
 0x3cf   : > { %10042 = vmatmul.msk.f32.vlgmr.msrb.gmra.mxu2 %vm418_vm8, %v2309_v12  ;;  %10046 = vmatmul.msk.f32.vlgmr.msrb.gmra.mxu3 %vm418_vm8, %v2309_v12  ;;  %v2456_v12 = vld [vmem:[#allocation3 + $0x1c0] sm:$0xff] }
 0x3d0   : > { %10036 = vmatmul.msk.f32.gmra.mxu0 %vm418_vm8, %v2164_v36  ;;  %10040 = vmatmul.msk.f32.gmra.mxu1 %vm418_vm8, %v2164_v36  ;;  %v2312_v36 = vld [vmem:[#allocation3 + $0x1b8] sm:$0xff] }
 0x3d1   : > { %2536 = vmatpush.msrb.mxu0 %v2502_v57  ;;  %2565 = vmatpush.msrb.mxu1 %v2503_v46 }
 0x3d2   : > { %v10912_v53 = vpop.permute.xlu0 %10911  ;;  %v10952_v19 = vpop.permute.xlu2 %10951 }
 0x3d3   : > { %v10914_v51 = vunpack.i.h.bf16 %v10912_v53  ;;  %v10913_v48 = vunpack.i.l.bf16 %v10912_v53  ;;  %2537 = vmatpush.msrb.mxu0 %v2500_v21  ;;  %2566 = vmatpush.msrb.mxu1 %v2501_v26  ;;  %v10927_v42 = vpop.permute.xlu1 %10926  ;;  %v10944_v21 = vunpack.i.h.bf16 %v10942_v1  ;;  %v2603_v1 = vld [vmem:[#allocation3 + $0x1e0] sm:$0xff] }
 0x3d4   : > { %v10929_v3 = vunpack.i.h.bf16 %v10927_v42  ;;  %v10928_v35 = vunpack.i.l.bf16 %v10927_v42 }
 0x3d5   : > { %v2643_v62 = vsel %vm1262_vm14, %v10904_v30, %v10913_v48  ;;  %v2644_v49 = vsel %vm1262_vm14, %v10913_v48, %v10914_v51 }
 0x3d6   : > { %2686 = vmatpush.msra.mxu2 %v2643_v62  ;;  %2715 = vmatpush.msra.mxu3 %v2644_v49  ;;  %v2498_v55 = vsel %vm1103_vm13, %v10928_v35, %v10929_v3  ;;  %v2499_v33 = vsel %vm1103_vm13, %v10929_v3, %v10933_v39  ;;  %v10953_v3 = vunpack.i.l.bf16 %v10952_v19  ;;  %v2458_v49 = vld [vmem:[#allocation3 + $0x1d0] sm:$0xff] }
 0x3d7   : > { %10043 = vmatmul.msk.f32.gmra.mxu2 %vm418_vm8, %v2310_v56  ;;  %10047 = vmatmul.msk.f32.gmra.mxu3 %vm418_vm8, %v2310_v56 }
 0x3d8   : > { %10037 = vmatmul.msk.f32.gmra.mxu0 %vm418_vm8, %v2165_v40  ;;  %10041 = vmatmul.msk.f32.gmra.mxu1 %vm418_vm8, %v2165_v40 }
 0x3d9   : > { %2538 = vmatpush.msrb.mxu0 %v2498_v55  ;;  %2567 = vmatpush.msrb.mxu1 %v2499_v33 }
 0x3da   : > { %v10937_v45 = vpop.permute.xlu0 %10936  ;;  %v10967_v53 = vpop.permute.xlu2 %10966 }
 0x3db   : > { %v10939_v5 = vunpack.i.h.bf16 %v10937_v45  ;;  %v10938_v9 = vunpack.i.l.bf16 %v10937_v45  ;;  %v13430_v27 = vpop.permute.xlu1 %10961  ;;  %v10969_v33 = vunpack.i.h.bf16 %v10967_v53  ;;  %v10968_v45 = vunpack.i.l.bf16 %v10967_v53 }
 0x3dc   : > { %v10963_v48 = vunpack.i.l.bf16 %v13430_v27 }
 0x3dd   : > { %v2496_v31 = vsel %vm1103_vm13, %v10934_v10, %v10938_v9  ;;  %v2497_v14 = vsel %vm1103_vm13, %v10938_v9, %v10939_v5  ;;  %v10954_v9 = vunpack.i.h.bf16 %v10952_v19 }
 0x3de   : > { %2539 = vmatpush.msrb.mxu0 %v2496_v31  ;;  %2568 = vmatpush.msrb.mxu1 %v2497_v14 }
 0x3df   : > { %10044 = vmatmul.msk.f32.gmra.mxu2 %vm418_vm8, %v2311_v38  ;;  %10048 = vmatmul.msk.f32.gmra.mxu3 %vm418_vm8, %v2311_v38  ;;  %v2794_v14 = vsel %vm1422_vm15, %v10954_v9, %v10968_v45  ;;  %v2899_v9 = vld [vmem:[#allocation3 + $0x230] sm:$0xff] }
 0x3e0   : > { %10050 = vmatmul.msk.f32.vlgmr.msrb.gmra.mxu0 %vm418_vm8, %v2456_v12  ;;  %10054 = vmatmul.msk.f32.vlgmr.msrb.gmra.mxu1 %vm418_vm8, %v2456_v12  ;;  %v2795_v12 = vsel %vm1422_vm15, %v10968_v45, %v10969_v33  ;;  %v13484_v33 = vpop.f32.mrf.mxu1  ;;  %v13488_v45 = vpop.f32.mrf.mxu0 }
 0x3e2   : > { %v10947_v52 = vpop.permute.xlu0 %10946  ;;  %v10992_v38 = vpop.permute.xlu2 %10991 }
 0x3e3   : > { %v10977_v54 = vpop.permute.xlu1 %10976  ;;  %v10949_v34 = vunpack.i.h.bf16 %v10947_v52  ;;  %v10948_v57 = vunpack.i.l.bf16 %v10947_v52  ;;  %v10964_v52 = vunpack.i.h.bf16 %v13430_v27  ;;  %v10993_v19 = vunpack.i.l.bf16 %v10992_v38 }
 0x3e4   : > { %v10979_v32 = vunpack.i.h.bf16 %v10977_v54  ;;  %v10978_v15 = vunpack.i.l.bf16 %v10977_v54 }
 0x3e5   : > { %v2941_v30 = vsel %vm1581_vm0, %v10944_v21, %v10948_v57  ;;  %v2942_v51 = vsel %vm1581_vm0, %v10948_v57, %v10949_v34  ;;  %v10994_v21 = vunpack.i.h.bf16 %v10992_v38 }
 0x3e6   : > { %v2943_v46 = vsel %vm1581_vm0, %v10978_v15, %v10979_v32  ;;  %v2944_v50 = vsel %vm1581_vm0, %v10979_v32, %v10943_v2  ;;  %v2604_v32 = vld [vmem:[#allocation3 + $0x1e8] sm:$0xff] }
 0x3e7   : > { %10045 = vmatmul.msk.f32.gmra.mxu2 %vm418_vm8, %v2312_v36  ;;  %10049 = vmatmul.msk.f32.gmra.mxu3 %vm418_vm8, %v2312_v36 }
 0x3e8   : > { %10051 = vmatmul.msk.f32.gmra.mxu0 %vm418_vm8, %v2457_v16  ;;  %10055 = vmatmul.msk.f32.gmra.mxu1 %vm418_vm8, %v2457_v16  ;;  %v13496_v38 = vpop.f32.mrf.mxu1 }
 0x3e9   : > { %2977 = vmatpush.msrb.mxu2 %v2943_v46  ;;  %3006 = vmatpush.msrb.mxu3 %v2944_v50  ;;  %v2459_v46 = vld [vmem:[#allocation3 + $0x1d8] sm:$0xff] }
 0x3ea   : > { %v10957_v26 = vpop.permute.xlu0 %10956 }
 0x3eb   : > { %v10959_v42 = vunpack.i.h.bf16 %v10957_v26  ;;  %v10958_v39 = vunpack.i.l.bf16 %v10957_v26  ;;  %2978 = vmatpush.msrb.mxu2 %v2941_v30  ;;  %3007 = vmatpush.msrb.mxu3 %v2942_v51  ;;  %v10982_v56 = vpop.permute.xlu1 %10981  ;;  %v2605_v51 = vld [vmem:[#allocation3 + $0x1f0] sm:$0xff] }
 0x3ec   : > { %v10984_v35 = vunpack.i.h.bf16 %v10982_v56  ;;  %v10983_v62 = vunpack.i.l.bf16 %v10982_v56  ;;  %v2606_v56 = vld [vmem:[#allocation3 + $0x1f8] sm:$0xff] }
 0x3ed   : > { %v2939_v40 = vsel %vm1581_vm0, %v10958_v39, %v10959_v42  ;;  %v2940_v55 = vsel %vm1581_vm0, %v10959_v42, %v10963_v48  ;;  %v2750_v39 = vld [vmem:[#allocation3 + $0x200] sm:$0xff] }
 0x3ee   : > { %2979 = vmatpush.msrb.mxu2 %v2939_v40  ;;  %3008 = vmatpush.msrb.mxu3 %v2940_v55  ;;  %v2796_v10 = vsel %vm1422_vm15, %v10983_v62, %v10984_v35  ;;  %v2797_v5 = vsel %vm1422_vm15, %v10984_v35, %v10953_v3  ;;  %v2751_v3 = vld [vmem:[#allocation3 + $0x208] sm:$0xff]  ;;  %v2752_v35 = vld [vmem:[#allocation3 + $0x210] sm:$0xff]  ;;  %v2753_v55 = vld [vmem:[#allocation3 + $0x218] sm:$0xff] }
 0x3ef   : > { %10058 = vmatmul.msk.f32.vlgmr.msra.gmra.mxu2 %vm418_vm8, %v2603_v1  ;;  %10062 = vmatmul.msk.f32.vlgmr.msra.gmra.mxu3 %vm418_vm8, %v2603_v1  ;;  %v2897_v1 = vld [vmem:[#allocation3 + $0x220] sm:$0xff]  ;;  %v2898_v40 = vld [vmem:[#allocation3 + $0x228] sm:$0xff] }
 0x3f0   : > { %10052 = vmatmul.msk.f32.gmra.mxu0 %vm418_vm8, %v2458_v49  ;;  %10056 = vmatmul.msk.f32.gmra.mxu1 %vm418_vm8, %v2458_v49 }
 0x3f1   : > { %2830 = vmatpush.msra.mxu0 %v2796_v10  ;;  %2859 = vmatpush.msra.mxu1 %v2797_v5 }
 0x3f2   : > { %v10972_v31 = vpop.permute.xlu0 %10971 }
 0x3f3   : > { %v10974_v54 = vunpack.i.h.bf16 %v10972_v31  ;;  %v10973_v2 = vunpack.i.l.bf16 %v10972_v31  ;;  %2831 = vmatpush.msra.mxu0 %v2794_v14  ;;  %2860 = vmatpush.msra.mxu1 %v2795_v12  ;;  %v10987_v36 = vpop.permute.xlu1 %10986  ;;  %v1964_v31 = vpop.f32.mrf.mxu0 }
 0x3f4   : > { %v10989_v15 = vunpack.i.h.bf16 %v10987_v36  ;;  %v10988_v16 = vunpack.i.l.bf16 %v10987_v36  ;;  %v1996_v36 = vpop.f32.mrf.mxu1 }
 0x3f5   : > { %v2937_v34 = vsel %vm1581_vm0, %v10964_v52, %v10973_v2  ;;  %v2938_v57 = vsel %vm1581_vm0, %v10973_v2, %v10974_v54  ;;  %v2900_v52 = vld [vmem:[#allocation3 + $0x238] sm:$0xff] }
 0x3f6   : > { %2980 = vmatpush.msrb.mxu2 %v2937_v34  ;;  %3009 = vmatpush.msrb.mxu3 %v2938_v57  ;;  %v2792_v50 = vsel %vm1422_vm15, %v10988_v16, %v10989_v15  ;;  %v2793_v27 = vsel %vm1422_vm15, %v10989_v15, %v10993_v19 }
 0x3f7   : > { %10059 = vmatmul.msk.f32.gmra.mxu2 %vm418_vm8, %v2604_v32  ;;  %10063 = vmatmul.msk.f32.gmra.mxu3 %vm418_vm8, %v2604_v32 }
 0x3f8   : > { %10053 = vmatmul.msk.f32.gmra.mxu0 %vm418_vm8, %v2459_v46  ;;  %10057 = vmatmul.msk.f32.gmra.mxu1 %vm418_vm8, %v2459_v46 }
 0x3f9   : > { %2832 = vmatpush.msra.mxu0 %v2792_v50  ;;  %2861 = vmatpush.msra.mxu1 %v2793_v27 }
 0x3fa   : > { %v10997_v53 = vpop.permute.xlu0 %10996 }
 0x3fb   : > { %v10999_v26 = vunpack.i.h.bf16 %v10997_v53  ;;  %v10998_v30 = vunpack.i.l.bf16 %v10997_v53  ;;  %v1967_v19 = vpop.f32.mrf.mxu0 }
 0x3fc   : > { %v13508_v16 = vpop.f32.mrf.mxu1 }
 0x3fd   : > { %v2790_v48 = vsel %vm1422_vm15, %v10994_v21, %v10998_v30  ;;  %v2791_v42 = vsel %vm1422_vm15, %v10998_v30, %v10999_v26 }
 0x3fe   : > { %2833 = vmatpush.msra.mxu0 %v2790_v48  ;;  %2862 = vmatpush.msra.mxu1 %v2791_v42 }
 0x3ff   : > { %10060 = vmatmul.msk.f32.gmra.mxu2 %vm418_vm8, %v2605_v51  ;;  %10064 = vmatmul.msk.f32.gmra.mxu3 %vm418_vm8, %v2605_v51 }
 0x400   : > { %10066 = vmatmul.msk.f32.vlgmr.msra.gmra.mxu0 %vm418_vm8, %v2750_v39  ;;  %10070 = vmatmul.msk.f32.vlgmr.msra.gmra.mxu1 %vm418_vm8, %v2750_v39 }
 0x403   : > { %v13510_v34 = vpop.f32.mrf.mxu0 }
 0x407   : > { %10061 = vmatmul.msk.f32.gmra.mxu2 %vm418_vm8, %v2606_v56  ;;  %10065 = vmatmul.msk.f32.gmra.mxu3 %vm418_vm8, %v2606_v56 }
 0x408   : > { %10067 = vmatmul.msk.f32.gmra.mxu0 %vm418_vm8, %v2751_v3  ;;  %10071 = vmatmul.msk.f32.gmra.mxu1 %vm418_vm8, %v2751_v3 }
 0x40f   : > { %10074 = vmatmul.msk.f32.vlgmr.msrb.gmra.mxu2 %vm418_vm8, %v2897_v1  ;;  %10078 = vmatmul.msk.f32.vlgmr.msrb.gmra.mxu3 %vm418_vm8, %v2897_v1 }
 0x410   : > { %10068 = vmatmul.msk.f32.gmra.mxu0 %vm418_vm8, %v2752_v35  ;;  %10072 = vmatmul.msk.f32.gmra.mxu1 %vm418_vm8, %v2752_v35 }
 0x412   : > { %v13480_v62 = vpop.f32.mrf.mxu2  ;;  %v13482_v49 = vpop.f32.mrf.mxu3 }
 0x417   : > { %10075 = vmatmul.msk.f32.gmra.mxu2 %vm418_vm8, %v2898_v40  ;;  %10079 = vmatmul.msk.f32.gmra.mxu3 %vm418_vm8, %v2898_v40 }
 0x418   : > { %10069 = vmatmul.msk.f32.gmra.mxu0 %vm418_vm8, %v2753_v55  ;;  %10073 = vmatmul.msk.f32.gmra.mxu1 %vm418_vm8, %v2753_v55 }
 0x41a   : > { %v1894_v10 = vpop.f32.mrf.mxu2  ;;  %v13492_v5 = vpop.f32.mrf.mxu3 }
 0x41b   : > { %v1965_v44 = vadd.f32 %v1964_v31, %v1894_v10 }
 0x41f   : > { %10076 = vmatmul.msk.f32.gmra.mxu2 %vm418_vm8, %v2899_v9  ;;  %10080 = vmatmul.msk.f32.gmra.mxu3 %vm418_vm8, %v2899_v9 }
 0x422   : > { %v1897_v14 = vpop.f32.mrf.mxu2  ;;  %v1926_v12 = vpop.f32.mrf.mxu3 }
 0x427   : > { %10077 = vmatmul.msk.f32.gmra.mxu2 %vm418_vm8, %v2900_v52  ;;  %10081 = vmatmul.msk.f32.gmra.mxu3 %vm418_vm8, %v2900_v52 }
 0x42a   : > { %v13500_v54 = vpop.f32.mrf.mxu2  ;;  %v13502_v2 = vpop.f32.mrf.mxu3 }
 0x432   : > { %v13504_v32 = vpop.f32.mrf.mxu2  ;;  %v13506_v15 = vpop.f32.mrf.mxu3 }
 0x43a   : > { %v2103_v57 = vpop.f32.mrf.mxu2  ;;  %v2132_v46 = vpop.f32.mrf.mxu3 }
 0x43b   : > { %v2143_v47 = vadd.f32 %v2103_v57, %v1965_v44  ;;  %v13558_v57 = vpop.permute.xlu0 %3043 }
 0x43d   : > { %v13512_v50 = vpop.f32.mrf.mxu0  ;;  %v13514_v27 = vpop.f32.mrf.mxu1 }
 0x442   : > { %v2106_v53 = vpop.f32.mrf.mxu2  ;;  %v2135_v21 = vpop.f32.mrf.mxu3 }
 0x445   : > { %v2250_v26 = vpop.f32.mrf.mxu0  ;;  %v2279_v30 = vpop.f32.mrf.mxu1 }
 0x446   : > { %v2290_v58 = vadd.f32 %v2250_v26, %v2143_v47 }
 0x44a   : > { %v13516_v51 = vpop.f32.mrf.mxu2  ;;  %v13518_v48 = vpop.f32.mrf.mxu3 }
 0x44d   : > { %v2253_v42 = vpop.f32.mrf.mxu0  ;;  %v2282_v39 = vpop.f32.mrf.mxu1 }
 0x452   : > { %v13520_v56 = vpop.f32.mrf.mxu2  ;;  %v13522_v3 = vpop.f32.mrf.mxu3 }
 0x453   : > { %17074 = vst [vmem:[#allocation32_spill] sm:$0xff] %v13520_v56 }
 0x454   : > { %17075 = vst [vmem:[#allocation33_spill] sm:$0xff] %v13522_v3 }
 0x455   : > { %v13524_v1 = vpop.f32.mrf.mxu0  ;;  %v13526_v35 = vpop.f32.mrf.mxu1 }
 0x45a   : > { %v2397_v40 = vpop.f32.mrf.mxu2  ;;  %v2426_v55 = vpop.f32.mrf.mxu3 }
 0x45d   : > { %v13528_v9 = vpop.f32.mrf.mxu0  ;;  %v13530_v52 = vpop.f32.mrf.mxu1 }
 0x45e   : > { %17076 = vst [vmem:[#allocation34_spill] sm:$0xff] %v13528_v9  ;;  %v1968_v9 = vadd.f32 %v1967_v19, %v1897_v14 }
 0x45f   : > { %17077 = vst [vmem:[#allocation35_spill] sm:$0xff] %v13530_v52  ;;  %v1997_v52 = vadd.f32 %v1996_v36, %v1926_v12 }
 0x461   : > { %v2146_v56 = vadd.f32 %v2135_v21, %v1997_v52 }
 0x462   : > { %v2400_v28 = vpop.f32.mrf.mxu2  ;;  %v2429_v6 = vpop.f32.mrf.mxu3 }
 0x463   : > { %v2293_v10 = vadd.f32 %v2282_v39, %v2146_v56 }
 0x465   : > { %v2544_v29 = vpop.f32.mrf.mxu0  ;;  %v2573_v63 = vpop.f32.mrf.mxu1 }
 0x46a   : > { %v13532_v22 = vpop.f32.mrf.mxu2  ;;  %v13534_v18 = vpop.f32.mrf.mxu3 }
 0x46d   : > { %v2547_v37 = vpop.f32.mrf.mxu0  ;;  %v2576_v17 = vpop.f32.mrf.mxu1 }
 0x472   : > { %v13536_v23 = vpop.f32.mrf.mxu2  ;;  %v13538_v11 = vpop.f32.mrf.mxu3 }
 0x473   : > { %17078 = vst [vmem:[#allocation36_spill] sm:$0xff] %v13536_v23  ;;  %v2437_v23 = vadd.f32 %v2397_v40, %v2290_v58  ;;  %v3054_v40 = vpop.permute.xlu1 %3053 }
 0x474   : > { %17079 = vst [vmem:[#allocation37_spill] sm:$0xff] %v13538_v11 }
 0x475   : > { %v13540_v0 = vpop.f32.mrf.mxu0  ;;  %v13542_v25 = vpop.f32.mrf.mxu1  ;;  %v2584_v3 = vadd.f32 %v2544_v29, %v2437_v23  ;;  %v2000_v23 = vadd.f32 %v13508_v16, %v13502_v2  ;;  %v1962_v2 = vadd.f32 %v13488_v45, %v13480_v62 }
 0x47a   : > { %v2691_v41 = vpop.f32.mrf.mxu2  ;;  %v2720_v43 = vpop.f32.mrf.mxu3 }
 0x47d   : > { %v13544_v61 = vpop.f32.mrf.mxu0  ;;  %v13546_v7 = vpop.f32.mrf.mxu1 }
 0x47e   : > { %17080 = vst [vmem:[#allocation38_spill] sm:$0xff] %v13544_v61  ;;  %v2145_v61 = vadd.f32 %v2106_v53, %v1968_v9  ;;  %v3049_v53 = vpop.permute.xlu2 %3048 }
 0x47f   : > { %17081 = vst [vmem:[#allocation39_spill] sm:$0xff] %v13546_v7  ;;  %v2731_v7 = vadd.f32 %v2691_v41, %v2584_v3  ;;  %v1971_v41 = vadd.f32 %v13510_v34, %v13500_v54 }
 0x482   : > { %v2694_v59 = vpop.f32.mrf.mxu2  ;;  %v2723_v20 = vpop.f32.mrf.mxu3 }
 0x485   : > { %v2838_v8 = vpop.f32.mrf.mxu0  ;;  %v2867_v24 = vpop.f32.mrf.mxu1 }
 0x486   : > { %v2878_v44 = vadd.f32 %v2838_v8, %v2731_v7  ;;  %v2147_v7 = vadd.f32 %v13516_v51, %v1971_v41 }
 0x488   : > { %v2294_v54 = vadd.f32 %v13524_v1, %v2147_v7  ;;  %v17095_v7 = vld [vmem:[#allocation39_spill] sm:$0xff] }
 0x48a   : > { %v13548_v4 = vpop.f32.mrf.mxu2  ;;  %v13550_v60 = vpop.f32.mrf.mxu3 }
 0x48b   : > { %17082 = vst [vmem:[#allocation40_spill] sm:$0xff] %v13548_v4  ;;  %v1994_v4 = vadd.f32 %v13496_v38, %v13492_v5 }
 0x48c   : > { %17083 = vst [vmem:[#allocation41_spill] sm:$0xff] %v13550_v60  ;;  %v2292_v60 = vadd.f32 %v2253_v42, %v2145_v61 }
 0x48d   : > { %v2144_v26 = vadd.f32 %v2132_v46, %v1994_v4  ;;  %v2841_v29 = vpop.f32.mrf.mxu0  ;;  %v2870_v14 = vpop.f32.mrf.mxu1  ;;  %v2148_v4 = vadd.f32 %v13518_v48, %v2000_v23  ;;  %v17086_v48 = vld [vmem:[#allocation32_spill] sm:$0xff] }
 0x48f   : > { %v2291_v5 = vadd.f32 %v2279_v30, %v2144_v26  ;;  %v2295_v36 = vadd.f32 %v13526_v35, %v2148_v4  ;;  %v17092_v26 = vld [vmem:[#allocation36_spill] sm:$0xff] }
 0x491   : > { %v2442_v62 = vadd.f32 %v13534_v18, %v2295_v36 }
 0x492   : > { %v13552_v13 = vpop.f32.mrf.mxu2  ;;  %v13554_v11 = vpop.f32.mrf.mxu3  ;;  %v17087_v18 = vld [vmem:[#allocation40_spill] sm:$0xff] }
 0x493   : > { %17084 = vst [vmem:[#allocation42_spill] sm:$0xff] %v13552_v13  ;;  %v2439_v13 = vadd.f32 %v2400_v28, %v2292_v60  ;;  %v2438_v60 = vadd.f32 %v2426_v55, %v2291_v5  ;;  %v17088_v3 = vld [vmem:[#allocation41_spill] sm:$0xff]  ;;  %v17094_v5 = vld [vmem:[#allocation38_spill] sm:$0xff] }
 0x494   : > { %17085 = vst [vmem:[#allocation43_spill] sm:$0xff] %v13554_v11  ;;  %v2440_v11 = vadd.f32 %v2429_v6, %v2293_v10 }
 0x495   : > { %v2586_v61 = vadd.f32 %v2547_v37, %v2439_v13  ;;  %v2585_v19 = vadd.f32 %v2573_v63, %v2438_v60  ;;  %v1991_v37 = vadd.f32 %v13484_v33, %v13482_v49  ;;  %v2589_v49 = vadd.f32 %v13542_v25, %v2442_v62  ;;  %v2844_v39 = vpop.f32.mrf.mxu0  ;;  %v2873_v56 = vpop.f32.mrf.mxu1  ;;  %v17090_v25 = vld [vmem:[#allocation34_spill] sm:$0xff] }
 0x496   : > { %v2587_v38 = vadd.f32 %v2576_v17, %v2440_v11  ;;  %v2141_v17 = vadd.f32 %v13504_v32, %v1962_v2 }
 0x497   : > { %v2733_v28 = vadd.f32 %v2694_v59, %v2586_v61  ;;  %v2441_v59 = vadd.f32 %v13532_v22, %v2294_v54  ;;  %v2732_v45 = vadd.f32 %v2720_v43, %v2585_v19  ;;  %v2142_v63 = vadd.f32 %v13506_v15, %v1991_v37 }
 0x498   : > { %v2734_v6 = vadd.f32 %v2723_v20, %v2587_v38  ;;  %v2288_v21 = vadd.f32 %v13512_v50, %v2141_v17  ;;  %v2736_v1 = vadd.f32 %v17088_v3, %v2589_v49  ;;  %v17100_v49 = vld [vmem:[#allocation9_spill] sm:$0xff]  ;;  %v17101_v3 = vld [vmem:[#allocation22_spill] sm:$0xff] }
 0x499   : > { %v2880_v13 = vadd.f32 %v2841_v29, %v2733_v28  ;;  %v2588_v30 = vadd.f32 %v13540_v0, %v2441_v59  ;;  %v2879_v33 = vadd.f32 %v2867_v24, %v2732_v45  ;;  %v2289_v22 = vadd.f32 %v13514_v27, %v2142_v63  ;;  %v17089_v0 = vld [vmem:[#allocation33_spill] sm:$0xff]  ;;  %v17091_v27 = vld [vmem:[#allocation35_spill] sm:$0xff]  ;;  %v17098_v45 = vld [vmem:[#allocation20_spill] sm:$0xff] }
 0x49a   : > { %v2985_v47 = vpop.f32.mrf.mxu2  ;;  %v3014_v31 = vpop.f32.mrf.mxu3  ;;  %v2881_v11 = vadd.f32 %v2870_v14, %v2734_v6  ;;  %v2435_v42 = vadd.f32 %v17086_v48, %v2288_v21  ;;  %v2883_v52 = vadd.f32 %v2873_v56, %v2736_v1  ;;  %v17093_v29 = vld [vmem:[#allocation37_spill] sm:$0xff]  ;;  %v17096_v60 = vld [vmem:[#allocation42_spill] sm:$0xff] }
 0x49b   : > { %v3025_v58 = vadd.f32 %v2985_v47, %v2878_v44  ;;  %v2735_v43 = vadd.f32 %v17087_v18, %v2588_v30  ;;  %v3026_v15 = vadd.f32 %v3014_v31, %v2879_v33  ;;  %v2436_v55 = vadd.f32 %v17089_v0, %v2289_v22  ;;  %v17097_v54 = vld [vmem:[#allocation43_spill] sm:$0xff]  ;;  %v17099_v21 = vld [vmem:[#allocation10_spill] sm:$0xff] }
 0x49c   : > { %v2582_v24 = vadd.f32 %v17090_v25, %v2435_v42 }
 0x49d   : > { %v3058_v8 = vadd.f32 %v13558_v57, %v3025_v58  ;;  %v2882_v9 = vadd.f32 %v2844_v39, %v2735_v43  ;;  %v2583_v10 = vadd.f32 %v17091_v27, %v2436_v55  ;;  %v3059_v31 = vadd.f32 %v13558_v57, %v3026_v15  ;;  %v3039_v57 = vpop.permute.xlu1 %3038  ;;  %v17102_v15 = vld [vmem:[#allocation6_spill] sm:$0xff] }
 0x49e   : > { %v2729_v58 = vadd.f32 %v17092_v26, %v2582_v24 }
 0x49f   : > { %v3066_v12 = vmax.f32 %v3058_v8, 0.0  ;;  %v2730_v14 = vadd.f32 %v17093_v29, %v2583_v10  ;;  %v3067_v6 = vmax.f32 %v3059_v31, 0.0 }
 0x4a0   : > { %v2876_v61 = vadd.f32 %v17094_v5, %v2729_v58  ;;  %v17103_v5 = vld [vmem:[#allocation11_spill] sm:$0xff] }
 0x4a1   : > { %3084 = vrot.lane.b32.xlu0 %v3066_v12, %s12245_s28  ;;  %v2877_v4 = vadd.f32 %v17095_v7, %v2730_v14 }
 0x4a2   : > { %v2988_v20 = vpop.f32.mrf.mxu2  ;;  %v3017_v16 = vpop.f32.mrf.mxu3  ;;  %v3023_v28 = vadd.f32 %v17096_v60, %v2876_v61 }
 0x4a3   : > { %v3027_v34 = vadd.f32 %v2988_v20, %v2880_v13  ;;  %v3028_v46 = vadd.f32 %v3017_v16, %v2881_v11  ;;  %v3024_v36 = vadd.f32 %v17097_v54, %v2877_v4  ;;  %v17104_v4 = vld [vmem:[#allocation8_spill] sm:$0xff] }
 0x4a4   : > { %v3056_v19 = vadd.f32 %v3039_v57, %v3023_v28 }
 0x4a5   : > { %v3060_v32 = vadd.f32 %v3049_v53, %v3027_v34  ;;  %v3061_v51 = vadd.f32 %v3049_v53, %v3028_v46  ;;  %v3057_v13 = vadd.f32 %v3039_v57, %v3024_v36 }
 0x4a6   : > { %v3064_v11 = vmax.f32 %v3056_v19, 0.0 }
 0x4a7   : > { %v3068_v35 = vmax.f32 %v3060_v32, 0.0  ;;  %v3069_v50 = vmax.f32 %v3061_v51, 0.0  ;;  %v3065_v37 = vmax.f32 %v3057_v13, 0.0 }
 0x4a9   : > { %3088 = vrot.lane.b32.xlu1 %v3068_v35, %s12245_s28  ;;  %3090 = vrot.lane.b32.xlu2 %v3069_v50, %s12245_s28 }
 0x4aa   : > { %v2991_v44 = vpop.f32.mrf.mxu2  ;;  %v3020_v47 = vpop.f32.mrf.mxu3 }
 0x4ab   : > { %v3029_v23 = vadd.f32 %v2991_v44, %v2882_v9  ;;  %v3030_v41 = vadd.f32 %v3020_v47, %v2883_v52 }
 0x4ad   : > { %v3062_v38 = vadd.f32 %v3054_v40, %v3029_v23  ;;  %v3063_v8 = vadd.f32 %v3054_v40, %v3030_v41 }
 0x4af   : > { %v3070_v12 = vmax.f32 %v3062_v38, 0.0  ;;  %v3071_v2 = vmax.f32 %v3063_v8, 0.0 }
 0x4b1   : > { %3086 = vrot.lane.b32.xlu1 %v3067_v6, %s12245_s28  ;;  %3092 = vrot.lane.b32.xlu2 %v3070_v12, %s12245_s28 }
 0x4b2   : > { %3094 = vrot.lane.b32.xlu0 %v3071_v2, %s12245_s28  ;;  %v17105_v2 = vld [vmem:[#allocation7_spill] sm:$0xff] }
 0x4b9   : > { %3080 = vrot.lane.b32.xlu2 %v3064_v11, %s12245_s28 }
 0x4ba   : > { %3082 = vrot.lane.b32.xlu0 %v3065_v37, %s12245_s28 }
 0x503   : > { %v3091_v17 = vpop.permute.xlu2 %3090 }
 0x504   : > { %3120 = vst.msk [vmem:[#allocation2 + $0x40] sm:$0xff] %vm260_vm2, %v3091_v17 }
 0x50b   : > { %v3093_v59 = vpop.permute.xlu2 %3092  ;;  %v13610_v46 = vld [vmem:[#allocation2 + $0x40] sm:$0xff] }
 0x50c   : > { %3121 = vst.msk [vmem:[#allocation2 + $0x48] sm:$0xff] %vm277_vm1, %v3093_v59  ;;  %v3157_v33 = vmul.f32 %v13610_v46, %v17100_v49  ;;  %v3366_v13 = vmul.f32 %v13610_v46, %v17105_v2 }
 0x513   : > { %v3085_v20 = vpop.permute.xlu0 %3084  ;;  %v3081_v16 = vpop.permute.xlu2 %3080  ;;  %v13604_v62 = vld [vmem:[#allocation2 + $0x48] sm:$0xff] }
 0x514   : > { %3115 = vst.msk [vmem:[#allocation2 + $0x18] sm:$0xff] %vm277_vm1, %v3085_v20  ;;  %v3138_v34 = vmul.f32 %v13604_v62, %v17098_v45  ;;  %v3158_v35 = vmul.f32 %v13604_v62, %v17102_v15  ;;  %v3367_v60 = vmul.f32 %v13604_v62, %v17104_v4 }
 0x515   : > { %3112 = vst.msk [vmem:[#allocation2] sm:$0xff] %vm277_vm1, %v3081_v16 }
 0x516   : > { %3312 = vmatpush.msra.mxu2 %v3138_v34  ;;  %v17106_v34 = vld [vmem:[#allocation14_spill] sm:$0xff] }
 0x51b   : > { %v3089_v53 = vpop.permute.xlu1 %3088  ;;  %v13623_v48 = vld [vmem:[#allocation2 + $0x18] sm:$0xff] }
 0x51c   : > { %v13613_v63 = vsel %vm260_vm2, %v3089_v53, %v3091_v17  ;;  %3118 = vst.msk [vmem:[#allocation2 + $0x30] sm:$0xff] %vm277_vm1, %v3089_v53  ;;  %v13632_v39 = vld [vmem:[#allocation2] sm:$0xff]  ;;  %v3134_v56 = vmul.f32 %v13623_v48, %v17098_v45  ;;  %v3152_v58 = vmul.f32 %v13623_v48, %v17102_v15  ;;  %v3361_v11 = vmul.f32 %v13623_v48, %v17104_v4 }
 0x51d   : > { %v3156_v30 = vmul.f32 %v13613_v63, %v17099_v21  ;;  %v3132_v0 = vmul.f32 %v13632_v39, %v17098_v45  ;;  %v3137_v25 = vmul.f32 %v13613_v63, %v17101_v3  ;;  %v3149_v38 = vmul.f32 %v13632_v39, %v17102_v15 }
 0x51e   : > { %v3365_v36 = vmul.f32 %v13613_v63, %v17103_v5 }
 0x51f   : > { %v11000_v32 = vpack.i.bf16 %v3157_v33, %v3156_v30  ;;  %v3358_v30 = vmul.f32 %v13632_v39, %v17104_v4 }
 0x520   : > { %v11035_v17 = vpack.i.bf16 %v3366_v13, %v3365_v36 }
 0x521   : > { %11001 = vrot.lane.b32.xlu0 %v11000_v32, %s12252_s20  ;;  %v17107_v32 = vld [vmem:[#allocation13_spill] sm:$0xff] }
 0x523   : > { %v3087_v51 = vpop.permute.xlu1 %3086  ;;  %v13621_v22 = vld [vmem:[#allocation2 + $0x30] sm:$0xff] }
 0x524   : > { %3117 = vst.msk [vmem:[#allocation2 + $0x28] sm:$0xff] %vm260_vm2, %v3087_v51  ;;  %v3095_v42 = vpop.permute.xlu0 %3094  ;;  %v3136_v18 = vmul.f32 %v13621_v22, %v17098_v45  ;;  %v13643_v40 = vsel %vm260_vm2, %v3085_v20, %v3087_v51  ;;  %v3155_v44 = vmul.f32 %v13621_v22, %v17102_v15  ;;  %v3364_v19 = vmul.f32 %v13621_v22, %v17104_v4 }
 0x525   : > { %v13629_v43 = vsel %vm260_vm2, %v3093_v59, %v3095_v42  ;;  %3123 = vst.msk [vmem:[#allocation2 + $0x58] sm:$0xff] %vm260_vm2, %v3095_v42  ;;  %v3135_v24 = vmul.f32 %v13643_v40, %v17101_v3  ;;  %v3153_v27 = vmul.f32 %v13643_v40, %v17099_v21  ;;  %v3362_v57 = vmul.f32 %v13643_v40, %v17103_v5 }
 0x526   : > { %3313 = vmatpush.msra.mxu2 %v3136_v18  ;;  %v3139_v1 = vmul.f32 %v13629_v43, %v17101_v3  ;;  %v3159_v50 = vmul.f32 %v13629_v43, %v17099_v21  ;;  %v3368_v61 = vmul.f32 %v13629_v43, %v17103_v5  ;;  %v3509_v53 = vmul.f32 %v13643_v40, %v17106_v34 }
 0x527   : > { %v11015_v41 = vpack.i.bf16 %v3153_v27, %v3152_v58  ;;  %v11045_v59 = vpack.i.bf16 %v3362_v57, %v3361_v11  ;;  %v3508_v51 = vmul.f32 %v13623_v48, %v17107_v32  ;;  %v17109_v58 = vld [vmem:[#allocation17_spill] sm:$0xff] }
 0x528   : > { %3314 = vmatpush.msra.mxu2 %v3134_v56  ;;  %3341 = vmatpush.msra.mxu3 %v3139_v1  ;;  %v11010_v55 = vpack.i.bf16 %v3159_v50, %v3158_v35  ;;  %v11040_v12 = vpack.i.bf16 %v3368_v61, %v3367_v60  ;;  %v17108_v1 = vld [vmem:[#allocation12_spill] sm:$0xff]  ;;  %v3512_v50 = vmul.f32 %v13613_v63, %v17106_v34 }
 0x529   : > { %v11070_v56 = vpack.i.bf16 %v3509_v53, %v3508_v51  ;;  %v17110_v61 = vld [vmem:[#allocation16_spill] sm:$0xff] }
 0x52a   : > { %3315 = vmatpush.msra.mxu2 %v3132_v0  ;;  %11011 = vrot.lane.b32.xlu1 %v11010_v55, %s12252_s20  ;;  %v3515_v0 = vmul.f32 %v13629_v43, %v17106_v34  ;;  %v3511_v55 = vmul.f32 %v13621_v22, %v17107_v32  ;;  %v3658_v36 = vmul.f32 %v13621_v22, %v17110_v61 }
 0x52b   : > { %3342 = vmatpush.msra.mxu3 %v3137_v25  ;;  %v13668_v23 = vld [vmem:[#allocation2 + $0x28] sm:$0xff]  ;;  %v3513_v25 = vmul.f32 %v13610_v46, %v17108_v1  ;;  %v3652_v53 = vmul.f32 %v13632_v39, %v17110_v61 }
 0x52c   : > { %v3083_v9 = vpop.permute.xlu0 %3082  ;;  %v13652_v52 = vld [vmem:[#allocation2 + $0x58] sm:$0xff]  ;;  %v3154_v29 = vmul.f32 %v13668_v23, %v17100_v49  ;;  %v3363_v20 = vmul.f32 %v13668_v23, %v17105_v2 }
 0x52d   : > { %v13657_v10 = vsel %vm260_vm2, %v3081_v16, %v3083_v9  ;;  %3114 = vst.msk [vmem:[#allocation2 + $0x10] sm:$0xff] %vm260_vm2, %v3083_v9  ;;  %v3160_v47 = vmul.f32 %v13652_v52, %v17100_v49  ;;  %3343 = vmatpush.msra.mxu3 %v3135_v24  ;;  %v3369_v54 = vmul.f32 %v13652_v52, %v17105_v2 }
 0x52e   : > { %v3133_v26 = vmul.f32 %v13657_v10, %v17101_v3  ;;  %v3150_v8 = vmul.f32 %v13657_v10, %v17099_v21  ;;  %v11020_v28 = vpack.i.bf16 %v3149_v38, %v3154_v29  ;;  %v3359_v33 = vmul.f32 %v13657_v10, %v17103_v5 }
 0x52f   : > { %v11005_v31 = vpack.i.bf16 %v3155_v44, %v3160_v47  ;;  %v11030_v37 = vpack.i.bf16 %v3364_v19, %v3369_v54  ;;  %v11050_v42 = vpack.i.bf16 %v3358_v30, %v3363_v20  ;;  %v3516_v35 = vmul.f32 %v13652_v52, %v17108_v1  ;;  %v17112_v20 = vld [vmem:[#allocation21_spill] sm:$0xff] }
 0x530   : > { %3344 = vmatpush.msra.mxu3 %v3133_v26  ;;  %v3514_v24 = vmul.f32 %v13604_v62, %v17107_v32  ;;  %v11065_v27 = vpack.i.bf16 %v3513_v25, %v3512_v50  ;;  %v3510_v47 = vmul.f32 %v13668_v23, %v17108_v1  ;;  %v3506_v29 = vmul.f32 %v13657_v10, %v17106_v34 }
 0x531   : > { %11006 = vrot.lane.b32.xlu2 %v11005_v31, %s12252_s20  ;;  %v11060_v9 = vpack.i.bf16 %v3511_v55, %v3516_v35  ;;  %v3662_v31 = vmul.f32 %v13629_v43, %v17109_v58  ;;  %v3661_v38 = vmul.f32 %v13604_v62, %v17110_v61  ;;  %v3656_v54 = vmul.f32 %v13643_v40, %v17109_v58  ;;  %v17114_v35 = vld [vmem:[#allocation19_spill] sm:$0xff] }
 0x532   : > { %11016 = vrot.lane.b32.xlu1 %v11015_v41, %s12252_s20  ;;  %v11095_v44 = vpack.i.bf16 %v3515_v0, %v3514_v24  ;;  %v3505_v41 = vmul.f32 %v13632_v39, %v17107_v32  ;;  %v3655_v19 = vmul.f32 %v13623_v48, %v17110_v61  ;;  %v3653_v30 = vmul.f32 %v13657_v10, %v17109_v58 }
 0x533   : > { %v11100_v60 = vpack.i.bf16 %v3662_v31, %v3661_v38  ;;  %v3810_v50 = vmul.f32 %v13652_v52, %v17114_v35  ;;  %v3806_v0 = vmul.f32 %v13613_v63, %v17112_v20  ;;  %v3809_v55 = vmul.f32 %v13629_v43, %v17112_v20 }
 0x534   : > { %v13674_v14 = vld [vmem:[#allocation2 + $0x10] sm:$0xff]  ;;  %v3807_v24 = vmul.f32 %v13610_v46, %v17114_v35 }
 0x535   : > { %v3151_v7 = vmul.f32 %v13674_v14, %v17100_v49  ;;  %v3360_v16 = vmul.f32 %v13674_v14, %v17105_v2  ;;  %v3507_v26 = vmul.f32 %v13674_v14, %v17108_v1  ;;  %v3801_v31 = vmul.f32 %v13674_v14, %v17114_v35 }
 0x537   : > { %v11025_v6 = vpack.i.bf16 %v3151_v7, %v3150_v8  ;;  %v11055_v18 = vpack.i.bf16 %v3360_v16, %v3359_v33  ;;  %v11075_v8 = vpack.i.bf16 %v3505_v41, %v3510_v47  ;;  %v11080_v7 = vpack.i.bf16 %v3507_v26, %v3506_v29  ;;  %v17113_v33 = vld [vmem:[#allocation18_spill] sm:$0xff] }
 0x538   : > { %v3803_v16 = vmul.f32 %v13643_v40, %v17112_v20  ;;  %v3802_v51 = vmul.f32 %v13623_v48, %v17113_v33  ;;  %v3805_v25 = vmul.f32 %v13621_v22, %v17113_v33  ;;  %v3804_v26 = vmul.f32 %v13668_v23, %v17114_v35  ;;  %v17115_v41 = vld [vmem:[#allocation26_spill] sm:$0xff] }
 0x539   : > { %11021 = vrot.lane.b32.xlu2 %v11020_v28, %s12252_s20  ;;  %11026 = vrot.lane.b32.xlu0 %v11025_v6, %s12252_s20  ;;  %v17111_v28 = vld [vmem:[#allocation15_spill] sm:$0xff]  ;;  %v3956_v29 = vmul.f32 %v13629_v43, %v17115_v41  ;;  %v3799_v38 = vmul.f32 %v13632_v39, %v17113_v33 }
 0x53a   : > { %11041 = vrot.lane.b32.xlu1 %v11040_v12, %s12251_s18  ;;  %v3663_v6 = vmul.f32 %v13652_v52, %v17111_v28  ;;  %v3659_v12 = vmul.f32 %v13613_v63, %v17109_v58  ;;  %v3660_v57 = vmul.f32 %v13610_v46, %v17111_v28 }
 0x53c   : > { %v11085_v13 = vpack.i.bf16 %v3658_v36, %v3663_v6  ;;  %v11090_v11 = vpack.i.bf16 %v3660_v57, %v3659_v12  ;;  %v11135_v6 = vpack.i.bf16 %v3799_v38, %v3804_v26  ;;  %v17117_v36 = vld [vmem:[#allocation24_spill] sm:$0xff] }
 0x53d   : > { %v3957_v57 = vmul.f32 %v13652_v52, %v17117_v36 }
 0x541   : > { %11031 = vrot.lane.b32.xlu2 %v11030_v37, %s12251_s18  ;;  %11036 = vrot.lane.b32.xlu0 %v11035_v17, %s12251_s18  ;;  %v11105_v37 = vpack.i.bf16 %v3656_v54, %v3655_v19  ;;  %v3657_v17 = vmul.f32 %v13668_v23, %v17111_v28  ;;  %v3953_v19 = vmul.f32 %v13613_v63, %v17115_v41 }
 0x542   : > { %11046 = vrot.lane.b32.xlu1 %v11045_v59, %s12251_s18  ;;  %v3654_v59 = vmul.f32 %v13674_v14, %v17111_v28 }
 0x549   : > { %11051 = vrot.lane.b32.xlu2 %v11050_v42, %s12251_s18  ;;  %11056 = vrot.lane.b32.xlu0 %v11055_v18, %s12251_s18  ;;  %v11110_v42 = vpack.i.bf16 %v3652_v53, %v3657_v17  ;;  %v11115_v18 = vpack.i.bf16 %v3654_v59, %v3653_v30  ;;  %v3951_v30 = vmul.f32 %v13668_v23, %v17117_v36 }
 0x54a   : > { %11071 = vrot.lane.b32.xlu1 %v11070_v56, %s12254_s25  ;;  %v11130_v56 = vpack.i.bf16 %v3803_v16, %v3802_v51  ;;  %v3948_v51 = vmul.f32 %v13674_v14, %v17117_v36 }
 0x551   : > { %11061 = vrot.lane.b32.xlu2 %v11060_v9, %s12254_s25  ;;  %11066 = vrot.lane.b32.xlu0 %v11065_v27, %s12254_s25  ;;  %v3808_v9 = vmul.f32 %v13604_v62, %v17113_v33  ;;  %v11120_v27 = vpack.i.bf16 %v3805_v25, %v3810_v50  ;;  %v3947_v50 = vmul.f32 %v13657_v10, %v17115_v41 }
 0x552   : > { %11096 = vrot.lane.b32.xlu1 %v11095_v44, %s12254_s25  ;;  %v11125_v44 = vpack.i.bf16 %v3807_v24, %v3806_v0  ;;  %v17119_v0 = vld [vmem:[#allocation23_spill] sm:$0xff] }
 0x553   : > { %v11155_v47 = vpack.i.bf16 %v3809_v55, %v3808_v9  ;;  %v4096_v55 = vmul.f32 %v13623_v48, %v17119_v0  ;;  %v11175_v24 = vpack.i.bf16 %v3948_v51, %v3947_v50  ;;  %v4099_v38 = vmul.f32 %v13621_v22, %v17119_v0 }
 0x559   : > { %11076 = vrot.lane.b32.xlu2 %v11075_v8, %s12254_s25  ;;  %11081 = vrot.lane.b32.xlu0 %v11080_v7, %s12254_s25  ;;  %v3800_v8 = vmul.f32 %v13657_v10, %v17112_v20  ;;  %v17116_v7 = vld [vmem:[#allocation25_spill] sm:$0xff] }
 0x55a   : > { %11101 = vrot.lane.b32.xlu1 %v11100_v60, %s12257_s7  ;;  %v3955_v60 = vmul.f32 %v13604_v62, %v17116_v7  ;;  %v3949_v17 = vmul.f32 %v13623_v48, %v17116_v7 }
 0x55b   : > { %v11140_v12 = vpack.i.bf16 %v3801_v31, %v3800_v8 }
 0x55c   : > { %v11160_v54 = vpack.i.bf16 %v3956_v29, %v3955_v60  ;;  %v3141_v29 = vld [vmem:[#allocation3 + $0x240] sm:$0xff]  ;;  %v4102_v60 = vmul.f32 %v13604_v62, %v17119_v0 }
 0x55d   : > { %10098 = vmatmul.msk.f32.vlgmr.msra.gmra.mxu3 %vm418_vm8, %v3141_v29  ;;  %10094 = vmatmul.msk.f32.vlgmr.msra.gmra.mxu2 %vm418_vm8, %v3141_v29 }
 0x561   : > { %11086 = vrot.lane.b32.xlu2 %v11085_v13, %s12257_s7  ;;  %11091 = vrot.lane.b32.xlu0 %v11090_v11, %s12257_s7  ;;  %v3950_v13 = vmul.f32 %v13643_v40, %v17115_v41  ;;  %v3952_v11 = vmul.f32 %v13621_v22, %v17116_v7 }
 0x562   : > { %11106 = vrot.lane.b32.xlu1 %v11105_v37, %s12257_s7  ;;  %v3954_v37 = vmul.f32 %v13610_v46, %v17117_v36 }
 0x563   : > { %v11145_v59 = vpack.i.bf16 %v3952_v11, %v3957_v57  ;;  %v11165_v53 = vpack.i.bf16 %v3950_v13, %v3949_v17  ;;  %v17121_v11 = vld [vmem:[#allocation31_spill] sm:$0xff] }
 0x564   : > { %v11150_v16 = vpack.i.bf16 %v3954_v37, %v3953_v19  ;;  %v4250_v37 = vmul.f32 %v13629_v43, %v17121_v11  ;;  %v3142_v17 = vld [vmem:[#allocation3 + $0x248] sm:$0xff]  ;;  %v4247_v50 = vmul.f32 %v13613_v63, %v17121_v11 }
 0x565   : > { %10099 = vmatmul.msk.f32.gmra.mxu3 %vm418_vm8, %v3142_v17  ;;  %10095 = vmatmul.msk.f32.gmra.mxu2 %vm418_vm8, %v3142_v17 }
 0x569   : > { %11111 = vrot.lane.b32.xlu2 %v11110_v42, %s12257_s7  ;;  %11116 = vrot.lane.b32.xlu0 %v11115_v18, %s12257_s7  ;;  %v17118_v42 = vld [vmem:[#allocation29_spill] sm:$0xff] }
 0x56a   : > { %11131 = vrot.lane.b32.xlu1 %v11130_v56, %s12258_s10  ;;  %v4097_v18 = vmul.f32 %v13643_v40, %v17118_v42  ;;  %v3946_v56 = vmul.f32 %v13632_v39, %v17116_v7  ;;  %v4100_v26 = vmul.f32 %v13613_v63, %v17118_v42  ;;  %v4103_v31 = vmul.f32 %v13629_v43, %v17118_v42 }
 0x56c   : > { %v11170_v25 = vpack.i.bf16 %v3946_v56, %v3951_v30  ;;  %v11190_v9 = vpack.i.bf16 %v4097_v18, %v4096_v55 }
 0x571   : > { %11121 = vrot.lane.b32.xlu2 %v11120_v27, %s12258_s10  ;;  %11126 = vrot.lane.b32.xlu0 %v11125_v44, %s12258_s10  ;;  %v17120_v44 = vld [vmem:[#allocation28_spill] sm:$0xff] }
 0x572   : > { %11156 = vrot.lane.b32.xlu1 %v11155_v47, %s12258_s10  ;;  %v4104_v47 = vmul.f32 %v13652_v52, %v17120_v44  ;;  %v4101_v8 = vmul.f32 %v13610_v46, %v17120_v44  ;;  %v4098_v19 = vmul.f32 %v13668_v23, %v17120_v44  ;;  %v4095_v13 = vmul.f32 %v13674_v14, %v17120_v44 }
 0x579   : > { %11136 = vrot.lane.b32.xlu2 %v11135_v6, %s12258_s10  ;;  %11141 = vrot.lane.b32.xlu0 %v11140_v12, %s12258_s10  ;;  %v11180_v6 = vpack.i.bf16 %v4099_v38, %v4104_v47  ;;  %v11185_v12 = vpack.i.bf16 %v4101_v8, %v4100_v26  ;;  %v4244_v26 = vmul.f32 %v13643_v40, %v17121_v11 }
 0x57a   : > { %11161 = vrot.lane.b32.xlu1 %v11160_v54, %s12259_s11  ;;  %v11215_v54 = vpack.i.bf16 %v4103_v31, %v4102_v60  ;;  %v3143_v31 = vld [vmem:[#allocation3 + $0x250] sm:$0xff] }
 0x57b   : > { %10100 = vmatmul.msk.f32.gmra.mxu3 %vm418_vm8, %v3143_v31  ;;  %10096 = vmatmul.msk.f32.gmra.mxu2 %vm418_vm8, %v3143_v31 }
 0x581   : > { %11146 = vrot.lane.b32.xlu2 %v11145_v59, %s12259_s11  ;;  %11151 = vrot.lane.b32.xlu0 %v11150_v16, %s12259_s11  ;;  %v4093_v59 = vmul.f32 %v13632_v39, %v17119_v0  ;;  %v4094_v16 = vmul.f32 %v13657_v10, %v17118_v42 }
 0x582   : > { %11166 = vrot.lane.b32.xlu1 %v11165_v53, %s12259_s11  ;;  %v17122_v53 = vld [vmem:[#allocation27_spill] sm:$0xff] }
 0x583   : > { %v4249_v30 = vmul.f32 %v13604_v62, %v17122_v53  ;;  %v11195_v51 = vpack.i.bf16 %v4093_v59, %v4098_v19  ;;  %v11200_v18 = vpack.i.bf16 %v4095_v13, %v4094_v16  ;;  %v4246_v62 = vmul.f32 %v13621_v22, %v17122_v53  ;;  %v3144_v16 = vld [vmem:[#allocation3 + $0x258] sm:$0xff] }
 0x584   : > { %v4243_v22 = vmul.f32 %v13623_v48, %v17122_v53  ;;  %v4240_v17 = vmul.f32 %v13632_v39, %v17122_v53  ;;  %10101 = vmatmul.msk.f32.gmra.mxu3 %vm418_vm8, %v3144_v16  ;;  %10097 = vmatmul.msk.f32.gmra.mxu2 %vm418_vm8, %v3144_v16  ;;  %v10161_v39 = vld [vmem:[%s16805_s2 + $0x58] sm:$0xff] }
 0x585   : > { %v11220_v56 = vpack.i.bf16 %v4250_v37, %v4249_v30 }
 0x589   : > { %11171 = vrot.lane.b32.xlu2 %v11170_v25, %s12259_s11  ;;  %11176 = vrot.lane.b32.xlu0 %v11175_v24, %s12259_s11  ;;  %v17123_v25 = vld [vmem:[#allocation30_spill] sm:$0xff] }
 0x58a   : > { %11191 = vrot.lane.b32.xlu1 %v11190_v9, %s12260_s12  ;;  %v4251_v24 = vmul.f32 %v13652_v52, %v17123_v25  ;;  %v4248_v9 = vmul.f32 %v13610_v46, %v17123_v25  ;;  %v4245_v13 = vmul.f32 %v13668_v23, %v17123_v25  ;;  %v4242_v37 = vmul.f32 %v13674_v14, %v17123_v25 }
 0x58b   : > { %v11007_v27 = vpop.permute.xlu2 %11006 }
 0x58c   : > { %v11008_v29 = vunpack.i.l.bf16 %v11007_v27  ;;  %v11210_v60 = vpack.i.bf16 %v4248_v9, %v4247_v50  ;;  %v11205_v46 = vpack.i.bf16 %v4246_v62, %v4251_v24  ;;  %v11230_v23 = vpack.i.bf16 %v4240_v17, %v4245_v13  ;;  %v3163_v17 = vld [vmem:[#allocation3 + $0x268] sm:$0xff] }
 0x591   : > { %11181 = vrot.lane.b32.xlu2 %v11180_v6, %s12260_s12  ;;  %11186 = vrot.lane.b32.xlu0 %v11185_v12, %s12260_s12  ;;  %v11009_v6 = vunpack.i.h.bf16 %v11007_v27 }
 0x592   : > { %11216 = vrot.lane.b32.xlu1 %v11215_v54, %s12260_s12  ;;  %v11225_v54 = vpack.i.bf16 %v4244_v26, %v4243_v22 }
 0x593   : > { %v13856_v57 = vpop.permute.xlu2 %11021  ;;  %v11002_v43 = vpop.permute.xlu0 %11001 }
 0x594   : > { %v11003_v38 = vunpack.i.l.bf16 %v11002_v43  ;;  %v11004_v52 = vunpack.i.h.bf16 %v11002_v43  ;;  %v11023_v30 = vunpack.i.l.bf16 %v13856_v57  ;;  %v11024_v62 = vunpack.i.h.bf16 %v13856_v57 }
 0x596   : > { %v3206_v19 = vsel %vm401_vm6, %v11009_v6, %v11003_v38  ;;  %v3207_v48 = vsel %vm401_vm6, %v11003_v38, %v11004_v52  ;;  %v10159_v52 = vld [vmem:[%s16805_s2 + $0x48] sm:$0xff] }
 0x599   : > { %11196 = vrot.lane.b32.xlu2 %v11195_v51, %s12260_s12  ;;  %11201 = vrot.lane.b32.xlu0 %v11200_v18, %s12260_s12  ;;  %v4241_v51 = vmul.f32 %v13657_v10, %v17121_v11 }
 0x59a   : > { %11221 = vrot.lane.b32.xlu1 %v11220_v56, %s12261_s13 }
 0x59b   : > { %v13877_v55 = vpop.permute.xlu2 %11031  ;;  %v11235_v43 = vpack.i.bf16 %v4242_v37, %v4241_v51 }
 0x59c   : > { %v11012_v47 = vpop.permute.xlu1 %11011  ;;  %v11033_v31 = vunpack.i.l.bf16 %v13877_v55 }
 0x59d   : > { %v11014_v8 = vunpack.i.h.bf16 %v11012_v47  ;;  %v11013_v63 = vunpack.i.l.bf16 %v11012_v47 }
 0x59f   : > { %v3208_v12 = vsel %vm401_vm6, %v11013_v63, %v11014_v8  ;;  %v3209_v40 = vsel %vm401_vm6, %v11014_v8, %v11008_v29  ;;  %v3162_v29 = vld [vmem:[#allocation3 + $0x260] sm:$0xff]  ;;  %v10160_v63 = vld [vmem:[%s16805_s2 + $0x50] sm:$0xff] }
 0x5a0   : > { %3242 = vmatpush.msrb.mxu0 %v3208_v12  ;;  %3271 = vmatpush.msrb.mxu1 %v3209_v40 }
 0x5a1   : > { %11206 = vrot.lane.b32.xlu2 %v11205_v46, %s12261_s13  ;;  %11211 = vrot.lane.b32.xlu0 %v11210_v60, %s12261_s13  ;;  %v10158_v46 = vld [vmem:[%s16805_s2 + $0x40] sm:$0xff] }
 0x5a2   : > { %11226 = vrot.lane.b32.xlu1 %v11225_v54, %s12261_s13  ;;  %3243 = vmatpush.msrb.mxu0 %v3206_v19  ;;  %v11034_v54 = vunpack.i.h.bf16 %v13877_v55 }
 0x5a3   : > { %v13898_v27 = vpop.permute.xlu2 %11051  ;;  %3272 = vmatpush.msrb.mxu1 %v3207_v48 }
 0x5a4   : > { %v11017_v59 = vpop.permute.xlu1 %11016  ;;  %v11053_v37 = vunpack.i.l.bf16 %v13898_v27 }
 0x5a5   : > { %v11019_v18 = vunpack.i.h.bf16 %v11017_v59  ;;  %v11018_v56 = vunpack.i.l.bf16 %v11017_v59 }
 0x5a7   : > { %v3204_v14 = vsel %vm401_vm6, %v11018_v56, %v11019_v18  ;;  %v3205_v50 = vsel %vm401_vm6, %v11019_v18, %v11023_v30 }
 0x5a8   : > { %3244 = vmatpush.msrb.mxu0 %v3204_v14  ;;  %3273 = vmatpush.msrb.mxu1 %v3205_v50 }
 0x5a9   : > { %11231 = vrot.lane.b32.xlu2 %v11230_v23, %s12261_s13  ;;  %11236 = vrot.lane.b32.xlu0 %v11235_v43, %s12261_s13  ;;  %v11054_v43 = vunpack.i.h.bf16 %v13898_v27 }
 0x5aa   : > { %4409 = vperm.xlu1 %10758, %v10161_v39  }
 0x5ab   : > { %v13918_v10 = vpop.permute.xlu2 %11061  ;;  %v11027_v24 = vpop.permute.xlu0 %11026 }
 0x5ac   : > { %v11029_v9 = vunpack.i.h.bf16 %v11027_v24  ;;  %v11028_v47 = vunpack.i.l.bf16 %v11027_v24  ;;  %v11042_v26 = vpop.permute.xlu1 %11041  ;;  %v3164_v24 = vld [vmem:[#allocation3 + $0x270] sm:$0xff]  ;;  %v11063_v27 = vunpack.i.l.bf16 %v13918_v10 }
 0x5ad   : > { %v11044_v38 = vunpack.i.h.bf16 %v11042_v26  ;;  %v11043_v8 = vunpack.i.l.bf16 %v11042_v26 }
 0x5ae   : > { %v3202_v60 = vsel %vm401_vm6, %v11024_v62, %v11028_v47  ;;  %v3203_v57 = vsel %vm401_vm6, %v11028_v47, %v11029_v9 }
 0x5af   : > { %3245 = vmatpush.msrb.mxu0 %v3202_v60  ;;  %3274 = vmatpush.msrb.mxu1 %v3203_v57  ;;  %v3417_v22 = vsel %vm624_vm9, %v11043_v8, %v11044_v38  ;;  %v3418_v6 = vsel %vm624_vm9, %v11044_v38, %v11033_v31 }
 0x5b0   : > { %10086 = vmatmul.msk.f32.vlgmr.msrb.gmra.mxu0 %vm418_vm8, %v3162_v29  ;;  %10090 = vmatmul.msk.f32.vlgmr.msrb.gmra.mxu1 %vm418_vm8, %v3162_v29  ;;  %v3165_v29 = vld [vmem:[#allocation3 + $0x278] sm:$0xff] }
 0x5b1   : > { %4404 = vperm.xlu2 %10759, %v10160_v63   ;;  %4399 = vperm.xlu0 %10757, %v10159_v52  }
 0x5b2   : > { %3451 = vmatpush.msra.mxu0 %v3417_v22  ;;  %3480 = vmatpush.msra.mxu1 %v3418_v6  ;;  %v11064_v22 = vunpack.i.h.bf16 %v13918_v10 }
 0x5b3   : > { %v13937_v12 = vpop.permute.xlu2 %11076  ;;  %v11037_v40 = vpop.permute.xlu0 %11036  ;;  %4394 = vperm.xlu1 %10758, %v10158_v46  }
 0x5b4   : > { %v11039_v19 = vunpack.i.h.bf16 %v11037_v40  ;;  %v11038_v48 = vunpack.i.l.bf16 %v11037_v40  ;;  %v11047_v13 = vpop.permute.xlu1 %11046  ;;  %v11078_v40 = vunpack.i.l.bf16 %v13937_v12 }
 0x5b5   : > { %v11049_v59 = vunpack.i.h.bf16 %v11047_v13  ;;  %v11048_v16 = vunpack.i.l.bf16 %v11047_v13 }
 0x5b6   : > { %v3415_v30 = vsel %vm624_vm9, %v11034_v54, %v11038_v48  ;;  %v3416_v51 = vsel %vm624_vm9, %v11038_v48, %v11039_v19  ;;  %v11079_v48 = vunpack.i.h.bf16 %v13937_v12 }
 0x5b7   : > { %3452 = vmatpush.msra.mxu0 %v3415_v30  ;;  %3481 = vmatpush.msra.mxu1 %v3416_v51  ;;  %v3413_v18 = vsel %vm624_vm9, %v11048_v16, %v11049_v59  ;;  %v3414_v56 = vsel %vm624_vm9, %v11049_v59, %v11053_v37 }
 0x5b8   : > { %10087 = vmatmul.msk.f32.gmra.mxu0 %vm418_vm8, %v3163_v17  ;;  %10091 = vmatmul.msk.f32.gmra.mxu1 %vm418_vm8, %v3163_v17 }
 0x5b9   : > { %3453 = vmatpush.msra.mxu0 %v3413_v18  ;;  %3482 = vmatpush.msra.mxu1 %v3414_v56  ;;  %v3371_v18 = vld [vmem:[#allocation3 + $0x280] sm:$0xff] }
 0x5bb   : > { %v13947_v55 = vpop.permute.xlu2 %11086  ;;  %v11057_v23 = vpop.permute.xlu0 %11056 }
 0x5bc   : > { %v11059_v14 = vunpack.i.h.bf16 %v11057_v23  ;;  %v11058_v50 = vunpack.i.l.bf16 %v11057_v23  ;;  %v11072_v39 = vpop.permute.xlu1 %11071  ;;  %v11088_v51 = vunpack.i.l.bf16 %v13947_v55 }
 0x5bd   : > { %v11074_v6 = vunpack.i.h.bf16 %v11072_v39  ;;  %v11073_v46 = vunpack.i.l.bf16 %v11072_v39 }
 0x5be   : > { %v3411_v62 = vsel %vm624_vm9, %v11054_v43, %v11058_v50  ;;  %v3412_v9 = vsel %vm624_vm9, %v11058_v50, %v11059_v14  ;;  %v3518_v14 = vld [vmem:[#allocation3 + $0x2a0] sm:$0xff] }
 0x5bf   : > { %3454 = vmatpush.msra.mxu0 %v3411_v62  ;;  %3483 = vmatpush.msra.mxu1 %v3412_v9  ;;  %v3560_v16 = vsel %vm784_vm10, %v11073_v46, %v11074_v6  ;;  %v3561_v30 = vsel %vm784_vm10, %v11074_v6, %v11078_v40  ;;  %v11089_v62 = vunpack.i.h.bf16 %v13947_v55 }
 0x5c0   : > { %10088 = vmatmul.msk.f32.gmra.mxu0 %vm418_vm8, %v3164_v24  ;;  %10092 = vmatmul.msk.f32.gmra.mxu1 %vm418_vm8, %v3164_v24 }
 0x5c3   : > { %v13954_v47 = vpop.permute.xlu2 %11111  ;;  %v11067_v26 = vpop.permute.xlu0 %11066 }
 0x5c4   : > { %v11097_v31 = vpop.permute.xlu1 %11096  ;;  %v11069_v63 = vunpack.i.h.bf16 %v11067_v26  ;;  %v11068_v52 = vunpack.i.l.bf16 %v11067_v26  ;;  %v11114_v46 = vunpack.i.h.bf16 %v13954_v47 }
 0x5c5   : > { %v11099_v38 = vunpack.i.h.bf16 %v11097_v31  ;;  %v11098_v8 = vunpack.i.l.bf16 %v11097_v31 }
 0x5c6   : > { %v3562_v54 = vsel %vm784_vm10, %v11064_v22, %v11068_v52  ;;  %v3563_v19 = vsel %vm784_vm10, %v11068_v52, %v11069_v63 }
 0x5c7   : > { %v3564_v60 = vsel %vm784_vm10, %v11098_v8, %v11099_v38  ;;  %v3565_v57 = vsel %vm784_vm10, %v11099_v38, %v11063_v27  ;;  %v11113_v27 = vunpack.i.l.bf16 %v13954_v47 }
 0x5c8   : > { %10089 = vmatmul.msk.f32.gmra.mxu0 %vm418_vm8, %v3165_v29  ;;  %10093 = vmatmul.msk.f32.gmra.mxu1 %vm418_vm8, %v3165_v29  ;;  %v3372_v29 = vld [vmem:[#allocation3 + $0x288] sm:$0xff] }
 0x5c9   : > { %3598 = vmatpush.msrb.mxu2 %v3564_v60  ;;  %3627 = vmatpush.msrb.mxu3 %v3565_v57  ;;  %v3519_v57 = vld [vmem:[#allocation3 + $0x2a8] sm:$0xff] }
 0x5cb   : > { %v11082_v13 = vpop.permute.xlu0 %11081  ;;  %3599 = vmatpush.msrb.mxu2 %v3562_v54  ;;  %3628 = vmatpush.msrb.mxu3 %v3563_v19  ;;  %v13966_v10 = vpop.permute.xlu2 %11121 }
 0x5cc   : > { %v11084_v37 = vunpack.i.h.bf16 %v11082_v13  ;;  %v11083_v17 = vunpack.i.l.bf16 %v11082_v13  ;;  %v11102_v59 = vpop.permute.xlu1 %11101 }
 0x5cd   : > { %v11104_v56 = vunpack.i.h.bf16 %v11102_v59  ;;  %v11103_v23 = vunpack.i.l.bf16 %v11102_v59  ;;  %3600 = vmatpush.msrb.mxu2 %v3560_v16  ;;  %3629 = vmatpush.msrb.mxu3 %v3561_v30  ;;  %v11123_v30 = vunpack.i.l.bf16 %v13966_v10 }
 0x5ce   : > { %v3558_v12 = vsel %vm784_vm10, %v11079_v48, %v11083_v17  ;;  %v3559_v43 = vsel %vm784_vm10, %v11083_v17, %v11084_v37  ;;  %v3373_v48 = vld [vmem:[#allocation3 + $0x290] sm:$0xff] }
 0x5cf   : > { %3601 = vmatpush.msrb.mxu2 %v3558_v12  ;;  %3630 = vmatpush.msrb.mxu3 %v3559_v43  ;;  %v3711_v50 = vsel %vm943_vm11, %v11103_v23, %v11104_v56  ;;  %v3712_v39 = vsel %vm943_vm11, %v11104_v56, %v11088_v51  ;;  %v3520_v17 = vld [vmem:[#allocation3 + $0x2b0] sm:$0xff]  ;;  %v3374_v51 = vld [vmem:[#allocation3 + $0x298] sm:$0xff] }
 0x5d0   : > { %10102 = vmatmul.msk.f32.vlgmr.msra.gmra.mxu0 %vm418_vm8, %v3371_v18  ;;  %10106 = vmatmul.msk.f32.vlgmr.msra.gmra.mxu1 %vm418_vm8, %v3371_v18  ;;  %v3521_v23 = vld [vmem:[#allocation3 + $0x2b8] sm:$0xff] }
 0x5d1   : > { %10110 = vmatmul.msk.f32.vlgmr.msrb.gmra.mxu2 %vm418_vm8, %v3518_v14  ;;  %10114 = vmatmul.msk.f32.vlgmr.msrb.gmra.mxu3 %vm418_vm8, %v3518_v14 }
 0x5d2   : > { %3745 = vmatpush.msrb.mxu0 %v3711_v50  ;;  %3774 = vmatpush.msrb.mxu1 %v3712_v39  ;;  %v11124_v39 = vunpack.i.h.bf16 %v13966_v10 }
 0x5d3   : > { %v11092_v24 = vpop.permute.xlu0 %11091  ;;  %v13981_v63 = vpop.permute.xlu2 %11136 }
 0x5d4   : > { %v11094_v9 = vunpack.i.h.bf16 %v11092_v24  ;;  %v11093_v26 = vunpack.i.l.bf16 %v11092_v24  ;;  %v11107_v31 = vpop.permute.xlu1 %11106 }
 0x5d5   : > { %v11109_v38 = vunpack.i.h.bf16 %v11107_v31  ;;  %v11108_v8 = vunpack.i.l.bf16 %v11107_v31 }
 0x5d6   : > { %v3709_v52 = vsel %vm943_vm11, %v11089_v62, %v11093_v26  ;;  %v3710_v60 = vsel %vm943_vm11, %v11093_v26, %v11094_v9  ;;  %v11138_v26 = vunpack.i.l.bf16 %v13981_v63 }
 0x5d7   : > { %3746 = vmatpush.msrb.mxu0 %v3709_v52  ;;  %3775 = vmatpush.msrb.mxu1 %v3710_v60  ;;  %v3707_v22 = vsel %vm943_vm11, %v11108_v8, %v11109_v38  ;;  %v3708_v55 = vsel %vm943_vm11, %v11109_v38, %v11113_v27  ;;  %v11139_v38 = vunpack.i.h.bf16 %v13981_v63  ;;  %v3665_v60 = vld [vmem:[#allocation3 + $0x2c0] sm:$0xff] }
 0x5d8   : > { %10103 = vmatmul.msk.f32.gmra.mxu0 %vm418_vm8, %v3372_v29  ;;  %10107 = vmatmul.msk.f32.gmra.mxu1 %vm418_vm8, %v3372_v29 }
 0x5d9   : > { %10111 = vmatmul.msk.f32.gmra.mxu2 %vm418_vm8, %v3519_v57  ;;  %10115 = vmatmul.msk.f32.gmra.mxu3 %vm418_vm8, %v3519_v57 }
 0x5da   : > { %3747 = vmatpush.msrb.mxu0 %v3707_v22  ;;  %3776 = vmatpush.msrb.mxu1 %v3708_v55 }
 0x5db   : > { %v11117_v6 = vpop.permute.xlu0 %11116  ;;  %v13994_v59 = vpop.permute.xlu2 %11146 }
 0x5dc   : > { %v11119_v40 = vunpack.i.h.bf16 %v11117_v6  ;;  %v11118_v54 = vunpack.i.l.bf16 %v11117_v6  ;;  %v11132_v19 = vpop.permute.xlu1 %11131 }
 0x5dd   : > { %v11134_v24 = vunpack.i.h.bf16 %v11132_v19  ;;  %v11133_v62 = vunpack.i.l.bf16 %v11132_v19 }
 0x5de   : > { %v3705_v13 = vsel %vm943_vm11, %v11114_v46, %v11118_v54  ;;  %v3706_v37 = vsel %vm943_vm11, %v11118_v54, %v11119_v40  ;;  %v11148_v46 = vunpack.i.l.bf16 %v13994_v59  ;;  %v3812_v54 = vld [vmem:[#allocation3 + $0x2e0] sm:$0xff] }
 0x5df   : > { %3748 = vmatpush.msrb.mxu0 %v3705_v13  ;;  %3777 = vmatpush.msrb.mxu1 %v3706_v37  ;;  %v3854_v55 = vsel %vm1103_vm13, %v11133_v62, %v11134_v24  ;;  %v3855_v6 = vsel %vm1103_vm13, %v11134_v24, %v11138_v26  ;;  %v11149_v37 = vunpack.i.h.bf16 %v13994_v59 }
 0x5e0   : > { %10104 = vmatmul.msk.f32.gmra.mxu0 %vm418_vm8, %v3373_v48  ;;  %10108 = vmatmul.msk.f32.gmra.mxu1 %vm418_vm8, %v3373_v48 }
 0x5e1   : > { %10112 = vmatmul.msk.f32.gmra.mxu2 %vm418_vm8, %v3520_v17  ;;  %10116 = vmatmul.msk.f32.gmra.mxu3 %vm418_vm8, %v3520_v17 }
 0x5e3   : > { %v11127_v47 = vpop.permute.xlu0 %11126  ;;  %v14008_v9 = vpop.permute.xlu2 %11171 }
 0x5e4   : > { %v11157_v16 = vpop.permute.xlu1 %11156  ;;  %v11129_v12 = vunpack.i.h.bf16 %v11127_v47  ;;  %v11128_v43 = vunpack.i.l.bf16 %v11127_v47  ;;  %v11174_v24 = vunpack.i.h.bf16 %v14008_v9 }
 0x5e5   : > { %v11159_v18 = vunpack.i.h.bf16 %v11157_v16  ;;  %v11158_v56 = vunpack.i.l.bf16 %v11157_v16 }
 0x5e6   : > { %v3856_v27 = vsel %vm1103_vm13, %v11124_v39, %v11128_v43  ;;  %v3857_v29 = vsel %vm1103_vm13, %v11128_v43, %v11129_v12 }
 0x5e7   : > { %v3858_v14 = vsel %vm1103_vm13, %v11158_v56, %v11159_v18  ;;  %v3859_v50 = vsel %vm1103_vm13, %v11159_v18, %v11123_v30  ;;  %v3666_v18 = vld [vmem:[#allocation3 + $0x2c8] sm:$0xff] }
 0x5e8   : > { %10105 = vmatmul.msk.f32.gmra.mxu0 %vm418_vm8, %v3374_v51  ;;  %10109 = vmatmul.msk.f32.gmra.mxu1 %vm418_vm8, %v3374_v51  ;;  %v11173_v51 = vunpack.i.l.bf16 %v14008_v9 }
 0x5e9   : > { %10113 = vmatmul.msk.f32.gmra.mxu2 %vm418_vm8, %v3521_v23  ;;  %10117 = vmatmul.msk.f32.gmra.mxu3 %vm418_vm8, %v3521_v23 }
 0x5ea   : > { %3892 = vmatpush.msra.mxu2 %v3858_v14  ;;  %3921 = vmatpush.msra.mxu3 %v3859_v50  ;;  %v3813_v14 = vld [vmem:[#allocation3 + $0x2e8] sm:$0xff] }
 0x5eb   : > { %v11142_v31 = vpop.permute.xlu0 %11141  ;;  %v11182_v17 = vpop.permute.xlu2 %11181 }
 0x5ec   : > { %v11144_v10 = vunpack.i.h.bf16 %v11142_v31  ;;  %v11143_v8 = vunpack.i.l.bf16 %v11142_v31  ;;  %3893 = vmatpush.msra.mxu2 %v3856_v27  ;;  %3922 = vmatpush.msra.mxu3 %v3857_v29  ;;  %v11162_v52 = vpop.permute.xlu1 %11161  ;;  %v3667_v27 = vld [vmem:[#allocation3 + $0x2d0] sm:$0xff] }
 0x5ed   : > { %v11164_v57 = vunpack.i.h.bf16 %v11162_v52  ;;  %v11163_v22 = vunpack.i.l.bf16 %v11162_v52 }
 0x5ee   : > { %3894 = vmatpush.msra.mxu2 %v3854_v55  ;;  %3923 = vmatpush.msra.mxu3 %v3855_v6  ;;  %v3852_v40 = vsel %vm1103_vm13, %v11139_v38, %v11143_v8  ;;  %v3853_v63 = vsel %vm1103_vm13, %v11143_v8, %v11144_v10  ;;  %v3814_v8 = vld [vmem:[#allocation3 + $0x2f0] sm:$0xff] }
 0x5ef   : > { %v4005_v19 = vsel %vm1262_vm14, %v11163_v22, %v11164_v57  ;;  %v4006_v48 = vsel %vm1262_vm14, %v11164_v57, %v11148_v46  ;;  %v3668_v57 = vld [vmem:[#allocation3 + $0x2d8] sm:$0xff] }
 0x5f0   : > { %10118 = vmatmul.msk.f32.vlgmr.msrb.gmra.mxu0 %vm418_vm8, %v3665_v60  ;;  %10122 = vmatmul.msk.f32.vlgmr.msrb.gmra.mxu1 %vm418_vm8, %v3665_v60  ;;  %v11183_v60 = vunpack.i.l.bf16 %v11182_v17 }
 0x5f1   : > { %3895 = vmatpush.msra.mxu2 %v3852_v40  ;;  %3924 = vmatpush.msra.mxu3 %v3853_v63  ;;  %v3815_v40 = vld [vmem:[#allocation3 + $0x2f8] sm:$0xff] }
 0x5f2   : > { %10126 = vmatmul.msk.f32.vlgmr.msra.gmra.mxu2 %vm418_vm8, %v3812_v54  ;;  %10130 = vmatmul.msk.f32.vlgmr.msra.gmra.mxu3 %vm418_vm8, %v3812_v54 }
 0x5f3   : > { %v11152_v13 = vpop.permute.xlu0 %11151  ;;  %4039 = vmatpush.msra.mxu0 %v4005_v19  ;;  %4068 = vmatpush.msra.mxu1 %v4006_v48  ;;  %v11197_v29 = vpop.permute.xlu2 %11196  ;;  %v11184_v19 = vunpack.i.h.bf16 %v11182_v17 }
 0x5f4   : > { %v11154_v47 = vunpack.i.h.bf16 %v11152_v13  ;;  %v11153_v16 = vunpack.i.l.bf16 %v11152_v13  ;;  %v11167_v30 = vpop.permute.xlu1 %11166 }
 0x5f5   : > { %v11169_v56 = vunpack.i.h.bf16 %v11167_v30  ;;  %v11168_v23 = vunpack.i.l.bf16 %v11167_v30 }
 0x5f6   : > { %v4003_v12 = vsel %vm1262_vm14, %v11149_v37, %v11153_v16  ;;  %v4004_v43 = vsel %vm1262_vm14, %v11153_v16, %v11154_v47  ;;  %v11198_v47 = vunpack.i.l.bf16 %v11197_v29 }
 0x5f7   : > { %4040 = vmatpush.msra.mxu0 %v4003_v12  ;;  %4069 = vmatpush.msra.mxu1 %v4004_v43  ;;  %v4001_v50 = vsel %vm1262_vm14, %v11168_v23, %v11169_v56  ;;  %v4002_v59 = vsel %vm1262_vm14, %v11169_v56, %v11173_v51  ;;  %v11199_v51 = vunpack.i.h.bf16 %v11197_v29 }
 0x5f8   : > { %10119 = vmatmul.msk.f32.gmra.mxu0 %vm418_vm8, %v3666_v18  ;;  %10123 = vmatmul.msk.f32.gmra.mxu1 %vm418_vm8, %v3666_v18 }
 0x5f9   : > { %4041 = vmatpush.msra.mxu0 %v4001_v50  ;;  %4070 = vmatpush.msra.mxu1 %v4002_v59  ;;  %v3959_v50 = vld [vmem:[#allocation3 + $0x300] sm:$0xff] }
 0x5fa   : > { %10127 = vmatmul.msk.f32.gmra.mxu2 %vm418_vm8, %v3813_v14  ;;  %10131 = vmatmul.msk.f32.gmra.mxu3 %vm418_vm8, %v3813_v14 }
 0x5fb   : > { %v11177_v39 = vpop.permute.xlu0 %11176  ;;  %v11207_v48 = vpop.permute.xlu2 %11206 }
 0x5fc   : > { %v11179_v62 = vunpack.i.h.bf16 %v11177_v39  ;;  %v11178_v26 = vunpack.i.l.bf16 %v11177_v39  ;;  %v11192_v31 = vpop.permute.xlu1 %11191  ;;  %v11208_v14 = vunpack.i.l.bf16 %v11207_v48 }
 0x5fd   : > { %v11194_v13 = vunpack.i.h.bf16 %v11192_v31  ;;  %v11193_v37 = vunpack.i.l.bf16 %v11192_v31 }
 0x5fe   : > { %v3999_v38 = vsel %vm1262_vm14, %v11174_v24, %v11178_v26  ;;  %v4000_v10 = vsel %vm1262_vm14, %v11178_v26, %v11179_v62  ;;  %v4106_v26 = vld [vmem:[#allocation3 + $0x320] sm:$0xff] }
 0x5ff   : > { %4042 = vmatpush.msra.mxu0 %v3999_v38  ;;  %4071 = vmatpush.msra.mxu1 %v4000_v10  ;;  %v4148_v12 = vsel %vm1422_vm15, %v11193_v37, %v11194_v13  ;;  %v4149_v43 = vsel %vm1422_vm15, %v11194_v13, %v11198_v47  ;;  %v11209_v10 = vunpack.i.h.bf16 %v11207_v48  ;;  %v3961_v47 = vld [vmem:[#allocation3 + $0x310] sm:$0xff] }
 0x600   : > { %10120 = vmatmul.msk.f32.gmra.mxu0 %vm418_vm8, %v3667_v27  ;;  %10124 = vmatmul.msk.f32.gmra.mxu1 %vm418_vm8, %v3667_v27 }
 0x602   : > { %10128 = vmatmul.msk.f32.gmra.mxu2 %vm418_vm8, %v3814_v8  ;;  %10132 = vmatmul.msk.f32.gmra.mxu3 %vm418_vm8, %v3814_v8 }
 0x603   : > { %v11187_v9 = vpop.permute.xlu0 %11186  ;;  %v11232_v29 = vpop.permute.xlu2 %11231 }
 0x604   : > { %v11217_v52 = vpop.permute.xlu1 %11216  ;;  %v11189_v6 = vunpack.i.h.bf16 %v11187_v9  ;;  %v11188_v46 = vunpack.i.l.bf16 %v11187_v9  ;;  %v11234_v48 = vunpack.i.h.bf16 %v11232_v29 }
 0x605   : > { %v11219_v22 = vunpack.i.h.bf16 %v11217_v52  ;;  %v11218_v55 = vunpack.i.l.bf16 %v11217_v52 }
 0x606   : > { %v4150_v16 = vsel %vm1422_vm15, %v11184_v19, %v11188_v46  ;;  %v4151_v30 = vsel %vm1422_vm15, %v11188_v46, %v11189_v6 }
 0x607   : > { %v4152_v63 = vsel %vm1422_vm15, %v11218_v55, %v11219_v22  ;;  %v4153_v54 = vsel %vm1422_vm15, %v11219_v22, %v11183_v60  ;;  %v11233_v60 = vunpack.i.l.bf16 %v11232_v29 }
 0x608   : > { %10121 = vmatmul.msk.f32.gmra.mxu0 %vm418_vm8, %v3668_v57  ;;  %10125 = vmatmul.msk.f32.gmra.mxu1 %vm418_vm8, %v3668_v57  ;;  %v3960_v57 = vld [vmem:[#allocation3 + $0x308] sm:$0xff] }
 0x609   : > { %4186 = vmatpush.msrb.mxu2 %v4152_v63  ;;  %4215 = vmatpush.msrb.mxu3 %v4153_v54 }
 0x60a   : > { %10129 = vmatmul.msk.f32.gmra.mxu2 %vm418_vm8, %v3815_v40  ;;  %10133 = vmatmul.msk.f32.gmra.mxu3 %vm418_vm8, %v3815_v40  ;;  %v4107_v40 = vld [vmem:[#allocation3 + $0x328] sm:$0xff] }
 0x60b   : > { %v11202_v17 = vpop.permute.xlu0 %11201  ;;  %4187 = vmatpush.msrb.mxu2 %v4150_v16  ;;  %4216 = vmatpush.msrb.mxu3 %v4151_v30 }
 0x60c   : > { %v11204_v18 = vunpack.i.h.bf16 %v11202_v17  ;;  %v11203_v56 = vunpack.i.l.bf16 %v11202_v17  ;;  %v11222_v23 = vpop.permute.xlu1 %11221  ;;  %v3962_v17 = vld [vmem:[#allocation3 + $0x318] sm:$0xff] }
 0x60d   : > { %v11224_v59 = vunpack.i.h.bf16 %v11222_v23  ;;  %v11223_v39 = vunpack.i.l.bf16 %v11222_v23  ;;  %4188 = vmatpush.msrb.mxu2 %v4148_v12  ;;  %4217 = vmatpush.msrb.mxu3 %v4149_v43  ;;  %v4253_v43 = vld [vmem:[#allocation3 + $0x340] sm:$0xff] }
 0x60e   : > { %v4146_v24 = vsel %vm1422_vm15, %v11199_v51, %v11203_v56  ;;  %v4147_v62 = vsel %vm1422_vm15, %v11203_v56, %v11204_v18  ;;  %v4108_v51 = vld [vmem:[#allocation3 + $0x330] sm:$0xff]  ;;  %v4109_v18 = vld [vmem:[#allocation3 + $0x338] sm:$0xff]  ;;  %v14078_v56 = vpop.f32.mrf.mxu2 }
 0x60f   : > { %4189 = vmatpush.msrb.mxu2 %v4146_v24  ;;  %4218 = vmatpush.msrb.mxu3 %v4147_v62  ;;  %v4299_v31 = vsel %vm1581_vm0, %v11223_v39, %v11224_v59  ;;  %v4300_v27 = vsel %vm1581_vm0, %v11224_v59, %v11208_v14  ;;  %v14084_v14 = vpop.f32.mrf.mxu3  ;;  %v4254_v39 = vld [vmem:[#allocation3 + $0x348] sm:$0xff] }
 0x610   : > { %10134 = vmatmul.msk.f32.vlgmr.msra.gmra.mxu0 %vm418_vm8, %v3959_v50  ;;  %10138 = vmatmul.msk.f32.vlgmr.msra.gmra.mxu1 %vm418_vm8, %v3959_v50 }
 0x611   : > { %4333 = vmatpush.msrb.mxu0 %v4299_v31  ;;  %4362 = vmatpush.msrb.mxu1 %v4300_v27  ;;  %v4255_v27 = vld [vmem:[#allocation3 + $0x350] sm:$0xff] }
 0x612   : > { %10142 = vmatmul.msk.f32.vlgmr.msrb.gmra.mxu2 %vm418_vm8, %v4106_v26  ;;  %10146 = vmatmul.msk.f32.vlgmr.msrb.gmra.mxu3 %vm418_vm8, %v4106_v26 }
 0x613   : > { %v11212_v38 = vpop.permute.xlu0 %11211 }
 0x614   : > { %v11214_v8 = vunpack.i.h.bf16 %v11212_v38  ;;  %v11213_v9 = vunpack.i.l.bf16 %v11212_v38  ;;  %v11227_v52 = vpop.permute.xlu1 %11226 }
 0x615   : > { %v11229_v22 = vunpack.i.h.bf16 %v11227_v52  ;;  %v11228_v55 = vunpack.i.l.bf16 %v11227_v52 }
 0x616   : > { %v4297_v6 = vsel %vm1581_vm0, %v11209_v10, %v11213_v9  ;;  %v4298_v46 = vsel %vm1581_vm0, %v11213_v9, %v11214_v8  ;;  %v3320_v24 = vpop.f32.mrf.mxu2  ;;  %v4256_v9 = vld [vmem:[#allocation3 + $0x358] sm:$0xff] }
 0x617   : > { %4334 = vmatpush.msrb.mxu0 %v4297_v6  ;;  %4363 = vmatpush.msrb.mxu1 %v4298_v46  ;;  %v4295_v63 = vsel %vm1581_vm0, %v11228_v55, %v11229_v22  ;;  %v4296_v54 = vsel %vm1581_vm0, %v11229_v22, %v11233_v60  ;;  %v14092_v62 = vpop.f32.mrf.mxu3 }
 0x618   : > { %10135 = vmatmul.msk.f32.gmra.mxu0 %vm418_vm8, %v3960_v57  ;;  %10139 = vmatmul.msk.f32.gmra.mxu1 %vm418_vm8, %v3960_v57 }
 0x619   : > { %4335 = vmatpush.msrb.mxu0 %v4295_v63  ;;  %4364 = vmatpush.msrb.mxu1 %v4296_v54 }
 0x61a   : > { %10143 = vmatmul.msk.f32.gmra.mxu2 %vm418_vm8, %v4107_v40  ;;  %10147 = vmatmul.msk.f32.gmra.mxu3 %vm418_vm8, %v4107_v40 }
 0x61b   : > { %v11237_v19 = vpop.permute.xlu0 %11236 }
 0x61c   : > { %v11239_v13 = vunpack.i.h.bf16 %v11237_v19  ;;  %v11238_v37 = vunpack.i.l.bf16 %v11237_v19 }
 0x61e   : > { %v4293_v16 = vsel %vm1581_vm0, %v11234_v48, %v11238_v37  ;;  %v4294_v30 = vsel %vm1581_vm0, %v11238_v37, %v11239_v13  ;;  %v3323_v29 = vpop.f32.mrf.mxu2 }
 0x61f   : > { %4336 = vmatpush.msrb.mxu0 %v4293_v16  ;;  %4365 = vmatpush.msrb.mxu1 %v4294_v30  ;;  %v3352_v38 = vpop.f32.mrf.mxu3 }
 0x620   : > { %10136 = vmatmul.msk.f32.gmra.mxu0 %vm418_vm8, %v3961_v47  ;;  %10140 = vmatmul.msk.f32.gmra.mxu1 %vm418_vm8, %v3961_v47 }
 0x622   : > { %10144 = vmatmul.msk.f32.gmra.mxu2 %vm418_vm8, %v4108_v51  ;;  %10148 = vmatmul.msk.f32.gmra.mxu3 %vm418_vm8, %v4108_v51 }
 0x626   : > { %v14108_v52 = vpop.f32.mrf.mxu2 }
 0x627   : > { %v14110_v60 = vpop.f32.mrf.mxu3 }
 0x628   : > { %10137 = vmatmul.msk.f32.gmra.mxu0 %vm418_vm8, %v3962_v17  ;;  %10141 = vmatmul.msk.f32.gmra.mxu1 %vm418_vm8, %v3962_v17 }
 0x62a   : > { %10145 = vmatmul.msk.f32.gmra.mxu2 %vm418_vm8, %v4109_v18  ;;  %10149 = vmatmul.msk.f32.gmra.mxu3 %vm418_vm8, %v4109_v18 }
 0x62d   : > { %v14080_v23 = vpop.f32.mrf.mxu0  ;;  %v14082_v12 = vpop.f32.mrf.mxu1 }
 0x630   : > { %10150 = vmatmul.msk.f32.vlgmr.msrb.gmra.mxu0 %vm418_vm8, %v4253_v43  ;;  %10154 = vmatmul.msk.f32.vlgmr.msrb.gmra.mxu1 %vm418_vm8, %v4253_v43 }
 0x635   : > { %v14088_v50 = vpop.f32.mrf.mxu0  ;;  %v14090_v59 = vpop.f32.mrf.mxu1 }
 0x636   : > { %v3321_v5 = vadd.f32 %v3320_v24, %v14088_v50  ;;  %v3350_v50 = vadd.f32 %v14092_v62, %v14090_v59 }
 0x638   : > { %10151 = vmatmul.msk.f32.gmra.mxu0 %vm418_vm8, %v4254_v39  ;;  %10155 = vmatmul.msk.f32.gmra.mxu1 %vm418_vm8, %v4254_v39 }
 0x63d   : > { %v14096_v26 = vpop.f32.mrf.mxu0  ;;  %v14098_v31 = vpop.f32.mrf.mxu1 }
 0x640   : > { %10152 = vmatmul.msk.f32.gmra.mxu0 %vm418_vm8, %v4255_v27  ;;  %10156 = vmatmul.msk.f32.gmra.mxu1 %vm418_vm8, %v4255_v27 }
 0x645   : > { %v14102_v10 = vpop.f32.mrf.mxu0  ;;  %v14104_v8 = vpop.f32.mrf.mxu1 }
 0x648   : > { %10153 = vmatmul.msk.f32.gmra.mxu0 %vm418_vm8, %v4256_v9  ;;  %10157 = vmatmul.msk.f32.gmra.mxu1 %vm418_vm8, %v4256_v9 }
 0x64d   : > { %v14112_v57 = vpop.f32.mrf.mxu0  ;;  %v14114_v22 = vpop.f32.mrf.mxu1 }
 0x654   : > { %v14116_v55 = vpop.f32.mrf.mxu2  ;;  %v14118_v6 = vpop.f32.mrf.mxu3 }
 0x655   : > { %v3459_v46 = vpop.f32.mrf.mxu0  ;;  %v3488_v40 = vpop.f32.mrf.mxu1 }
 0x656   : > { %v3499_v15 = vadd.f32 %v3459_v46, %v3321_v5 }
 0x65c   : > { %v3606_v63 = vpop.f32.mrf.mxu2  ;;  %v14120_v54 = vpop.f32.mrf.mxu3 }
 0x65d   : > { %v3462_v19 = vpop.f32.mrf.mxu0  ;;  %v3491_v48 = vpop.f32.mrf.mxu1  ;;  %v3646_v3 = vadd.f32 %v3606_v63, %v3499_v15 }
 0x664   : > { %v3609_v47 = vpop.f32.mrf.mxu2  ;;  %v3638_v16 = vpop.f32.mrf.mxu3 }
 0x665   : > { %v14122_v13 = vpop.f32.mrf.mxu0  ;;  %v14124_v37 = vpop.f32.mrf.mxu1 }
 0x66c   : > { %v14130_v17 = vpop.f32.mrf.mxu2  ;;  %v14132_v18 = vpop.f32.mrf.mxu3 }
 0x66d   : > { %v14126_v30 = vpop.f32.mrf.mxu0  ;;  %v14128_v51 = vpop.f32.mrf.mxu1 }
 0x66e   : > { %17124 = vst [vmem:[#allocation32_spill] sm:$0xff] %v14126_v30 }
 0x675   : > { %v3753_v43 = vpop.f32.mrf.mxu0  ;;  %v3782_v39 = vpop.f32.mrf.mxu1 }
 0x676   : > { %v14134_v27 = vpop.f32.mrf.mxu2  ;;  %v14136_v9 = vpop.f32.mrf.mxu3 }
 0x677   : > { %17125 = vst [vmem:[#allocation40_spill] sm:$0xff] %v14134_v27  ;;  %v3353_v27 = vadd.f32 %v3352_v38, %v14098_v31 }
 0x678   : > { %17126 = vst [vmem:[#allocation41_spill] sm:$0xff] %v14136_v9 }
 0x679   : > { %v3502_v30 = vadd.f32 %v3491_v48, %v3353_v27 }
 0x67b   : > { %v3649_v15 = vadd.f32 %v3638_v16, %v3502_v30 }
 0x67d   : > { %v3756_v0 = vpop.f32.mrf.mxu0  ;;  %v3785_v42 = vpop.f32.mrf.mxu1 }
 0x67e   : > { %v3900_v44 = vpop.f32.mrf.mxu2  ;;  %v3929_v11 = vpop.f32.mrf.mxu3 }
 0x685   : > { %v14138_v53 = vpop.f32.mrf.mxu0  ;;  %v14140_v25 = vpop.f32.mrf.mxu1 }
 0x686   : > { %v3903_v35 = vpop.f32.mrf.mxu2  ;;  %v3932_v41 = vpop.f32.mrf.mxu3 }
 0x68d   : > { %v14142_v33 = vpop.f32.mrf.mxu0  ;;  %v14144_v20 = vpop.f32.mrf.mxu1 }
 0x68e   : > { %17127 = vst [vmem:[#allocation33_spill] sm:$0xff] %v14142_v33  ;;  %v14146_v32 = vpop.f32.mrf.mxu2  ;;  %v14148_v34 = vpop.f32.mrf.mxu3 }
 0x68f   : > { %17128 = vst [vmem:[#allocation34_spill] sm:$0xff] %v14144_v20  ;;  %v3793_v20 = vadd.f32 %v3753_v43, %v3646_v3  ;;  %v3796_v43 = vadd.f32 %v3785_v42, %v3649_v15 }
 0x695   : > { %v4047_v7 = vpop.f32.mrf.mxu0  ;;  %v4076_v36 = vpop.f32.mrf.mxu1 }
 0x696   : > { %v14150_v61 = vpop.f32.mrf.mxu2  ;;  %v14152_v28 = vpop.f32.mrf.mxu3 }
 0x697   : > { %17129 = vst [vmem:[#allocation35_spill] sm:$0xff] %v14150_v61  ;;  %v3324_v61 = vadd.f32 %v3323_v29, %v14096_v26 }
 0x698   : > { %17130 = vst [vmem:[#allocation36_spill] sm:$0xff] %v14152_v28  ;;  %v3940_v28 = vadd.f32 %v3900_v44, %v3793_v20  ;;  %v3356_v20 = vadd.f32 %v14110_v60, %v14104_v8  ;;  %v3347_v8 = vadd.f32 %v14084_v14, %v14082_v12  ;;  %v3318_v60 = vadd.f32 %v14078_v56, %v14080_v23 }
 0x699   : > { %v3501_v9 = vadd.f32 %v3462_v19, %v3324_v61  ;;  %v3327_v61 = vadd.f32 %v14108_v52, %v14102_v10 }
 0x69b   : > { %v3648_v5 = vadd.f32 %v3609_v47, %v3501_v9  ;;  %v3503_v62 = vadd.f32 %v14122_v13, %v3327_v61  ;;  %v4405_v13 = vpop.permute.xlu2 %4404  ;;  %v4410_v9 = vpop.permute.xlu1 %4409 }
 0x69d   : > { %v4050_v1 = vpop.f32.mrf.mxu0  ;;  %v4079_v58 = vpop.f32.mrf.mxu1  ;;  %v3795_v3 = vadd.f32 %v3756_v0, %v3648_v5  ;;  %v3504_v0 = vadd.f32 %v14124_v37, %v3356_v20  ;;  %v3650_v10 = vadd.f32 %v14130_v17, %v3503_v62  ;;  %v17139_v20 = vld [vmem:[#allocation33_spill] sm:$0xff] }
 0x69e   : > { %v4194_v49 = vpop.f32.mrf.mxu2  ;;  %v4223_v21 = vpop.f32.mrf.mxu3 }
 0x69f   : > { %v3942_v59 = vadd.f32 %v3903_v35, %v3795_v3  ;;  %v3651_v52 = vadd.f32 %v14132_v18, %v3504_v0  ;;  %v17138_v3 = vld [vmem:[#allocation34_spill] sm:$0xff] }
 0x6a1   : > { %v4089_v26 = vadd.f32 %v4050_v1, %v3942_v59  ;;  %v3797_v1 = vadd.f32 %v14138_v53, %v3650_v10  ;;  %v3798_v12 = vadd.f32 %v14140_v25, %v3651_v52 }
 0x6a3   : > { %v3944_v47 = vadd.f32 %v14146_v32, %v3797_v1  ;;  %v3945_v56 = vadd.f32 %v14148_v34, %v3798_v12  ;;  %v17135_v32 = vld [vmem:[#allocation32_spill] sm:$0xff]  ;;  %v17136_v34 = vld [vmem:[#allocation41_spill] sm:$0xff] }
 0x6a5   : > { %v14154_v2 = vpop.f32.mrf.mxu0  ;;  %v14156_v4 = vpop.f32.mrf.mxu1 }
 0x6a6   : > { %17131 = vst [vmem:[#allocation37_spill] sm:$0xff] %v14154_v2  ;;  %v4087_v2 = vadd.f32 %v4047_v7, %v3940_v28  ;;  %v4197_v28 = vpop.f32.mrf.mxu2  ;;  %v4226_v7 = vpop.f32.mrf.mxu3 }
 0x6a7   : > { %v4236_v35 = vadd.f32 %v4197_v28, %v4089_v26  ;;  %v17140_v28 = vld [vmem:[#allocation36_spill] sm:$0xff] }
 0x6a8   : > { %v4234_v24 = vadd.f32 %v4194_v49, %v4087_v2  ;;  %v3943_v49 = vadd.f32 %v3932_v41, %v3796_v43 }
 0x6aa   : > { %v4090_v29 = vadd.f32 %v4079_v58, %v3943_v49  ;;  %v17141_v49 = vld [vmem:[#allocation35_spill] sm:$0xff] }
 0x6ac   : > { %v4237_v41 = vadd.f32 %v4226_v7, %v4090_v29 }
 0x6ad   : > { %v14159_v45 = vpop.f32.mrf.mxu0  ;;  %v14161_v33 = vpop.f32.mrf.mxu1  ;;  %v17134_v25 = vld [vmem:[#allocation37_spill] sm:$0xff] }
 0x6ae   : > { %17132 = vst [vmem:[#allocation38_spill] sm:$0xff] %v14159_v45  ;;  %v14167_v45 = vpop.permute.xlu0 %4399  ;;  %v4200_v17 = vpop.f32.mrf.mxu2 }
 0x6af   : > { %17133 = vst [vmem:[#allocation39_spill] sm:$0xff] %v14161_v33  ;;  %v3500_v33 = vadd.f32 %v3488_v40, %v3350_v50  ;;  %v3498_v40 = vadd.f32 %v14114_v22, %v3347_v8  ;;  %v4229_v18 = vpop.f32.mrf.mxu3 }
 0x6b1   : > { %v3647_v44 = vadd.f32 %v14120_v54, %v3500_v33  ;;  %v3645_v37 = vadd.f32 %v14118_v6, %v3498_v40 }
 0x6b3   : > { %v3794_v42 = vadd.f32 %v3782_v39, %v3647_v44  ;;  %v3792_v30 = vadd.f32 %v14128_v51, %v3645_v37  ;;  %v4092_v39 = vadd.f32 %v14156_v4, %v3945_v56  ;;  %v17146_v37 = vld [vmem:[#allocation9_spill] sm:$0xff] }
 0x6b5   : > { %v4341_v46 = vpop.f32.mrf.mxu0  ;;  %v4370_v63 = vpop.f32.mrf.mxu1  ;;  %v3941_v33 = vadd.f32 %v3929_v11, %v3794_v42  ;;  %v3497_v11 = vadd.f32 %v14112_v57, %v3318_v60  ;;  %v4239_v15 = vadd.f32 %v4229_v18, %v4092_v39  ;;  %v17148_v39 = vld [vmem:[#allocation6_spill] sm:$0xff] }
 0x6b6   : > { %v4381_v31 = vadd.f32 %v4341_v46, %v4234_v24  ;;  %v17142_v62 = vld [vmem:[#allocation39_spill] sm:$0xff] }
 0x6b7   : > { %v4088_v14 = vadd.f32 %v4076_v36, %v3941_v33  ;;  %v3644_v53 = vadd.f32 %v14116_v55, %v3497_v11  ;;  %v4091_v36 = vadd.f32 %v17134_v25, %v3944_v47  ;;  %v17137_v55 = vld [vmem:[#allocation40_spill] sm:$0xff] }
 0x6b8   : > { %v4414_v2 = vadd.f32 %v14167_v45, %v4381_v31 }
 0x6b9   : > { %v4235_v23 = vadd.f32 %v4223_v21, %v4088_v14  ;;  %v3791_v50 = vadd.f32 %v17135_v32, %v3644_v53  ;;  %v3939_v21 = vadd.f32 %v17136_v34, %v3792_v30  ;;  %v4238_v5 = vadd.f32 %v4200_v17, %v4091_v36  ;;  %v17147_v17 = vld [vmem:[#allocation22_spill] sm:$0xff] }
 0x6ba   : > { %v4422_v38 = vmax.f32 %v4414_v2, 0.0 }
 0x6bb   : > { %v4382_v57 = vadd.f32 %v4370_v63, %v4235_v23  ;;  %v3938_v51 = vadd.f32 %v17137_v55, %v3791_v50  ;;  %v4086_v4 = vadd.f32 %v17138_v3, %v3939_v21 }
 0x6bc   : > { %4440 = vrot.lane.b32.xlu0 %v4422_v38, %s12245_s28  ;;  %v17143_v38 = vld [vmem:[#allocation38_spill] sm:$0xff] }
 0x6bd   : > { %v4344_v58 = vpop.f32.mrf.mxu0  ;;  %v4373_v54 = vpop.f32.mrf.mxu1  ;;  %v4415_v63 = vadd.f32 %v14167_v45, %v4382_v57  ;;  %v4085_v61 = vadd.f32 %v17139_v20, %v3938_v51  ;;  %v4233_v7 = vadd.f32 %v17140_v28, %v4086_v4  ;;  %v17149_v28 = vld [vmem:[#allocation11_spill] sm:$0xff] }
 0x6be   : > { %v4383_v19 = vadd.f32 %v4344_v58, %v4236_v35  ;;  %v4384_v48 = vadd.f32 %v4373_v54, %v4237_v41  ;;  %v4395_v45 = vpop.permute.xlu1 %4394  ;;  %v17144_v54 = vld [vmem:[#allocation20_spill] sm:$0xff] }
 0x6bf   : > { %v4232_v2 = vadd.f32 %v17141_v49, %v4085_v61  ;;  %v4380_v0 = vadd.f32 %v17142_v62, %v4233_v7  ;;  %v4423_v42 = vmax.f32 %v4415_v63, 0.0 }
 0x6c0   : > { %v4416_v22 = vadd.f32 %v4405_v13, %v4383_v19  ;;  %v4417_v16 = vadd.f32 %v4405_v13, %v4384_v48  ;;  %v17145_v13 = vld [vmem:[#allocation10_spill] sm:$0xff] }
 0x6c1   : > { %v4379_v8 = vadd.f32 %v17143_v38, %v4232_v2  ;;  %v4413_v10 = vadd.f32 %v4395_v45, %v4380_v0  ;;  %v17150_v2 = vld [vmem:[#allocation8_spill] sm:$0xff] }
 0x6c2   : > { %v4424_v27 = vmax.f32 %v4416_v22, 0.0  ;;  %v4425_v6 = vmax.f32 %v4417_v16, 0.0 }
 0x6c3   : > { %v4412_v52 = vadd.f32 %v4395_v45, %v4379_v8  ;;  %v4421_v33 = vmax.f32 %v4413_v10, 0.0 }
 0x6c4   : > { %4446 = vrot.lane.b32.xlu2 %v4425_v6, %s12245_s28  ;;  %4444 = vrot.lane.b32.xlu1 %v4424_v27, %s12245_s28 }
 0x6c5   : > { %v4347_v24 = vpop.f32.mrf.mxu0  ;;  %v4376_v46 = vpop.f32.mrf.mxu1  ;;  %v4420_v35 = vmax.f32 %v4412_v52, 0.0 }
 0x6c6   : > { %v4385_v43 = vadd.f32 %v4347_v24, %v4238_v5  ;;  %v4386_v31 = vadd.f32 %v4376_v46, %v4239_v15 }
 0x6c8   : > { %v4418_v44 = vadd.f32 %v4410_v9, %v4385_v43  ;;  %v4419_v59 = vadd.f32 %v4410_v9, %v4386_v31 }
 0x6ca   : > { %v4426_v26 = vmax.f32 %v4418_v44, 0.0  ;;  %v4427_v29 = vmax.f32 %v4419_v59, 0.0 }
 0x6cc   : > { %4450 = vrot.lane.b32.xlu0 %v4427_v29, %s12245_s28  ;;  %4442 = vrot.lane.b32.xlu1 %v4423_v42, %s12245_s28  ;;  %v17151_v29 = vld [vmem:[#allocation7_spill] sm:$0xff] }
 0x6cd   : > { %4448 = vrot.lane.b32.xlu2 %v4426_v26, %s12245_s28 }
 0x6d4   : > { %4438 = vrot.lane.b32.xlu0 %v4421_v33, %s12245_s28 }
 0x6d5   : > { %4436 = vrot.lane.b32.xlu2 %v4420_v35, %s12245_s28 }
 0x71e   : > { %v4447_v41 = vpop.permute.xlu2 %4446 }
 0x71f   : > { %4476 = vst.msk [vmem:[#allocation2 + $0x40] sm:$0xff] %vm260_vm2, %v4447_v41 }
 0x726   : > { %v14220_v14 = vld [vmem:[#allocation2 + $0x40] sm:$0xff] }
 0x727   : > { %v4449_v60 = vpop.permute.xlu2 %4448  ;;  %v4513_v47 = vmul.f32 %v14220_v14, %v17146_v37  ;;  %v4722_v52 = vmul.f32 %v14220_v14, %v17151_v29 }
 0x728   : > { %4477 = vst.msk [vmem:[#allocation2 + $0x48] sm:$0xff] %vm277_vm1, %v4449_v60 }
 0x72e   : > { %v4441_v40 = vpop.permute.xlu0 %4440 }
 0x72f   : > { %4471 = vst.msk [vmem:[#allocation2 + $0x18] sm:$0xff] %vm277_vm1, %v4441_v40  ;;  %v4437_v1 = vpop.permute.xlu2 %4436  ;;  %v14215_v58 = vld [vmem:[#allocation2 + $0x48] sm:$0xff] }
 0x730   : > { %4468 = vst.msk [vmem:[#allocation2] sm:$0xff] %vm277_vm1, %v4437_v1  ;;  %v4494_v12 = vmul.f32 %v14215_v58, %v17144_v54  ;;  %v4514_v57 = vmul.f32 %v14215_v58, %v17148_v39  ;;  %v4723_v62 = vmul.f32 %v14215_v58, %v17150_v2 }
 0x732   : > { %4668 = vmatpush.msra.mxu0 %v4494_v12  ;;  %v17152_v12 = vld [vmem:[#allocation15_spill] sm:$0xff] }
 0x736   : > { %v4445_v19 = vpop.permute.xlu1 %4444  ;;  %v14233_v53 = vld [vmem:[#allocation2 + $0x18] sm:$0xff] }
 0x737   : > { %v14223_v48 = vsel %vm260_vm2, %v4445_v19, %v4447_v41  ;;  %4474 = vst.msk [vmem:[#allocation2 + $0x30] sm:$0xff] %vm277_vm1, %v4445_v19  ;;  %v14242_v36 = vld [vmem:[#allocation2] sm:$0xff]  ;;  %v4490_v9 = vmul.f32 %v14233_v53, %v17144_v54  ;;  %v4508_v4 = vmul.f32 %v14233_v53, %v17148_v39  ;;  %v4717_v33 = vmul.f32 %v14233_v53, %v17150_v2 }
 0x738   : > { %v4512_v11 = vmul.f32 %v14223_v48, %v17145_v13  ;;  %v4493_v50 = vmul.f32 %v14223_v48, %v17147_v17  ;;  %v4488_v34 = vmul.f32 %v14242_v36, %v17144_v54  ;;  %v4505_v44 = vmul.f32 %v14242_v36, %v17148_v39 }
 0x739   : > { %v4721_v8 = vmul.f32 %v14223_v48, %v17149_v28 }
 0x73a   : > { %v11240_v56 = vpack.i.bf16 %v4513_v47, %v4512_v11  ;;  %v4714_v11 = vmul.f32 %v14242_v36, %v17150_v2 }
 0x73b   : > { %v11275_v41 = vpack.i.bf16 %v4722_v52, %v4721_v8 }
 0x73c   : > { %11241 = vrot.lane.b32.xlu0 %v11240_v56, %s12252_s20  ;;  %v17153_v56 = vld [vmem:[#allocation16_spill] sm:$0xff] }
 0x73e   : > { %v4451_v23 = vpop.permute.xlu0 %4450  ;;  %v4443_v22 = vpop.permute.xlu1 %4442  ;;  %v14231_v16 = vld [vmem:[#allocation2 + $0x30] sm:$0xff] }
 0x73f   : > { %v14236_v30 = vsel %vm260_vm2, %v4449_v60, %v4451_v23  ;;  %4479 = vst.msk [vmem:[#allocation2 + $0x58] sm:$0xff] %vm260_vm2, %v4451_v23  ;;  %v4492_v25 = vmul.f32 %v14231_v16, %v17144_v54  ;;  %v14251_v6 = vsel %vm260_vm2, %v4441_v40, %v4443_v22  ;;  %v4511_v24 = vmul.f32 %v14231_v16, %v17148_v39 }
 0x740   : > { %4473 = vst.msk [vmem:[#allocation2 + $0x28] sm:$0xff] %vm260_vm2, %v4443_v22  ;;  %v4495_v18 = vmul.f32 %v14236_v30, %v17147_v17  ;;  %v4515_v27 = vmul.f32 %v14236_v30, %v17145_v13  ;;  %v4491_v21 = vmul.f32 %v14251_v6, %v17147_v17  ;;  %v4509_v55 = vmul.f32 %v14251_v6, %v17145_v13 }
 0x741   : > { %4669 = vmatpush.msra.mxu0 %v4492_v25  ;;  %v4724_v7 = vmul.f32 %v14236_v30, %v17149_v28  ;;  %v4718_v45 = vmul.f32 %v14251_v6, %v17149_v28  ;;  %v4720_v10 = vmul.f32 %v14231_v16, %v17150_v2  ;;  %v5008_v23 = vmul.f32 %v14242_v36, %v17153_v56 }
 0x742   : > { %4697 = vmatpush.msra.mxu1 %v4495_v18  ;;  %v11250_v32 = vpack.i.bf16 %v4515_v27, %v4514_v57  ;;  %v11255_v31 = vpack.i.bf16 %v4509_v55, %v4508_v4  ;;  %v17154_v27 = vld [vmem:[#allocation17_spill] sm:$0xff] }
 0x743   : > { %4670 = vmatpush.msra.mxu0 %v4490_v9  ;;  %v11280_v26 = vpack.i.bf16 %v4724_v7, %v4723_v62  ;;  %v11285_v60 = vpack.i.bf16 %v4718_v45, %v4717_v33  ;;  %v5015_v9 = vmul.f32 %v14223_v48, %v17154_v27  ;;  %v5012_v4 = vmul.f32 %v14251_v6, %v17154_v27 }
 0x744   : > { %11251 = vrot.lane.b32.xlu1 %v11250_v32, %s12252_s20  ;;  %4698 = vmatpush.msra.mxu1 %v4493_v50  ;;  %v5018_v32 = vmul.f32 %v14236_v30, %v17154_v27  ;;  %v5014_v50 = vmul.f32 %v14231_v16, %v17153_v56 }
 0x745   : > { %4671 = vmatpush.msra.mxu0 %v4488_v34  ;;  %v5016_v34 = vmul.f32 %v14220_v14, %v17152_v12 }
 0x746   : > { %v4439_v5 = vpop.permute.xlu0 %4438  ;;  %v14262_v15 = vld [vmem:[#allocation2 + $0x58] sm:$0xff]  ;;  %4699 = vmatpush.msra.mxu1 %v4491_v21  ;;  %v5017_v21 = vmul.f32 %v14215_v58, %v17153_v56 }
 0x747   : > { %v14267_v51 = vsel %vm260_vm2, %v4437_v1, %v4439_v5  ;;  %4470 = vst.msk [vmem:[#allocation2 + $0x10] sm:$0xff] %vm260_vm2, %v4439_v5  ;;  %v4516_v46 = vmul.f32 %v14262_v15, %v17146_v37  ;;  %v14278_v43 = vld [vmem:[#allocation2 + $0x28] sm:$0xff]  ;;  %v4725_v38 = vmul.f32 %v14262_v15, %v17151_v29  ;;  %v5019_v57 = vmul.f32 %v14262_v15, %v17152_v12 }
 0x748   : > { %v4489_v3 = vmul.f32 %v14267_v51, %v17147_v17  ;;  %v4510_v20 = vmul.f32 %v14278_v43, %v17146_v37  ;;  %v4506_v59 = vmul.f32 %v14267_v51, %v17145_v13  ;;  %v4719_v40 = vmul.f32 %v14278_v43, %v17151_v29 }
 0x749   : > { %v11245_v63 = vpack.i.bf16 %v4511_v24, %v4516_v46  ;;  %v11270_v35 = vpack.i.bf16 %v4720_v10, %v4725_v38  ;;  %v5013_v19 = vmul.f32 %v14278_v43, %v17152_v12  ;;  %v4715_v47 = vmul.f32 %v14267_v51, %v17149_v28  ;;  %v17155_v46 = vld [vmem:[#allocation12_spill] sm:$0xff] }
 0x74a   : > { %4700 = vmatpush.msra.mxu1 %v4489_v3  ;;  %v11260_v0 = vpack.i.bf16 %v4505_v44, %v4510_v20  ;;  %v11290_v22 = vpack.i.bf16 %v4714_v11, %v4719_v40  ;;  %v11300_v5 = vpack.i.bf16 %v5014_v50, %v5019_v57  ;;  %v11305_v55 = vpack.i.bf16 %v5016_v34, %v5015_v9  ;;  %v17157_v20 = vld [vmem:[#allocation13_spill] sm:$0xff]  ;;  %v17158_v40 = vld [vmem:[#allocation24_spill] sm:$0xff]  ;;  %v17160_v9 = vld [vmem:[#allocation26_spill] sm:$0xff] }
 0x74b   : > { %11246 = vrot.lane.b32.xlu2 %v11245_v63, %s12252_s20  ;;  %v11320_v18 = vpack.i.bf16 %v5008_v23, %v5013_v19  ;;  %v11335_v24 = vpack.i.bf16 %v5018_v32, %v5017_v21  ;;  %v4872_v3 = vmul.f32 %v14262_v15, %v17155_v46  ;;  %v17156_v63 = vld [vmem:[#allocation14_spill] sm:$0xff]  ;;  %v4867_v7 = vmul.f32 %v14231_v16, %v17157_v20 }
 0x74c   : > { %11256 = vrot.lane.b32.xlu1 %v11255_v31, %s12252_s20  ;;  %v4871_v31 = vmul.f32 %v14236_v30, %v17156_v63  ;;  %v5011_v44 = vmul.f32 %v14233_v53, %v17153_v56  ;;  %v4865_v38 = vmul.f32 %v14251_v6, %v17156_v63  ;;  %v4869_v8 = vmul.f32 %v14220_v14, %v17155_v46 }
 0x74d   : > { %v5009_v45 = vmul.f32 %v14267_v51, %v17154_v27  ;;  %v4864_v10 = vmul.f32 %v14233_v53, %v17157_v20  ;;  %v4861_v19 = vmul.f32 %v14242_v36, %v17157_v20  ;;  %v4862_v11 = vmul.f32 %v14267_v51, %v17156_v63 }
 0x74e   : > { %v14284_v61 = vld [vmem:[#allocation2 + $0x10] sm:$0xff]  ;;  %v11315_v62 = vpack.i.bf16 %v5012_v4, %v5011_v44  ;;  %v5313_v57 = vmul.f32 %v14262_v15, %v17158_v40  ;;  %v5309_v32 = vmul.f32 %v14223_v48, %v17160_v9  ;;  %v5312_v50 = vmul.f32 %v14236_v30, %v17160_v9  ;;  %v17161_v4 = vld [vmem:[#allocation19_spill] sm:$0xff]  ;;  %v17162_v44 = vld [vmem:[#allocation21_spill] sm:$0xff] }
 0x74f   : > { %v4507_v49 = vmul.f32 %v14284_v61, %v17146_v37  ;;  %v4716_v1 = vmul.f32 %v14284_v61, %v17151_v29  ;;  %v5310_v21 = vmul.f32 %v14220_v14, %v17158_v40 }
 0x751   : > { %v11265_v42 = vpack.i.bf16 %v4507_v49, %v4506_v59  ;;  %v11295_v25 = vpack.i.bf16 %v4716_v1, %v4715_v47  ;;  %v4870_v59 = vmul.f32 %v14215_v58, %v17157_v20  ;;  %v11310_v49 = vpack.i.bf16 %v4867_v7, %v4872_v3  ;;  %v17159_v47 = vld [vmem:[#allocation25_spill] sm:$0xff] }
 0x752   : > { %v5307_v1 = vmul.f32 %v14278_v43, %v17158_v40  ;;  %v5302_v23 = vmul.f32 %v14242_v36, %v17159_v47  ;;  %v5308_v34 = vmul.f32 %v14231_v16, %v17159_v47  ;;  %v5306_v7 = vmul.f32 %v14251_v6, %v17160_v9 }
 0x753   : > { %11261 = vrot.lane.b32.xlu2 %v11260_v0, %s12252_s20  ;;  %11266 = vrot.lane.b32.xlu0 %v11265_v42, %s12252_s20  ;;  %v11340_v0 = vpack.i.bf16 %v4871_v31, %v4870_v59  ;;  %v4868_v42 = vmul.f32 %v14223_v48, %v17156_v63  ;;  %v5166_v31 = vmul.f32 %v14262_v15, %v17161_v4 }
 0x754   : > { %11281 = vrot.lane.b32.xlu1 %v11280_v26, %s12251_s18  ;;  %v5010_v26 = vmul.f32 %v14284_v61, %v17152_v12  ;;  %v5165_v59 = vmul.f32 %v14236_v30, %v17162_v44 }
 0x755   : > { %v11325_v52 = vpack.i.bf16 %v4869_v8, %v4868_v42 }
 0x756   : > { %v11330_v33 = vpack.i.bf16 %v5010_v26, %v5009_v45  ;;  %v5162_v45 = vmul.f32 %v14223_v48, %v17162_v44 }
 0x75b   : > { %11271 = vrot.lane.b32.xlu2 %v11270_v35, %s12251_s18  ;;  %11276 = vrot.lane.b32.xlu0 %v11275_v41, %s12251_s18  ;;  %v11345_v35 = vpack.i.bf16 %v4865_v38, %v4864_v10  ;;  %v4866_v41 = vmul.f32 %v14278_v43, %v17155_v46  ;;  %v5304_v10 = vmul.f32 %v14284_v61, %v17158_v40 }
 0x75c   : > { %11286 = vrot.lane.b32.xlu1 %v11285_v60, %s12251_s18  ;;  %v4863_v60 = vmul.f32 %v14284_v61, %v17155_v46 }
 0x763   : > { %11291 = vrot.lane.b32.xlu2 %v11290_v22, %s12251_s18  ;;  %11296 = vrot.lane.b32.xlu0 %v11295_v25, %s12251_s18  ;;  %v11350_v22 = vpack.i.bf16 %v4861_v19, %v4866_v41  ;;  %v11355_v25 = vpack.i.bf16 %v4863_v60, %v4862_v11  ;;  %v5160_v11 = vmul.f32 %v14278_v43, %v17161_v4 }
 0x764   : > { %11321 = vrot.lane.b32.xlu1 %v11320_v18, %s12257_s7  ;;  %v11380_v18 = vpack.i.bf16 %v5302_v23, %v5307_v1  ;;  %v5157_v23 = vmul.f32 %v14284_v61, %v17161_v4 }
 0x76b   : > { %11301 = vrot.lane.b32.xlu2 %v11300_v5, %s12257_s7  ;;  %11306 = vrot.lane.b32.xlu0 %v11305_v55, %s12257_s7  ;;  %v5311_v5 = vmul.f32 %v14215_v58, %v17159_v47  ;;  %v11360_v55 = vpack.i.bf16 %v5308_v34, %v5313_v57  ;;  %v5156_v57 = vmul.f32 %v14267_v51, %v17162_v44 }
 0x76c   : > { %11336 = vrot.lane.b32.xlu1 %v11335_v24, %s12257_s7  ;;  %v11365_v24 = vpack.i.bf16 %v5310_v21, %v5309_v32  ;;  %v17165_v32 = vld [vmem:[#allocation27_spill] sm:$0xff] }
 0x76d   : > { %v11395_v3 = vpack.i.bf16 %v5312_v50, %v5311_v5  ;;  %v5596_v50 = vmul.f32 %v14242_v36, %v17165_v32  ;;  %v11415_v21 = vpack.i.bf16 %v5157_v23, %v5156_v57 }
 0x773   : > { %11311 = vrot.lane.b32.xlu2 %v11310_v49, %s12254_s25  ;;  %11316 = vrot.lane.b32.xlu0 %v11315_v62, %s12257_s7  ;;  %v17163_v49 = vld [vmem:[#allocation18_spill] sm:$0xff] }
 0x774   : > { %11341 = vrot.lane.b32.xlu1 %v11340_v0, %s12254_s25  ;;  %v5161_v62 = vmul.f32 %v14231_v16, %v17163_v49  ;;  %v5305_v0 = vmul.f32 %v14233_v53, %v17159_v47  ;;  %v5164_v42 = vmul.f32 %v14215_v58, %v17163_v49  ;;  %v5158_v41 = vmul.f32 %v14233_v53, %v17163_v49 }
 0x776   : > { %v11370_v26 = vpack.i.bf16 %v5161_v62, %v5166_v31  ;;  %v11375_v38 = vpack.i.bf16 %v5306_v7, %v5305_v0  ;;  %v11400_v8 = vpack.i.bf16 %v5165_v59, %v5164_v42  ;;  %v5602_v59 = vmul.f32 %v14231_v16, %v17165_v32 }
 0x777   : > { %v5605_v0 = vmul.f32 %v14215_v58, %v17165_v32 }
 0x77b   : > { %11326 = vrot.lane.b32.xlu2 %v11325_v52, %s12254_s25  ;;  %11331 = vrot.lane.b32.xlu0 %v11330_v33, %s12257_s7  ;;  %v5159_v52 = vmul.f32 %v14251_v6, %v17162_v44  ;;  %v5163_v33 = vmul.f32 %v14220_v14, %v17161_v4 }
 0x77c   : > { %11346 = vrot.lane.b32.xlu1 %v11345_v35, %s12254_s25  ;;  %v5303_v35 = vmul.f32 %v14267_v51, %v17160_v9 }
 0x77d   : > { %v11385_v60 = vpack.i.bf16 %v5163_v33, %v5162_v45  ;;  %v11405_v19 = vpack.i.bf16 %v5159_v52, %v5158_v41  ;;  %v17167_v45 = vld [vmem:[#allocation28_spill] sm:$0xff]  ;;  %v17168_v33 = vld [vmem:[#allocation29_spill] sm:$0xff]  ;;  %v4497_v41 = vld [vmem:[#allocation3 + $0x360] sm:$0xff] }
 0x77e   : > { %v11390_v1 = vpack.i.bf16 %v5304_v10, %v5303_v35  ;;  %v5460_v10 = vmul.f32 %v14262_v15, %v17167_v45  ;;  %v5459_v35 = vmul.f32 %v14236_v30, %v17168_v33  ;;  %10174 = vmatmul.msk.f32.vlgmr.msra.gmra.mxu1 %vm418_vm8, %v4497_v41  ;;  %10170 = vmatmul.msk.f32.vlgmr.msra.gmra.mxu0 %vm418_vm8, %v4497_v41 }
 0x783   : > { %11351 = vrot.lane.b32.xlu2 %v11350_v22, %s12254_s25  ;;  %11356 = vrot.lane.b32.xlu0 %v11355_v25, %s12254_s25  ;;  %v17164_v22 = vld [vmem:[#allocation30_spill] sm:$0xff] }
 0x784   : > { %11381 = vrot.lane.b32.xlu1 %v11380_v18, %s12259_s11  ;;  %v5601_v25 = vmul.f32 %v14278_v43, %v17164_v22  ;;  %v5155_v18 = vmul.f32 %v14242_v36, %v17163_v49  ;;  %v5604_v62 = vmul.f32 %v14220_v14, %v17164_v22  ;;  %v5598_v57 = vmul.f32 %v14284_v61, %v17164_v22 }
 0x786   : > { %v11410_v34 = vpack.i.bf16 %v5155_v18, %v5160_v11  ;;  %v11440_v5 = vpack.i.bf16 %v5596_v50, %v5601_v25 }
 0x78b   : > { %11361 = vrot.lane.b32.xlu2 %v11360_v55, %s12259_s11  ;;  %11366 = vrot.lane.b32.xlu0 %v11365_v24, %s12259_s11  ;;  %v5607_v24 = vmul.f32 %v14262_v15, %v17164_v22 }
 0x78c   : > { %11396 = vrot.lane.b32.xlu1 %v11395_v3, %s12259_s11  ;;  %v17166_v3 = vld [vmem:[#allocation31_spill] sm:$0xff] }
 0x78d   : > { %v5603_v31 = vmul.f32 %v14223_v48, %v17166_v3  ;;  %v5606_v7 = vmul.f32 %v14236_v30, %v17166_v3  ;;  %v11420_v42 = vpack.i.bf16 %v5602_v59, %v5607_v24  ;;  %v5600_v52 = vmul.f32 %v14251_v6, %v17166_v3 }
 0x78e   : > { %v5597_v50 = vmul.f32 %v14267_v51, %v17166_v3 }
 0x793   : > { %11371 = vrot.lane.b32.xlu2 %v11370_v26, %s12258_s10  ;;  %11376 = vrot.lane.b32.xlu0 %v11375_v38, %s12259_s11  ;;  %v11425_v26 = vpack.i.bf16 %v5604_v62, %v5603_v31  ;;  %v11455_v38 = vpack.i.bf16 %v5606_v7, %v5605_v0 }
 0x794   : > { %11401 = vrot.lane.b32.xlu1 %v11400_v8, %s12258_s10 }
 0x79b   : > { %11386 = vrot.lane.b32.xlu2 %v11385_v60, %s12258_s10  ;;  %11391 = vrot.lane.b32.xlu0 %v11390_v1, %s12259_s11  ;;  %v17169_v60 = vld [vmem:[#allocation23_spill] sm:$0xff] }
 0x79c   : > { %11406 = vrot.lane.b32.xlu1 %v11405_v19, %s12258_s10  ;;  %v5455_v1 = vmul.f32 %v14231_v16, %v17169_v60  ;;  %v5599_v19 = vmul.f32 %v14233_v53, %v17165_v32  ;;  %v5458_v15 = vmul.f32 %v14215_v58, %v17169_v60  ;;  %v5456_v16 = vmul.f32 %v14223_v48, %v17168_v33 }
 0x79d   : > { %v5457_v58 = vmul.f32 %v14220_v14, %v17167_v45  ;;  %v5452_v14 = vmul.f32 %v14233_v53, %v17169_v60  ;;  %v5449_v41 = vmul.f32 %v14242_v36, %v17169_v60  ;;  %v10237_v36 = vld [vmem:[%s16805_s2 + $0x78] sm:$0xff] }
 0x79e   : > { %v11430_v11 = vpack.i.bf16 %v5455_v1, %v5460_v10  ;;  %v11435_v23 = vpack.i.bf16 %v5600_v52, %v5599_v19  ;;  %v11460_v25 = vpack.i.bf16 %v5459_v35, %v5458_v15  ;;  %v5454_v52 = vmul.f32 %v14278_v43, %v17167_v45  ;;  %v4499_v19 = vld [vmem:[#allocation3 + $0x370] sm:$0xff] }
 0x79f   : > { %v11445_v62 = vpack.i.bf16 %v5457_v58, %v5456_v16  ;;  %v5451_v35 = vmul.f32 %v14284_v61, %v17167_v45 }
 0x7a0   : > { %v11470_v43 = vpack.i.bf16 %v5449_v41, %v5454_v52 }
 0x7a3   : > { %11411 = vrot.lane.b32.xlu2 %v11410_v34, %s12258_s10  ;;  %11416 = vrot.lane.b32.xlu0 %v11415_v21, %s12258_s10  ;;  %v5453_v21 = vmul.f32 %v14251_v6, %v17168_v33 }
 0x7a4   : > { %11441 = vrot.lane.b32.xlu1 %v11440_v5, %s12261_s13  ;;  %v4498_v5 = vld [vmem:[#allocation3 + $0x368] sm:$0xff] }
 0x7a5   : > { %v11247_v55 = vpop.permute.xlu2 %11246  ;;  %10175 = vmatmul.msk.f32.gmra.mxu1 %vm418_vm8, %v4498_v5  ;;  %10171 = vmatmul.msk.f32.gmra.mxu0 %vm418_vm8, %v4498_v5  ;;  %v4500_v5 = vld [vmem:[#allocation3 + $0x378] sm:$0xff] }
 0x7a6   : > { %v11248_v24 = vunpack.i.l.bf16 %v11247_v55  ;;  %v11249_v0 = vunpack.i.h.bf16 %v11247_v55 }
 0x7ab   : > { %11421 = vrot.lane.b32.xlu2 %v11420_v42, %s12261_s13  ;;  %11426 = vrot.lane.b32.xlu0 %v11425_v26, %s12261_s13  ;;  %v11450_v42 = vpack.i.bf16 %v5598_v57, %v5597_v50 }
 0x7ac   : > { %11456 = vrot.lane.b32.xlu1 %v11455_v38, %s12261_s13  ;;  %v11465_v38 = vpack.i.bf16 %v5453_v21, %v5452_v14 }
 0x7ad   : > { %v14464_v8 = vpop.permute.xlu2 %11261  ;;  %10176 = vmatmul.msk.f32.gmra.mxu1 %vm418_vm8, %v4499_v19  ;;  %10172 = vmatmul.msk.f32.gmra.mxu0 %vm418_vm8, %v4499_v19 }
 0x7ae   : > { %v11242_v30 = vpop.permute.xlu0 %11241  ;;  %v11263_v15 = vunpack.i.l.bf16 %v14464_v8  ;;  %v11264_v58 = vunpack.i.h.bf16 %v14464_v8  ;;  %v10235_v8 = vld [vmem:[%s16805_s2 + $0x68] sm:$0xff] }
 0x7af   : > { %v11243_v48 = vunpack.i.l.bf16 %v11242_v30  ;;  %v11244_v59 = vunpack.i.h.bf16 %v11242_v30 }
 0x7b1   : > { %v4562_v10 = vsel %vm401_vm6, %v11249_v0, %v11243_v48  ;;  %v4563_v53 = vsel %vm401_vm6, %v11243_v48, %v11244_v59  ;;  %v4518_v48 = vld [vmem:[#allocation3 + $0x380] sm:$0xff]  ;;  %v10236_v59 = vld [vmem:[%s16805_s2 + $0x70] sm:$0xff] }
 0x7b3   : > { %11431 = vrot.lane.b32.xlu2 %v11430_v11, %s12260_s12  ;;  %11436 = vrot.lane.b32.xlu0 %v11435_v23, %s12261_s13  ;;  %v5450_v11 = vmul.f32 %v14267_v51, %v17168_v33 }
 0x7b4   : > { %11461 = vrot.lane.b32.xlu1 %v11460_v25, %s12260_s12 }
 0x7b5   : > { %v14485_v18 = vpop.permute.xlu2 %11271  ;;  %v11475_v30 = vpack.i.bf16 %v5451_v35, %v5450_v11  ;;  %10177 = vmatmul.msk.f32.gmra.mxu1 %vm418_vm8, %v4500_v5  ;;  %10173 = vmatmul.msk.f32.gmra.mxu0 %vm418_vm8, %v4500_v5 }
 0x7b6   : > { %v11252_v34 = vpop.permute.xlu1 %11251 }
 0x7b7   : > { %v11254_v31 = vunpack.i.h.bf16 %v11252_v34  ;;  %v11253_v7 = vunpack.i.l.bf16 %v11252_v34 }
 0x7b9   : > { %v4564_v26 = vsel %vm401_vm6, %v11253_v7, %v11254_v31  ;;  %v4565_v6 = vsel %vm401_vm6, %v11254_v31, %v11248_v24  ;;  %v11273_v24 = vunpack.i.l.bf16 %v14485_v18 }
 0x7ba   : > { %4598 = vmatpush.msra.mxu2 %v4564_v26  ;;  %4627 = vmatpush.msra.mxu3 %v4565_v6  ;;  %v10234_v26 = vld [vmem:[%s16805_s2 + $0x60] sm:$0xff] }
 0x7bb   : > { %11446 = vrot.lane.b32.xlu2 %v11445_v62, %s12260_s12  ;;  %11451 = vrot.lane.b32.xlu0 %v11450_v42, %s12261_s13 }
 0x7bc   : > { %11466 = vrot.lane.b32.xlu1 %v11465_v38, %s12260_s12  ;;  %4599 = vmatpush.msra.mxu2 %v4562_v10  ;;  %v11274_v10 = vunpack.i.h.bf16 %v14485_v18 }
 0x7bd   : > { %v14506_v55 = vpop.permute.xlu2 %11291  ;;  %4628 = vmatpush.msra.mxu3 %v4563_v53 }
 0x7be   : > { %v11257_v1 = vpop.permute.xlu1 %11256  ;;  %v11293_v41 = vunpack.i.l.bf16 %v14506_v55 }
 0x7bf   : > { %v11259_v23 = vunpack.i.h.bf16 %v11257_v1  ;;  %v11258_v25 = vunpack.i.l.bf16 %v11257_v1  ;;  %v4519_v1 = vld [vmem:[#allocation3 + $0x388] sm:$0xff] }
 0x7c1   : > { %v4560_v61 = vsel %vm401_vm6, %v11258_v25, %v11259_v23  ;;  %v4561_v16 = vsel %vm401_vm6, %v11259_v23, %v11263_v15 }
 0x7c2   : > { %4600 = vmatpush.msra.mxu2 %v4560_v61  ;;  %4629 = vmatpush.msra.mxu3 %v4561_v16  ;;  %v11294_v61 = vunpack.i.h.bf16 %v14506_v55 }
 0x7c3   : > { %11471 = vrot.lane.b32.xlu2 %v11470_v43, %s12260_s12  ;;  %11476 = vrot.lane.b32.xlu0 %v11475_v30, %s12260_s12 }
 0x7c4   : > { %5765 = vperm.xlu1 %10758, %v10237_v36  }
 0x7c5   : > { %v14526_v51 = vpop.permute.xlu2 %11301  ;;  %v11267_v57 = vpop.permute.xlu0 %11266 }
 0x7c6   : > { %v11269_v50 = vunpack.i.h.bf16 %v11267_v57  ;;  %v11268_v34 = vunpack.i.l.bf16 %v11267_v57  ;;  %v11282_v21 = vpop.permute.xlu1 %11281  ;;  %v11303_v55 = vunpack.i.l.bf16 %v14526_v51 }
 0x7c7   : > { %v11284_v31 = vunpack.i.h.bf16 %v11282_v21  ;;  %v11283_v7 = vunpack.i.l.bf16 %v11282_v21 }
 0x7c8   : > { %v4558_v62 = vsel %vm401_vm6, %v11264_v58, %v11268_v34  ;;  %v4559_v14 = vsel %vm401_vm6, %v11268_v34, %v11269_v50  ;;  %v4520_v58 = vld [vmem:[#allocation3 + $0x390] sm:$0xff] }
 0x7c9   : > { %4601 = vmatpush.msra.mxu2 %v4558_v62  ;;  %4630 = vmatpush.msra.mxu3 %v4559_v14  ;;  %v4773_v0 = vsel %vm624_vm9, %v11283_v7, %v11284_v31  ;;  %v4774_v42 = vsel %vm624_vm9, %v11284_v31, %v11273_v24 }
 0x7ca   : > { %10162 = vmatmul.msk.f32.vlgmr.msra.gmra.mxu2 %vm418_vm8, %v4518_v48  ;;  %10166 = vmatmul.msk.f32.vlgmr.msra.gmra.mxu3 %vm418_vm8, %v4518_v48  ;;  %v4521_v48 = vld [vmem:[#allocation3 + $0x398] sm:$0xff] }
 0x7cb   : > { %5760 = vperm.xlu2 %10759, %v10236_v59   ;;  %5755 = vperm.xlu0 %10757, %v10235_v8  }
 0x7cc   : > { %4807 = vmatpush.msrb.mxu2 %v4773_v0  ;;  %4836 = vmatpush.msrb.mxu3 %v4774_v42  ;;  %v11304_v0 = vunpack.i.h.bf16 %v14526_v51 }
 0x7cd   : > { %v14547_v6 = vpop.permute.xlu2 %11311  ;;  %v11277_v38 = vpop.permute.xlu0 %11276  ;;  %5750 = vperm.xlu1 %10758, %v10234_v26  }
 0x7ce   : > { %v11279_v53 = vunpack.i.h.bf16 %v11277_v38  ;;  %v11278_v52 = vunpack.i.l.bf16 %v11277_v38  ;;  %v11287_v35 = vpop.permute.xlu1 %11286 }
 0x7cf   : > { %v11289_v19 = vunpack.i.h.bf16 %v11287_v35  ;;  %v11288_v15 = vunpack.i.l.bf16 %v11287_v35 }
 0x7d0   : > { %v4771_v11 = vsel %vm624_vm9, %v11274_v10, %v11278_v52  ;;  %v4772_v23 = vsel %vm624_vm9, %v11278_v52, %v11279_v53 }
 0x7d1   : > { %4808 = vmatpush.msrb.mxu2 %v4771_v11  ;;  %4837 = vmatpush.msrb.mxu3 %v4772_v23  ;;  %v4769_v25 = vsel %vm624_vm9, %v11288_v15, %v11289_v19  ;;  %v4770_v43 = vsel %vm624_vm9, %v11289_v19, %v11293_v41  ;;  %v11313_v41 = vunpack.i.l.bf16 %v14547_v6 }
 0x7d2   : > { %10163 = vmatmul.msk.f32.gmra.mxu2 %vm418_vm8, %v4519_v1  ;;  %10167 = vmatmul.msk.f32.gmra.mxu3 %vm418_vm8, %v4519_v1  ;;  %v4727_v1 = vld [vmem:[#allocation3 + $0x3a0] sm:$0xff] }
 0x7d3   : > { %4809 = vmatpush.msrb.mxu2 %v4769_v25  ;;  %4838 = vmatpush.msrb.mxu3 %v4770_v43 }
 0x7d5   : > { %v11327_v18 = vpop.permute.xlu2 %11326  ;;  %v11297_v30 = vpop.permute.xlu0 %11296 }
 0x7d6   : > { %v11299_v16 = vunpack.i.h.bf16 %v11297_v30  ;;  %v11298_v36 = vunpack.i.l.bf16 %v11297_v30  ;;  %v14558_v57 = vpop.permute.xlu1 %11321  ;;  %v11329_v11 = vunpack.i.h.bf16 %v11327_v18  ;;  %v11328_v23 = vunpack.i.l.bf16 %v11327_v18 }
 0x7d7   : > { %v11323_v10 = vunpack.i.l.bf16 %v14558_v57 }
 0x7d8   : > { %v4767_v50 = vsel %vm624_vm9, %v11294_v61, %v11298_v36  ;;  %v4768_v34 = vsel %vm624_vm9, %v11298_v36, %v11299_v16  ;;  %v11314_v16 = vunpack.i.h.bf16 %v14547_v6  ;;  %v4919_v36 = vsel %vm784_vm10, %v11328_v23, %v11329_v11 }
 0x7d9   : > { %4810 = vmatpush.msrb.mxu2 %v4767_v50  ;;  %4839 = vmatpush.msrb.mxu3 %v4768_v34  ;;  %v11324_v50 = vunpack.i.h.bf16 %v14558_v57 }
 0x7da   : > { %10164 = vmatmul.msk.f32.gmra.mxu2 %vm418_vm8, %v4520_v58  ;;  %10168 = vmatmul.msk.f32.gmra.mxu3 %vm418_vm8, %v4520_v58  ;;  %v4918_v18 = vsel %vm784_vm10, %v11314_v16, %v11328_v23 }
 0x7dd   : > { %v14564_v21 = vpop.permute.xlu2 %11351  ;;  %v11307_v5 = vpop.permute.xlu0 %11306 }
 0x7de   : > { %v11337_v24 = vpop.permute.xlu1 %11336  ;;  %v11309_v59 = vunpack.i.h.bf16 %v11307_v5  ;;  %v11308_v8 = vunpack.i.l.bf16 %v11307_v5  ;;  %v11353_v6 = vunpack.i.l.bf16 %v14564_v21 }
 0x7df   : > { %v11339_v31 = vunpack.i.h.bf16 %v11337_v24  ;;  %v11338_v7 = vunpack.i.l.bf16 %v11337_v24 }
 0x7e0   : > { %v5065_v42 = vsel %vm943_vm11, %v11304_v0, %v11308_v8  ;;  %v5066_v26 = vsel %vm943_vm11, %v11308_v8, %v11309_v59  ;;  %v11354_v0 = vunpack.i.h.bf16 %v14564_v21 }
 0x7e1   : > { %v5067_v62 = vsel %vm943_vm11, %v11338_v7, %v11339_v31  ;;  %v5068_v14 = vsel %vm943_vm11, %v11339_v31, %v11303_v55  ;;  %v4728_v55 = vld [vmem:[#allocation3 + $0x3a8] sm:$0xff] }
 0x7e2   : > { %10165 = vmatmul.msk.f32.gmra.mxu2 %vm418_vm8, %v4521_v48  ;;  %10169 = vmatmul.msk.f32.gmra.mxu3 %vm418_vm8, %v4521_v48 }
 0x7e3   : > { %5101 = vmatpush.msra.mxu2 %v5067_v62  ;;  %5130 = vmatpush.msra.mxu3 %v5068_v14 }
 0x7e5   : > { %v11317_v38 = vpop.permute.xlu0 %11316  ;;  %5102 = vmatpush.msra.mxu2 %v5065_v42  ;;  %5131 = vmatpush.msra.mxu3 %v5066_v26  ;;  %v14575_v53 = vpop.permute.xlu2 %11361 }
 0x7e6   : > { %v11319_v52 = vunpack.i.h.bf16 %v11317_v38  ;;  %v11318_v35 = vunpack.i.l.bf16 %v11317_v38  ;;  %v11342_v51 = vpop.permute.xlu1 %11341 }
 0x7e7   : > { %v11344_v19 = vunpack.i.h.bf16 %v11342_v51  ;;  %v11343_v15 = vunpack.i.l.bf16 %v11342_v51  ;;  %v4874_v51 = vld [vmem:[#allocation3 + $0x3c0] sm:$0xff] }
 0x7e8   : > { %v5063_v25 = vsel %vm943_vm11, %v11318_v35, %v11319_v52  ;;  %v5064_v43 = vsel %vm943_vm11, %v11319_v52, %v11323_v10  ;;  %v4729_v10 = vld [vmem:[#allocation3 + $0x3b0] sm:$0xff] }
 0x7e9   : > { %5103 = vmatpush.msra.mxu2 %v5063_v25  ;;  %5132 = vmatpush.msra.mxu3 %v5064_v43  ;;  %v4920_v30 = vsel %vm784_vm10, %v11343_v15, %v11344_v19  ;;  %v4921_v61 = vsel %vm784_vm10, %v11344_v19, %v11313_v41  ;;  %v11363_v19 = vunpack.i.l.bf16 %v14575_v53  ;;  %v4730_v15 = vld [vmem:[#allocation3 + $0x3b8] sm:$0xff]  ;;  %v4875_v25 = vld [vmem:[#allocation3 + $0x3c8] sm:$0xff] }
 0x7ea   : > { %10178 = vmatmul.msk.f32.vlgmr.msrb.gmra.mxu2 %vm418_vm8, %v4727_v1  ;;  %10182 = vmatmul.msk.f32.vlgmr.msrb.gmra.mxu3 %vm418_vm8, %v4727_v1 }
 0x7eb   : > { %4954 = vmatpush.msrb.mxu0 %v4920_v30  ;;  %4983 = vmatpush.msrb.mxu1 %v4921_v61 }
 0x7ed   : > { %v11332_v58 = vpop.permute.xlu0 %11331  ;;  %4955 = vmatpush.msrb.mxu0 %v4918_v18  ;;  %4984 = vmatpush.msrb.mxu1 %v4919_v36  ;;  %v14589_v7 = vpop.permute.xlu2 %11371  ;;  %v11364_v18 = vunpack.i.h.bf16 %v14575_v53 }
 0x7ee   : > { %v11334_v34 = vunpack.i.h.bf16 %v11332_v58  ;;  %v11333_v5 = vunpack.i.l.bf16 %v11332_v58  ;;  %v11347_v24 = vpop.permute.xlu1 %11346 }
 0x7ef   : > { %v11349_v48 = vunpack.i.h.bf16 %v11347_v24  ;;  %v11348_v31 = vunpack.i.l.bf16 %v11347_v24 }
 0x7f0   : > { %v5061_v59 = vsel %vm943_vm11, %v11324_v50, %v11333_v5  ;;  %v5062_v8 = vsel %vm943_vm11, %v11333_v5, %v11334_v34 }
 0x7f1   : > { %5104 = vmatpush.msra.mxu2 %v5061_v59  ;;  %5133 = vmatpush.msra.mxu3 %v5062_v8  ;;  %v4916_v62 = vsel %vm784_vm10, %v11348_v31, %v11349_v48  ;;  %v4917_v57 = vsel %vm784_vm10, %v11349_v48, %v11353_v6  ;;  %v5021_v48 = vld [vmem:[#allocation3 + $0x3e0] sm:$0xff]  ;;  %v4876_v8 = vld [vmem:[#allocation3 + $0x3d0] sm:$0xff] }
 0x7f2   : > { %10179 = vmatmul.msk.f32.gmra.mxu2 %vm418_vm8, %v4728_v55  ;;  %10183 = vmatmul.msk.f32.gmra.mxu3 %vm418_vm8, %v4728_v55  ;;  %v11373_v55 = vunpack.i.l.bf16 %v14589_v7 }
 0x7f3   : > { %4956 = vmatpush.msrb.mxu0 %v4916_v62  ;;  %4985 = vmatpush.msrb.mxu1 %v4917_v57 }
 0x7f5   : > { %v11357_v14 = vpop.permute.xlu0 %11356  ;;  %v11387_v41 = vpop.permute.xlu2 %11386 }
 0x7f6   : > { %v11359_v42 = vunpack.i.h.bf16 %v11357_v14  ;;  %v11358_v26 = vunpack.i.l.bf16 %v11357_v14  ;;  %v14598_v38 = vpop.permute.xlu1 %11381  ;;  %v11389_v14 = vunpack.i.h.bf16 %v11387_v41 }
 0x7f7   : > { %v11383_v5 = vunpack.i.l.bf16 %v14598_v38 }
 0x7f8   : > { %v4914_v52 = vsel %vm784_vm10, %v11354_v0, %v11358_v26  ;;  %v4915_v35 = vsel %vm784_vm10, %v11358_v26, %v11359_v42  ;;  %v11388_v0 = vunpack.i.l.bf16 %v11387_v41  ;;  %v11384_v41 = vunpack.i.h.bf16 %v14598_v38 }
 0x7f9   : > { %4957 = vmatpush.msrb.mxu0 %v4914_v52  ;;  %4986 = vmatpush.msrb.mxu1 %v4915_v35 }
 0x7fa   : > { %10180 = vmatmul.msk.f32.gmra.mxu2 %vm418_vm8, %v4729_v10  ;;  %10184 = vmatmul.msk.f32.gmra.mxu3 %vm418_vm8, %v4729_v10  ;;  %v11374_v10 = vunpack.i.h.bf16 %v14589_v7 }
 0x7fb   : > { %10186 = vmatmul.msk.f32.vlgmr.msrb.gmra.mxu0 %vm418_vm8, %v4874_v51  ;;  %10190 = vmatmul.msk.f32.vlgmr.msrb.gmra.mxu1 %vm418_vm8, %v4874_v51  ;;  %v5213_v51 = vsel %vm1103_vm13, %v11388_v0, %v11389_v14  ;;  %v5169_v14 = vld [vmem:[#allocation3 + $0x408] sm:$0xff] }
 0x7fc   : > { %v5212_v35 = vsel %vm1103_vm13, %v11374_v10, %v11388_v0 }
 0x7fd   : > { %v11367_v21 = vpop.permute.xlu0 %11366  ;;  %v14614_v36 = vpop.permute.xlu2 %11411 }
 0x7fe   : > { %v11397_v1 = vpop.permute.xlu1 %11396  ;;  %v11369_v43 = vunpack.i.h.bf16 %v11367_v21  ;;  %v11368_v30 = vunpack.i.l.bf16 %v11367_v21  ;;  %v11413_v7 = vunpack.i.l.bf16 %v14614_v36 }
 0x7ff   : > { %v11399_v11 = vunpack.i.h.bf16 %v11397_v1  ;;  %v11398_v23 = vunpack.i.l.bf16 %v11397_v1 }
 0x800   : > { %v5359_v50 = vsel %vm1262_vm14, %v11364_v18, %v11368_v30  ;;  %v5360_v34 = vsel %vm1262_vm14, %v11368_v30, %v11369_v43 }
 0x801   : > { %v5361_v61 = vsel %vm1262_vm14, %v11398_v23, %v11399_v11  ;;  %v5362_v16 = vsel %vm1262_vm14, %v11399_v11, %v11363_v19  ;;  %v5022_v11 = vld [vmem:[#allocation3 + $0x3e8] sm:$0xff] }
 0x802   : > { %10181 = vmatmul.msk.f32.gmra.mxu2 %vm418_vm8, %v4730_v15  ;;  %10185 = vmatmul.msk.f32.gmra.mxu3 %vm418_vm8, %v4730_v15 }
 0x803   : > { %10187 = vmatmul.msk.f32.gmra.mxu0 %vm418_vm8, %v4875_v25  ;;  %10191 = vmatmul.msk.f32.gmra.mxu1 %vm418_vm8, %v4875_v25 }
 0x804   : > { %5395 = vmatpush.msrb.mxu2 %v5361_v61  ;;  %5424 = vmatpush.msrb.mxu3 %v5362_v16  ;;  %v4877_v61 = vld [vmem:[#allocation3 + $0x3d8] sm:$0xff] }
 0x805   : > { %v11377_v58 = vpop.permute.xlu0 %11376  ;;  %v11422_v21 = vpop.permute.xlu2 %11421 }
 0x806   : > { %v11379_v24 = vunpack.i.h.bf16 %v11377_v58  ;;  %v11378_v6 = vunpack.i.l.bf16 %v11377_v58  ;;  %5396 = vmatpush.msrb.mxu2 %v5359_v50  ;;  %5425 = vmatpush.msrb.mxu3 %v5360_v34  ;;  %v11402_v53 = vpop.permute.xlu1 %11401  ;;  %v11414_v58 = vunpack.i.h.bf16 %v14614_v36 }
 0x807   : > { %v11404_v31 = vunpack.i.h.bf16 %v11402_v53  ;;  %v11403_v59 = vunpack.i.l.bf16 %v11402_v53 }
 0x808   : > { %v5357_v62 = vsel %vm1262_vm14, %v11378_v6, %v11379_v24  ;;  %v5358_v57 = vsel %vm1262_vm14, %v11379_v24, %v11383_v5  ;;  %v5023_v24 = vld [vmem:[#allocation3 + $0x3f0] sm:$0xff] }
 0x809   : > { %5397 = vmatpush.msrb.mxu2 %v5357_v62  ;;  %5426 = vmatpush.msrb.mxu3 %v5358_v57  ;;  %v5214_v42 = vsel %vm1103_vm13, %v11403_v59, %v11404_v31  ;;  %v5215_v26 = vsel %vm1103_vm13, %v11404_v31, %v11373_v55  ;;  %v11423_v59 = vunpack.i.l.bf16 %v11422_v21 }
 0x80a   : > { %10194 = vmatmul.msk.f32.vlgmr.msra.gmra.mxu2 %vm418_vm8, %v5021_v48  ;;  %10198 = vmatmul.msk.f32.vlgmr.msra.gmra.mxu3 %vm418_vm8, %v5021_v48  ;;  %v5168_v48 = vld [vmem:[#allocation3 + $0x400] sm:$0xff] }
 0x80b   : > { %10188 = vmatmul.msk.f32.gmra.mxu0 %vm418_vm8, %v4876_v8  ;;  %10192 = vmatmul.msk.f32.gmra.mxu1 %vm418_vm8, %v4876_v8  ;;  %v5024_v8 = vld [vmem:[#allocation3 + $0x3f8] sm:$0xff] }
 0x80c   : > { %5248 = vmatpush.msra.mxu0 %v5214_v42  ;;  %5277 = vmatpush.msra.mxu1 %v5215_v26 }
 0x80d   : > { %v11392_v52 = vpop.permute.xlu0 %11391  ;;  %v11432_v6 = vpop.permute.xlu2 %11431 }
 0x80e   : > { %v11394_v1 = vunpack.i.h.bf16 %v11392_v52  ;;  %v11393_v19 = vunpack.i.l.bf16 %v11392_v52  ;;  %5249 = vmatpush.msra.mxu0 %v5212_v35  ;;  %5278 = vmatpush.msra.mxu1 %v5213_v51  ;;  %v11407_v15 = vpop.permute.xlu1 %11406  ;;  %v11424_v35 = vunpack.i.h.bf16 %v11422_v21  ;;  %v5315_v21 = vld [vmem:[#allocation3 + $0x420] sm:$0xff] }
 0x80f   : > { %v11409_v23 = vunpack.i.h.bf16 %v11407_v15  ;;  %v11408_v25 = vunpack.i.l.bf16 %v11407_v15 }
 0x810   : > { %v5355_v43 = vsel %vm1262_vm14, %v11384_v41, %v11393_v19  ;;  %v5356_v30 = vsel %vm1262_vm14, %v11393_v19, %v11394_v1 }
 0x811   : > { %5398 = vmatpush.msrb.mxu2 %v5355_v43  ;;  %5427 = vmatpush.msrb.mxu3 %v5356_v30  ;;  %v5210_v38 = vsel %vm1103_vm13, %v11408_v25, %v11409_v23  ;;  %v5211_v16 = vsel %vm1103_vm13, %v11409_v23, %v11413_v7  ;;  %v11433_v23 = vunpack.i.l.bf16 %v11432_v6  ;;  %v5170_v30 = vld [vmem:[#allocation3 + $0x410] sm:$0xff] }
 0x812   : > { %10195 = vmatmul.msk.f32.gmra.mxu2 %vm418_vm8, %v5022_v11  ;;  %10199 = vmatmul.msk.f32.gmra.mxu3 %vm418_vm8, %v5022_v11 }
 0x813   : > { %10189 = vmatmul.msk.f32.gmra.mxu0 %vm418_vm8, %v4877_v61  ;;  %10193 = vmatmul.msk.f32.gmra.mxu1 %vm418_vm8, %v4877_v61 }
 0x814   : > { %5250 = vmatpush.msra.mxu0 %v5210_v38  ;;  %5279 = vmatpush.msra.mxu1 %v5211_v16 }
 0x815   : > { %v11417_v18 = vpop.permute.xlu0 %11416  ;;  %v11447_v52 = vpop.permute.xlu2 %11446 }
 0x816   : > { %v11419_v50 = vunpack.i.h.bf16 %v11417_v18  ;;  %v11418_v34 = vunpack.i.l.bf16 %v11417_v18  ;;  %v14642_v5 = vpop.permute.xlu1 %11441  ;;  %v11449_v16 = vunpack.i.h.bf16 %v11447_v52  ;;  %v11448_v18 = vunpack.i.l.bf16 %v11447_v52 }
 0x817   : > { %v11443_v19 = vunpack.i.l.bf16 %v14642_v5 }
 0x818   : > { %v5208_v53 = vsel %vm1103_vm13, %v11414_v58, %v11418_v34  ;;  %v5209_v55 = vsel %vm1103_vm13, %v11418_v34, %v11419_v50  ;;  %v11434_v34 = vunpack.i.h.bf16 %v11432_v6 }
 0x819   : > { %5251 = vmatpush.msra.mxu0 %v5208_v53  ;;  %5280 = vmatpush.msra.mxu1 %v5209_v55 }
 0x81a   : > { %10196 = vmatmul.msk.f32.gmra.mxu2 %vm418_vm8, %v5023_v24  ;;  %10200 = vmatmul.msk.f32.gmra.mxu3 %vm418_vm8, %v5023_v24  ;;  %v5506_v55 = vsel %vm1422_vm15, %v11434_v34, %v11448_v18  ;;  %v5611_v34 = vld [vmem:[#allocation3 + $0x470] sm:$0xff] }
 0x81b   : > { %10202 = vmatmul.msk.f32.vlgmr.msra.gmra.mxu0 %vm418_vm8, %v5168_v48  ;;  %10206 = vmatmul.msk.f32.vlgmr.msra.gmra.mxu1 %vm418_vm8, %v5168_v48  ;;  %v5507_v48 = vsel %vm1422_vm15, %v11448_v18, %v11449_v16  ;;  %v14696_v16 = vpop.f32.mrf.mxu1  ;;  %v14700_v18 = vpop.f32.mrf.mxu0 }
 0x81d   : > { %v11427_v36 = vpop.permute.xlu0 %11426  ;;  %v11472_v24 = vpop.permute.xlu2 %11471 }
 0x81e   : > { %v11457_v31 = vpop.permute.xlu1 %11456  ;;  %v11429_v0 = vunpack.i.h.bf16 %v11427_v36  ;;  %v11428_v42 = vunpack.i.l.bf16 %v11427_v36  ;;  %v11444_v36 = vunpack.i.h.bf16 %v14642_v5  ;;  %v11473_v6 = vunpack.i.l.bf16 %v11472_v24 }
 0x81f   : > { %v11459_v62 = vunpack.i.h.bf16 %v11457_v31  ;;  %v11458_v57 = vunpack.i.l.bf16 %v11457_v31 }
 0x820   : > { %v5653_v41 = vsel %vm1581_vm0, %v11424_v35, %v11428_v42  ;;  %v5654_v1 = vsel %vm1581_vm0, %v11428_v42, %v11429_v0  ;;  %v11474_v35 = vunpack.i.h.bf16 %v11472_v24 }
 0x821   : > { %v5655_v26 = vsel %vm1581_vm0, %v11458_v57, %v11459_v62  ;;  %v5656_v10 = vsel %vm1581_vm0, %v11459_v62, %v11423_v59  ;;  %v5316_v62 = vld [vmem:[#allocation3 + $0x428] sm:$0xff] }
 0x822   : > { %10197 = vmatmul.msk.f32.gmra.mxu2 %vm418_vm8, %v5024_v8  ;;  %10201 = vmatmul.msk.f32.gmra.mxu3 %vm418_vm8, %v5024_v8 }
 0x823   : > { %10203 = vmatmul.msk.f32.gmra.mxu0 %vm418_vm8, %v5169_v14  ;;  %10207 = vmatmul.msk.f32.gmra.mxu1 %vm418_vm8, %v5169_v14  ;;  %v14708_v24 = vpop.f32.mrf.mxu1 }
 0x824   : > { %5689 = vmatpush.msra.mxu2 %v5655_v26  ;;  %5718 = vmatpush.msra.mxu3 %v5656_v10  ;;  %v5171_v26 = vld [vmem:[#allocation3 + $0x418] sm:$0xff] }
 0x825   : > { %v11437_v51 = vpop.permute.xlu0 %11436 }
 0x826   : > { %v11439_v15 = vunpack.i.h.bf16 %v11437_v51  ;;  %v11438_v7 = vunpack.i.l.bf16 %v11437_v51  ;;  %5690 = vmatpush.msra.mxu2 %v5653_v41  ;;  %5719 = vmatpush.msra.mxu3 %v5654_v1  ;;  %v11462_v11 = vpop.permute.xlu1 %11461  ;;  %v5317_v1 = vld [vmem:[#allocation3 + $0x430] sm:$0xff] }
 0x827   : > { %v11464_v25 = vunpack.i.h.bf16 %v11462_v11  ;;  %v11463_v43 = vunpack.i.l.bf16 %v11462_v11  ;;  %v5318_v11 = vld [vmem:[#allocation3 + $0x438] sm:$0xff] }
 0x828   : > { %v5651_v61 = vsel %vm1581_vm0, %v11438_v7, %v11439_v15  ;;  %v5652_v38 = vsel %vm1581_vm0, %v11439_v15, %v11443_v19  ;;  %v5462_v7 = vld [vmem:[#allocation3 + $0x440] sm:$0xff] }
 0x829   : > { %5691 = vmatpush.msra.mxu2 %v5651_v61  ;;  %5720 = vmatpush.msra.mxu3 %v5652_v38  ;;  %v5508_v58 = vsel %vm1422_vm15, %v11463_v43, %v11464_v25  ;;  %v5509_v50 = vsel %vm1422_vm15, %v11464_v25, %v11433_v23  ;;  %v5463_v23 = vld [vmem:[#allocation3 + $0x448] sm:$0xff]  ;;  %v5464_v25 = vld [vmem:[#allocation3 + $0x450] sm:$0xff]  ;;  %v5465_v38 = vld [vmem:[#allocation3 + $0x458] sm:$0xff] }
 0x82a   : > { %10210 = vmatmul.msk.f32.vlgmr.msrb.gmra.mxu2 %vm418_vm8, %v5315_v21  ;;  %10214 = vmatmul.msk.f32.vlgmr.msrb.gmra.mxu3 %vm418_vm8, %v5315_v21  ;;  %v5609_v21 = vld [vmem:[#allocation3 + $0x460] sm:$0xff]  ;;  %v5610_v61 = vld [vmem:[#allocation3 + $0x468] sm:$0xff] }
 0x82b   : > { %10204 = vmatmul.msk.f32.gmra.mxu0 %vm418_vm8, %v5170_v30  ;;  %10208 = vmatmul.msk.f32.gmra.mxu1 %vm418_vm8, %v5170_v30 }
 0x82c   : > { %5542 = vmatpush.msrb.mxu0 %v5508_v58  ;;  %5571 = vmatpush.msrb.mxu1 %v5509_v50 }
 0x82d   : > { %v11452_v53 = vpop.permute.xlu0 %11451 }
 0x82e   : > { %v11454_v31 = vunpack.i.h.bf16 %v11452_v53  ;;  %v11453_v59 = vunpack.i.l.bf16 %v11452_v53  ;;  %5543 = vmatpush.msrb.mxu0 %v5506_v55  ;;  %5572 = vmatpush.msrb.mxu1 %v5507_v48  ;;  %v11467_v8 = vpop.permute.xlu1 %11466  ;;  %v4676_v53 = vpop.f32.mrf.mxu0 }
 0x82f   : > { %v11469_v57 = vunpack.i.h.bf16 %v11467_v8  ;;  %v11468_v14 = vunpack.i.l.bf16 %v11467_v8  ;;  %v4708_v8 = vpop.f32.mrf.mxu1 }
 0x830   : > { %v5649_v0 = vsel %vm1581_vm0, %v11444_v36, %v11453_v59  ;;  %v5650_v42 = vsel %vm1581_vm0, %v11453_v59, %v11454_v31  ;;  %v5612_v36 = vld [vmem:[#allocation3 + $0x478] sm:$0xff] }
 0x831   : > { %5692 = vmatpush.msra.mxu2 %v5649_v0  ;;  %5721 = vmatpush.msra.mxu3 %v5650_v42  ;;  %v5504_v10 = vsel %vm1422_vm15, %v11468_v14, %v11469_v57  ;;  %v5505_v5 = vsel %vm1422_vm15, %v11469_v57, %v11473_v6 }
 0x832   : > { %10211 = vmatmul.msk.f32.gmra.mxu2 %vm418_vm8, %v5316_v62  ;;  %10215 = vmatmul.msk.f32.gmra.mxu3 %vm418_vm8, %v5316_v62 }
 0x833   : > { %10205 = vmatmul.msk.f32.gmra.mxu0 %vm418_vm8, %v5171_v26  ;;  %10209 = vmatmul.msk.f32.gmra.mxu1 %vm418_vm8, %v5171_v26 }
 0x834   : > { %5544 = vmatpush.msrb.mxu0 %v5504_v10  ;;  %5573 = vmatpush.msrb.mxu1 %v5505_v5 }
 0x835   : > { %v11477_v52 = vpop.permute.xlu0 %11476 }
 0x836   : > { %v11479_v51 = vunpack.i.h.bf16 %v11477_v52  ;;  %v11478_v41 = vunpack.i.l.bf16 %v11477_v52  ;;  %v4679_v6 = vpop.f32.mrf.mxu0 }
 0x837   : > { %v14720_v14 = vpop.f32.mrf.mxu1 }
 0x838   : > { %v5502_v19 = vsel %vm1422_vm15, %v11474_v35, %v11478_v41  ;;  %v5503_v15 = vsel %vm1422_vm15, %v11478_v41, %v11479_v51 }
 0x839   : > { %5545 = vmatpush.msrb.mxu0 %v5502_v19  ;;  %5574 = vmatpush.msrb.mxu1 %v5503_v15 }
 0x83a   : > { %10212 = vmatmul.msk.f32.gmra.mxu2 %vm418_vm8, %v5317_v1  ;;  %10216 = vmatmul.msk.f32.gmra.mxu3 %vm418_vm8, %v5317_v1 }
 0x83b   : > { %10218 = vmatmul.msk.f32.vlgmr.msrb.gmra.mxu0 %vm418_vm8, %v5462_v7  ;;  %10222 = vmatmul.msk.f32.vlgmr.msrb.gmra.mxu1 %vm418_vm8, %v5462_v7 }
 0x83e   : > { %v14722_v0 = vpop.f32.mrf.mxu0 }
 0x842   : > { %10213 = vmatmul.msk.f32.gmra.mxu2 %vm418_vm8, %v5318_v11  ;;  %10217 = vmatmul.msk.f32.gmra.mxu3 %vm418_vm8, %v5318_v11 }
 0x843   : > { %10219 = vmatmul.msk.f32.gmra.mxu0 %vm418_vm8, %v5463_v23  ;;  %10223 = vmatmul.msk.f32.gmra.mxu1 %vm418_vm8, %v5463_v23 }
 0x84a   : > { %10226 = vmatmul.msk.f32.vlgmr.msra.gmra.mxu2 %vm418_vm8, %v5609_v21  ;;  %10230 = vmatmul.msk.f32.vlgmr.msra.gmra.mxu3 %vm418_vm8, %v5609_v21 }
 0x84b   : > { %10220 = vmatmul.msk.f32.gmra.mxu0 %vm418_vm8, %v5464_v25  ;;  %10224 = vmatmul.msk.f32.gmra.mxu1 %vm418_vm8, %v5464_v25 }
 0x84d   : > { %v14692_v43 = vpop.f32.mrf.mxu2  ;;  %v14694_v30 = vpop.f32.mrf.mxu3 }
 0x852   : > { %10227 = vmatmul.msk.f32.gmra.mxu2 %vm418_vm8, %v5610_v61  ;;  %10231 = vmatmul.msk.f32.gmra.mxu3 %vm418_vm8, %v5610_v61 }
 0x853   : > { %10221 = vmatmul.msk.f32.gmra.mxu0 %vm418_vm8, %v5465_v38  ;;  %10225 = vmatmul.msk.f32.gmra.mxu1 %vm418_vm8, %v5465_v38 }
 0x855   : > { %v4606_v58 = vpop.f32.mrf.mxu2  ;;  %v14704_v50 = vpop.f32.mrf.mxu3 }
 0x856   : > { %v4677_v28 = vadd.f32 %v4676_v53, %v4606_v58 }
 0x85a   : > { %10228 = vmatmul.msk.f32.gmra.mxu2 %vm418_vm8, %v5611_v34  ;;  %10232 = vmatmul.msk.f32.gmra.mxu3 %vm418_vm8, %v5611_v34 }
 0x85d   : > { %v4609_v55 = vpop.f32.mrf.mxu2  ;;  %v4638_v48 = vpop.f32.mrf.mxu3 }
 0x862   : > { %10229 = vmatmul.msk.f32.gmra.mxu2 %vm418_vm8, %v5612_v36  ;;  %10233 = vmatmul.msk.f32.gmra.mxu3 %vm418_vm8, %v5612_v36 }
 0x865   : > { %v14712_v31 = vpop.f32.mrf.mxu2  ;;  %v14714_v59 = vpop.f32.mrf.mxu3 }
 0x86d   : > { %v14716_v62 = vpop.f32.mrf.mxu2  ;;  %v14718_v57 = vpop.f32.mrf.mxu3 }
 0x875   : > { %v4815_v42 = vpop.f32.mrf.mxu2  ;;  %v4844_v26 = vpop.f32.mrf.mxu3 }
 0x876   : > { %v4855_v39 = vadd.f32 %v4815_v42, %v4677_v28  ;;  %v14770_v42 = vpop.permute.xlu0 %5755 }
 0x878   : > { %v14724_v10 = vpop.f32.mrf.mxu0  ;;  %v14726_v5 = vpop.f32.mrf.mxu1 }
 0x87d   : > { %v4818_v52 = vpop.f32.mrf.mxu2  ;;  %v4847_v35 = vpop.f32.mrf.mxu3 }
 0x880   : > { %v4962_v51 = vpop.f32.mrf.mxu0  ;;  %v4991_v41 = vpop.f32.mrf.mxu1 }
 0x881   : > { %v5002_v17 = vadd.f32 %v4962_v51, %v4855_v39 }
 0x885   : > { %v14728_v1 = vpop.f32.mrf.mxu2  ;;  %v14730_v19 = vpop.f32.mrf.mxu3 }
 0x888   : > { %v4965_v15 = vpop.f32.mrf.mxu0  ;;  %v4994_v7 = vpop.f32.mrf.mxu1 }
 0x88d   : > { %v14732_v11 = vpop.f32.mrf.mxu2  ;;  %v14734_v23 = vpop.f32.mrf.mxu3 }
 0x88e   : > { %17170 = vst [vmem:[#allocation42_spill] sm:$0xff] %v14732_v11 }
 0x88f   : > { %17171 = vst [vmem:[#allocation43_spill] sm:$0xff] %v14734_v23 }
 0x890   : > { %v14736_v21 = vpop.f32.mrf.mxu0  ;;  %v14738_v25 = vpop.f32.mrf.mxu1 }
 0x895   : > { %v5109_v61 = vpop.f32.mrf.mxu2  ;;  %v5138_v38 = vpop.f32.mrf.mxu3 }
 0x898   : > { %v14740_v34 = vpop.f32.mrf.mxu0  ;;  %v14742_v36 = vpop.f32.mrf.mxu1 }
 0x899   : > { %17172 = vst [vmem:[#allocation37_spill] sm:$0xff] %v14740_v34  ;;  %v4680_v34 = vadd.f32 %v4679_v6, %v4609_v55 }
 0x89a   : > { %17173 = vst [vmem:[#allocation32_spill] sm:$0xff] %v14742_v36  ;;  %v4709_v36 = vadd.f32 %v4708_v8, %v4638_v48 }
 0x89c   : > { %v4858_v11 = vadd.f32 %v4847_v35, %v4709_v36 }
 0x89d   : > { %v5112_v22 = vpop.f32.mrf.mxu2  ;;  %v5141_v32 = vpop.f32.mrf.mxu3 }
 0x89e   : > { %v5005_v58 = vadd.f32 %v4994_v7, %v4858_v11 }
 0x8a0   : > { %v5256_v3 = vpop.f32.mrf.mxu0  ;;  %v5285_v45 = vpop.f32.mrf.mxu1 }
 0x8a5   : > { %v14744_v60 = vpop.f32.mrf.mxu2  ;;  %v14746_v33 = vpop.f32.mrf.mxu3 }
 0x8a8   : > { %v5259_v9 = vpop.f32.mrf.mxu0  ;;  %v5288_v4 = vpop.f32.mrf.mxu1 }
 0x8ad   : > { %v14748_v40 = vpop.f32.mrf.mxu2  ;;  %v14750_v47 = vpop.f32.mrf.mxu3 }
 0x8ae   : > { %17174 = vst [vmem:[#allocation41_spill] sm:$0xff] %v14748_v40  ;;  %v5149_v40 = vadd.f32 %v5109_v61, %v5002_v17  ;;  %v5766_v61 = vpop.permute.xlu1 %5765 }
 0x8af   : > { %17175 = vst [vmem:[#allocation40_spill] sm:$0xff] %v14750_v47 }
 0x8b0   : > { %v14752_v12 = vpop.f32.mrf.mxu0  ;;  %v14754_v56 = vpop.f32.mrf.mxu1  ;;  %v5296_v23 = vadd.f32 %v5256_v3, %v5149_v40  ;;  %v4712_v40 = vadd.f32 %v14720_v14, %v14714_v59  ;;  %v4674_v59 = vadd.f32 %v14700_v18, %v14692_v43 }
 0x8b5   : > { %v5403_v49 = vpop.f32.mrf.mxu2  ;;  %v5432_v44 = vpop.f32.mrf.mxu3 }
 0x8b8   : > { %v14756_v20 = vpop.f32.mrf.mxu0  ;;  %v14758_v63 = vpop.f32.mrf.mxu1 }
 0x8b9   : > { %17176 = vst [vmem:[#allocation34_spill] sm:$0xff] %v14756_v20  ;;  %v4857_v20 = vadd.f32 %v4818_v52, %v4680_v34  ;;  %v5761_v52 = vpop.permute.xlu2 %5760 }
 0x8ba   : > { %17177 = vst [vmem:[#allocation33_spill] sm:$0xff] %v14758_v63  ;;  %v5443_v63 = vadd.f32 %v5403_v49, %v5296_v23  ;;  %v4683_v49 = vadd.f32 %v14722_v0, %v14712_v31 }
 0x8bd   : > { %v5406_v27 = vpop.f32.mrf.mxu2  ;;  %v5435_v46 = vpop.f32.mrf.mxu3 }
 0x8c0   : > { %v5550_v37 = vpop.f32.mrf.mxu0  ;;  %v5579_v13 = vpop.f32.mrf.mxu1 }
 0x8c1   : > { %v5590_v28 = vadd.f32 %v5550_v37, %v5443_v63  ;;  %v4859_v63 = vadd.f32 %v14728_v1, %v4683_v49 }
 0x8c3   : > { %v5006_v31 = vadd.f32 %v14736_v21, %v4859_v63  ;;  %v17191_v63 = vld [vmem:[#allocation33_spill] sm:$0xff] }
 0x8c5   : > { %v14760_v29 = vpop.f32.mrf.mxu2  ;;  %v14762_v2 = vpop.f32.mrf.mxu3 }
 0x8c6   : > { %17178 = vst [vmem:[#allocation36_spill] sm:$0xff] %v14760_v29  ;;  %v4706_v29 = vadd.f32 %v14708_v24, %v14704_v50 }
 0x8c7   : > { %17179 = vst [vmem:[#allocation35_spill] sm:$0xff] %v14762_v2  ;;  %v5004_v2 = vadd.f32 %v4965_v15, %v4857_v20 }
 0x8c8   : > { %v4856_v51 = vadd.f32 %v4844_v26, %v4706_v29  ;;  %v5553_v3 = vpop.f32.mrf.mxu0  ;;  %v5582_v55 = vpop.f32.mrf.mxu1  ;;  %v4860_v29 = vadd.f32 %v14730_v19, %v4712_v40  ;;  %v17182_v19 = vld [vmem:[#allocation42_spill] sm:$0xff] }
 0x8ca   : > { %v5003_v50 = vadd.f32 %v4991_v41, %v4856_v51  ;;  %v5007_v8 = vadd.f32 %v14738_v25, %v4860_v29  ;;  %v17188_v51 = vld [vmem:[#allocation41_spill] sm:$0xff] }
 0x8cc   : > { %v5154_v43 = vadd.f32 %v14746_v33, %v5007_v8 }
 0x8cd   : > { %v14764_v54 = vpop.f32.mrf.mxu2  ;;  %v14766_v47 = vpop.f32.mrf.mxu3  ;;  %v17183_v33 = vld [vmem:[#allocation36_spill] sm:$0xff] }
 0x8ce   : > { %17180 = vst [vmem:[#allocation39_spill] sm:$0xff] %v14764_v54  ;;  %v5151_v54 = vadd.f32 %v5112_v22, %v5004_v2  ;;  %v5150_v2 = vadd.f32 %v5138_v38, %v5003_v50  ;;  %v17184_v23 = vld [vmem:[#allocation35_spill] sm:$0xff]  ;;  %v17190_v50 = vld [vmem:[#allocation34_spill] sm:$0xff] }
 0x8cf   : > { %17181 = vst [vmem:[#allocation38_spill] sm:$0xff] %v14766_v47  ;;  %v5152_v47 = vadd.f32 %v5141_v32, %v5005_v58 }
 0x8d0   : > { %v5298_v20 = vadd.f32 %v5259_v9, %v5151_v54  ;;  %v5297_v6 = vadd.f32 %v5285_v45, %v5150_v2  ;;  %v4703_v9 = vadd.f32 %v14696_v16, %v14694_v30  ;;  %v5301_v30 = vadd.f32 %v14754_v56, %v5154_v43  ;;  %v5556_v7 = vpop.f32.mrf.mxu0  ;;  %v5585_v11 = vpop.f32.mrf.mxu1  ;;  %v17186_v56 = vld [vmem:[#allocation37_spill] sm:$0xff] }
 0x8d1   : > { %v5299_v24 = vadd.f32 %v5288_v4, %v5152_v47  ;;  %v4853_v4 = vadd.f32 %v14716_v62, %v4674_v59 }
 0x8d2   : > { %v5445_v22 = vadd.f32 %v5406_v27, %v5298_v20  ;;  %v5153_v27 = vadd.f32 %v14744_v60, %v5006_v31  ;;  %v5444_v18 = vadd.f32 %v5432_v44, %v5297_v6  ;;  %v4854_v45 = vadd.f32 %v14718_v57, %v4703_v9 }
 0x8d3   : > { %v5446_v32 = vadd.f32 %v5435_v46, %v5299_v24  ;;  %v5000_v35 = vadd.f32 %v14724_v10, %v4853_v4  ;;  %v5448_v21 = vadd.f32 %v17184_v23, %v5301_v30  ;;  %v17196_v30 = vld [vmem:[#allocation9_spill] sm:$0xff]  ;;  %v17197_v23 = vld [vmem:[#allocation22_spill] sm:$0xff] }
 0x8d4   : > { %v5592_v54 = vadd.f32 %v5553_v3, %v5445_v22  ;;  %v5300_v41 = vadd.f32 %v14752_v12, %v5153_v27  ;;  %v5591_v16 = vadd.f32 %v5579_v13, %v5444_v18  ;;  %v5001_v60 = vadd.f32 %v14726_v5, %v4854_v45  ;;  %v17185_v12 = vld [vmem:[#allocation43_spill] sm:$0xff]  ;;  %v17187_v5 = vld [vmem:[#allocation32_spill] sm:$0xff] }
 0x8d5   : > { %v5697_v39 = vpop.f32.mrf.mxu2  ;;  %v5726_v53 = vpop.f32.mrf.mxu3  ;;  %v5593_v47 = vadd.f32 %v5582_v55, %v5446_v32  ;;  %v5147_v15 = vadd.f32 %v17182_v19, %v5000_v35  ;;  %v5595_v36 = vadd.f32 %v5585_v11, %v5448_v21  ;;  %v17189_v3 = vld [vmem:[#allocation40_spill] sm:$0xff]  ;;  %v17192_v2 = vld [vmem:[#allocation39_spill] sm:$0xff]  ;;  %v17195_v35 = vld [vmem:[#allocation10_spill] sm:$0xff] }
 0x8d6   : > { %v5737_v17 = vadd.f32 %v5697_v39, %v5590_v28  ;;  %v5447_v44 = vadd.f32 %v17183_v33, %v5300_v41  ;;  %v5738_v57 = vadd.f32 %v5726_v53, %v5591_v16  ;;  %v5148_v38 = vadd.f32 %v17185_v12, %v5001_v60  ;;  %v17193_v31 = vld [vmem:[#allocation38_spill] sm:$0xff]  ;;  %v17194_v18 = vld [vmem:[#allocation20_spill] sm:$0xff] }
 0x8d7   : > { %v5294_v13 = vadd.f32 %v17186_v56, %v5147_v15 }
 0x8d8   : > { %v5770_v37 = vadd.f32 %v14770_v42, %v5737_v17  ;;  %v5594_v34 = vadd.f32 %v5556_v7, %v5447_v44  ;;  %v5295_v58 = vadd.f32 %v17187_v5, %v5148_v38  ;;  %v5771_v53 = vadd.f32 %v14770_v42, %v5738_v57  ;;  %v5751_v42 = vpop.permute.xlu1 %5750  ;;  %v17198_v57 = vld [vmem:[#allocation6_spill] sm:$0xff] }
 0x8d9   : > { %v5441_v17 = vadd.f32 %v17188_v51, %v5294_v13 }
 0x8da   : > { %v5778_v48 = vmax.f32 %v5770_v37, 0.0  ;;  %v5442_v55 = vadd.f32 %v17189_v3, %v5295_v58  ;;  %v5779_v32 = vmax.f32 %v5771_v53, 0.0 }
 0x8db   : > { %v5588_v20 = vadd.f32 %v17190_v50, %v5441_v17  ;;  %v17199_v50 = vld [vmem:[#allocation11_spill] sm:$0xff] }
 0x8dc   : > { %5796 = vrot.lane.b32.xlu0 %v5778_v48, %s12245_s28  ;;  %v5589_v29 = vadd.f32 %v17191_v63, %v5442_v55 }
 0x8dd   : > { %v5700_v46 = vpop.f32.mrf.mxu2  ;;  %v5729_v14 = vpop.f32.mrf.mxu3  ;;  %v5735_v22 = vadd.f32 %v17192_v2, %v5588_v20 }
 0x8de   : > { %v5739_v0 = vadd.f32 %v5700_v46, %v5592_v54  ;;  %v5740_v26 = vadd.f32 %v5729_v14, %v5593_v47  ;;  %v5736_v8 = vadd.f32 %v17193_v31, %v5589_v29  ;;  %v17200_v29 = vld [vmem:[#allocation8_spill] sm:$0xff] }
 0x8df   : > { %v5768_v6 = vadd.f32 %v5751_v42, %v5735_v22 }
 0x8e0   : > { %v5772_v62 = vadd.f32 %v5761_v52, %v5739_v0  ;;  %v5773_v1 = vadd.f32 %v5761_v52, %v5740_v26  ;;  %v5769_v54 = vadd.f32 %v5751_v42, %v5736_v8 }
 0x8e1   : > { %v5776_v47 = vmax.f32 %v5768_v6, 0.0 }
 0x8e2   : > { %v5780_v25 = vmax.f32 %v5772_v62, 0.0  ;;  %v5781_v10 = vmax.f32 %v5773_v1, 0.0  ;;  %v5777_v9 = vmax.f32 %v5769_v54, 0.0 }
 0x8e4   : > { %5800 = vrot.lane.b32.xlu1 %v5780_v25, %s12245_s28  ;;  %5802 = vrot.lane.b32.xlu2 %v5781_v10, %s12245_s28 }
 0x8e5   : > { %v5703_v28 = vpop.f32.mrf.mxu2  ;;  %v5732_v39 = vpop.f32.mrf.mxu3 }
 0x8e6   : > { %v5741_v40 = vadd.f32 %v5703_v28, %v5594_v34  ;;  %v5742_v49 = vadd.f32 %v5732_v39, %v5595_v36 }
 0x8e8   : > { %v5774_v24 = vadd.f32 %v5766_v61, %v5741_v40  ;;  %v5775_v37 = vadd.f32 %v5766_v61, %v5742_v49 }
 0x8ea   : > { %v5782_v48 = vmax.f32 %v5774_v24, 0.0  ;;  %v5783_v59 = vmax.f32 %v5775_v37, 0.0 }
 0x8ec   : > { %5798 = vrot.lane.b32.xlu1 %v5779_v32, %s12245_s28  ;;  %5804 = vrot.lane.b32.xlu2 %v5782_v48, %s12245_s28 }
 0x8ed   : > { %5806 = vrot.lane.b32.xlu0 %v5783_v59, %s12245_s28  ;;  %v17201_v59 = vld [vmem:[#allocation7_spill] sm:$0xff] }
 0x8f4   : > { %5792 = vrot.lane.b32.xlu2 %v5776_v47, %s12245_s28 }
 0x8f5   : > { %5794 = vrot.lane.b32.xlu0 %v5777_v9, %s12245_s28 }
 0x93e   : > { %v5803_v4 = vpop.permute.xlu2 %5802 }
 0x93f   : > { %5832 = vst.msk [vmem:[#allocation2 + $0x40] sm:$0xff] %vm260_vm2, %v5803_v4 }
 0x946   : > { %v5805_v27 = vpop.permute.xlu2 %5804  ;;  %v14822_v26 = vld [vmem:[#allocation2 + $0x40] sm:$0xff] }
 0x947   : > { %5833 = vst.msk [vmem:[#allocation2 + $0x48] sm:$0xff] %vm277_vm1, %v5805_v27  ;;  %v5869_v16 = vmul.f32 %v14822_v26, %v17196_v30  ;;  %v6078_v54 = vmul.f32 %v14822_v26, %v17201_v59 }
 0x94e   : > { %v5797_v46 = vpop.permute.xlu0 %5796  ;;  %v5793_v14 = vpop.permute.xlu2 %5792  ;;  %v14816_v43 = vld [vmem:[#allocation2 + $0x48] sm:$0xff] }
 0x94f   : > { %5827 = vst.msk [vmem:[#allocation2 + $0x18] sm:$0xff] %vm277_vm1, %v5797_v46  ;;  %v5850_v0 = vmul.f32 %v14816_v43, %v17194_v18  ;;  %v5870_v25 = vmul.f32 %v14816_v43, %v17198_v57  ;;  %v6079_v2 = vmul.f32 %v14816_v43, %v17200_v29 }
 0x950   : > { %5824 = vst.msk [vmem:[#allocation2] sm:$0xff] %vm277_vm1, %v5793_v14 }
 0x951   : > { %6024 = vmatpush.msrb.mxu2 %v5850_v0  ;;  %v17202_v0 = vld [vmem:[#allocation14_spill] sm:$0xff] }
 0x956   : > { %v5801_v52 = vpop.permute.xlu1 %5800  ;;  %v14835_v19 = vld [vmem:[#allocation2 + $0x18] sm:$0xff] }
 0x957   : > { %v14825_v45 = vsel %vm260_vm2, %v5801_v52, %v5803_v4  ;;  %5830 = vst.msk [vmem:[#allocation2 + $0x30] sm:$0xff] %vm277_vm1, %v5801_v52  ;;  %v14844_v7 = vld [vmem:[#allocation2] sm:$0xff]  ;;  %v5846_v11 = vmul.f32 %v14835_v19, %v17194_v18  ;;  %v5864_v17 = vmul.f32 %v14835_v19, %v17198_v57  ;;  %v6073_v47 = vmul.f32 %v14835_v19, %v17200_v29 }
 0x958   : > { %v5868_v41 = vmul.f32 %v14825_v45, %v17195_v35  ;;  %v5844_v12 = vmul.f32 %v14844_v7, %v17194_v18  ;;  %v5849_v56 = vmul.f32 %v14825_v45, %v17197_v23  ;;  %v5861_v24 = vmul.f32 %v14844_v7, %v17198_v57 }
 0x959   : > { %v6077_v8 = vmul.f32 %v14825_v45, %v17199_v50 }
 0x95a   : > { %v11480_v62 = vpack.i.bf16 %v5869_v16, %v5868_v41  ;;  %v6070_v41 = vmul.f32 %v14844_v7, %v17200_v29 }
 0x95b   : > { %v11515_v4 = vpack.i.bf16 %v6078_v54, %v6077_v8 }
 0x95c   : > { %11481 = vrot.lane.b32.xlu0 %v11480_v62, %s12252_s20  ;;  %v17203_v62 = vld [vmem:[#allocation13_spill] sm:$0xff] }
 0x95e   : > { %v5799_v1 = vpop.permute.xlu1 %5798  ;;  %v14833_v60 = vld [vmem:[#allocation2 + $0x30] sm:$0xff] }
 0x95f   : > { %5829 = vst.msk [vmem:[#allocation2 + $0x28] sm:$0xff] %vm260_vm2, %v5799_v1  ;;  %v5807_v15 = vpop.permute.xlu0 %5806  ;;  %v5848_v33 = vmul.f32 %v14833_v60, %v17194_v18  ;;  %v14855_v61 = vsel %vm260_vm2, %v5797_v46, %v5799_v1  ;;  %v5867_v28 = vmul.f32 %v14833_v60, %v17198_v57  ;;  %v6076_v6 = vmul.f32 %v14833_v60, %v17200_v29 }
 0x960   : > { %v14841_v44 = vsel %vm260_vm2, %v5805_v27, %v5807_v15  ;;  %5835 = vst.msk [vmem:[#allocation2 + $0x58] sm:$0xff] %vm260_vm2, %v5807_v15  ;;  %v5847_v13 = vmul.f32 %v14855_v61, %v17197_v23  ;;  %v5865_v5 = vmul.f32 %v14855_v61, %v17195_v35  ;;  %v6074_v42 = vmul.f32 %v14855_v61, %v17199_v50 }
 0x961   : > { %6025 = vmatpush.msrb.mxu2 %v5848_v33  ;;  %v5851_v21 = vmul.f32 %v14841_v44, %v17197_v23  ;;  %v5871_v10 = vmul.f32 %v14841_v44, %v17195_v35  ;;  %v6080_v20 = vmul.f32 %v14841_v44, %v17199_v50  ;;  %v6221_v52 = vmul.f32 %v14855_v61, %v17202_v0 }
 0x962   : > { %v11495_v49 = vpack.i.bf16 %v5865_v5, %v5864_v17  ;;  %v11525_v27 = vpack.i.bf16 %v6074_v42, %v6073_v47  ;;  %v6220_v1 = vmul.f32 %v14835_v19, %v17203_v62  ;;  %v17205_v17 = vld [vmem:[#allocation17_spill] sm:$0xff] }
 0x963   : > { %6026 = vmatpush.msrb.mxu2 %v5846_v11  ;;  %6053 = vmatpush.msrb.mxu3 %v5851_v21  ;;  %v11490_v38 = vpack.i.bf16 %v5871_v10, %v5870_v25  ;;  %v11520_v48 = vpack.i.bf16 %v6080_v20, %v6079_v2  ;;  %v17204_v21 = vld [vmem:[#allocation12_spill] sm:$0xff]  ;;  %v6224_v10 = vmul.f32 %v14825_v45, %v17202_v0 }
 0x964   : > { %v11550_v11 = vpack.i.bf16 %v6221_v52, %v6220_v1  ;;  %v17206_v20 = vld [vmem:[#allocation16_spill] sm:$0xff] }
 0x965   : > { %6027 = vmatpush.msrb.mxu2 %v5844_v12  ;;  %11491 = vrot.lane.b32.xlu1 %v11490_v38, %s12252_s20  ;;  %v6227_v12 = vmul.f32 %v14841_v44, %v17202_v0  ;;  %v6223_v38 = vmul.f32 %v14833_v60, %v17203_v62  ;;  %v6370_v8 = vmul.f32 %v14833_v60, %v17206_v20 }
 0x966   : > { %6054 = vmatpush.msrb.mxu3 %v5849_v56  ;;  %v14880_v40 = vld [vmem:[#allocation2 + $0x28] sm:$0xff]  ;;  %v6225_v56 = vmul.f32 %v14822_v26, %v17204_v21  ;;  %v6364_v52 = vmul.f32 %v14844_v7, %v17206_v20 }
 0x967   : > { %v5795_v34 = vpop.permute.xlu0 %5794  ;;  %v14864_v36 = vld [vmem:[#allocation2 + $0x58] sm:$0xff]  ;;  %v5866_v3 = vmul.f32 %v14880_v40, %v17196_v30  ;;  %v6075_v46 = vmul.f32 %v14880_v40, %v17201_v59 }
 0x968   : > { %v14869_v58 = vsel %vm260_vm2, %v5793_v14, %v5795_v34  ;;  %5826 = vst.msk [vmem:[#allocation2 + $0x10] sm:$0xff] %vm260_vm2, %v5795_v34  ;;  %v5872_v39 = vmul.f32 %v14864_v36, %v17196_v30  ;;  %6055 = vmatpush.msrb.mxu3 %v5847_v13  ;;  %v6081_v31 = vmul.f32 %v14864_v36, %v17201_v59 }
 0x969   : > { %v5845_v51 = vmul.f32 %v14869_v58, %v17197_v23  ;;  %v5862_v37 = vmul.f32 %v14869_v58, %v17195_v35  ;;  %v11500_v22 = vpack.i.bf16 %v5861_v24, %v5866_v3  ;;  %v6071_v16 = vmul.f32 %v14869_v58, %v17199_v50 }
 0x96a   : > { %v11485_v53 = vpack.i.bf16 %v5867_v28, %v5872_v39  ;;  %v11510_v9 = vpack.i.bf16 %v6076_v6, %v6081_v31  ;;  %v11530_v15 = vpack.i.bf16 %v6070_v41, %v6075_v46  ;;  %v6228_v25 = vmul.f32 %v14864_v36, %v17204_v21  ;;  %v17208_v46 = vld [vmem:[#allocation21_spill] sm:$0xff] }
 0x96b   : > { %6056 = vmatpush.msrb.mxu3 %v5845_v51  ;;  %v6226_v13 = vmul.f32 %v14816_v43, %v17203_v62  ;;  %v11545_v5 = vpack.i.bf16 %v6225_v56, %v6224_v10  ;;  %v6222_v39 = vmul.f32 %v14880_v40, %v17204_v21  ;;  %v6218_v3 = vmul.f32 %v14869_v58, %v17202_v0 }
 0x96c   : > { %11486 = vrot.lane.b32.xlu2 %v11485_v53, %s12252_s20  ;;  %v11540_v34 = vpack.i.bf16 %v6223_v38, %v6228_v25  ;;  %v6374_v53 = vmul.f32 %v14841_v44, %v17205_v17  ;;  %v6373_v24 = vmul.f32 %v14816_v43, %v17206_v20  ;;  %v6368_v31 = vmul.f32 %v14855_v61, %v17205_v17  ;;  %v17210_v25 = vld [vmem:[#allocation19_spill] sm:$0xff] }
 0x96d   : > { %11496 = vrot.lane.b32.xlu1 %v11495_v49, %s12252_s20  ;;  %v11575_v28 = vpack.i.bf16 %v6227_v12, %v6226_v13  ;;  %v6217_v49 = vmul.f32 %v14844_v7, %v17203_v62  ;;  %v6367_v6 = vmul.f32 %v14835_v19, %v17206_v20  ;;  %v6365_v41 = vmul.f32 %v14869_v58, %v17205_v17 }
 0x96e   : > { %v11580_v2 = vpack.i.bf16 %v6374_v53, %v6373_v24  ;;  %v6522_v10 = vmul.f32 %v14864_v36, %v17210_v25  ;;  %v6518_v12 = vmul.f32 %v14825_v45, %v17208_v46  ;;  %v6521_v38 = vmul.f32 %v14841_v44, %v17208_v46 }
 0x96f   : > { %v14886_v55 = vld [vmem:[#allocation2 + $0x10] sm:$0xff]  ;;  %v6519_v13 = vmul.f32 %v14822_v26, %v17210_v25 }
 0x970   : > { %v5863_v63 = vmul.f32 %v14886_v55, %v17196_v30  ;;  %v6072_v14 = vmul.f32 %v14886_v55, %v17201_v59  ;;  %v6219_v51 = vmul.f32 %v14886_v55, %v17204_v21  ;;  %v6513_v53 = vmul.f32 %v14886_v55, %v17210_v25 }
 0x972   : > { %v11505_v32 = vpack.i.bf16 %v5863_v63, %v5862_v37  ;;  %v11535_v33 = vpack.i.bf16 %v6072_v14, %v6071_v16  ;;  %v11555_v37 = vpack.i.bf16 %v6217_v49, %v6222_v39  ;;  %v11560_v63 = vpack.i.bf16 %v6219_v51, %v6218_v3  ;;  %v17209_v16 = vld [vmem:[#allocation18_spill] sm:$0xff] }
 0x973   : > { %v6515_v14 = vmul.f32 %v14855_v61, %v17208_v46  ;;  %v6514_v1 = vmul.f32 %v14835_v19, %v17209_v16  ;;  %v6517_v56 = vmul.f32 %v14833_v60, %v17209_v16  ;;  %v6516_v51 = vmul.f32 %v14880_v40, %v17210_v25  ;;  %v17211_v49 = vld [vmem:[#allocation26_spill] sm:$0xff] }
 0x974   : > { %11501 = vrot.lane.b32.xlu2 %v11500_v22, %s12252_s20  ;;  %11506 = vrot.lane.b32.xlu0 %v11505_v32, %s12252_s20  ;;  %v17207_v22 = vld [vmem:[#allocation15_spill] sm:$0xff]  ;;  %v6668_v3 = vmul.f32 %v14841_v44, %v17211_v49  ;;  %v6511_v24 = vmul.f32 %v14844_v7, %v17209_v16 }
 0x975   : > { %11521 = vrot.lane.b32.xlu1 %v11520_v48, %s12251_s18  ;;  %v6375_v32 = vmul.f32 %v14864_v36, %v17207_v22  ;;  %v6371_v48 = vmul.f32 %v14825_v45, %v17205_v17  ;;  %v6372_v42 = vmul.f32 %v14822_v26, %v17207_v22 }
 0x977   : > { %v11565_v54 = vpack.i.bf16 %v6370_v8, %v6375_v32  ;;  %v11570_v47 = vpack.i.bf16 %v6372_v42, %v6371_v48  ;;  %v11615_v32 = vpack.i.bf16 %v6511_v24, %v6516_v51  ;;  %v17213_v8 = vld [vmem:[#allocation24_spill] sm:$0xff] }
 0x978   : > { %v6669_v42 = vmul.f32 %v14864_v36, %v17213_v8 }
 0x97c   : > { %11511 = vrot.lane.b32.xlu2 %v11510_v9, %s12251_s18  ;;  %11516 = vrot.lane.b32.xlu0 %v11515_v4, %s12251_s18  ;;  %v11585_v9 = vpack.i.bf16 %v6368_v31, %v6367_v6  ;;  %v6369_v4 = vmul.f32 %v14880_v40, %v17207_v22  ;;  %v6665_v6 = vmul.f32 %v14825_v45, %v17211_v49 }
 0x97d   : > { %11526 = vrot.lane.b32.xlu1 %v11525_v27, %s12251_s18  ;;  %v6366_v27 = vmul.f32 %v14886_v55, %v17207_v22 }
 0x984   : > { %11531 = vrot.lane.b32.xlu2 %v11530_v15, %s12251_s18  ;;  %11536 = vrot.lane.b32.xlu0 %v11535_v33, %s12251_s18  ;;  %v11590_v15 = vpack.i.bf16 %v6364_v52, %v6369_v4  ;;  %v11595_v33 = vpack.i.bf16 %v6366_v27, %v6365_v41  ;;  %v6663_v41 = vmul.f32 %v14880_v40, %v17213_v8 }
 0x985   : > { %11551 = vrot.lane.b32.xlu1 %v11550_v11, %s12254_s25  ;;  %v11610_v11 = vpack.i.bf16 %v6515_v14, %v6514_v1  ;;  %v6660_v1 = vmul.f32 %v14886_v55, %v17213_v8 }
 0x98c   : > { %11541 = vrot.lane.b32.xlu2 %v11540_v34, %s12254_s25  ;;  %11546 = vrot.lane.b32.xlu0 %v11545_v5, %s12254_s25  ;;  %v6520_v34 = vmul.f32 %v14816_v43, %v17209_v16  ;;  %v11600_v5 = vpack.i.bf16 %v6517_v56, %v6522_v10  ;;  %v6659_v10 = vmul.f32 %v14869_v58, %v17211_v49 }
 0x98d   : > { %11576 = vrot.lane.b32.xlu1 %v11575_v28, %s12254_s25  ;;  %v11605_v28 = vpack.i.bf16 %v6519_v13, %v6518_v12  ;;  %v17215_v12 = vld [vmem:[#allocation23_spill] sm:$0xff] }
 0x98e   : > { %v11635_v39 = vpack.i.bf16 %v6521_v38, %v6520_v34  ;;  %v6808_v38 = vmul.f32 %v14835_v19, %v17215_v12  ;;  %v11655_v13 = vpack.i.bf16 %v6660_v1, %v6659_v10  ;;  %v6811_v24 = vmul.f32 %v14833_v60, %v17215_v12 }
 0x994   : > { %11556 = vrot.lane.b32.xlu2 %v11555_v37, %s12254_s25  ;;  %11561 = vrot.lane.b32.xlu0 %v11560_v63, %s12254_s25  ;;  %v6512_v37 = vmul.f32 %v14869_v58, %v17208_v46  ;;  %v17212_v63 = vld [vmem:[#allocation25_spill] sm:$0xff] }
 0x995   : > { %11581 = vrot.lane.b32.xlu1 %v11580_v2, %s12257_s7  ;;  %v6667_v2 = vmul.f32 %v14816_v43, %v17212_v63  ;;  %v6661_v4 = vmul.f32 %v14835_v19, %v17212_v63 }
 0x996   : > { %v11620_v48 = vpack.i.bf16 %v6513_v53, %v6512_v37 }
 0x997   : > { %v11640_v31 = vpack.i.bf16 %v6668_v3, %v6667_v2  ;;  %v5853_v3 = vld [vmem:[#allocation3 + $0x480] sm:$0xff]  ;;  %v6814_v2 = vmul.f32 %v14816_v43, %v17215_v12 }
 0x998   : > { %10250 = vmatmul.msk.f32.vlgmr.msrb.gmra.mxu3 %vm418_vm8, %v5853_v3  ;;  %10246 = vmatmul.msk.f32.vlgmr.msrb.gmra.mxu2 %vm418_vm8, %v5853_v3 }
 0x99c   : > { %11566 = vrot.lane.b32.xlu2 %v11565_v54, %s12257_s7  ;;  %11571 = vrot.lane.b32.xlu0 %v11570_v47, %s12257_s7  ;;  %v6662_v54 = vmul.f32 %v14855_v61, %v17211_v49  ;;  %v6664_v47 = vmul.f32 %v14833_v60, %v17212_v63 }
 0x99d   : > { %11586 = vrot.lane.b32.xlu1 %v11585_v9, %s12257_s7  ;;  %v6666_v9 = vmul.f32 %v14822_v26, %v17213_v8 }
 0x99e   : > { %v11625_v27 = vpack.i.bf16 %v6664_v47, %v6669_v42  ;;  %v11645_v52 = vpack.i.bf16 %v6662_v54, %v6661_v4  ;;  %v17217_v47 = vld [vmem:[#allocation31_spill] sm:$0xff] }
 0x99f   : > { %v11630_v14 = vpack.i.bf16 %v6666_v9, %v6665_v6  ;;  %v6962_v9 = vmul.f32 %v14841_v44, %v17217_v47  ;;  %v5854_v4 = vld [vmem:[#allocation3 + $0x488] sm:$0xff]  ;;  %v6959_v10 = vmul.f32 %v14825_v45, %v17217_v47 }
 0x9a0   : > { %10251 = vmatmul.msk.f32.gmra.mxu3 %vm418_vm8, %v5854_v4  ;;  %10247 = vmatmul.msk.f32.gmra.mxu2 %vm418_vm8, %v5854_v4 }
 0x9a4   : > { %11591 = vrot.lane.b32.xlu2 %v11590_v15, %s12257_s7  ;;  %11596 = vrot.lane.b32.xlu0 %v11595_v33, %s12257_s7  ;;  %v17214_v15 = vld [vmem:[#allocation29_spill] sm:$0xff] }
 0x9a5   : > { %11611 = vrot.lane.b32.xlu1 %v11610_v11, %s12258_s10  ;;  %v6809_v33 = vmul.f32 %v14855_v61, %v17214_v15  ;;  %v6658_v11 = vmul.f32 %v14844_v7, %v17212_v63  ;;  %v6812_v51 = vmul.f32 %v14825_v45, %v17214_v15  ;;  %v6815_v53 = vmul.f32 %v14841_v44, %v17214_v15 }
 0x9a7   : > { %v11650_v56 = vpack.i.bf16 %v6658_v11, %v6663_v41  ;;  %v11670_v34 = vpack.i.bf16 %v6809_v33, %v6808_v38 }
 0x9ac   : > { %11601 = vrot.lane.b32.xlu2 %v11600_v5, %s12258_s10  ;;  %11606 = vrot.lane.b32.xlu0 %v11605_v28, %s12258_s10  ;;  %v17216_v28 = vld [vmem:[#allocation28_spill] sm:$0xff] }
 0x9ad   : > { %11636 = vrot.lane.b32.xlu1 %v11635_v39, %s12258_s10  ;;  %v6816_v39 = vmul.f32 %v14864_v36, %v17216_v28  ;;  %v6813_v37 = vmul.f32 %v14822_v26, %v17216_v28  ;;  %v6810_v6 = vmul.f32 %v14880_v40, %v17216_v28  ;;  %v6807_v54 = vmul.f32 %v14886_v55, %v17216_v28 }
 0x9b4   : > { %11616 = vrot.lane.b32.xlu2 %v11615_v32, %s12258_s10  ;;  %11621 = vrot.lane.b32.xlu0 %v11620_v48, %s12258_s10  ;;  %v11660_v32 = vpack.i.bf16 %v6811_v24, %v6816_v39  ;;  %v11665_v48 = vpack.i.bf16 %v6813_v37, %v6812_v51  ;;  %v6956_v51 = vmul.f32 %v14855_v61, %v17217_v47 }
 0x9b5   : > { %11641 = vrot.lane.b32.xlu1 %v11640_v31, %s12259_s11  ;;  %v11695_v31 = vpack.i.bf16 %v6815_v53, %v6814_v2  ;;  %v5855_v53 = vld [vmem:[#allocation3 + $0x490] sm:$0xff] }
 0x9b6   : > { %10252 = vmatmul.msk.f32.gmra.mxu3 %vm418_vm8, %v5855_v53  ;;  %10248 = vmatmul.msk.f32.gmra.mxu2 %vm418_vm8, %v5855_v53 }
 0x9bc   : > { %11626 = vrot.lane.b32.xlu2 %v11625_v27, %s12259_s11  ;;  %11631 = vrot.lane.b32.xlu0 %v11630_v14, %s12259_s11  ;;  %v6805_v27 = vmul.f32 %v14844_v7, %v17215_v12  ;;  %v6806_v14 = vmul.f32 %v14869_v58, %v17214_v15 }
 0x9bd   : > { %11646 = vrot.lane.b32.xlu1 %v11645_v52, %s12259_s11  ;;  %v17218_v52 = vld [vmem:[#allocation27_spill] sm:$0xff] }
 0x9be   : > { %v6961_v41 = vmul.f32 %v14816_v43, %v17218_v52  ;;  %v11675_v1 = vpack.i.bf16 %v6805_v27, %v6810_v6  ;;  %v11680_v33 = vpack.i.bf16 %v6807_v54, %v6806_v14  ;;  %v6958_v43 = vmul.f32 %v14833_v60, %v17218_v52  ;;  %v5856_v14 = vld [vmem:[#allocation3 + $0x498] sm:$0xff] }
 0x9bf   : > { %v6955_v60 = vmul.f32 %v14835_v19, %v17218_v52  ;;  %v6952_v4 = vmul.f32 %v14844_v7, %v17218_v52  ;;  %10253 = vmatmul.msk.f32.gmra.mxu3 %vm418_vm8, %v5856_v14  ;;  %10249 = vmatmul.msk.f32.gmra.mxu2 %vm418_vm8, %v5856_v14  ;;  %v10313_v7 = vld [vmem:[%s16805_s2 + $0x98] sm:$0xff] }
 0x9c0   : > { %v11700_v11 = vpack.i.bf16 %v6962_v9, %v6961_v41 }
 0x9c4   : > { %11651 = vrot.lane.b32.xlu2 %v11650_v56, %s12259_s11  ;;  %11656 = vrot.lane.b32.xlu0 %v11655_v13, %s12259_s11  ;;  %v17219_v56 = vld [vmem:[#allocation30_spill] sm:$0xff] }
 0x9c5   : > { %11671 = vrot.lane.b32.xlu1 %v11670_v34, %s12260_s12  ;;  %v6963_v13 = vmul.f32 %v14864_v36, %v17219_v56  ;;  %v6960_v34 = vmul.f32 %v14822_v26, %v17219_v56  ;;  %v6957_v54 = vmul.f32 %v14880_v40, %v17219_v56  ;;  %v6954_v9 = vmul.f32 %v14886_v55, %v17219_v56 }
 0x9c6   : > { %v11487_v5 = vpop.permute.xlu2 %11486 }
 0x9c7   : > { %v11488_v3 = vunpack.i.l.bf16 %v11487_v5  ;;  %v11690_v2 = vpack.i.bf16 %v6960_v34, %v6959_v10  ;;  %v11685_v26 = vpack.i.bf16 %v6958_v43, %v6963_v13  ;;  %v11710_v40 = vpack.i.bf16 %v6952_v4, %v6957_v54  ;;  %v5875_v4 = vld [vmem:[#allocation3 + $0x4a8] sm:$0xff] }
 0x9cc   : > { %11661 = vrot.lane.b32.xlu2 %v11660_v32, %s12260_s12  ;;  %11666 = vrot.lane.b32.xlu0 %v11665_v48, %s12260_s12  ;;  %v11489_v32 = vunpack.i.h.bf16 %v11487_v5 }
 0x9cd   : > { %11696 = vrot.lane.b32.xlu1 %v11695_v31, %s12260_s12  ;;  %v11705_v31 = vpack.i.bf16 %v6956_v51, %v6955_v60 }
 0x9ce   : > { %v15068_v42 = vpop.permute.xlu2 %11501  ;;  %v11482_v44 = vpop.permute.xlu0 %11481 }
 0x9cf   : > { %v11483_v24 = vunpack.i.l.bf16 %v11482_v44  ;;  %v11484_v36 = vunpack.i.h.bf16 %v11482_v44  ;;  %v11503_v41 = vunpack.i.l.bf16 %v15068_v42  ;;  %v11504_v43 = vunpack.i.h.bf16 %v15068_v42 }
 0x9d1   : > { %v5918_v6 = vsel %vm401_vm6, %v11489_v32, %v11483_v24  ;;  %v5919_v19 = vsel %vm401_vm6, %v11483_v24, %v11484_v36  ;;  %v10311_v36 = vld [vmem:[%s16805_s2 + $0x88] sm:$0xff] }
 0x9d4   : > { %11676 = vrot.lane.b32.xlu2 %v11675_v1, %s12260_s12  ;;  %11681 = vrot.lane.b32.xlu0 %v11680_v33, %s12260_s12  ;;  %v6953_v1 = vmul.f32 %v14869_v58, %v17217_v47 }
 0x9d5   : > { %11701 = vrot.lane.b32.xlu1 %v11700_v11, %s12261_s13 }
 0x9d6   : > { %v15089_v38 = vpop.permute.xlu2 %11511  ;;  %v11715_v44 = vpack.i.bf16 %v6954_v9, %v6953_v1 }
 0x9d7   : > { %v11492_v39 = vpop.permute.xlu1 %11491  ;;  %v11513_v53 = vunpack.i.l.bf16 %v15089_v38 }
 0x9d8   : > { %v11494_v37 = vunpack.i.h.bf16 %v11492_v39  ;;  %v11493_v45 = vunpack.i.l.bf16 %v11492_v39 }
 0x9da   : > { %v5920_v48 = vsel %vm401_vm6, %v11493_v45, %v11494_v37  ;;  %v5921_v61 = vsel %vm401_vm6, %v11494_v37, %v11488_v3  ;;  %v5874_v3 = vld [vmem:[#allocation3 + $0x4a0] sm:$0xff]  ;;  %v10312_v45 = vld [vmem:[%s16805_s2 + $0x90] sm:$0xff] }
 0x9db   : > { %5954 = vmatpush.msra.mxu0 %v5920_v48  ;;  %5983 = vmatpush.msra.mxu1 %v5921_v61 }
 0x9dc   : > { %11686 = vrot.lane.b32.xlu2 %v11685_v26, %s12261_s13  ;;  %11691 = vrot.lane.b32.xlu0 %v11690_v2, %s12261_s13  ;;  %v10310_v26 = vld [vmem:[%s16805_s2 + $0x80] sm:$0xff] }
 0x9dd   : > { %11706 = vrot.lane.b32.xlu1 %v11705_v31, %s12261_s13  ;;  %5955 = vmatpush.msra.mxu0 %v5918_v6  ;;  %v11514_v31 = vunpack.i.h.bf16 %v15089_v38 }
 0x9de   : > { %v15110_v5 = vpop.permute.xlu2 %11531  ;;  %5984 = vmatpush.msra.mxu1 %v5919_v19 }
 0x9df   : > { %v11497_v27 = vpop.permute.xlu1 %11496  ;;  %v11533_v9 = vunpack.i.l.bf16 %v15110_v5 }
 0x9e0   : > { %v11499_v33 = vunpack.i.h.bf16 %v11497_v27  ;;  %v11498_v11 = vunpack.i.l.bf16 %v11497_v27 }
 0x9e2   : > { %v5916_v55 = vsel %vm401_vm6, %v11498_v11, %v11499_v33  ;;  %v5917_v10 = vsel %vm401_vm6, %v11499_v33, %v11503_v41 }
 0x9e3   : > { %5956 = vmatpush.msra.mxu0 %v5916_v55  ;;  %5985 = vmatpush.msra.mxu1 %v5917_v10 }
 0x9e4   : > { %11711 = vrot.lane.b32.xlu2 %v11710_v40, %s12261_s13  ;;  %11716 = vrot.lane.b32.xlu0 %v11715_v44, %s12261_s13  ;;  %v11534_v44 = vunpack.i.h.bf16 %v15110_v5 }
 0x9e5   : > { %7121 = vperm.xlu1 %10758, %v10313_v7  }
 0x9e6   : > { %v15130_v58 = vpop.permute.xlu2 %11541  ;;  %v11507_v13 = vpop.permute.xlu0 %11506 }
 0x9e7   : > { %v11509_v34 = vunpack.i.h.bf16 %v11507_v13  ;;  %v11508_v39 = vunpack.i.l.bf16 %v11507_v13  ;;  %v11522_v51 = vpop.permute.xlu1 %11521  ;;  %v5876_v13 = vld [vmem:[#allocation3 + $0x4b0] sm:$0xff]  ;;  %v11543_v5 = vunpack.i.l.bf16 %v15130_v58 }
 0x9e8   : > { %v11524_v24 = vunpack.i.h.bf16 %v11522_v51  ;;  %v11523_v37 = vunpack.i.l.bf16 %v11522_v51 }
 0x9e9   : > { %v5914_v2 = vsel %vm401_vm6, %v11504_v43, %v11508_v39  ;;  %v5915_v42 = vsel %vm401_vm6, %v11508_v39, %v11509_v34 }
 0x9ea   : > { %5957 = vmatpush.msra.mxu0 %v5914_v2  ;;  %5986 = vmatpush.msra.mxu1 %v5915_v42  ;;  %v6129_v60 = vsel %vm624_vm9, %v11523_v37, %v11524_v24  ;;  %v6130_v32 = vsel %vm624_vm9, %v11524_v24, %v11513_v53 }
 0x9eb   : > { %10238 = vmatmul.msk.f32.vlgmr.msra.gmra.mxu0 %vm418_vm8, %v5874_v3  ;;  %10242 = vmatmul.msk.f32.vlgmr.msra.gmra.mxu1 %vm418_vm8, %v5874_v3  ;;  %v5877_v3 = vld [vmem:[#allocation3 + $0x4b8] sm:$0xff] }
 0x9ec   : > { %7116 = vperm.xlu2 %10759, %v10312_v45   ;;  %7111 = vperm.xlu0 %10757, %v10311_v36  }
 0x9ed   : > { %6163 = vmatpush.msrb.mxu0 %v6129_v60  ;;  %6192 = vmatpush.msrb.mxu1 %v6130_v32  ;;  %v11544_v60 = vunpack.i.h.bf16 %v15130_v58 }
 0x9ee   : > { %v15149_v48 = vpop.permute.xlu2 %11556  ;;  %v11517_v61 = vpop.permute.xlu0 %11516  ;;  %7106 = vperm.xlu1 %10758, %v10310_v26  }
 0x9ef   : > { %v11519_v6 = vunpack.i.h.bf16 %v11517_v61  ;;  %v11518_v19 = vunpack.i.l.bf16 %v11517_v61  ;;  %v11527_v54 = vpop.permute.xlu1 %11526  ;;  %v11558_v61 = vunpack.i.l.bf16 %v15149_v48 }
 0x9f0   : > { %v11529_v27 = vunpack.i.h.bf16 %v11527_v54  ;;  %v11528_v14 = vunpack.i.l.bf16 %v11527_v54 }
 0x9f1   : > { %v6127_v41 = vsel %vm624_vm9, %v11514_v31, %v11518_v19  ;;  %v6128_v1 = vsel %vm624_vm9, %v11518_v19, %v11519_v6  ;;  %v11559_v19 = vunpack.i.h.bf16 %v15149_v48 }
 0x9f2   : > { %6164 = vmatpush.msrb.mxu0 %v6127_v41  ;;  %6193 = vmatpush.msrb.mxu1 %v6128_v1  ;;  %v6125_v33 = vsel %vm624_vm9, %v11528_v14, %v11529_v27  ;;  %v6126_v11 = vsel %vm624_vm9, %v11529_v27, %v11533_v9 }
 0x9f3   : > { %10239 = vmatmul.msk.f32.gmra.mxu0 %vm418_vm8, %v5875_v4  ;;  %10243 = vmatmul.msk.f32.gmra.mxu1 %vm418_vm8, %v5875_v4 }
 0x9f4   : > { %6165 = vmatpush.msrb.mxu0 %v6125_v33  ;;  %6194 = vmatpush.msrb.mxu1 %v6126_v11  ;;  %v6083_v33 = vld [vmem:[#allocation3 + $0x4c0] sm:$0xff] }
 0x9f6   : > { %v15159_v38 = vpop.permute.xlu2 %11566  ;;  %v11537_v40 = vpop.permute.xlu0 %11536 }
 0x9f7   : > { %v11539_v55 = vunpack.i.h.bf16 %v11537_v40  ;;  %v11538_v10 = vunpack.i.l.bf16 %v11537_v40  ;;  %v11552_v7 = vpop.permute.xlu1 %11551  ;;  %v11568_v1 = vunpack.i.l.bf16 %v15159_v38 }
 0x9f8   : > { %v11554_v32 = vunpack.i.h.bf16 %v11552_v7  ;;  %v11553_v26 = vunpack.i.l.bf16 %v11552_v7 }
 0x9f9   : > { %v6123_v43 = vsel %vm624_vm9, %v11534_v44, %v11538_v10  ;;  %v6124_v34 = vsel %vm624_vm9, %v11538_v10, %v11539_v55  ;;  %v6230_v55 = vld [vmem:[#allocation3 + $0x4e0] sm:$0xff] }
 0x9fa   : > { %6166 = vmatpush.msrb.mxu0 %v6123_v43  ;;  %6195 = vmatpush.msrb.mxu1 %v6124_v34  ;;  %v6272_v14 = vsel %vm784_vm10, %v11553_v26, %v11554_v32  ;;  %v6273_v41 = vsel %vm784_vm10, %v11554_v32, %v11558_v61  ;;  %v11569_v43 = vunpack.i.h.bf16 %v15159_v38 }
 0x9fb   : > { %10240 = vmatmul.msk.f32.gmra.mxu0 %vm418_vm8, %v5876_v13  ;;  %10244 = vmatmul.msk.f32.gmra.mxu1 %vm418_vm8, %v5876_v13 }
 0x9fe   : > { %v15166_v39 = vpop.permute.xlu2 %11591  ;;  %v11547_v51 = vpop.permute.xlu0 %11546 }
 0x9ff   : > { %v11577_v53 = vpop.permute.xlu1 %11576  ;;  %v11549_v45 = vunpack.i.h.bf16 %v11547_v51  ;;  %v11548_v36 = vunpack.i.l.bf16 %v11547_v51  ;;  %v11594_v26 = vunpack.i.h.bf16 %v15166_v39 }
 0xa00   : > { %v11579_v24 = vunpack.i.h.bf16 %v11577_v53  ;;  %v11578_v37 = vunpack.i.l.bf16 %v11577_v53 }
 0xa01   : > { %v6274_v31 = vsel %vm784_vm10, %v11544_v60, %v11548_v36  ;;  %v6275_v6 = vsel %vm784_vm10, %v11548_v36, %v11549_v45 }
 0xa02   : > { %v6276_v2 = vsel %vm784_vm10, %v11578_v37, %v11579_v24  ;;  %v6277_v42 = vsel %vm784_vm10, %v11579_v24, %v11543_v5  ;;  %v11593_v5 = vunpack.i.l.bf16 %v15166_v39 }
 0xa03   : > { %10241 = vmatmul.msk.f32.gmra.mxu0 %vm418_vm8, %v5877_v3  ;;  %10245 = vmatmul.msk.f32.gmra.mxu1 %vm418_vm8, %v5877_v3  ;;  %v6084_v3 = vld [vmem:[#allocation3 + $0x4c8] sm:$0xff] }
 0xa04   : > { %6310 = vmatpush.msra.mxu2 %v6276_v2  ;;  %6339 = vmatpush.msra.mxu3 %v6277_v42  ;;  %v6231_v42 = vld [vmem:[#allocation3 + $0x4e8] sm:$0xff] }
 0xa06   : > { %v11562_v54 = vpop.permute.xlu0 %11561  ;;  %6311 = vmatpush.msra.mxu2 %v6274_v31  ;;  %6340 = vmatpush.msra.mxu3 %v6275_v6  ;;  %v15178_v58 = vpop.permute.xlu2 %11601 }
 0xa07   : > { %v11564_v9 = vunpack.i.h.bf16 %v11562_v54  ;;  %v11563_v4 = vunpack.i.l.bf16 %v11562_v54  ;;  %v11582_v27 = vpop.permute.xlu1 %11581 }
 0xa08   : > { %v11584_v11 = vunpack.i.h.bf16 %v11582_v27  ;;  %v11583_v40 = vunpack.i.l.bf16 %v11582_v27  ;;  %6312 = vmatpush.msra.mxu2 %v6272_v14  ;;  %6341 = vmatpush.msra.mxu3 %v6273_v41  ;;  %v11603_v41 = vunpack.i.l.bf16 %v15178_v58 }
 0xa09   : > { %v6270_v48 = vsel %vm784_vm10, %v11559_v19, %v11563_v4  ;;  %v6271_v44 = vsel %vm784_vm10, %v11563_v4, %v11564_v9  ;;  %v6085_v19 = vld [vmem:[#allocation3 + $0x4d0] sm:$0xff] }
 0xa0a   : > { %6313 = vmatpush.msra.mxu2 %v6270_v48  ;;  %6342 = vmatpush.msra.mxu3 %v6271_v44  ;;  %v6423_v10 = vsel %vm943_vm11, %v11583_v40, %v11584_v11  ;;  %v6424_v7 = vsel %vm943_vm11, %v11584_v11, %v11568_v1  ;;  %v6232_v4 = vld [vmem:[#allocation3 + $0x4f0] sm:$0xff]  ;;  %v6086_v1 = vld [vmem:[#allocation3 + $0x4d8] sm:$0xff] }
 0xa0b   : > { %10254 = vmatmul.msk.f32.vlgmr.msrb.gmra.mxu0 %vm418_vm8, %v6083_v33  ;;  %10258 = vmatmul.msk.f32.vlgmr.msrb.gmra.mxu1 %vm418_vm8, %v6083_v33  ;;  %v6233_v40 = vld [vmem:[#allocation3 + $0x4f8] sm:$0xff] }
 0xa0c   : > { %10262 = vmatmul.msk.f32.vlgmr.msra.gmra.mxu2 %vm418_vm8, %v6230_v55  ;;  %10266 = vmatmul.msk.f32.vlgmr.msra.gmra.mxu3 %vm418_vm8, %v6230_v55 }
 0xa0d   : > { %6457 = vmatpush.msra.mxu0 %v6423_v10  ;;  %6486 = vmatpush.msra.mxu1 %v6424_v7  ;;  %v11604_v7 = vunpack.i.h.bf16 %v15178_v58 }
 0xa0e   : > { %v11572_v13 = vpop.permute.xlu0 %11571  ;;  %v15193_v45 = vpop.permute.xlu2 %11616 }
 0xa0f   : > { %v11574_v34 = vunpack.i.h.bf16 %v11572_v13  ;;  %v11573_v51 = vunpack.i.l.bf16 %v11572_v13  ;;  %v11587_v53 = vpop.permute.xlu1 %11586 }
 0xa10   : > { %v11589_v24 = vunpack.i.h.bf16 %v11587_v53  ;;  %v11588_v37 = vunpack.i.l.bf16 %v11587_v53 }
 0xa11   : > { %v6421_v36 = vsel %vm943_vm11, %v11569_v43, %v11573_v51  ;;  %v6422_v2 = vsel %vm943_vm11, %v11573_v51, %v11574_v34  ;;  %v11618_v51 = vunpack.i.l.bf16 %v15193_v45 }
 0xa12   : > { %6458 = vmatpush.msra.mxu0 %v6421_v36  ;;  %6487 = vmatpush.msra.mxu1 %v6422_v2  ;;  %v6419_v60 = vsel %vm943_vm11, %v11588_v37, %v11589_v24  ;;  %v6420_v38 = vsel %vm943_vm11, %v11589_v24, %v11593_v5  ;;  %v11619_v24 = vunpack.i.h.bf16 %v15193_v45  ;;  %v6377_v2 = vld [vmem:[#allocation3 + $0x500] sm:$0xff] }
 0xa13   : > { %10255 = vmatmul.msk.f32.gmra.mxu0 %vm418_vm8, %v6084_v3  ;;  %10259 = vmatmul.msk.f32.gmra.mxu1 %vm418_vm8, %v6084_v3 }
 0xa14   : > { %10263 = vmatmul.msk.f32.gmra.mxu2 %vm418_vm8, %v6231_v42  ;;  %10267 = vmatmul.msk.f32.gmra.mxu3 %vm418_vm8, %v6231_v42 }
 0xa15   : > { %6459 = vmatpush.msra.mxu0 %v6419_v60  ;;  %6488 = vmatpush.msra.mxu1 %v6420_v38 }
 0xa16   : > { %v11597_v32 = vpop.permute.xlu0 %11596  ;;  %v15206_v27 = vpop.permute.xlu2 %11626 }
 0xa17   : > { %v11599_v61 = vunpack.i.h.bf16 %v11597_v32  ;;  %v11598_v31 = vunpack.i.l.bf16 %v11597_v32  ;;  %v11612_v6 = vpop.permute.xlu1 %11611 }
 0xa18   : > { %v11614_v13 = vunpack.i.h.bf16 %v11612_v6  ;;  %v11613_v43 = vunpack.i.l.bf16 %v11612_v6 }
 0xa19   : > { %v6417_v54 = vsel %vm943_vm11, %v11594_v26, %v11598_v31  ;;  %v6418_v9 = vsel %vm943_vm11, %v11598_v31, %v11599_v61  ;;  %v11628_v26 = vunpack.i.l.bf16 %v15206_v27  ;;  %v6524_v31 = vld [vmem:[#allocation3 + $0x520] sm:$0xff] }
 0xa1a   : > { %6460 = vmatpush.msra.mxu0 %v6417_v54  ;;  %6489 = vmatpush.msra.mxu1 %v6418_v9  ;;  %v6566_v38 = vsel %vm1103_vm13, %v11613_v43, %v11614_v13  ;;  %v6567_v32 = vsel %vm1103_vm13, %v11614_v13, %v11618_v51  ;;  %v11629_v9 = vunpack.i.h.bf16 %v15206_v27 }
 0xa1b   : > { %10256 = vmatmul.msk.f32.gmra.mxu0 %vm418_vm8, %v6085_v19  ;;  %10260 = vmatmul.msk.f32.gmra.mxu1 %vm418_vm8, %v6085_v19 }
 0xa1c   : > { %10264 = vmatmul.msk.f32.gmra.mxu2 %vm418_vm8, %v6232_v4  ;;  %10268 = vmatmul.msk.f32.gmra.mxu3 %vm418_vm8, %v6232_v4 }
 0xa1e   : > { %v11607_v39 = vpop.permute.xlu0 %11606  ;;  %v15220_v34 = vpop.permute.xlu2 %11651 }
 0xa1f   : > { %v11637_v14 = vpop.permute.xlu1 %11636  ;;  %v11609_v48 = vunpack.i.h.bf16 %v11607_v39  ;;  %v11608_v44 = vunpack.i.l.bf16 %v11607_v39  ;;  %v11654_v13 = vunpack.i.h.bf16 %v15220_v34 }
 0xa20   : > { %v11639_v33 = vunpack.i.h.bf16 %v11637_v14  ;;  %v11638_v11 = vunpack.i.l.bf16 %v11637_v14 }
 0xa21   : > { %v6568_v5 = vsel %vm1103_vm13, %v11604_v7, %v11608_v44  ;;  %v6569_v3 = vsel %vm1103_vm13, %v11608_v44, %v11609_v48 }
 0xa22   : > { %v6570_v55 = vsel %vm1103_vm13, %v11638_v11, %v11639_v33  ;;  %v6571_v10 = vsel %vm1103_vm13, %v11639_v33, %v11603_v41  ;;  %v6378_v33 = vld [vmem:[#allocation3 + $0x508] sm:$0xff] }
 0xa23   : > { %10257 = vmatmul.msk.f32.gmra.mxu0 %vm418_vm8, %v6086_v1  ;;  %10261 = vmatmul.msk.f32.gmra.mxu1 %vm418_vm8, %v6086_v1  ;;  %v11653_v1 = vunpack.i.l.bf16 %v15220_v34 }
 0xa24   : > { %10265 = vmatmul.msk.f32.gmra.mxu2 %vm418_vm8, %v6233_v40  ;;  %10269 = vmatmul.msk.f32.gmra.mxu3 %vm418_vm8, %v6233_v40 }
 0xa25   : > { %6604 = vmatpush.msrb.mxu2 %v6570_v55  ;;  %6633 = vmatpush.msrb.mxu3 %v6571_v10  ;;  %v6525_v55 = vld [vmem:[#allocation3 + $0x528] sm:$0xff] }
 0xa26   : > { %v11622_v53 = vpop.permute.xlu0 %11621  ;;  %v11662_v4 = vpop.permute.xlu2 %11661 }
 0xa27   : > { %v11624_v58 = vunpack.i.h.bf16 %v11622_v53  ;;  %v11623_v37 = vunpack.i.l.bf16 %v11622_v53  ;;  %6605 = vmatpush.msrb.mxu2 %v6568_v5  ;;  %6634 = vmatpush.msrb.mxu3 %v6569_v3  ;;  %v11642_v36 = vpop.permute.xlu1 %11641  ;;  %v6379_v5 = vld [vmem:[#allocation3 + $0x510] sm:$0xff] }
 0xa28   : > { %v11644_v42 = vunpack.i.h.bf16 %v11642_v36  ;;  %v11643_v60 = vunpack.i.l.bf16 %v11642_v36 }
 0xa29   : > { %6606 = vmatpush.msrb.mxu2 %v6566_v38  ;;  %6635 = vmatpush.msrb.mxu3 %v6567_v32  ;;  %v6564_v61 = vsel %vm1103_vm13, %v11619_v24, %v11623_v37  ;;  %v6565_v45 = vsel %vm1103_vm13, %v11623_v37, %v11624_v58  ;;  %v6526_v37 = vld [vmem:[#allocation3 + $0x530] sm:$0xff] }
 0xa2a   : > { %v6717_v6 = vsel %vm1262_vm14, %v11643_v60, %v11644_v42  ;;  %v6718_v19 = vsel %vm1262_vm14, %v11644_v42, %v11628_v26  ;;  %v6380_v42 = vld [vmem:[#allocation3 + $0x518] sm:$0xff] }
 0xa2b   : > { %10270 = vmatmul.msk.f32.vlgmr.msra.gmra.mxu0 %vm418_vm8, %v6377_v2  ;;  %10274 = vmatmul.msk.f32.vlgmr.msra.gmra.mxu1 %vm418_vm8, %v6377_v2  ;;  %v11663_v2 = vunpack.i.l.bf16 %v11662_v4 }
 0xa2c   : > { %6607 = vmatpush.msrb.mxu2 %v6564_v61  ;;  %6636 = vmatpush.msrb.mxu3 %v6565_v45  ;;  %v6527_v61 = vld [vmem:[#allocation3 + $0x538] sm:$0xff] }
 0xa2d   : > { %10278 = vmatmul.msk.f32.vlgmr.msrb.gmra.mxu2 %vm418_vm8, %v6524_v31  ;;  %10282 = vmatmul.msk.f32.vlgmr.msrb.gmra.mxu3 %vm418_vm8, %v6524_v31 }
 0xa2e   : > { %v11632_v54 = vpop.permute.xlu0 %11631  ;;  %6751 = vmatpush.msrb.mxu0 %v6717_v6  ;;  %6780 = vmatpush.msrb.mxu1 %v6718_v19  ;;  %v11677_v3 = vpop.permute.xlu2 %11676  ;;  %v11664_v6 = vunpack.i.h.bf16 %v11662_v4 }
 0xa2f   : > { %v11634_v39 = vunpack.i.h.bf16 %v11632_v54  ;;  %v11633_v14 = vunpack.i.l.bf16 %v11632_v54  ;;  %v11647_v41 = vpop.permute.xlu1 %11646 }
 0xa30   : > { %v11649_v11 = vunpack.i.h.bf16 %v11647_v41  ;;  %v11648_v40 = vunpack.i.l.bf16 %v11647_v41 }
 0xa31   : > { %v6715_v48 = vsel %vm1262_vm14, %v11629_v9, %v11633_v14  ;;  %v6716_v44 = vsel %vm1262_vm14, %v11633_v14, %v11634_v39  ;;  %v11678_v39 = vunpack.i.l.bf16 %v11677_v3 }
 0xa32   : > { %6752 = vmatpush.msrb.mxu0 %v6715_v48  ;;  %6781 = vmatpush.msrb.mxu1 %v6716_v44  ;;  %v6713_v10 = vsel %vm1262_vm14, %v11648_v40, %v11649_v11  ;;  %v6714_v27 = vsel %vm1262_vm14, %v11649_v11, %v11653_v1  ;;  %v11679_v1 = vunpack.i.h.bf16 %v11677_v3 }
 0xa33   : > { %10271 = vmatmul.msk.f32.gmra.mxu0 %vm418_vm8, %v6378_v33  ;;  %10275 = vmatmul.msk.f32.gmra.mxu1 %vm418_vm8, %v6378_v33 }
 0xa34   : > { %6753 = vmatpush.msrb.mxu0 %v6713_v10  ;;  %6782 = vmatpush.msrb.mxu1 %v6714_v27  ;;  %v6671_v10 = vld [vmem:[#allocation3 + $0x540] sm:$0xff] }
 0xa35   : > { %10279 = vmatmul.msk.f32.gmra.mxu2 %vm418_vm8, %v6525_v55  ;;  %10283 = vmatmul.msk.f32.gmra.mxu3 %vm418_vm8, %v6525_v55 }
 0xa36   : > { %v11657_v7 = vpop.permute.xlu0 %11656  ;;  %v11687_v19 = vpop.permute.xlu2 %11686 }
 0xa37   : > { %v11659_v43 = vunpack.i.h.bf16 %v11657_v7  ;;  %v11658_v51 = vunpack.i.l.bf16 %v11657_v7  ;;  %v11672_v53 = vpop.permute.xlu1 %11671  ;;  %v11688_v55 = vunpack.i.l.bf16 %v11687_v19 }
 0xa38   : > { %v11674_v54 = vunpack.i.h.bf16 %v11672_v53  ;;  %v11673_v9 = vunpack.i.l.bf16 %v11672_v53 }
 0xa39   : > { %v6711_v24 = vsel %vm1262_vm14, %v11654_v13, %v11658_v51  ;;  %v6712_v58 = vsel %vm1262_vm14, %v11658_v51, %v11659_v43  ;;  %v6818_v51 = vld [vmem:[#allocation3 + $0x560] sm:$0xff] }
 0xa3a   : > { %6754 = vmatpush.msrb.mxu0 %v6711_v24  ;;  %6783 = vmatpush.msrb.mxu1 %v6712_v58  ;;  %v6860_v48 = vsel %vm1422_vm15, %v11673_v9, %v11674_v54  ;;  %v6861_v44 = vsel %vm1422_vm15, %v11674_v54, %v11678_v39  ;;  %v11689_v58 = vunpack.i.h.bf16 %v11687_v19  ;;  %v6673_v39 = vld [vmem:[#allocation3 + $0x550] sm:$0xff] }
 0xa3b   : > { %10272 = vmatmul.msk.f32.gmra.mxu0 %vm418_vm8, %v6379_v5  ;;  %10276 = vmatmul.msk.f32.gmra.mxu1 %vm418_vm8, %v6379_v5 }
 0xa3d   : > { %10280 = vmatmul.msk.f32.gmra.mxu2 %vm418_vm8, %v6526_v37  ;;  %10284 = vmatmul.msk.f32.gmra.mxu3 %vm418_vm8, %v6526_v37 }
 0xa3e   : > { %v11667_v34 = vpop.permute.xlu0 %11666  ;;  %v11712_v3 = vpop.permute.xlu2 %11711 }
 0xa3f   : > { %v11697_v36 = vpop.permute.xlu1 %11696  ;;  %v11669_v32 = vunpack.i.h.bf16 %v11667_v34  ;;  %v11668_v26 = vunpack.i.l.bf16 %v11667_v34  ;;  %v11714_v19 = vunpack.i.h.bf16 %v11712_v3 }
 0xa40   : > { %v11699_v60 = vunpack.i.h.bf16 %v11697_v36  ;;  %v11698_v38 = vunpack.i.l.bf16 %v11697_v36 }
 0xa41   : > { %v6862_v14 = vsel %vm1422_vm15, %v11664_v6, %v11668_v26  ;;  %v6863_v41 = vsel %vm1422_vm15, %v11668_v26, %v11669_v32 }
 0xa42   : > { %v6864_v45 = vsel %vm1422_vm15, %v11698_v38, %v11699_v60  ;;  %v6865_v31 = vsel %vm1422_vm15, %v11699_v60, %v11663_v2  ;;  %v11713_v2 = vunpack.i.l.bf16 %v11712_v3 }
 0xa43   : > { %10273 = vmatmul.msk.f32.gmra.mxu0 %vm418_vm8, %v6380_v42  ;;  %10277 = vmatmul.msk.f32.gmra.mxu1 %vm418_vm8, %v6380_v42  ;;  %v6672_v42 = vld [vmem:[#allocation3 + $0x548] sm:$0xff] }
 0xa44   : > { %6898 = vmatpush.msra.mxu2 %v6864_v45  ;;  %6927 = vmatpush.msra.mxu3 %v6865_v31 }
 0xa45   : > { %10281 = vmatmul.msk.f32.gmra.mxu2 %vm418_vm8, %v6527_v61  ;;  %10285 = vmatmul.msk.f32.gmra.mxu3 %vm418_vm8, %v6527_v61  ;;  %v6819_v61 = vld [vmem:[#allocation3 + $0x568] sm:$0xff] }
 0xa46   : > { %v11682_v4 = vpop.permute.xlu0 %11681  ;;  %6899 = vmatpush.msra.mxu2 %v6862_v14  ;;  %6928 = vmatpush.msra.mxu3 %v6863_v41 }
 0xa47   : > { %v11684_v33 = vunpack.i.h.bf16 %v11682_v4  ;;  %v11683_v11 = vunpack.i.l.bf16 %v11682_v4  ;;  %v11702_v40 = vpop.permute.xlu1 %11701  ;;  %v6674_v4 = vld [vmem:[#allocation3 + $0x558] sm:$0xff] }
 0xa48   : > { %v11704_v27 = vunpack.i.h.bf16 %v11702_v40  ;;  %v11703_v7 = vunpack.i.l.bf16 %v11702_v40  ;;  %6900 = vmatpush.msra.mxu2 %v6860_v48  ;;  %6929 = vmatpush.msra.mxu3 %v6861_v44  ;;  %v6965_v44 = vld [vmem:[#allocation3 + $0x580] sm:$0xff] }
 0xa49   : > { %v6858_v13 = vsel %vm1422_vm15, %v11679_v1, %v11683_v11  ;;  %v6859_v43 = vsel %vm1422_vm15, %v11683_v11, %v11684_v33  ;;  %v6820_v1 = vld [vmem:[#allocation3 + $0x570] sm:$0xff]  ;;  %v6821_v33 = vld [vmem:[#allocation3 + $0x578] sm:$0xff]  ;;  %v15290_v11 = vpop.f32.mrf.mxu2 }
 0xa4a   : > { %6901 = vmatpush.msra.mxu2 %v6858_v13  ;;  %6930 = vmatpush.msra.mxu3 %v6859_v43  ;;  %v7011_v53 = vsel %vm1581_vm0, %v11703_v7, %v11704_v27  ;;  %v7012_v5 = vsel %vm1581_vm0, %v11704_v27, %v11688_v55  ;;  %v15296_v55 = vpop.f32.mrf.mxu3  ;;  %v6966_v7 = vld [vmem:[#allocation3 + $0x588] sm:$0xff] }
 0xa4b   : > { %10286 = vmatmul.msk.f32.vlgmr.msrb.gmra.mxu0 %vm418_vm8, %v6671_v10  ;;  %10290 = vmatmul.msk.f32.vlgmr.msrb.gmra.mxu1 %vm418_vm8, %v6671_v10 }
 0xa4c   : > { %7045 = vmatpush.msra.mxu0 %v7011_v53  ;;  %7074 = vmatpush.msra.mxu1 %v7012_v5  ;;  %v6967_v5 = vld [vmem:[#allocation3 + $0x590] sm:$0xff] }
 0xa4d   : > { %10294 = vmatmul.msk.f32.vlgmr.msra.gmra.mxu2 %vm418_vm8, %v6818_v51  ;;  %10298 = vmatmul.msk.f32.vlgmr.msra.gmra.mxu3 %vm418_vm8, %v6818_v51 }
 0xa4e   : > { %v11692_v24 = vpop.permute.xlu0 %11691 }
 0xa4f   : > { %v11694_v37 = vunpack.i.h.bf16 %v11692_v24  ;;  %v11693_v34 = vunpack.i.l.bf16 %v11692_v24  ;;  %v11707_v36 = vpop.permute.xlu1 %11706 }
 0xa50   : > { %v11709_v60 = vunpack.i.h.bf16 %v11707_v36  ;;  %v11708_v38 = vunpack.i.l.bf16 %v11707_v36 }
 0xa51   : > { %v7009_v32 = vsel %vm1581_vm0, %v11689_v58, %v11693_v34  ;;  %v7010_v26 = vsel %vm1581_vm0, %v11693_v34, %v11694_v37  ;;  %v6032_v13 = vpop.f32.mrf.mxu2  ;;  %v6968_v34 = vld [vmem:[#allocation3 + $0x598] sm:$0xff] }
 0xa52   : > { %7046 = vmatpush.msra.mxu0 %v7009_v32  ;;  %7075 = vmatpush.msra.mxu1 %v7010_v26  ;;  %v7007_v45 = vsel %vm1581_vm0, %v11708_v38, %v11709_v60  ;;  %v7008_v31 = vsel %vm1581_vm0, %v11709_v60, %v11713_v2  ;;  %v15304_v43 = vpop.f32.mrf.mxu3 }
 0xa53   : > { %10287 = vmatmul.msk.f32.gmra.mxu0 %vm418_vm8, %v6672_v42  ;;  %10291 = vmatmul.msk.f32.gmra.mxu1 %vm418_vm8, %v6672_v42 }
 0xa54   : > { %7047 = vmatpush.msra.mxu0 %v7007_v45  ;;  %7076 = vmatpush.msra.mxu1 %v7008_v31 }
 0xa55   : > { %10295 = vmatmul.msk.f32.gmra.mxu2 %vm418_vm8, %v6819_v61  ;;  %10299 = vmatmul.msk.f32.gmra.mxu3 %vm418_vm8, %v6819_v61 }
 0xa56   : > { %v11717_v6 = vpop.permute.xlu0 %11716 }
 0xa57   : > { %v11719_v54 = vunpack.i.h.bf16 %v11717_v6  ;;  %v11718_v9 = vunpack.i.l.bf16 %v11717_v6 }
 0xa59   : > { %v7005_v14 = vsel %vm1581_vm0, %v11714_v19, %v11718_v9  ;;  %v7006_v41 = vsel %vm1581_vm0, %v11718_v9, %v11719_v54  ;;  %v6035_v3 = vpop.f32.mrf.mxu2 }
 0xa5a   : > { %7048 = vmatpush.msra.mxu0 %v7005_v14  ;;  %7077 = vmatpush.msra.mxu1 %v7006_v41  ;;  %v6064_v24 = vpop.f32.mrf.mxu3 }
 0xa5b   : > { %10288 = vmatmul.msk.f32.gmra.mxu0 %vm418_vm8, %v6673_v39  ;;  %10292 = vmatmul.msk.f32.gmra.mxu1 %vm418_vm8, %v6673_v39 }
 0xa5d   : > { %10296 = vmatmul.msk.f32.gmra.mxu2 %vm418_vm8, %v6820_v1  ;;  %10300 = vmatmul.msk.f32.gmra.mxu3 %vm418_vm8, %v6820_v1 }
 0xa61   : > { %v15320_v36 = vpop.f32.mrf.mxu2 }
 0xa62   : > { %v15322_v2 = vpop.f32.mrf.mxu3 }
 0xa63   : > { %10289 = vmatmul.msk.f32.gmra.mxu0 %vm418_vm8, %v6674_v4  ;;  %10293 = vmatmul.msk.f32.gmra.mxu1 %vm418_vm8, %v6674_v4 }
 0xa65   : > { %10297 = vmatmul.msk.f32.gmra.mxu2 %vm418_vm8, %v6821_v33  ;;  %10301 = vmatmul.msk.f32.gmra.mxu3 %vm418_vm8, %v6821_v33 }
 0xa68   : > { %v15292_v40 = vpop.f32.mrf.mxu0  ;;  %v15294_v48 = vpop.f32.mrf.mxu1 }
 0xa6b   : > { %10302 = vmatmul.msk.f32.vlgmr.msra.gmra.mxu0 %vm418_vm8, %v6965_v44  ;;  %10306 = vmatmul.msk.f32.vlgmr.msra.gmra.mxu1 %vm418_vm8, %v6965_v44 }
 0xa70   : > { %v15300_v10 = vpop.f32.mrf.mxu0  ;;  %v15302_v27 = vpop.f32.mrf.mxu1 }
 0xa71   : > { %v6033_v50 = vadd.f32 %v6032_v13, %v15300_v10  ;;  %v6062_v10 = vadd.f32 %v15304_v43, %v15302_v27 }
 0xa73   : > { %10303 = vmatmul.msk.f32.gmra.mxu0 %vm418_vm8, %v6966_v7  ;;  %10307 = vmatmul.msk.f32.gmra.mxu1 %vm418_vm8, %v6966_v7 }
 0xa78   : > { %v15308_v51 = vpop.f32.mrf.mxu0  ;;  %v15310_v53 = vpop.f32.mrf.mxu1 }
 0xa7b   : > { %10304 = vmatmul.msk.f32.gmra.mxu0 %vm418_vm8, %v6967_v5  ;;  %10308 = vmatmul.msk.f32.gmra.mxu1 %vm418_vm8, %v6967_v5 }
 0xa80   : > { %v15314_v58 = vpop.f32.mrf.mxu0  ;;  %v15316_v37 = vpop.f32.mrf.mxu1 }
 0xa83   : > { %10305 = vmatmul.msk.f32.gmra.mxu0 %vm418_vm8, %v6968_v34  ;;  %10309 = vmatmul.msk.f32.gmra.mxu1 %vm418_vm8, %v6968_v34 }
 0xa88   : > { %v15324_v42 = vpop.f32.mrf.mxu0  ;;  %v15326_v60 = vpop.f32.mrf.mxu1 }
 0xa8f   : > { %v15328_v38 = vpop.f32.mrf.mxu2  ;;  %v15330_v32 = vpop.f32.mrf.mxu3 }
 0xa90   : > { %v6171_v26 = vpop.f32.mrf.mxu0  ;;  %v6200_v61 = vpop.f32.mrf.mxu1 }
 0xa91   : > { %v6211_v57 = vadd.f32 %v6171_v26, %v6033_v50 }
 0xa97   : > { %v6318_v45 = vpop.f32.mrf.mxu2  ;;  %v15332_v31 = vpop.f32.mrf.mxu3 }
 0xa98   : > { %v6174_v6 = vpop.f32.mrf.mxu0  ;;  %v6203_v19 = vpop.f32.mrf.mxu1  ;;  %v6358_v23 = vadd.f32 %v6318_v45, %v6211_v57 }
 0xa9f   : > { %v6321_v39 = vpop.f32.mrf.mxu2  ;;  %v6350_v14 = vpop.f32.mrf.mxu3 }
 0xaa0   : > { %v15334_v54 = vpop.f32.mrf.mxu0  ;;  %v15336_v9 = vpop.f32.mrf.mxu1 }
 0xaa7   : > { %v15342_v4 = vpop.f32.mrf.mxu2  ;;  %v15344_v33 = vpop.f32.mrf.mxu3 }
 0xaa8   : > { %v15338_v41 = vpop.f32.mrf.mxu0  ;;  %v15340_v1 = vpop.f32.mrf.mxu1 }
 0xaa9   : > { %17220 = vst [vmem:[#allocation42_spill] sm:$0xff] %v15338_v41 }
 0xab0   : > { %v6465_v44 = vpop.f32.mrf.mxu0  ;;  %v6494_v7 = vpop.f32.mrf.mxu1 }
 0xab1   : > { %v15346_v5 = vpop.f32.mrf.mxu2  ;;  %v15348_v34 = vpop.f32.mrf.mxu3 }
 0xab2   : > { %17221 = vst [vmem:[#allocation36_spill] sm:$0xff] %v15346_v5  ;;  %v6065_v5 = vadd.f32 %v6064_v24, %v15310_v53 }
 0xab3   : > { %17222 = vst [vmem:[#allocation35_spill] sm:$0xff] %v15348_v34 }
 0xab4   : > { %v6214_v41 = vadd.f32 %v6203_v19, %v6065_v5 }
 0xab6   : > { %v6361_v57 = vadd.f32 %v6350_v14, %v6214_v41 }
 0xab8   : > { %v6468_v12 = vpop.f32.mrf.mxu0  ;;  %v6497_v15 = vpop.f32.mrf.mxu1 }
 0xab9   : > { %v6612_v28 = vpop.f32.mrf.mxu2  ;;  %v6641_v47 = vpop.f32.mrf.mxu3 }
 0xac0   : > { %v15350_v52 = vpop.f32.mrf.mxu0  ;;  %v15352_v56 = vpop.f32.mrf.mxu1 }
 0xac1   : > { %v6615_v25 = vpop.f32.mrf.mxu2  ;;  %v6644_v49 = vpop.f32.mrf.mxu3 }
 0xac8   : > { %v15354_v16 = vpop.f32.mrf.mxu0  ;;  %v15356_v46 = vpop.f32.mrf.mxu1 }
 0xac9   : > { %17223 = vst [vmem:[#allocation43_spill] sm:$0xff] %v15354_v16  ;;  %v15358_v62 = vpop.f32.mrf.mxu2  ;;  %v15360_v0 = vpop.f32.mrf.mxu3 }
 0xaca   : > { %17224 = vst [vmem:[#allocation37_spill] sm:$0xff] %v15356_v46  ;;  %v6505_v46 = vadd.f32 %v6465_v44, %v6358_v23  ;;  %v6508_v44 = vadd.f32 %v6497_v15, %v6361_v57 }
 0xad0   : > { %v6759_v63 = vpop.f32.mrf.mxu0  ;;  %v6788_v8 = vpop.f32.mrf.mxu1 }
 0xad1   : > { %v15362_v20 = vpop.f32.mrf.mxu2  ;;  %v15364_v22 = vpop.f32.mrf.mxu3 }
 0xad2   : > { %17225 = vst [vmem:[#allocation32_spill] sm:$0xff] %v15362_v20  ;;  %v6036_v20 = vadd.f32 %v6035_v3, %v15308_v51 }
 0xad3   : > { %17226 = vst [vmem:[#allocation41_spill] sm:$0xff] %v15364_v22  ;;  %v6652_v22 = vadd.f32 %v6612_v28, %v6505_v46  ;;  %v6068_v46 = vadd.f32 %v15322_v2, %v15316_v37  ;;  %v6059_v37 = vadd.f32 %v15296_v55, %v15294_v48  ;;  %v6030_v2 = vadd.f32 %v15290_v11, %v15292_v40 }
 0xad4   : > { %v6213_v34 = vadd.f32 %v6174_v6, %v6036_v20  ;;  %v6039_v20 = vadd.f32 %v15320_v36, %v15314_v58 }
 0xad6   : > { %v6360_v50 = vadd.f32 %v6321_v39, %v6213_v34  ;;  %v6215_v43 = vadd.f32 %v15334_v54, %v6039_v20  ;;  %v7117_v54 = vpop.permute.xlu2 %7116  ;;  %v7122_v34 = vpop.permute.xlu1 %7121 }
 0xad8   : > { %v6762_v21 = vpop.f32.mrf.mxu0  ;;  %v6791_v17 = vpop.f32.mrf.mxu1  ;;  %v6507_v23 = vadd.f32 %v6468_v12, %v6360_v50  ;;  %v6216_v12 = vadd.f32 %v15336_v9, %v6068_v46  ;;  %v6362_v58 = vadd.f32 %v15342_v4, %v6215_v43  ;;  %v17235_v46 = vld [vmem:[#allocation43_spill] sm:$0xff] }
 0xad9   : > { %v6906_v30 = vpop.f32.mrf.mxu2  ;;  %v6935_v35 = vpop.f32.mrf.mxu3 }
 0xada   : > { %v6654_v27 = vadd.f32 %v6615_v25, %v6507_v23  ;;  %v6363_v36 = vadd.f32 %v15344_v33, %v6216_v12  ;;  %v17234_v23 = vld [vmem:[#allocation37_spill] sm:$0xff] }
 0xadc   : > { %v6801_v51 = vadd.f32 %v6762_v21, %v6654_v27  ;;  %v6509_v21 = vadd.f32 %v15350_v52, %v6362_v58  ;;  %v6510_v48 = vadd.f32 %v15352_v56, %v6363_v36 }
 0xade   : > { %v6656_v39 = vadd.f32 %v15358_v62, %v6509_v21  ;;  %v6657_v11 = vadd.f32 %v15360_v0, %v6510_v48  ;;  %v17231_v62 = vld [vmem:[#allocation42_spill] sm:$0xff]  ;;  %v17232_v0 = vld [vmem:[#allocation35_spill] sm:$0xff] }
 0xae0   : > { %v15366_v59 = vpop.f32.mrf.mxu0  ;;  %v15368_v29 = vpop.f32.mrf.mxu1 }
 0xae1   : > { %17227 = vst [vmem:[#allocation40_spill] sm:$0xff] %v15366_v59  ;;  %v6799_v59 = vadd.f32 %v6759_v63, %v6652_v22  ;;  %v6909_v22 = vpop.f32.mrf.mxu2  ;;  %v6938_v63 = vpop.f32.mrf.mxu3 }
 0xae2   : > { %v6948_v25 = vadd.f32 %v6909_v22, %v6801_v51  ;;  %v17236_v22 = vld [vmem:[#allocation41_spill] sm:$0xff] }
 0xae3   : > { %v6946_v13 = vadd.f32 %v6906_v30, %v6799_v59  ;;  %v6655_v30 = vadd.f32 %v6644_v49, %v6508_v44 }
 0xae5   : > { %v6802_v3 = vadd.f32 %v6791_v17, %v6655_v30  ;;  %v17237_v30 = vld [vmem:[#allocation32_spill] sm:$0xff] }
 0xae7   : > { %v6949_v49 = vadd.f32 %v6938_v63, %v6802_v3 }
 0xae8   : > { %v15371_v18 = vpop.f32.mrf.mxu0  ;;  %v15373_v16 = vpop.f32.mrf.mxu1  ;;  %v17230_v56 = vld [vmem:[#allocation40_spill] sm:$0xff] }
 0xae9   : > { %17228 = vst [vmem:[#allocation34_spill] sm:$0xff] %v15371_v18  ;;  %v15379_v18 = vpop.permute.xlu0 %7111  ;;  %v6912_v4 = vpop.f32.mrf.mxu2 }
 0xaea   : > { %17229 = vst [vmem:[#allocation33_spill] sm:$0xff] %v15373_v16  ;;  %v6212_v16 = vadd.f32 %v6200_v61, %v6062_v10  ;;  %v6210_v61 = vadd.f32 %v15326_v60, %v6059_v37  ;;  %v6941_v33 = vpop.f32.mrf.mxu3 }
 0xaec   : > { %v6359_v28 = vadd.f32 %v15332_v31, %v6212_v16  ;;  %v6357_v9 = vadd.f32 %v15330_v32, %v6210_v61 }
 0xaee   : > { %v6506_v15 = vadd.f32 %v6494_v7, %v6359_v28  ;;  %v6504_v41 = vadd.f32 %v15340_v1, %v6357_v9  ;;  %v6804_v7 = vadd.f32 %v15368_v29, %v6657_v11  ;;  %v17242_v9 = vld [vmem:[#allocation9_spill] sm:$0xff] }
 0xaf0   : > { %v7053_v26 = vpop.f32.mrf.mxu0  ;;  %v7082_v45 = vpop.f32.mrf.mxu1  ;;  %v6653_v16 = vadd.f32 %v6641_v47, %v6506_v15  ;;  %v6209_v47 = vadd.f32 %v15324_v42, %v6030_v2  ;;  %v6951_v57 = vadd.f32 %v6941_v33, %v6804_v7  ;;  %v17244_v7 = vld [vmem:[#allocation6_spill] sm:$0xff] }
 0xaf1   : > { %v7093_v53 = vadd.f32 %v7053_v26, %v6946_v13  ;;  %v17238_v43 = vld [vmem:[#allocation33_spill] sm:$0xff] }
 0xaf2   : > { %v6800_v55 = vadd.f32 %v6788_v8, %v6653_v16  ;;  %v6356_v52 = vadd.f32 %v15328_v38, %v6209_v47  ;;  %v6803_v8 = vadd.f32 %v17230_v56, %v6656_v39  ;;  %v17233_v38 = vld [vmem:[#allocation36_spill] sm:$0xff] }
 0xaf3   : > { %v7126_v59 = vadd.f32 %v15379_v18, %v7093_v53 }
 0xaf4   : > { %v6947_v40 = vadd.f32 %v6935_v35, %v6800_v55  ;;  %v6503_v10 = vadd.f32 %v17231_v62, %v6356_v52  ;;  %v6651_v35 = vadd.f32 %v17232_v0, %v6504_v41  ;;  %v6950_v50 = vadd.f32 %v6912_v4, %v6803_v8  ;;  %v17243_v4 = vld [vmem:[#allocation22_spill] sm:$0xff] }
 0xaf5   : > { %v7134_v24 = vmax.f32 %v7126_v59, 0.0 }
 0xaf6   : > { %v7094_v42 = vadd.f32 %v7082_v45, %v6947_v40  ;;  %v6650_v1 = vadd.f32 %v17233_v38, %v6503_v10  ;;  %v6798_v29 = vadd.f32 %v17234_v23, %v6651_v35 }
 0xaf7   : > { %7152 = vrot.lane.b32.xlu0 %v7134_v24, %s12245_s28  ;;  %v17239_v24 = vld [vmem:[#allocation34_spill] sm:$0xff] }
 0xaf8   : > { %v7056_v17 = vpop.f32.mrf.mxu0  ;;  %v7085_v31 = vpop.f32.mrf.mxu1  ;;  %v7127_v45 = vadd.f32 %v15379_v18, %v7094_v42  ;;  %v6797_v20 = vadd.f32 %v17235_v46, %v6650_v1  ;;  %v6945_v63 = vadd.f32 %v17236_v22, %v6798_v29  ;;  %v17245_v22 = vld [vmem:[#allocation11_spill] sm:$0xff] }
 0xaf9   : > { %v7095_v6 = vadd.f32 %v7056_v17, %v6948_v25  ;;  %v7096_v19 = vadd.f32 %v7085_v31, %v6949_v49  ;;  %v7107_v18 = vpop.permute.xlu1 %7106  ;;  %v17240_v31 = vld [vmem:[#allocation20_spill] sm:$0xff] }
 0xafa   : > { %v6944_v59 = vadd.f32 %v17237_v30, %v6797_v20  ;;  %v7092_v12 = vadd.f32 %v17238_v43, %v6945_v63  ;;  %v7135_v15 = vmax.f32 %v7127_v45, 0.0 }
 0xafb   : > { %v7128_v60 = vadd.f32 %v7117_v54, %v7095_v6  ;;  %v7129_v14 = vadd.f32 %v7117_v54, %v7096_v19  ;;  %v17241_v54 = vld [vmem:[#allocation10_spill] sm:$0xff] }
 0xafc   : > { %v7091_v37 = vadd.f32 %v17239_v24, %v6944_v59  ;;  %v7125_v58 = vadd.f32 %v7107_v18, %v7092_v12  ;;  %v17246_v59 = vld [vmem:[#allocation8_spill] sm:$0xff] }
 0xafd   : > { %v7136_v5 = vmax.f32 %v7128_v60, 0.0  ;;  %v7137_v32 = vmax.f32 %v7129_v14, 0.0 }
 0xafe   : > { %v7124_v36 = vadd.f32 %v7107_v18, %v7091_v37  ;;  %v7133_v16 = vmax.f32 %v7125_v58, 0.0 }
 0xaff   : > { %7158 = vrot.lane.b32.xlu2 %v7137_v32, %s12245_s28  ;;  %7156 = vrot.lane.b32.xlu1 %v7136_v5, %s12245_s28 }
 0xb00   : > { %v7059_v13 = vpop.f32.mrf.mxu0  ;;  %v7088_v26 = vpop.f32.mrf.mxu1  ;;  %v7132_v25 = vmax.f32 %v7124_v36, 0.0 }
 0xb01   : > { %v7097_v44 = vadd.f32 %v7059_v13, %v6950_v50  ;;  %v7098_v53 = vadd.f32 %v7088_v26, %v6951_v57 }
 0xb03   : > { %v7130_v28 = vadd.f32 %v7122_v34, %v7097_v44  ;;  %v7131_v27 = vadd.f32 %v7122_v34, %v7098_v53 }
 0xb05   : > { %v7138_v51 = vmax.f32 %v7130_v28, 0.0  ;;  %v7139_v3 = vmax.f32 %v7131_v27, 0.0 }
 0xb07   : > { %7162 = vrot.lane.b32.xlu0 %v7139_v3, %s12245_s28  ;;  %7154 = vrot.lane.b32.xlu1 %v7135_v15, %s12245_s28  ;;  %v17247_v3 = vld [vmem:[#allocation7_spill] sm:$0xff] }
 0xb08   : > { %7160 = vrot.lane.b32.xlu2 %v7138_v51, %s12245_s28 }
 0xb0f   : > { %7150 = vrot.lane.b32.xlu0 %v7133_v16, %s12245_s28 }
 0xb10   : > { %7148 = vrot.lane.b32.xlu2 %v7132_v25, %s12245_s28 }
 0xb59   : > { %v7159_v49 = vpop.permute.xlu2 %7158 }
 0xb5a   : > { %7188 = vst.msk [vmem:[#allocation2 + $0x40] sm:$0xff] %vm260_vm2, %v7159_v49 }
 0xb61   : > { %v15432_v55 = vld [vmem:[#allocation2 + $0x40] sm:$0xff] }
 0xb62   : > { %v7161_v2 = vpop.permute.xlu2 %7160  ;;  %v7225_v39 = vmul.f32 %v15432_v55, %v17242_v9  ;;  %v7434_v36 = vmul.f32 %v15432_v55, %v17247_v3 }
 0xb63   : > { %7189 = vst.msk [vmem:[#allocation2 + $0x48] sm:$0xff] %vm277_vm1, %v7161_v2 }
 0xb69   : > { %v7153_v61 = vpop.permute.xlu0 %7152 }
 0xb6a   : > { %7183 = vst.msk [vmem:[#allocation2 + $0x18] sm:$0xff] %vm277_vm1, %v7153_v61  ;;  %v7149_v21 = vpop.permute.xlu2 %7148  ;;  %v15427_v17 = vld [vmem:[#allocation2 + $0x48] sm:$0xff] }
 0xb6b   : > { %7180 = vst.msk [vmem:[#allocation2] sm:$0xff] %vm277_vm1, %v7149_v21  ;;  %v7206_v48 = vmul.f32 %v15427_v17, %v17240_v31  ;;  %v7226_v42 = vmul.f32 %v15427_v17, %v17244_v7  ;;  %v7435_v43 = vmul.f32 %v15427_v17, %v17246_v59 }
 0xb6d   : > { %7380 = vmatpush.msrb.mxu0 %v7206_v48  ;;  %v17248_v48 = vld [vmem:[#allocation15_spill] sm:$0xff] }
 0xb71   : > { %v7157_v6 = vpop.permute.xlu1 %7156  ;;  %v15445_v52 = vld [vmem:[#allocation2 + $0x18] sm:$0xff] }
 0xb72   : > { %v15435_v19 = vsel %vm260_vm2, %v7157_v6, %v7159_v49  ;;  %7186 = vst.msk [vmem:[#allocation2 + $0x30] sm:$0xff] %vm277_vm1, %v7157_v6  ;;  %v15454_v8 = vld [vmem:[#allocation2] sm:$0xff]  ;;  %v7202_v34 = vmul.f32 %v15445_v52, %v17240_v31  ;;  %v7220_v29 = vmul.f32 %v15445_v52, %v17244_v7  ;;  %v7429_v16 = vmul.f32 %v15445_v52, %v17246_v59 }
 0xb73   : > { %v7224_v47 = vmul.f32 %v15435_v19, %v17241_v54  ;;  %v7205_v10 = vmul.f32 %v15435_v19, %v17243_v4  ;;  %v7200_v0 = vmul.f32 %v15454_v8, %v17240_v31  ;;  %v7217_v28 = vmul.f32 %v15454_v8, %v17244_v7 }
 0xb74   : > { %v7433_v37 = vmul.f32 %v15435_v19, %v17245_v22 }
 0xb75   : > { %v11720_v11 = vpack.i.bf16 %v7225_v39, %v7224_v47  ;;  %v7426_v47 = vmul.f32 %v15454_v8, %v17246_v59 }
 0xb76   : > { %v11755_v49 = vpack.i.bf16 %v7434_v36, %v7433_v37 }
 0xb77   : > { %11721 = vrot.lane.b32.xlu0 %v11720_v11, %s12252_s20  ;;  %v17249_v11 = vld [vmem:[#allocation16_spill] sm:$0xff] }
 0xb79   : > { %v7163_v40 = vpop.permute.xlu0 %7162  ;;  %v7155_v60 = vpop.permute.xlu1 %7154  ;;  %v15443_v14 = vld [vmem:[#allocation2 + $0x30] sm:$0xff] }
 0xb7a   : > { %v15448_v41 = vsel %vm260_vm2, %v7161_v2, %v7163_v40  ;;  %7191 = vst.msk [vmem:[#allocation2 + $0x58] sm:$0xff] %vm260_vm2, %v7163_v40  ;;  %v7204_v56 = vmul.f32 %v15443_v14, %v17240_v31  ;;  %v15463_v32 = vsel %vm260_vm2, %v7153_v61, %v7155_v60  ;;  %v7223_v13 = vmul.f32 %v15443_v14, %v17244_v7 }
 0xb7b   : > { %7185 = vst.msk [vmem:[#allocation2 + $0x28] sm:$0xff] %vm260_vm2, %v7155_v60  ;;  %v7207_v33 = vmul.f32 %v15448_v41, %v17243_v4  ;;  %v7227_v5 = vmul.f32 %v15448_v41, %v17241_v54  ;;  %v7203_v35 = vmul.f32 %v15463_v32, %v17243_v4  ;;  %v7221_v38 = vmul.f32 %v15463_v32, %v17241_v54 }
 0xb7c   : > { %7381 = vmatpush.msrb.mxu0 %v7204_v56  ;;  %v7436_v63 = vmul.f32 %v15448_v41, %v17245_v22  ;;  %v7430_v18 = vmul.f32 %v15463_v32, %v17245_v22  ;;  %v7432_v58 = vmul.f32 %v15443_v14, %v17246_v59  ;;  %v7720_v40 = vmul.f32 %v15454_v8, %v17249_v11 }
 0xb7d   : > { %7409 = vmatpush.msrb.mxu1 %v7207_v33  ;;  %v11730_v62 = vpack.i.bf16 %v7227_v5, %v7226_v42  ;;  %v11735_v53 = vpack.i.bf16 %v7221_v38, %v7220_v29  ;;  %v17250_v5 = vld [vmem:[#allocation17_spill] sm:$0xff] }
 0xb7e   : > { %7382 = vmatpush.msrb.mxu0 %v7202_v34  ;;  %v11760_v51 = vpack.i.bf16 %v7436_v63, %v7435_v43  ;;  %v11765_v2 = vpack.i.bf16 %v7430_v18, %v7429_v16  ;;  %v7727_v34 = vmul.f32 %v15435_v19, %v17250_v5  ;;  %v7724_v29 = vmul.f32 %v15463_v32, %v17250_v5 }
 0xb7f   : > { %11731 = vrot.lane.b32.xlu1 %v11730_v62, %s12252_s20  ;;  %7410 = vmatpush.msrb.mxu1 %v7205_v10  ;;  %v7730_v62 = vmul.f32 %v15448_v41, %v17250_v5  ;;  %v7726_v10 = vmul.f32 %v15443_v14, %v17249_v11 }
 0xb80   : > { %7383 = vmatpush.msrb.mxu0 %v7200_v0  ;;  %v7728_v0 = vmul.f32 %v15432_v55, %v17248_v48 }
 0xb81   : > { %v7151_v50 = vpop.permute.xlu0 %7150  ;;  %v15474_v57 = vld [vmem:[#allocation2 + $0x58] sm:$0xff]  ;;  %7411 = vmatpush.msrb.mxu1 %v7203_v35  ;;  %v7729_v35 = vmul.f32 %v15427_v17, %v17249_v11 }
 0xb82   : > { %v15479_v1 = vsel %vm260_vm2, %v7149_v21, %v7151_v50  ;;  %7182 = vst.msk [vmem:[#allocation2 + $0x10] sm:$0xff] %vm260_vm2, %v7151_v50  ;;  %v7228_v26 = vmul.f32 %v15474_v57, %v17242_v9  ;;  %v15490_v44 = vld [vmem:[#allocation2 + $0x28] sm:$0xff]  ;;  %v7437_v24 = vmul.f32 %v15474_v57, %v17247_v3  ;;  %v7731_v42 = vmul.f32 %v15474_v57, %v17248_v48 }
 0xb83   : > { %v7201_v23 = vmul.f32 %v15479_v1, %v17243_v4  ;;  %v7222_v46 = vmul.f32 %v15490_v44, %v17242_v9  ;;  %v7218_v27 = vmul.f32 %v15479_v1, %v17241_v54  ;;  %v7431_v61 = vmul.f32 %v15490_v44, %v17247_v3 }
 0xb84   : > { %v11725_v45 = vpack.i.bf16 %v7223_v13, %v7228_v26  ;;  %v11750_v25 = vpack.i.bf16 %v7432_v58, %v7437_v24  ;;  %v7725_v6 = vmul.f32 %v15490_v44, %v17248_v48  ;;  %v7427_v39 = vmul.f32 %v15479_v1, %v17245_v22  ;;  %v17251_v26 = vld [vmem:[#allocation12_spill] sm:$0xff] }
 0xb85   : > { %7412 = vmatpush.msrb.mxu1 %v7201_v23  ;;  %v11740_v12 = vpack.i.bf16 %v7217_v28, %v7222_v46  ;;  %v11770_v60 = vpack.i.bf16 %v7426_v47, %v7431_v61  ;;  %v11780_v50 = vpack.i.bf16 %v7726_v10, %v7731_v42  ;;  %v11785_v38 = vpack.i.bf16 %v7728_v0, %v7727_v34  ;;  %v17253_v46 = vld [vmem:[#allocation13_spill] sm:$0xff]  ;;  %v17254_v61 = vld [vmem:[#allocation24_spill] sm:$0xff]  ;;  %v17256_v34 = vld [vmem:[#allocation26_spill] sm:$0xff] }
 0xb86   : > { %11726 = vrot.lane.b32.xlu2 %v11725_v45, %s12252_s20  ;;  %v11800_v33 = vpack.i.bf16 %v7720_v40, %v7725_v6  ;;  %v11815_v13 = vpack.i.bf16 %v7730_v62, %v7729_v35  ;;  %v7584_v23 = vmul.f32 %v15474_v57, %v17251_v26  ;;  %v17252_v45 = vld [vmem:[#allocation14_spill] sm:$0xff]  ;;  %v7579_v63 = vmul.f32 %v15443_v14, %v17253_v46 }
 0xb87   : > { %11736 = vrot.lane.b32.xlu1 %v11735_v53, %s12252_s20  ;;  %v7583_v53 = vmul.f32 %v15448_v41, %v17252_v45  ;;  %v7723_v28 = vmul.f32 %v15445_v52, %v17249_v11  ;;  %v7577_v24 = vmul.f32 %v15463_v32, %v17252_v45  ;;  %v7581_v37 = vmul.f32 %v15432_v55, %v17251_v26 }
 0xb88   : > { %v7721_v18 = vmul.f32 %v15479_v1, %v17250_v5  ;;  %v7576_v58 = vmul.f32 %v15445_v52, %v17253_v46  ;;  %v7573_v6 = vmul.f32 %v15454_v8, %v17253_v46  ;;  %v7574_v47 = vmul.f32 %v15479_v1, %v17252_v45 }
 0xb89   : > { %v15496_v20 = vld [vmem:[#allocation2 + $0x10] sm:$0xff]  ;;  %v11795_v43 = vpack.i.bf16 %v7724_v29, %v7723_v28  ;;  %v8025_v42 = vmul.f32 %v15474_v57, %v17254_v61  ;;  %v8021_v62 = vmul.f32 %v15435_v19, %v17256_v34  ;;  %v8024_v10 = vmul.f32 %v15448_v41, %v17256_v34  ;;  %v17257_v29 = vld [vmem:[#allocation19_spill] sm:$0xff]  ;;  %v17258_v28 = vld [vmem:[#allocation21_spill] sm:$0xff] }
 0xb8a   : > { %v7219_v30 = vmul.f32 %v15496_v20, %v17242_v9  ;;  %v7428_v21 = vmul.f32 %v15496_v20, %v17247_v3  ;;  %v8022_v35 = vmul.f32 %v15432_v55, %v17254_v61 }
 0xb8c   : > { %v11745_v15 = vpack.i.bf16 %v7219_v30, %v7218_v27  ;;  %v11775_v56 = vpack.i.bf16 %v7428_v21, %v7427_v39  ;;  %v7582_v27 = vmul.f32 %v15427_v17, %v17253_v46  ;;  %v11790_v30 = vpack.i.bf16 %v7579_v63, %v7584_v23  ;;  %v17255_v39 = vld [vmem:[#allocation25_spill] sm:$0xff] }
 0xb8d   : > { %v8019_v21 = vmul.f32 %v15490_v44, %v17254_v61  ;;  %v8014_v40 = vmul.f32 %v15454_v8, %v17255_v39  ;;  %v8020_v0 = vmul.f32 %v15443_v14, %v17255_v39  ;;  %v8018_v63 = vmul.f32 %v15463_v32, %v17256_v34 }
 0xb8e   : > { %11741 = vrot.lane.b32.xlu2 %v11740_v12, %s12252_s20  ;;  %11746 = vrot.lane.b32.xlu0 %v11745_v15, %s12252_s20  ;;  %v11820_v12 = vpack.i.bf16 %v7583_v53, %v7582_v27  ;;  %v7580_v15 = vmul.f32 %v15435_v19, %v17252_v45  ;;  %v7878_v53 = vmul.f32 %v15474_v57, %v17257_v29 }
 0xb8f   : > { %11761 = vrot.lane.b32.xlu1 %v11760_v51, %s12251_s18  ;;  %v7722_v51 = vmul.f32 %v15496_v20, %v17248_v48  ;;  %v7877_v27 = vmul.f32 %v15448_v41, %v17258_v28 }
 0xb90   : > { %v11805_v36 = vpack.i.bf16 %v7581_v37, %v7580_v15 }
 0xb91   : > { %v11810_v16 = vpack.i.bf16 %v7722_v51, %v7721_v18  ;;  %v7874_v18 = vmul.f32 %v15435_v19, %v17258_v28 }
 0xb96   : > { %11751 = vrot.lane.b32.xlu2 %v11750_v25, %s12251_s18  ;;  %11756 = vrot.lane.b32.xlu0 %v11755_v49, %s12251_s18  ;;  %v11825_v25 = vpack.i.bf16 %v7577_v24, %v7576_v58  ;;  %v7578_v49 = vmul.f32 %v15490_v44, %v17251_v26  ;;  %v8016_v58 = vmul.f32 %v15496_v20, %v17254_v61 }
 0xb97   : > { %11766 = vrot.lane.b32.xlu1 %v11765_v2, %s12251_s18  ;;  %v7575_v2 = vmul.f32 %v15496_v20, %v17251_v26 }
 0xb9e   : > { %11771 = vrot.lane.b32.xlu2 %v11770_v60, %s12251_s18  ;;  %11776 = vrot.lane.b32.xlu0 %v11775_v56, %s12251_s18  ;;  %v11830_v60 = vpack.i.bf16 %v7573_v6, %v7578_v49  ;;  %v11835_v56 = vpack.i.bf16 %v7575_v2, %v7574_v47  ;;  %v7872_v47 = vmul.f32 %v15490_v44, %v17257_v29 }
 0xb9f   : > { %11801 = vrot.lane.b32.xlu1 %v11800_v33, %s12257_s7  ;;  %v11860_v33 = vpack.i.bf16 %v8014_v40, %v8019_v21  ;;  %v7869_v40 = vmul.f32 %v15496_v20, %v17257_v29 }
 0xba6   : > { %11781 = vrot.lane.b32.xlu2 %v11780_v50, %s12257_s7  ;;  %11786 = vrot.lane.b32.xlu0 %v11785_v38, %s12257_s7  ;;  %v8023_v50 = vmul.f32 %v15427_v17, %v17255_v39  ;;  %v11840_v38 = vpack.i.bf16 %v8020_v0, %v8025_v42  ;;  %v7868_v42 = vmul.f32 %v15479_v1, %v17258_v28 }
 0xba7   : > { %11816 = vrot.lane.b32.xlu1 %v11815_v13, %s12257_s7  ;;  %v11845_v13 = vpack.i.bf16 %v8022_v35, %v8021_v62  ;;  %v17261_v62 = vld [vmem:[#allocation27_spill] sm:$0xff] }
 0xba8   : > { %v11875_v23 = vpack.i.bf16 %v8024_v10, %v8023_v50  ;;  %v8308_v10 = vmul.f32 %v15454_v8, %v17261_v62  ;;  %v11895_v35 = vpack.i.bf16 %v7869_v40, %v7868_v42 }
 0xbae   : > { %11791 = vrot.lane.b32.xlu2 %v11790_v30, %s12254_s25  ;;  %11796 = vrot.lane.b32.xlu0 %v11795_v43, %s12257_s7  ;;  %v17259_v30 = vld [vmem:[#allocation18_spill] sm:$0xff] }
 0xbaf   : > { %11821 = vrot.lane.b32.xlu1 %v11820_v12, %s12254_s25  ;;  %v7873_v43 = vmul.f32 %v15443_v14, %v17259_v30  ;;  %v8017_v12 = vmul.f32 %v15445_v52, %v17255_v39  ;;  %v7876_v15 = vmul.f32 %v15427_v17, %v17259_v30  ;;  %v7870_v49 = vmul.f32 %v15445_v52, %v17259_v30 }
 0xbb1   : > { %v11850_v51 = vpack.i.bf16 %v7873_v43, %v7878_v53  ;;  %v11855_v24 = vpack.i.bf16 %v8018_v63, %v8017_v12  ;;  %v11880_v37 = vpack.i.bf16 %v7877_v27, %v7876_v15  ;;  %v8314_v27 = vmul.f32 %v15443_v14, %v17261_v62 }
 0xbb2   : > { %v8317_v12 = vmul.f32 %v15427_v17, %v17261_v62 }
 0xbb6   : > { %11806 = vrot.lane.b32.xlu2 %v11805_v36, %s12254_s25  ;;  %11811 = vrot.lane.b32.xlu0 %v11810_v16, %s12257_s7  ;;  %v7871_v36 = vmul.f32 %v15463_v32, %v17258_v28  ;;  %v7875_v16 = vmul.f32 %v15432_v55, %v17257_v29 }
 0xbb7   : > { %11826 = vrot.lane.b32.xlu1 %v11825_v25, %s12254_s25  ;;  %v8015_v25 = vmul.f32 %v15479_v1, %v17256_v34 }
 0xbb8   : > { %v11865_v2 = vpack.i.bf16 %v7875_v16, %v7874_v18  ;;  %v11885_v6 = vpack.i.bf16 %v7871_v36, %v7870_v49  ;;  %v17263_v18 = vld [vmem:[#allocation28_spill] sm:$0xff]  ;;  %v17264_v16 = vld [vmem:[#allocation29_spill] sm:$0xff]  ;;  %v7209_v49 = vld [vmem:[#allocation3 + $0x5a0] sm:$0xff] }
 0xbb9   : > { %v11870_v21 = vpack.i.bf16 %v8016_v58, %v8015_v25  ;;  %v8172_v58 = vmul.f32 %v15474_v57, %v17263_v18  ;;  %v8171_v25 = vmul.f32 %v15448_v41, %v17264_v16  ;;  %10326 = vmatmul.msk.f32.vlgmr.msrb.gmra.mxu1 %vm418_vm8, %v7209_v49  ;;  %10322 = vmatmul.msk.f32.vlgmr.msrb.gmra.mxu0 %vm418_vm8, %v7209_v49 }
 0xbbe   : > { %11831 = vrot.lane.b32.xlu2 %v11830_v60, %s12254_s25  ;;  %11836 = vrot.lane.b32.xlu0 %v11835_v56, %s12254_s25  ;;  %v17260_v60 = vld [vmem:[#allocation30_spill] sm:$0xff] }
 0xbbf   : > { %11861 = vrot.lane.b32.xlu1 %v11860_v33, %s12259_s11  ;;  %v8313_v56 = vmul.f32 %v15490_v44, %v17260_v60  ;;  %v7867_v33 = vmul.f32 %v15454_v8, %v17259_v30  ;;  %v8316_v43 = vmul.f32 %v15432_v55, %v17260_v60  ;;  %v8310_v42 = vmul.f32 %v15496_v20, %v17260_v60 }
 0xbc1   : > { %v11890_v0 = vpack.i.bf16 %v7867_v33, %v7872_v47  ;;  %v11920_v50 = vpack.i.bf16 %v8308_v10, %v8313_v56 }
 0xbc6   : > { %11841 = vrot.lane.b32.xlu2 %v11840_v38, %s12259_s11  ;;  %11846 = vrot.lane.b32.xlu0 %v11845_v13, %s12259_s11  ;;  %v8319_v13 = vmul.f32 %v15474_v57, %v17260_v60 }
 0xbc7   : > { %11876 = vrot.lane.b32.xlu1 %v11875_v23, %s12259_s11  ;;  %v17262_v23 = vld [vmem:[#allocation31_spill] sm:$0xff] }
 0xbc8   : > { %v8315_v53 = vmul.f32 %v15435_v19, %v17262_v23  ;;  %v8318_v63 = vmul.f32 %v15448_v41, %v17262_v23  ;;  %v11900_v15 = vpack.i.bf16 %v8314_v27, %v8319_v13  ;;  %v8312_v36 = vmul.f32 %v15463_v32, %v17262_v23 }
 0xbc9   : > { %v8309_v10 = vmul.f32 %v15479_v1, %v17262_v23 }
 0xbce   : > { %11851 = vrot.lane.b32.xlu2 %v11850_v51, %s12258_s10  ;;  %11856 = vrot.lane.b32.xlu0 %v11855_v24, %s12259_s11  ;;  %v11905_v51 = vpack.i.bf16 %v8316_v43, %v8315_v53  ;;  %v11935_v24 = vpack.i.bf16 %v8318_v63, %v8317_v12 }
 0xbcf   : > { %11881 = vrot.lane.b32.xlu1 %v11880_v37, %s12258_s10 }
 0xbd6   : > { %11866 = vrot.lane.b32.xlu2 %v11865_v2, %s12258_s10  ;;  %11871 = vrot.lane.b32.xlu0 %v11870_v21, %s12259_s11  ;;  %v17265_v2 = vld [vmem:[#allocation23_spill] sm:$0xff] }
 0xbd7   : > { %11886 = vrot.lane.b32.xlu1 %v11885_v6, %s12258_s10  ;;  %v8167_v21 = vmul.f32 %v15443_v14, %v17265_v2  ;;  %v8311_v6 = vmul.f32 %v15445_v52, %v17261_v62  ;;  %v8170_v57 = vmul.f32 %v15427_v17, %v17265_v2  ;;  %v8168_v14 = vmul.f32 %v15435_v19, %v17264_v16 }
 0xbd8   : > { %v8169_v17 = vmul.f32 %v15432_v55, %v17263_v18  ;;  %v8164_v55 = vmul.f32 %v15445_v52, %v17265_v2  ;;  %v8161_v49 = vmul.f32 %v15454_v8, %v17265_v2  ;;  %v10389_v8 = vld [vmem:[%s16805_s2 + $0xb8] sm:$0xff] }
 0xbd9   : > { %v11910_v47 = vpack.i.bf16 %v8167_v21, %v8172_v58  ;;  %v11915_v40 = vpack.i.bf16 %v8312_v36, %v8311_v6  ;;  %v11940_v56 = vpack.i.bf16 %v8171_v25, %v8170_v57  ;;  %v8166_v36 = vmul.f32 %v15490_v44, %v17263_v18  ;;  %v7211_v6 = vld [vmem:[#allocation3 + $0x5b0] sm:$0xff] }
 0xbda   : > { %v11925_v43 = vpack.i.bf16 %v8169_v17, %v8168_v14  ;;  %v8163_v25 = vmul.f32 %v15496_v20, %v17263_v18 }
 0xbdb   : > { %v11950_v44 = vpack.i.bf16 %v8161_v49, %v8166_v36 }
 0xbde   : > { %11891 = vrot.lane.b32.xlu2 %v11890_v0, %s12258_s10  ;;  %11896 = vrot.lane.b32.xlu0 %v11895_v35, %s12258_s10  ;;  %v8165_v35 = vmul.f32 %v15463_v32, %v17264_v16 }
 0xbdf   : > { %11921 = vrot.lane.b32.xlu1 %v11920_v50, %s12261_s13  ;;  %v7210_v50 = vld [vmem:[#allocation3 + $0x5a8] sm:$0xff] }
 0xbe0   : > { %v11727_v38 = vpop.permute.xlu2 %11726  ;;  %10327 = vmatmul.msk.f32.gmra.mxu1 %vm418_vm8, %v7210_v50  ;;  %10323 = vmatmul.msk.f32.gmra.mxu0 %vm418_vm8, %v7210_v50  ;;  %v7212_v50 = vld [vmem:[#allocation3 + $0x5b8] sm:$0xff] }
 0xbe1   : > { %v11728_v13 = vunpack.i.l.bf16 %v11727_v38  ;;  %v11729_v12 = vunpack.i.h.bf16 %v11727_v38 }
 0xbe6   : > { %11901 = vrot.lane.b32.xlu2 %v11900_v15, %s12261_s13  ;;  %11906 = vrot.lane.b32.xlu0 %v11905_v51, %s12261_s13  ;;  %v11930_v15 = vpack.i.bf16 %v8310_v42, %v8309_v10 }
 0xbe7   : > { %11936 = vrot.lane.b32.xlu1 %v11935_v24, %s12261_s13  ;;  %v11945_v24 = vpack.i.bf16 %v8165_v35, %v8164_v55 }
 0xbe8   : > { %v15676_v37 = vpop.permute.xlu2 %11741  ;;  %10328 = vmatmul.msk.f32.gmra.mxu1 %vm418_vm8, %v7211_v6  ;;  %10324 = vmatmul.msk.f32.gmra.mxu0 %vm418_vm8, %v7211_v6 }
 0xbe9   : > { %v11722_v41 = vpop.permute.xlu0 %11721  ;;  %v11743_v57 = vunpack.i.l.bf16 %v15676_v37  ;;  %v11744_v17 = vunpack.i.h.bf16 %v15676_v37  ;;  %v10387_v37 = vld [vmem:[%s16805_s2 + $0xa8] sm:$0xff] }
 0xbea   : > { %v11723_v19 = vunpack.i.l.bf16 %v11722_v41  ;;  %v11724_v27 = vunpack.i.h.bf16 %v11722_v41 }
 0xbec   : > { %v7274_v58 = vsel %vm401_vm6, %v11729_v12, %v11723_v19  ;;  %v7275_v52 = vsel %vm401_vm6, %v11723_v19, %v11724_v27  ;;  %v7230_v19 = vld [vmem:[#allocation3 + $0x5c0] sm:$0xff]  ;;  %v10388_v27 = vld [vmem:[%s16805_s2 + $0xb0] sm:$0xff] }
 0xbee   : > { %11911 = vrot.lane.b32.xlu2 %v11910_v47, %s12260_s12  ;;  %11916 = vrot.lane.b32.xlu0 %v11915_v40, %s12261_s13  ;;  %v8162_v47 = vmul.f32 %v15479_v1, %v17264_v16 }
 0xbef   : > { %11941 = vrot.lane.b32.xlu1 %v11940_v56, %s12260_s12 }
 0xbf0   : > { %v15697_v33 = vpop.permute.xlu2 %11751  ;;  %v11955_v41 = vpack.i.bf16 %v8163_v25, %v8162_v47  ;;  %10329 = vmatmul.msk.f32.gmra.mxu1 %vm418_vm8, %v7212_v50  ;;  %10325 = vmatmul.msk.f32.gmra.mxu0 %vm418_vm8, %v7212_v50 }
 0xbf1   : > { %v11732_v0 = vpop.permute.xlu1 %11731 }
 0xbf2   : > { %v11734_v53 = vunpack.i.h.bf16 %v11732_v0  ;;  %v11733_v63 = vunpack.i.l.bf16 %v11732_v0 }
 0xbf4   : > { %v7276_v51 = vsel %vm401_vm6, %v11733_v63, %v11734_v53  ;;  %v7277_v32 = vsel %vm401_vm6, %v11734_v53, %v11728_v13  ;;  %v11753_v13 = vunpack.i.l.bf16 %v15697_v33 }
 0xbf5   : > { %7310 = vmatpush.msrb.mxu2 %v7276_v51  ;;  %7339 = vmatpush.msrb.mxu3 %v7277_v32  ;;  %v10386_v51 = vld [vmem:[%s16805_s2 + $0xa0] sm:$0xff] }
 0xbf6   : > { %11926 = vrot.lane.b32.xlu2 %v11925_v43, %s12260_s12  ;;  %11931 = vrot.lane.b32.xlu0 %v11930_v15, %s12261_s13 }
 0xbf7   : > { %11946 = vrot.lane.b32.xlu1 %v11945_v24, %s12260_s12  ;;  %7311 = vmatpush.msrb.mxu2 %v7274_v58  ;;  %v11754_v58 = vunpack.i.h.bf16 %v15697_v33 }
 0xbf8   : > { %v15718_v38 = vpop.permute.xlu2 %11771  ;;  %7340 = vmatpush.msrb.mxu3 %v7275_v52 }
 0xbf9   : > { %v11737_v21 = vpop.permute.xlu1 %11736  ;;  %v11773_v49 = vunpack.i.l.bf16 %v15718_v38 }
 0xbfa   : > { %v11739_v40 = vunpack.i.h.bf16 %v11737_v21  ;;  %v11738_v56 = vunpack.i.l.bf16 %v11737_v21  ;;  %v7231_v21 = vld [vmem:[#allocation3 + $0x5c8] sm:$0xff] }
 0xbfc   : > { %v7272_v20 = vsel %vm401_vm6, %v11738_v56, %v11739_v40  ;;  %v7273_v14 = vsel %vm401_vm6, %v11739_v40, %v11743_v57 }
 0xbfd   : > { %7312 = vmatpush.msrb.mxu2 %v7272_v20  ;;  %7341 = vmatpush.msrb.mxu3 %v7273_v14  ;;  %v11774_v20 = vunpack.i.h.bf16 %v15718_v38 }
 0xbfe   : > { %11951 = vrot.lane.b32.xlu2 %v11950_v44, %s12260_s12  ;;  %11956 = vrot.lane.b32.xlu0 %v11955_v41, %s12260_s12 }
 0xbff   : > { %8477 = vperm.xlu1 %10758, %v10389_v8  }
 0xc00   : > { %v15738_v1 = vpop.permute.xlu2 %11781  ;;  %v11747_v42 = vpop.permute.xlu0 %11746 }
 0xc01   : > { %v11749_v10 = vunpack.i.h.bf16 %v11747_v42  ;;  %v11748_v0 = vunpack.i.l.bf16 %v11747_v42  ;;  %v11762_v35 = vpop.permute.xlu1 %11761  ;;  %v11783_v38 = vunpack.i.l.bf16 %v15738_v1 }
 0xc02   : > { %v11764_v53 = vunpack.i.h.bf16 %v11762_v35  ;;  %v11763_v63 = vunpack.i.l.bf16 %v11762_v35 }
 0xc03   : > { %v7270_v43 = vsel %vm401_vm6, %v11744_v17, %v11748_v0  ;;  %v7271_v55 = vsel %vm401_vm6, %v11748_v0, %v11749_v10  ;;  %v7232_v17 = vld [vmem:[#allocation3 + $0x5d0] sm:$0xff] }
 0xc04   : > { %7313 = vmatpush.msrb.mxu2 %v7270_v43  ;;  %7342 = vmatpush.msrb.mxu3 %v7271_v55  ;;  %v7485_v12 = vsel %vm624_vm9, %v11763_v63, %v11764_v53  ;;  %v7486_v15 = vsel %vm624_vm9, %v11764_v53, %v11753_v13 }
 0xc05   : > { %10314 = vmatmul.msk.f32.vlgmr.msrb.gmra.mxu2 %vm418_vm8, %v7230_v19  ;;  %10318 = vmatmul.msk.f32.vlgmr.msrb.gmra.mxu3 %vm418_vm8, %v7230_v19  ;;  %v7233_v19 = vld [vmem:[#allocation3 + $0x5d8] sm:$0xff] }
 0xc06   : > { %8472 = vperm.xlu2 %10759, %v10388_v27   ;;  %8467 = vperm.xlu0 %10757, %v10387_v37  }
 0xc07   : > { %7519 = vmatpush.msra.mxu2 %v7485_v12  ;;  %7548 = vmatpush.msra.mxu3 %v7486_v15  ;;  %v11784_v12 = vunpack.i.h.bf16 %v15738_v1 }
 0xc08   : > { %v15759_v32 = vpop.permute.xlu2 %11791  ;;  %v11757_v24 = vpop.permute.xlu0 %11756  ;;  %8462 = vperm.xlu1 %10758, %v10386_v51  }
 0xc09   : > { %v11759_v52 = vunpack.i.h.bf16 %v11757_v24  ;;  %v11758_v36 = vunpack.i.l.bf16 %v11757_v24  ;;  %v11767_v25 = vpop.permute.xlu1 %11766 }
 0xc0a   : > { %v11769_v6 = vunpack.i.h.bf16 %v11767_v25  ;;  %v11768_v57 = vunpack.i.l.bf16 %v11767_v25 }
 0xc0b   : > { %v7483_v47 = vsel %vm624_vm9, %v11754_v58, %v11758_v36  ;;  %v7484_v40 = vsel %vm624_vm9, %v11758_v36, %v11759_v52 }
 0xc0c   : > { %7520 = vmatpush.msra.mxu2 %v7483_v47  ;;  %7549 = vmatpush.msra.mxu3 %v7484_v40  ;;  %v7481_v56 = vsel %vm624_vm9, %v11768_v57, %v11769_v6  ;;  %v7482_v44 = vsel %vm624_vm9, %v11769_v6, %v11773_v49  ;;  %v11793_v49 = vunpack.i.l.bf16 %v15759_v32 }
 0xc0d   : > { %10315 = vmatmul.msk.f32.gmra.mxu2 %vm418_vm8, %v7231_v21  ;;  %10319 = vmatmul.msk.f32.gmra.mxu3 %vm418_vm8, %v7231_v21  ;;  %v7439_v21 = vld [vmem:[#allocation3 + $0x5e0] sm:$0xff] }
 0xc0e   : > { %7521 = vmatpush.msra.mxu2 %v7481_v56  ;;  %7550 = vmatpush.msra.mxu3 %v7482_v44 }
 0xc10   : > { %v11807_v33 = vpop.permute.xlu2 %11806  ;;  %v11777_v41 = vpop.permute.xlu0 %11776 }
 0xc11   : > { %v11779_v14 = vunpack.i.h.bf16 %v11777_v41  ;;  %v11778_v8 = vunpack.i.l.bf16 %v11777_v41  ;;  %v15770_v42 = vpop.permute.xlu1 %11801  ;;  %v11809_v47 = vunpack.i.h.bf16 %v11807_v33  ;;  %v11808_v40 = vunpack.i.l.bf16 %v11807_v33 }
 0xc12   : > { %v11803_v58 = vunpack.i.l.bf16 %v15770_v42 }
 0xc13   : > { %v7479_v10 = vsel %vm624_vm9, %v11774_v20, %v11778_v8  ;;  %v7480_v0 = vsel %vm624_vm9, %v11778_v8, %v11779_v14  ;;  %v11794_v14 = vunpack.i.h.bf16 %v15759_v32  ;;  %v7631_v8 = vsel %vm784_vm10, %v11808_v40, %v11809_v47 }
 0xc14   : > { %7522 = vmatpush.msra.mxu2 %v7479_v10  ;;  %7551 = vmatpush.msra.mxu3 %v7480_v0  ;;  %v11804_v10 = vunpack.i.h.bf16 %v15770_v42 }
 0xc15   : > { %10316 = vmatmul.msk.f32.gmra.mxu2 %vm418_vm8, %v7232_v17  ;;  %10320 = vmatmul.msk.f32.gmra.mxu3 %vm418_vm8, %v7232_v17  ;;  %v7630_v33 = vsel %vm784_vm10, %v11794_v14, %v11808_v40 }
 0xc18   : > { %v15776_v35 = vpop.permute.xlu2 %11831  ;;  %v11787_v50 = vpop.permute.xlu0 %11786 }
 0xc19   : > { %v11817_v13 = vpop.permute.xlu1 %11816  ;;  %v11789_v27 = vunpack.i.h.bf16 %v11787_v50  ;;  %v11788_v37 = vunpack.i.l.bf16 %v11787_v50  ;;  %v11833_v32 = vunpack.i.l.bf16 %v15776_v35 }
 0xc1a   : > { %v11819_v53 = vunpack.i.h.bf16 %v11817_v13  ;;  %v11818_v63 = vunpack.i.l.bf16 %v11817_v13 }
 0xc1b   : > { %v7777_v15 = vsel %vm943_vm11, %v11784_v12, %v11788_v37  ;;  %v7778_v51 = vsel %vm943_vm11, %v11788_v37, %v11789_v27  ;;  %v11834_v12 = vunpack.i.h.bf16 %v15776_v35 }
 0xc1c   : > { %v7779_v43 = vsel %vm943_vm11, %v11818_v63, %v11819_v53  ;;  %v7780_v55 = vsel %vm943_vm11, %v11819_v53, %v11783_v38  ;;  %v7440_v38 = vld [vmem:[#allocation3 + $0x5e8] sm:$0xff] }
 0xc1d   : > { %10317 = vmatmul.msk.f32.gmra.mxu2 %vm418_vm8, %v7233_v19  ;;  %10321 = vmatmul.msk.f32.gmra.mxu3 %vm418_vm8, %v7233_v19 }
 0xc1e   : > { %7813 = vmatpush.msrb.mxu2 %v7779_v43  ;;  %7842 = vmatpush.msrb.mxu3 %v7780_v55 }
 0xc20   : > { %v11797_v24 = vpop.permute.xlu0 %11796  ;;  %7814 = vmatpush.msrb.mxu2 %v7777_v15  ;;  %7843 = vmatpush.msrb.mxu3 %v7778_v51  ;;  %v15787_v52 = vpop.permute.xlu2 %11841 }
 0xc21   : > { %v11799_v36 = vunpack.i.h.bf16 %v11797_v24  ;;  %v11798_v25 = vunpack.i.l.bf16 %v11797_v24  ;;  %v11822_v1 = vpop.permute.xlu1 %11821 }
 0xc22   : > { %v11824_v6 = vunpack.i.h.bf16 %v11822_v1  ;;  %v11823_v57 = vunpack.i.l.bf16 %v11822_v1  ;;  %v7586_v1 = vld [vmem:[#allocation3 + $0x600] sm:$0xff] }
 0xc23   : > { %v7775_v56 = vsel %vm943_vm11, %v11798_v25, %v11799_v36  ;;  %v7776_v44 = vsel %vm943_vm11, %v11799_v36, %v11803_v58  ;;  %v7441_v58 = vld [vmem:[#allocation3 + $0x5f0] sm:$0xff] }
 0xc24   : > { %7815 = vmatpush.msrb.mxu2 %v7775_v56  ;;  %7844 = vmatpush.msrb.mxu3 %v7776_v44  ;;  %v7632_v41 = vsel %vm784_vm10, %v11823_v57, %v11824_v6  ;;  %v7633_v20 = vsel %vm784_vm10, %v11824_v6, %v11793_v49  ;;  %v11843_v6 = vunpack.i.l.bf16 %v15787_v52  ;;  %v7442_v57 = vld [vmem:[#allocation3 + $0x5f8] sm:$0xff]  ;;  %v7587_v56 = vld [vmem:[#allocation3 + $0x608] sm:$0xff] }
 0xc25   : > { %10330 = vmatmul.msk.f32.vlgmr.msra.gmra.mxu2 %vm418_vm8, %v7439_v21  ;;  %10334 = vmatmul.msk.f32.vlgmr.msra.gmra.mxu3 %vm418_vm8, %v7439_v21 }
 0xc26   : > { %7666 = vmatpush.msra.mxu0 %v7632_v41  ;;  %7695 = vmatpush.msra.mxu1 %v7633_v20 }
 0xc28   : > { %v11812_v17 = vpop.permute.xlu0 %11811  ;;  %7667 = vmatpush.msra.mxu0 %v7630_v33  ;;  %7696 = vmatpush.msra.mxu1 %v7631_v8  ;;  %v15801_v63 = vpop.permute.xlu2 %11851  ;;  %v11844_v33 = vunpack.i.h.bf16 %v15787_v52 }
 0xc29   : > { %v11814_v0 = vunpack.i.h.bf16 %v11812_v17  ;;  %v11813_v50 = vunpack.i.l.bf16 %v11812_v17  ;;  %v11827_v13 = vpop.permute.xlu1 %11826 }
 0xc2a   : > { %v11829_v19 = vunpack.i.h.bf16 %v11827_v13  ;;  %v11828_v53 = vunpack.i.l.bf16 %v11827_v13 }
 0xc2b   : > { %v7773_v27 = vsel %vm943_vm11, %v11804_v10, %v11813_v50  ;;  %v7774_v37 = vsel %vm943_vm11, %v11813_v50, %v11814_v0 }
 0xc2c   : > { %7816 = vmatpush.msrb.mxu2 %v7773_v27  ;;  %7845 = vmatpush.msrb.mxu3 %v7774_v37  ;;  %v7628_v43 = vsel %vm784_vm10, %v11828_v53, %v11829_v19  ;;  %v7629_v42 = vsel %vm784_vm10, %v11829_v19, %v11833_v32  ;;  %v7733_v19 = vld [vmem:[#allocation3 + $0x620] sm:$0xff]  ;;  %v7588_v37 = vld [vmem:[#allocation3 + $0x610] sm:$0xff] }
 0xc2d   : > { %10331 = vmatmul.msk.f32.gmra.mxu2 %vm418_vm8, %v7440_v38  ;;  %10335 = vmatmul.msk.f32.gmra.mxu3 %vm418_vm8, %v7440_v38  ;;  %v11853_v38 = vunpack.i.l.bf16 %v15801_v63 }
 0xc2e   : > { %7668 = vmatpush.msra.mxu0 %v7628_v43  ;;  %7697 = vmatpush.msra.mxu1 %v7629_v42 }
 0xc30   : > { %v11837_v55 = vpop.permute.xlu0 %11836  ;;  %v11867_v49 = vpop.permute.xlu2 %11866 }
 0xc31   : > { %v11839_v15 = vunpack.i.h.bf16 %v11837_v55  ;;  %v11838_v51 = vunpack.i.l.bf16 %v11837_v55  ;;  %v15810_v24 = vpop.permute.xlu1 %11861  ;;  %v11869_v55 = vunpack.i.h.bf16 %v11867_v49 }
 0xc32   : > { %v11863_v50 = vunpack.i.l.bf16 %v15810_v24 }
 0xc33   : > { %v7626_v36 = vsel %vm784_vm10, %v11834_v12, %v11838_v51  ;;  %v7627_v25 = vsel %vm784_vm10, %v11838_v51, %v11839_v15  ;;  %v11868_v12 = vunpack.i.l.bf16 %v11867_v49  ;;  %v11864_v49 = vunpack.i.h.bf16 %v15810_v24 }
 0xc34   : > { %7669 = vmatpush.msra.mxu0 %v7626_v36  ;;  %7698 = vmatpush.msra.mxu1 %v7627_v25 }
 0xc35   : > { %10332 = vmatmul.msk.f32.gmra.mxu2 %vm418_vm8, %v7441_v58  ;;  %10336 = vmatmul.msk.f32.gmra.mxu3 %vm418_vm8, %v7441_v58  ;;  %v11854_v58 = vunpack.i.h.bf16 %v15801_v63 }
 0xc36   : > { %10338 = vmatmul.msk.f32.vlgmr.msra.gmra.mxu0 %vm418_vm8, %v7586_v1  ;;  %10342 = vmatmul.msk.f32.vlgmr.msra.gmra.mxu1 %vm418_vm8, %v7586_v1  ;;  %v7925_v1 = vsel %vm1103_vm13, %v11868_v12, %v11869_v55  ;;  %v7881_v55 = vld [vmem:[#allocation3 + $0x648] sm:$0xff] }
 0xc37   : > { %v7924_v25 = vsel %vm1103_vm13, %v11854_v58, %v11868_v12 }
 0xc38   : > { %v11847_v35 = vpop.permute.xlu0 %11846  ;;  %v15826_v8 = vpop.permute.xlu2 %11891 }
 0xc39   : > { %v11877_v21 = vpop.permute.xlu1 %11876  ;;  %v11849_v44 = vunpack.i.h.bf16 %v11847_v35  ;;  %v11848_v41 = vunpack.i.l.bf16 %v11847_v35  ;;  %v11893_v63 = vunpack.i.l.bf16 %v15826_v8 }
 0xc3a   : > { %v11879_v47 = vunpack.i.h.bf16 %v11877_v21  ;;  %v11878_v40 = vunpack.i.l.bf16 %v11877_v21 }
 0xc3b   : > { %v8071_v10 = vsel %vm1262_vm14, %v11844_v33, %v11848_v41  ;;  %v8072_v0 = vsel %vm1262_vm14, %v11848_v41, %v11849_v44 }
 0xc3c   : > { %v8073_v20 = vsel %vm1262_vm14, %v11878_v40, %v11879_v47  ;;  %v8074_v14 = vsel %vm1262_vm14, %v11879_v47, %v11843_v6  ;;  %v7734_v47 = vld [vmem:[#allocation3 + $0x628] sm:$0xff] }
 0xc3d   : > { %10333 = vmatmul.msk.f32.gmra.mxu2 %vm418_vm8, %v7442_v57  ;;  %10337 = vmatmul.msk.f32.gmra.mxu3 %vm418_vm8, %v7442_v57 }
 0xc3e   : > { %10339 = vmatmul.msk.f32.gmra.mxu0 %vm418_vm8, %v7587_v56  ;;  %10343 = vmatmul.msk.f32.gmra.mxu1 %vm418_vm8, %v7587_v56 }
 0xc3f   : > { %8107 = vmatpush.msra.mxu2 %v8073_v20  ;;  %8136 = vmatpush.msra.mxu3 %v8074_v14  ;;  %v7589_v20 = vld [vmem:[#allocation3 + $0x618] sm:$0xff] }
 0xc40   : > { %v11857_v17 = vpop.permute.xlu0 %11856  ;;  %v11902_v35 = vpop.permute.xlu2 %11901 }
 0xc41   : > { %v11859_v13 = vunpack.i.h.bf16 %v11857_v17  ;;  %v11858_v32 = vunpack.i.l.bf16 %v11857_v17  ;;  %8108 = vmatpush.msra.mxu2 %v8071_v10  ;;  %8137 = vmatpush.msra.mxu3 %v8072_v0  ;;  %v11882_v52 = vpop.permute.xlu1 %11881  ;;  %v11894_v17 = vunpack.i.h.bf16 %v15826_v8 }
 0xc42   : > { %v11884_v53 = vunpack.i.h.bf16 %v11882_v52  ;;  %v11883_v27 = vunpack.i.l.bf16 %v11882_v52 }
 0xc43   : > { %v8069_v43 = vsel %vm1262_vm14, %v11858_v32, %v11859_v13  ;;  %v8070_v42 = vsel %vm1262_vm14, %v11859_v13, %v11863_v50  ;;  %v7735_v13 = vld [vmem:[#allocation3 + $0x630] sm:$0xff] }
 0xc44   : > { %8109 = vmatpush.msra.mxu2 %v8069_v43  ;;  %8138 = vmatpush.msra.mxu3 %v8070_v42  ;;  %v7926_v15 = vsel %vm1103_vm13, %v11883_v27, %v11884_v53  ;;  %v7927_v51 = vsel %vm1103_vm13, %v11884_v53, %v11853_v38  ;;  %v11903_v27 = vunpack.i.l.bf16 %v11902_v35 }
 0xc45   : > { %10346 = vmatmul.msk.f32.vlgmr.msrb.gmra.mxu2 %vm418_vm8, %v7733_v19  ;;  %10350 = vmatmul.msk.f32.vlgmr.msrb.gmra.mxu3 %vm418_vm8, %v7733_v19  ;;  %v7880_v19 = vld [vmem:[#allocation3 + $0x640] sm:$0xff] }
 0xc46   : > { %10340 = vmatmul.msk.f32.gmra.mxu0 %vm418_vm8, %v7588_v37  ;;  %10344 = vmatmul.msk.f32.gmra.mxu1 %vm418_vm8, %v7588_v37  ;;  %v7736_v37 = vld [vmem:[#allocation3 + $0x638] sm:$0xff] }
 0xc47   : > { %7960 = vmatpush.msrb.mxu0 %v7926_v15  ;;  %7989 = vmatpush.msrb.mxu1 %v7927_v51 }
 0xc48   : > { %v11872_v36 = vpop.permute.xlu0 %11871  ;;  %v11912_v32 = vpop.permute.xlu2 %11911 }
 0xc49   : > { %v11874_v21 = vunpack.i.h.bf16 %v11872_v36  ;;  %v11873_v6 = vunpack.i.l.bf16 %v11872_v36  ;;  %7961 = vmatpush.msrb.mxu0 %v7924_v25  ;;  %7990 = vmatpush.msrb.mxu1 %v7925_v1  ;;  %v11887_v57 = vpop.permute.xlu1 %11886  ;;  %v11904_v25 = vunpack.i.h.bf16 %v11902_v35  ;;  %v8027_v35 = vld [vmem:[#allocation3 + $0x660] sm:$0xff] }
 0xc4a   : > { %v11889_v40 = vunpack.i.h.bf16 %v11887_v57  ;;  %v11888_v56 = vunpack.i.l.bf16 %v11887_v57 }
 0xc4b   : > { %v8067_v44 = vsel %vm1262_vm14, %v11864_v49, %v11873_v6  ;;  %v8068_v41 = vsel %vm1262_vm14, %v11873_v6, %v11874_v21 }
 0xc4c   : > { %8110 = vmatpush.msra.mxu2 %v8067_v44  ;;  %8139 = vmatpush.msra.mxu3 %v8068_v41  ;;  %v7922_v24 = vsel %vm1103_vm13, %v11888_v56, %v11889_v40  ;;  %v7923_v14 = vsel %vm1103_vm13, %v11889_v40, %v11893_v63  ;;  %v11913_v40 = vunpack.i.l.bf16 %v11912_v32  ;;  %v7882_v41 = vld [vmem:[#allocation3 + $0x650] sm:$0xff] }
 0xc4d   : > { %10347 = vmatmul.msk.f32.gmra.mxu2 %vm418_vm8, %v7734_v47  ;;  %10351 = vmatmul.msk.f32.gmra.mxu3 %vm418_vm8, %v7734_v47 }
 0xc4e   : > { %10341 = vmatmul.msk.f32.gmra.mxu0 %vm418_vm8, %v7589_v20  ;;  %10345 = vmatmul.msk.f32.gmra.mxu1 %vm418_vm8, %v7589_v20 }
 0xc4f   : > { %7962 = vmatpush.msrb.mxu0 %v7922_v24  ;;  %7991 = vmatpush.msrb.mxu1 %v7923_v14 }
 0xc50   : > { %v11897_v33 = vpop.permute.xlu0 %11896  ;;  %v11927_v36 = vpop.permute.xlu2 %11926 }
 0xc51   : > { %v11899_v10 = vunpack.i.h.bf16 %v11897_v33  ;;  %v11898_v0 = vunpack.i.l.bf16 %v11897_v33  ;;  %v15854_v50 = vpop.permute.xlu1 %11921  ;;  %v11929_v14 = vunpack.i.h.bf16 %v11927_v36  ;;  %v11928_v33 = vunpack.i.l.bf16 %v11927_v36 }
 0xc52   : > { %v11923_v6 = vunpack.i.l.bf16 %v15854_v50 }
 0xc53   : > { %v7920_v52 = vsel %vm1103_vm13, %v11894_v17, %v11898_v0  ;;  %v7921_v38 = vsel %vm1103_vm13, %v11898_v0, %v11899_v10  ;;  %v11914_v0 = vunpack.i.h.bf16 %v11912_v32 }
 0xc54   : > { %7963 = vmatpush.msrb.mxu0 %v7920_v52  ;;  %7992 = vmatpush.msrb.mxu1 %v7921_v38 }
 0xc55   : > { %10348 = vmatmul.msk.f32.gmra.mxu2 %vm418_vm8, %v7735_v13  ;;  %10352 = vmatmul.msk.f32.gmra.mxu3 %vm418_vm8, %v7735_v13  ;;  %v8218_v38 = vsel %vm1422_vm15, %v11914_v0, %v11928_v33  ;;  %v8323_v0 = vld [vmem:[#allocation3 + $0x6b0] sm:$0xff] }
 0xc56   : > { %10354 = vmatmul.msk.f32.vlgmr.msrb.gmra.mxu0 %vm418_vm8, %v7880_v19  ;;  %10358 = vmatmul.msk.f32.vlgmr.msrb.gmra.mxu1 %vm418_vm8, %v7880_v19  ;;  %v8219_v19 = vsel %vm1422_vm15, %v11928_v33, %v11929_v14  ;;  %v15908_v14 = vpop.f32.mrf.mxu1  ;;  %v15912_v33 = vpop.f32.mrf.mxu0 }
 0xc58   : > { %v11907_v8 = vpop.permute.xlu0 %11906  ;;  %v11952_v13 = vpop.permute.xlu2 %11951 }
 0xc59   : > { %v11937_v53 = vpop.permute.xlu1 %11936  ;;  %v11909_v12 = vunpack.i.h.bf16 %v11907_v8  ;;  %v11908_v15 = vunpack.i.l.bf16 %v11907_v8  ;;  %v11924_v8 = vunpack.i.h.bf16 %v15854_v50  ;;  %v11953_v32 = vunpack.i.l.bf16 %v11952_v13 }
 0xc5a   : > { %v11939_v43 = vunpack.i.h.bf16 %v11937_v53  ;;  %v11938_v42 = vunpack.i.l.bf16 %v11937_v53 }
 0xc5b   : > { %v8365_v49 = vsel %vm1581_vm0, %v11904_v25, %v11908_v15  ;;  %v8366_v21 = vsel %vm1581_vm0, %v11908_v15, %v11909_v12  ;;  %v11954_v25 = vunpack.i.h.bf16 %v11952_v13 }
 0xc5c   : > { %v8367_v51 = vsel %vm1581_vm0, %v11938_v42, %v11939_v43  ;;  %v8368_v58 = vsel %vm1581_vm0, %v11939_v43, %v11903_v27  ;;  %v8028_v43 = vld [vmem:[#allocation3 + $0x668] sm:$0xff] }
 0xc5d   : > { %10349 = vmatmul.msk.f32.gmra.mxu2 %vm418_vm8, %v7736_v37  ;;  %10353 = vmatmul.msk.f32.gmra.mxu3 %vm418_vm8, %v7736_v37 }
 0xc5e   : > { %10355 = vmatmul.msk.f32.gmra.mxu0 %vm418_vm8, %v7881_v55  ;;  %10359 = vmatmul.msk.f32.gmra.mxu1 %vm418_vm8, %v7881_v55  ;;  %v15920_v13 = vpop.f32.mrf.mxu1 }
 0xc5f   : > { %8401 = vmatpush.msrb.mxu2 %v8367_v51  ;;  %8430 = vmatpush.msrb.mxu3 %v8368_v58  ;;  %v7883_v51 = vld [vmem:[#allocation3 + $0x658] sm:$0xff] }
 0xc60   : > { %v11917_v1 = vpop.permute.xlu0 %11916 }
 0xc61   : > { %v11919_v57 = vunpack.i.h.bf16 %v11917_v1  ;;  %v11918_v63 = vunpack.i.l.bf16 %v11917_v1  ;;  %8402 = vmatpush.msrb.mxu2 %v8365_v49  ;;  %8431 = vmatpush.msrb.mxu3 %v8366_v21  ;;  %v11942_v47 = vpop.permute.xlu1 %11941  ;;  %v8029_v21 = vld [vmem:[#allocation3 + $0x670] sm:$0xff] }
 0xc62   : > { %v11944_v56 = vunpack.i.h.bf16 %v11942_v47  ;;  %v11943_v44 = vunpack.i.l.bf16 %v11942_v47  ;;  %v8030_v47 = vld [vmem:[#allocation3 + $0x678] sm:$0xff] }
 0xc63   : > { %v8363_v20 = vsel %vm1581_vm0, %v11918_v63, %v11919_v57  ;;  %v8364_v24 = vsel %vm1581_vm0, %v11919_v57, %v11923_v6  ;;  %v8174_v63 = vld [vmem:[#allocation3 + $0x680] sm:$0xff] }
 0xc64   : > { %8403 = vmatpush.msrb.mxu2 %v8363_v20  ;;  %8432 = vmatpush.msrb.mxu3 %v8364_v24  ;;  %v8220_v17 = vsel %vm1422_vm15, %v11943_v44, %v11944_v56  ;;  %v8221_v10 = vsel %vm1422_vm15, %v11944_v56, %v11913_v40  ;;  %v8175_v40 = vld [vmem:[#allocation3 + $0x688] sm:$0xff]  ;;  %v8176_v56 = vld [vmem:[#allocation3 + $0x690] sm:$0xff]  ;;  %v8177_v24 = vld [vmem:[#allocation3 + $0x698] sm:$0xff] }
 0xc65   : > { %10362 = vmatmul.msk.f32.vlgmr.msra.gmra.mxu2 %vm418_vm8, %v8027_v35  ;;  %10366 = vmatmul.msk.f32.vlgmr.msra.gmra.mxu3 %vm418_vm8, %v8027_v35  ;;  %v8321_v35 = vld [vmem:[#allocation3 + $0x6a0] sm:$0xff]  ;;  %v8322_v20 = vld [vmem:[#allocation3 + $0x6a8] sm:$0xff] }
 0xc66   : > { %10356 = vmatmul.msk.f32.gmra.mxu0 %vm418_vm8, %v7882_v41  ;;  %10360 = vmatmul.msk.f32.gmra.mxu1 %vm418_vm8, %v7882_v41 }
 0xc67   : > { %8254 = vmatpush.msra.mxu0 %v8220_v17  ;;  %8283 = vmatpush.msra.mxu1 %v8221_v10 }
 0xc68   : > { %v11932_v52 = vpop.permute.xlu0 %11931 }
 0xc69   : > { %v11934_v53 = vunpack.i.h.bf16 %v11932_v52  ;;  %v11933_v27 = vunpack.i.l.bf16 %v11932_v52  ;;  %8255 = vmatpush.msra.mxu0 %v8218_v38  ;;  %8284 = vmatpush.msra.mxu1 %v8219_v19  ;;  %v11947_v37 = vpop.permute.xlu1 %11946  ;;  %v7388_v52 = vpop.f32.mrf.mxu0 }
 0xc6a   : > { %v11949_v42 = vunpack.i.h.bf16 %v11947_v37  ;;  %v11948_v55 = vunpack.i.l.bf16 %v11947_v37  ;;  %v7420_v37 = vpop.f32.mrf.mxu1 }
 0xc6b   : > { %v8361_v12 = vsel %vm1581_vm0, %v11924_v8, %v11933_v27  ;;  %v8362_v15 = vsel %vm1581_vm0, %v11933_v27, %v11934_v53  ;;  %v8324_v8 = vld [vmem:[#allocation3 + $0x6b8] sm:$0xff] }
 0xc6c   : > { %8404 = vmatpush.msrb.mxu2 %v8361_v12  ;;  %8433 = vmatpush.msrb.mxu3 %v8362_v15  ;;  %v8216_v58 = vsel %vm1422_vm15, %v11948_v55, %v11949_v42  ;;  %v8217_v50 = vsel %vm1422_vm15, %v11949_v42, %v11953_v32 }
 0xc6d   : > { %10363 = vmatmul.msk.f32.gmra.mxu2 %vm418_vm8, %v8028_v43  ;;  %10367 = vmatmul.msk.f32.gmra.mxu3 %vm418_vm8, %v8028_v43 }
 0xc6e   : > { %10357 = vmatmul.msk.f32.gmra.mxu0 %vm418_vm8, %v7883_v51  ;;  %10361 = vmatmul.msk.f32.gmra.mxu1 %vm418_vm8, %v7883_v51 }
 0xc6f   : > { %8256 = vmatpush.msra.mxu0 %v8216_v58  ;;  %8285 = vmatpush.msra.mxu1 %v8217_v50 }
 0xc70   : > { %v11957_v36 = vpop.permute.xlu0 %11956 }
 0xc71   : > { %v11959_v1 = vunpack.i.h.bf16 %v11957_v36  ;;  %v11958_v49 = vunpack.i.l.bf16 %v11957_v36  ;;  %v7391_v32 = vpop.f32.mrf.mxu0 }
 0xc72   : > { %v15932_v55 = vpop.f32.mrf.mxu1 }
 0xc73   : > { %v8214_v6 = vsel %vm1422_vm15, %v11954_v25, %v11958_v49  ;;  %v8215_v57 = vsel %vm1422_vm15, %v11958_v49, %v11959_v1 }
 0xc74   : > { %8257 = vmatpush.msra.mxu0 %v8214_v6  ;;  %8286 = vmatpush.msra.mxu1 %v8215_v57 }
 0xc75   : > { %10364 = vmatmul.msk.f32.gmra.mxu2 %vm418_vm8, %v8029_v21  ;;  %10368 = vmatmul.msk.f32.gmra.mxu3 %vm418_vm8, %v8029_v21 }
 0xc76   : > { %10370 = vmatmul.msk.f32.vlgmr.msra.gmra.mxu0 %vm418_vm8, %v8174_v63  ;;  %10374 = vmatmul.msk.f32.vlgmr.msra.gmra.mxu1 %vm418_vm8, %v8174_v63 }
 0xc79   : > { %v15934_v12 = vpop.f32.mrf.mxu0 }
 0xc7d   : > { %10365 = vmatmul.msk.f32.gmra.mxu2 %vm418_vm8, %v8030_v47  ;;  %10369 = vmatmul.msk.f32.gmra.mxu3 %vm418_vm8, %v8030_v47 }
 0xc7e   : > { %10371 = vmatmul.msk.f32.gmra.mxu0 %vm418_vm8, %v8175_v40  ;;  %10375 = vmatmul.msk.f32.gmra.mxu1 %vm418_vm8, %v8175_v40 }
 0xc85   : > { %10378 = vmatmul.msk.f32.vlgmr.msrb.gmra.mxu2 %vm418_vm8, %v8321_v35  ;;  %10382 = vmatmul.msk.f32.vlgmr.msrb.gmra.mxu3 %vm418_vm8, %v8321_v35 }
 0xc86   : > { %10372 = vmatmul.msk.f32.gmra.mxu0 %vm418_vm8, %v8176_v56  ;;  %10376 = vmatmul.msk.f32.gmra.mxu1 %vm418_vm8, %v8176_v56 }
 0xc88   : > { %v15904_v44 = vpop.f32.mrf.mxu2  ;;  %v15906_v41 = vpop.f32.mrf.mxu3 }
 0xc8d   : > { %10379 = vmatmul.msk.f32.gmra.mxu2 %vm418_vm8, %v8322_v20  ;;  %10383 = vmatmul.msk.f32.gmra.mxu3 %vm418_vm8, %v8322_v20 }
 0xc8e   : > { %10373 = vmatmul.msk.f32.gmra.mxu0 %vm418_vm8, %v8177_v24  ;;  %10377 = vmatmul.msk.f32.gmra.mxu1 %vm418_vm8, %v8177_v24 }
 0xc90   : > { %v7318_v17 = vpop.f32.mrf.mxu2  ;;  %v15916_v10 = vpop.f32.mrf.mxu3 }
 0xc91   : > { %v7389_v28 = vadd.f32 %v7388_v52, %v7318_v17 }
 0xc95   : > { %10380 = vmatmul.msk.f32.gmra.mxu2 %vm418_vm8, %v8323_v0  ;;  %10384 = vmatmul.msk.f32.gmra.mxu3 %vm418_vm8, %v8323_v0 }
 0xc98   : > { %v7321_v38 = vpop.f32.mrf.mxu2  ;;  %v7350_v19 = vpop.f32.mrf.mxu3 }
 0xc9d   : > { %10381 = vmatmul.msk.f32.gmra.mxu2 %vm418_vm8, %v8324_v8  ;;  %10385 = vmatmul.msk.f32.gmra.mxu3 %vm418_vm8, %v8324_v8 }
 0xca0   : > { %v15924_v53 = vpop.f32.mrf.mxu2  ;;  %v15926_v27 = vpop.f32.mrf.mxu3 }
 0xca8   : > { %v15928_v43 = vpop.f32.mrf.mxu2  ;;  %v15930_v42 = vpop.f32.mrf.mxu3 }
 0xcb0   : > { %v7527_v15 = vpop.f32.mrf.mxu2  ;;  %v7556_v51 = vpop.f32.mrf.mxu3 }
 0xcb1   : > { %v7567_v48 = vadd.f32 %v7527_v15, %v7389_v28  ;;  %v15982_v15 = vpop.permute.xlu0 %8467 }
 0xcb3   : > { %v15936_v58 = vpop.f32.mrf.mxu0  ;;  %v15938_v50 = vpop.f32.mrf.mxu1 }
 0xcb8   : > { %v7530_v36 = vpop.f32.mrf.mxu2  ;;  %v7559_v25 = vpop.f32.mrf.mxu3 }
 0xcbb   : > { %v7674_v1 = vpop.f32.mrf.mxu0  ;;  %v7703_v49 = vpop.f32.mrf.mxu1 }
 0xcbc   : > { %v7714_v5 = vadd.f32 %v7674_v1, %v7567_v48 }
 0xcc0   : > { %v15940_v21 = vpop.f32.mrf.mxu2  ;;  %v15942_v6 = vpop.f32.mrf.mxu3 }
 0xcc3   : > { %v7677_v57 = vpop.f32.mrf.mxu0  ;;  %v7706_v63 = vpop.f32.mrf.mxu1 }
 0xcc8   : > { %v15944_v47 = vpop.f32.mrf.mxu2  ;;  %v15946_v40 = vpop.f32.mrf.mxu3 }
 0xcc9   : > { %17266 = vst [vmem:[#allocation39_spill] sm:$0xff] %v15944_v47 }
 0xcca   : > { %17267 = vst [vmem:[#allocation38_spill] sm:$0xff] %v15946_v40 }
 0xccb   : > { %v15948_v35 = vpop.f32.mrf.mxu0  ;;  %v15950_v56 = vpop.f32.mrf.mxu1 }
 0xcd0   : > { %v7821_v20 = vpop.f32.mrf.mxu2  ;;  %v7850_v24 = vpop.f32.mrf.mxu3 }
 0xcd3   : > { %v15952_v0 = vpop.f32.mrf.mxu0  ;;  %v15954_v8 = vpop.f32.mrf.mxu1 }
 0xcd4   : > { %17268 = vst [vmem:[#allocation40_spill] sm:$0xff] %v15952_v0  ;;  %v7392_v0 = vadd.f32 %v7391_v32, %v7321_v38 }
 0xcd5   : > { %17269 = vst [vmem:[#allocation42_spill] sm:$0xff] %v15954_v8  ;;  %v7421_v8 = vadd.f32 %v7420_v37, %v7350_v19 }
 0xcd7   : > { %v7570_v47 = vadd.f32 %v7559_v25, %v7421_v8 }
 0xcd8   : > { %v7824_v11 = vpop.f32.mrf.mxu2  ;;  %v7853_v26 = vpop.f32.mrf.mxu3 }
 0xcd9   : > { %v7717_v17 = vadd.f32 %v7706_v63, %v7570_v47 }
 0xcdb   : > { %v7968_v46 = vpop.f32.mrf.mxu0  ;;  %v7997_v45 = vpop.f32.mrf.mxu1 }
 0xce0   : > { %v15956_v23 = vpop.f32.mrf.mxu2  ;;  %v15958_v16 = vpop.f32.mrf.mxu3 }
 0xce3   : > { %v7971_v2 = vpop.f32.mrf.mxu0  ;;  %v8000_v39 = vpop.f32.mrf.mxu1 }
 0xce8   : > { %v15960_v34 = vpop.f32.mrf.mxu2  ;;  %v15962_v62 = vpop.f32.mrf.mxu3 }
 0xce9   : > { %17270 = vst [vmem:[#allocation35_spill] sm:$0xff] %v15960_v34  ;;  %v7861_v34 = vadd.f32 %v7821_v20, %v7714_v5  ;;  %v8478_v20 = vpop.permute.xlu1 %8477 }
 0xcea   : > { %17271 = vst [vmem:[#allocation36_spill] sm:$0xff] %v15962_v62 }
 0xceb   : > { %v15964_v22 = vpop.f32.mrf.mxu0  ;;  %v15966_v59 = vpop.f32.mrf.mxu1  ;;  %v8008_v40 = vadd.f32 %v7968_v46, %v7861_v34  ;;  %v7424_v46 = vadd.f32 %v15932_v55, %v15926_v27  ;;  %v7395_v34 = vadd.f32 %v15934_v12, %v15924_v53  ;;  %v7386_v27 = vadd.f32 %v15912_v33, %v15904_v44 }
 0xcf0   : > { %v8115_v30 = vpop.f32.mrf.mxu2  ;;  %v8144_v60 = vpop.f32.mrf.mxu3 }
 0xcf3   : > { %v15968_v3 = vpop.f32.mrf.mxu0  ;;  %v15970_v4 = vpop.f32.mrf.mxu1 }
 0xcf4   : > { %17272 = vst [vmem:[#allocation37_spill] sm:$0xff] %v15968_v3  ;;  %v7569_v3 = vadd.f32 %v7530_v36, %v7392_v0  ;;  %v8473_v36 = vpop.permute.xlu2 %8472 }
 0xcf5   : > { %17273 = vst [vmem:[#allocation43_spill] sm:$0xff] %v15970_v4  ;;  %v8155_v4 = vadd.f32 %v8115_v30, %v8008_v40 }
 0xcf8   : > { %v8118_v18 = vpop.f32.mrf.mxu2  ;;  %v8147_v61 = vpop.f32.mrf.mxu3 }
 0xcfb   : > { %v8262_v9 = vpop.f32.mrf.mxu0  ;;  %v8291_v54 = vpop.f32.mrf.mxu1 }
 0xcfc   : > { %v8302_v28 = vadd.f32 %v8262_v9, %v8155_v4  ;;  %v7571_v4 = vadd.f32 %v15940_v21, %v7395_v34 }
 0xcfe   : > { %v7718_v53 = vadd.f32 %v15948_v35, %v7571_v4  ;;  %v17287_v4 = vld [vmem:[#allocation43_spill] sm:$0xff] }
 0xd00   : > { %v15972_v7 = vpop.f32.mrf.mxu2  ;;  %v15974_v29 = vpop.f32.mrf.mxu3 }
 0xd01   : > { %17274 = vst [vmem:[#allocation41_spill] sm:$0xff] %v15972_v7  ;;  %v7418_v7 = vadd.f32 %v15920_v13, %v15916_v10 }
 0xd02   : > { %17275 = vst [vmem:[#allocation32_spill] sm:$0xff] %v15974_v29  ;;  %v7716_v29 = vadd.f32 %v7677_v57, %v7569_v3 }
 0xd03   : > { %v7568_v1 = vadd.f32 %v7556_v51, %v7418_v7  ;;  %v8265_v30 = vpop.f32.mrf.mxu0  ;;  %v8294_v38 = vpop.f32.mrf.mxu1  ;;  %v7572_v7 = vadd.f32 %v15942_v6, %v7424_v46  ;;  %v17278_v6 = vld [vmem:[#allocation39_spill] sm:$0xff] }
 0xd05   : > { %v7715_v10 = vadd.f32 %v7703_v49, %v7568_v1  ;;  %v7719_v37 = vadd.f32 %v15950_v56, %v7572_v7  ;;  %v17284_v1 = vld [vmem:[#allocation35_spill] sm:$0xff] }
 0xd07   : > { %v7866_v44 = vadd.f32 %v15958_v16, %v7719_v37 }
 0xd08   : > { %v15976_v31 = vpop.f32.mrf.mxu2  ;;  %v15978_v62 = vpop.f32.mrf.mxu3  ;;  %v17279_v16 = vld [vmem:[#allocation41_spill] sm:$0xff] }
 0xd09   : > { %17276 = vst [vmem:[#allocation33_spill] sm:$0xff] %v15976_v31  ;;  %v7863_v31 = vadd.f32 %v7824_v11, %v7716_v29  ;;  %v7862_v11 = vadd.f32 %v7850_v24, %v7715_v10  ;;  %v17280_v40 = vld [vmem:[#allocation32_spill] sm:$0xff]  ;;  %v17286_v10 = vld [vmem:[#allocation37_spill] sm:$0xff] }
 0xd0a   : > { %17277 = vst [vmem:[#allocation34_spill] sm:$0xff] %v15978_v62  ;;  %v7864_v62 = vadd.f32 %v7853_v26, %v7717_v17 }
 0xd0b   : > { %v8010_v3 = vadd.f32 %v7971_v2, %v7863_v31  ;;  %v8009_v32 = vadd.f32 %v7997_v45, %v7862_v11  ;;  %v7565_v2 = vadd.f32 %v15928_v43, %v7386_v27  ;;  %v8268_v63 = vpop.f32.mrf.mxu0  ;;  %v8297_v47 = vpop.f32.mrf.mxu1 }
 0xd0c   : > { %v8011_v13 = vadd.f32 %v8000_v39, %v7864_v62  ;;  %v7415_v62 = vadd.f32 %v15908_v14, %v15906_v41  ;;  %v8013_v41 = vadd.f32 %v15966_v59, %v7866_v44  ;;  %v17282_v59 = vld [vmem:[#allocation40_spill] sm:$0xff] }
 0xd0d   : > { %v8157_v26 = vadd.f32 %v8118_v18, %v8010_v3  ;;  %v8156_v33 = vadd.f32 %v8144_v60, %v8009_v32  ;;  %v7712_v25 = vadd.f32 %v15936_v58, %v7565_v2 }
 0xd0e   : > { %v8158_v29 = vadd.f32 %v8147_v61, %v8011_v13  ;;  %v7865_v61 = vadd.f32 %v15956_v23, %v7718_v53  ;;  %v7566_v45 = vadd.f32 %v15930_v42, %v7415_v62  ;;  %v8160_v35 = vadd.f32 %v17280_v40, %v8013_v41  ;;  %v17292_v41 = vld [vmem:[#allocation9_spill] sm:$0xff] }
 0xd0f   : > { %v8304_v31 = vadd.f32 %v8265_v30, %v8157_v26  ;;  %v8303_v14 = vadd.f32 %v8291_v54, %v8156_v33  ;;  %v7859_v57 = vadd.f32 %v17278_v6, %v7712_v25  ;;  %v17285_v30 = vld [vmem:[#allocation36_spill] sm:$0xff]  ;;  %v17291_v25 = vld [vmem:[#allocation10_spill] sm:$0xff]  ;;  %v17294_v6 = vld [vmem:[#allocation15_spill] sm:$0xff] }
 0xd10   : > { %v8409_v48 = vpop.f32.mrf.mxu2  ;;  %v8438_v52 = vpop.f32.mrf.mxu3  ;;  %v8305_v39 = vadd.f32 %v8294_v38, %v8158_v29  ;;  %v8012_v49 = vadd.f32 %v15964_v22, %v7865_v61  ;;  %v7713_v23 = vadd.f32 %v15938_v50, %v7566_v45  ;;  %v17281_v22 = vld [vmem:[#allocation38_spill] sm:$0xff]  ;;  %v8307_v8 = vadd.f32 %v8297_v47, %v8160_v35  ;;  %v17288_v11 = vld [vmem:[#allocation33_spill] sm:$0xff]  ;;  %v17290_v33 = vld [vmem:[#allocation20_spill] sm:$0xff] }
 0xd11   : > { %v8449_v5 = vadd.f32 %v8409_v48, %v8302_v28  ;;  %v8450_v42 = vadd.f32 %v8438_v52, %v8303_v14  ;;  %v8006_v54 = vadd.f32 %v17282_v59, %v7859_v57  ;;  %v17283_v50 = vld [vmem:[#allocation42_spill] sm:$0xff]  ;;  %v17297_v47 = vld [vmem:[#allocation19_spill] sm:$0xff] }
 0xd12   : > { %v8159_v60 = vadd.f32 %v17279_v16, %v8012_v49  ;;  %v7860_v24 = vadd.f32 %v17281_v22, %v7713_v23  ;;  %v17289_v53 = vld [vmem:[#allocation34_spill] sm:$0xff] }
 0xd13   : > { %v8482_v9 = vadd.f32 %v15982_v15, %v8449_v5  ;;  %v8153_v5 = vadd.f32 %v17284_v1, %v8006_v54  ;;  %v8483_v52 = vadd.f32 %v15982_v15, %v8450_v42  ;;  %v8463_v15 = vpop.permute.xlu1 %8462  ;;  %v17301_v1 = vld [vmem:[#allocation7_spill] sm:$0xff] }
 0xd14   : > { %v8306_v0 = vadd.f32 %v8268_v63, %v8159_v60  ;;  %v8007_v17 = vadd.f32 %v17283_v50, %v7860_v24  ;;  %v17295_v60 = vld [vmem:[#allocation21_spill] sm:$0xff] }
 0xd15   : > { %v8490_v19 = vmax.f32 %v8482_v9, 0.0  ;;  %v8300_v3 = vadd.f32 %v17286_v10, %v8153_v5  ;;  %v8491_v29 = vmax.f32 %v8483_v52, 0.0  ;;  %v17302_v52 = vld [vmem:[#allocation24_spill] sm:$0xff] }
 0xd16   : > { %v8154_v38 = vadd.f32 %v17285_v30, %v8007_v17  ;;  %v17300_v17 = vld [vmem:[#allocation22_spill] sm:$0xff] }
 0xd17   : > { %8508 = vrot.lane.b32.xlu0 %v8490_v19, %s12245_s28  ;;  %v8447_v26 = vadd.f32 %v17288_v11, %v8300_v3  ;;  %v17307_v11 = vld [vmem:[#allocation30_spill] sm:$0xff] }
 0xd18   : > { %v8412_v18 = vpop.f32.mrf.mxu2  ;;  %v8441_v55 = vpop.f32.mrf.mxu3  ;;  %v8301_v7 = vadd.f32 %v17287_v4, %v8154_v38  ;;  %v17304_v38 = vld [vmem:[#allocation28_spill] sm:$0xff]  ;;  %v17306_v4 = vld [vmem:[#allocation11_spill] sm:$0xff] }
 0xd19   : > { %v8451_v12 = vadd.f32 %v8412_v18, %v8304_v31  ;;  %v8452_v51 = vadd.f32 %v8441_v55, %v8305_v39  ;;  %v8480_v32 = vadd.f32 %v8463_v15, %v8447_v26 }
 0xd1a   : > { %v8448_v37 = vadd.f32 %v17289_v53, %v8301_v7 }
 0xd1b   : > { %v8484_v43 = vadd.f32 %v8473_v36, %v8451_v12  ;;  %v8485_v21 = vadd.f32 %v8473_v36, %v8452_v51  ;;  %v8488_v39 = vmax.f32 %v8480_v32, 0.0 }
 0xd1c   : > { %v8481_v31 = vadd.f32 %v8463_v15, %v8448_v37  ;;  %v17311_v15 = vld [vmem:[#allocation25_spill] sm:$0xff] }
 0xd1d   : > { %v8492_v56 = vmax.f32 %v8484_v43, 0.0  ;;  %v8493_v58 = vmax.f32 %v8485_v21, 0.0  ;;  %v17293_v21 = vld [vmem:[#allocation17_spill] sm:$0xff] }
 0xd1e   : > { %v8489_v62 = vmax.f32 %v8481_v31, 0.0  ;;  %v17313_v31 = vld [vmem:[#allocation23_spill] sm:$0xff] }
 0xd1f   : > { %8512 = vrot.lane.b32.xlu1 %v8492_v56, %s12245_s28  ;;  %8514 = vrot.lane.b32.xlu2 %v8493_v58, %s12245_s28 }
 0xd20   : > { %v8415_v28 = vpop.f32.mrf.mxu2  ;;  %v8444_v48 = vpop.f32.mrf.mxu3 }
 0xd21   : > { %v8453_v46 = vadd.f32 %v8415_v28, %v8306_v0  ;;  %v8454_v34 = vadd.f32 %v8444_v48, %v8307_v8  ;;  %v17299_v0 = vld [vmem:[#allocation6_spill] sm:$0xff] }
 0xd23   : > { %v8486_v13 = vadd.f32 %v8478_v20, %v8453_v46  ;;  %v8487_v9 = vadd.f32 %v8478_v20, %v8454_v34 }
 0xd25   : > { %v8494_v19 = vmax.f32 %v8486_v13, 0.0  ;;  %v8495_v27 = vmax.f32 %v8487_v9, 0.0  ;;  %v17305_v13 = vld [vmem:[#allocation8_spill] sm:$0xff] }
 0xd27   : > { %8510 = vrot.lane.b32.xlu1 %v8491_v29, %s12245_s28  ;;  %8516 = vrot.lane.b32.xlu2 %v8494_v19, %s12245_s28  ;;  %v17309_v29 = vld [vmem:[#allocation18_spill] sm:$0xff] }
 0xd28   : > { %8518 = vrot.lane.b32.xlu0 %v8495_v27, %s12245_s28 }
 0xd2f   : > { %8504 = vrot.lane.b32.xlu2 %v8488_v39, %s12245_s28 }
 0xd30   : > { %8506 = vrot.lane.b32.xlu0 %v8489_v62, %s12245_s28  ;;  %v17314_v62 = vld [vmem:[#allocation27_spill] sm:$0xff] }
 0xd79   : > { %v8515_v2 = vpop.permute.xlu2 %8514 }
 0xd7a   : > { %8544 = vst.msk [vmem:[#allocation2 + $0x40] sm:$0xff] %vm260_vm2, %v8515_v2 }
 0xd81   : > { %v8517_v61 = vpop.permute.xlu2 %8516  ;;  %v16034_v51 = vld [vmem:[#allocation2 + $0x40] sm:$0xff] }
 0xd82   : > { %8545 = vst.msk [vmem:[#allocation2 + $0x48] sm:$0xff] %vm277_vm1, %v8517_v61  ;;  %v8581_v14 = vmul.f32 %v16034_v51, %v17292_v41  ;;  %v16050_v57 = vmul.f32 %v16034_v51, %v17294_v6  ;;  %v16061_v40 = vmul.f32 %v16034_v51, %v17297_v47  ;;  %v16091_v5 = vmul.f32 %v16034_v51, %v17301_v1 }
 0xd83   : > { %v16095_v46 = vmul.f32 %v16034_v51, %v17302_v52  ;;  %v16101_v10 = vmul.f32 %v16034_v51, %v17304_v38  ;;  %v16115_v26 = vmul.f32 %v16034_v51, %v17307_v11 }
 0xd84   : > { %17298 = vst [vmem:[#allocation41_spill] sm:$0xff] %v16061_v40 }
 0xd85   : > { %17303 = vst [vmem:[#allocation32_spill] sm:$0xff] %v16095_v46 }
 0xd86   : > { %17308 = vst [vmem:[#allocation38_spill] sm:$0xff] %v16115_v26  ;;  %v17331_v26 = vld [vmem:[#allocation12_spill] sm:$0xff] }
 0xd89   : > { %v8509_v18 = vpop.permute.xlu0 %8508  ;;  %v8505_v55 = vpop.permute.xlu2 %8504  ;;  %v16028_v44 = vld [vmem:[#allocation2 + $0x48] sm:$0xff] }
 0xd8a   : > { %8539 = vst.msk [vmem:[#allocation2 + $0x18] sm:$0xff] %vm277_vm1, %v8509_v18  ;;  %v8562_v12 = vmul.f32 %v16028_v44, %v17290_v33  ;;  %v8582_v8 = vmul.f32 %v16028_v44, %v17299_v0  ;;  %v16107_v9 = vmul.f32 %v16028_v44, %v17305_v13  ;;  %v16128_v53 = vmul.f32 %v16028_v44, %v17309_v29 }
 0xd8b   : > { %8536 = vst.msk [vmem:[#allocation2] sm:$0xff] %vm277_vm1, %v8505_v55  ;;  %v16134_v32 = vmul.f32 %v16028_v44, %v17311_v15  ;;  %v16138_v39 = vmul.f32 %v16028_v44, %v17313_v31 }
 0xd8c   : > { %8736 = vmatpush.msra.mxu2 %v8562_v12  ;;  %17310 = vst [vmem:[#allocation40_spill] sm:$0xff] %v16128_v53 }
 0xd8d   : > { %17312 = vst [vmem:[#allocation42_spill] sm:$0xff] %v16134_v32 }
 0xd91   : > { %v8513_v36 = vpop.permute.xlu1 %8512  ;;  %v16065_v56 = vld [vmem:[#allocation2 + $0x18] sm:$0xff] }
 0xd92   : > { %v16037_v45 = vsel %vm260_vm2, %v8513_v36, %v8515_v2  ;;  %8542 = vst.msk [vmem:[#allocation2 + $0x30] sm:$0xff] %vm277_vm1, %v8513_v36  ;;  %v16078_v54 = vld [vmem:[#allocation2] sm:$0xff]  ;;  %v8558_v50 = vmul.f32 %v16065_v56, %v17290_v33  ;;  %v16120_v19 = vmul.f32 %v16065_v56, %v17309_v29  ;;  %v16142_v2 = vmul.f32 %v16028_v44, %v17314_v62 }
 0xd93   : > { %v8580_v49 = vmul.f32 %v16037_v45, %v17291_v25  ;;  %v16046_v23 = vmul.f32 %v16037_v45, %v17293_v21  ;;  %v16057_v63 = vmul.f32 %v16037_v45, %v17295_v60  ;;  %v8556_v34 = vmul.f32 %v16078_v54, %v17290_v33 }
 0xd94   : > { %v8561_v3 = vmul.f32 %v16037_v45, %v17300_v17  ;;  %v16111_v7 = vmul.f32 %v16037_v45, %v17306_v4 }
 0xd95   : > { %v11960_v43 = vpack.i.bf16 %v8581_v14, %v8580_v49  ;;  %17296 = vst [vmem:[#allocation39_spill] sm:$0xff] %v16057_v63 }
 0xd97   : > { %11961 = vrot.lane.b32.xlu0 %v11960_v43, %s12252_s20  ;;  %v16162_v43 = vmul.f32 %v16065_v56, %v17305_v13 }
 0xd99   : > { %v8511_v35 = vpop.permute.xlu1 %8510  ;;  %v16063_v42 = vld [vmem:[#allocation2 + $0x30] sm:$0xff] }
 0xd9a   : > { %v16070_v20 = vsel %vm260_vm2, %v8509_v18, %v8511_v35  ;;  %8541 = vst.msk [vmem:[#allocation2 + $0x28] sm:$0xff] %vm260_vm2, %v8511_v35  ;;  %v8519_v22 = vpop.permute.xlu0 %8518  ;;  %v8560_v24 = vmul.f32 %v16063_v42, %v17290_v33  ;;  %v16146_v18 = vmul.f32 %v16078_v54, %v17299_v0  ;;  %v8576_v33 = vmul.f32 %v16065_v56, %v17299_v0 }
 0xd9b   : > { %v16076_v59 = vsel %vm260_vm2, %v8517_v61, %v8519_v22  ;;  %8547 = vst.msk [vmem:[#allocation2 + $0x58] sm:$0xff] %vm260_vm2, %v8519_v22  ;;  %v16124_v27 = vmul.f32 %v16070_v20, %v17295_v60  ;;  %v8559_v37 = vmul.f32 %v16070_v20, %v17300_v17  ;;  %v8577_v12 = vmul.f32 %v16070_v20, %v17291_v25 }
 0xd9c   : > { %8737 = vmatpush.msra.mxu2 %v8560_v24  ;;  %v8563_v28 = vmul.f32 %v16076_v59, %v17300_v17  ;;  %v8583_v48 = vmul.f32 %v16076_v59, %v17291_v25  ;;  %v16170_v24 = vmul.f32 %v16078_v54, %v17309_v29  ;;  %v8792_v16 = vmul.f32 %v16076_v59, %v17306_v4 }
 0xd9e   : > { %8738 = vmatpush.msra.mxu2 %v8558_v50  ;;  %8765 = vmatpush.msra.mxu3 %v8563_v28  ;;  %v11970_v30 = vpack.i.bf16 %v8583_v48, %v8582_v8  ;;  %17315 = vst [vmem:[#allocation35_spill] sm:$0xff] %v16170_v24  ;;  %v17317_v8 = vld [vmem:[#allocation26_spill] sm:$0xff]  ;;  %v8579_v28 = vmul.f32 %v16063_v42, %v17299_v0 }
 0xd9f   : > { %v16178_v50 = vmul.f32 %v16037_v45, %v17317_v8  ;;  %v16200_v0 = vmul.f32 %v16065_v56, %v17313_v31  ;;  %v12000_v32 = vpack.i.bf16 %v8792_v16, %v16107_v9  ;;  %v16335_v9 = vmul.f32 %v16063_v42, %v17314_v62 }
 0xda0   : > { %8739 = vmatpush.msra.mxu2 %v8556_v34  ;;  %11971 = vrot.lane.b32.xlu1 %v11970_v30, %s12252_s20  ;;  %v16192_v30 = vmul.f32 %v16078_v54, %v17311_v15 }
 0xda1   : > { %8766 = vmatpush.msra.mxu3 %v8561_v3  ;;  %17318 = vst [vmem:[#allocation37_spill] sm:$0xff] %v16178_v50  ;;  %v16184_v34 = vld [vmem:[#allocation2 + $0x28] sm:$0xff]  ;;  %v11975_v3 = vpack.i.bf16 %v8577_v12, %v8576_v33  ;;  %v16214_v33 = vmul.f32 %v16078_v54, %v17313_v31 }
 0xda2   : > { %v8507_v61 = vpop.permute.xlu0 %8506  ;;  %v16164_v35 = vld [vmem:[#allocation2 + $0x58] sm:$0xff]  ;;  %v16250_v53 = vmul.f32 %v16184_v34, %v17302_v52  ;;  %v17323_v50 = vld [vmem:[#allocation31_spill] sm:$0xff]  ;;  %17326 = vst [vmem:[#allocation9_spill] sm:$0xff] %v16335_v9 }
 0xda3   : > { %v16155_v49 = vsel %vm260_vm2, %v8505_v55, %v8507_v61  ;;  %8538 = vst.msk [vmem:[#allocation2 + $0x10] sm:$0xff] %vm260_vm2, %v8507_v61  ;;  %8767 = vmatpush.msra.mxu3 %v8559_v37  ;;  %v16174_v55 = vmul.f32 %v16076_v59, %v17295_v60  ;;  %v8584_v48 = vmul.f32 %v16164_v35, %v17292_v41  ;;  %v17320_v61 = vld [vmem:[#allocation29_spill] sm:$0xff] }
 0xda4   : > { %v8557_v22 = vmul.f32 %v16155_v49, %v17300_v17  ;;  %v16188_v17 = vmul.f32 %v16076_v59, %v17317_v8  ;;  %v16196_v37 = vmul.f32 %v16065_v56, %v17311_v15  ;;  %v16204_v58 = vmul.f32 %v16037_v45, %v17320_v61  ;;  %17321 = vst [vmem:[#allocation33_spill] sm:$0xff] %v16214_v33 }
 0xda5   : > { %17316 = vst [vmem:[#allocation36_spill] sm:$0xff] %v16174_v55  ;;  %v11965_v36 = vpack.i.bf16 %v8579_v28, %v8584_v48  ;;  %v16219_v12 = vmul.f32 %v16164_v35, %v17297_v47  ;;  %v16223_v28 = vmul.f32 %v16184_v34, %v17297_v47  ;;  %v16236_v14 = vmul.f32 %v16164_v35, %v17302_v52 }
 0xda6   : > { %17319 = vst [vmem:[#allocation43_spill] sm:$0xff] %v16188_v17  ;;  %8768 = vmatpush.msra.mxu3 %v8557_v22  ;;  %v16210_v22 = vmul.f32 %v16063_v42, %v17309_v29  ;;  %v16229_v29 = vmul.f32 %v16063_v42, %v17311_v15  ;;  %v16254_v55 = vmul.f32 %v16070_v20, %v17317_v8 }
 0xda7   : > { %17322 = vst [vmem:[#allocation34_spill] sm:$0xff] %v16223_v28  ;;  %11966 = vrot.lane.b32.xlu2 %v11965_v36, %s12252_s20  ;;  %v8574_v63 = vmul.f32 %v16155_v49, %v17291_v25  ;;  %v16262_v15 = vmul.f32 %v16155_v49, %v17295_v60  ;;  %v16266_v36 = vmul.f32 %v16037_v45, %v17323_v50 }
 0xda8   : > { %11976 = vrot.lane.b32.xlu1 %v11975_v3, %s12252_s20  ;;  %v8578_v3 = vmul.f32 %v16184_v34, %v17292_v41  ;;  %v8786_v17 = vmul.f32 %v16070_v20, %v17306_v4  ;;  %v16286_v28 = vmul.f32 %v16155_v49, %v17317_v8  ;;  %v16299_v16 = vmul.f32 %v16164_v35, %v17304_v38 }
 0xda9   : > { %17324 = vst [vmem:[#allocation20_spill] sm:$0xff] %v16266_v36  ;;  %v8788_v36 = vmul.f32 %v16063_v42, %v17305_v13  ;;  %v17328_v33 = vpack.i.bf16 %v16091_v5, %v16111_v7  ;;  %v8783_v5 = vmul.f32 %v16155_v49, %v17306_v4  ;;  %v17330_v7 = vld [vmem:[#allocation13_spill] sm:$0xff] }
 0xdaa   : > { %v16242_v48 = vld [vmem:[#allocation2 + $0x10] sm:$0xff]  ;;  %v11980_v60 = vpack.i.bf16 %v16146_v18, %v8578_v3  ;;  %v16294_v18 = vmul.f32 %v16063_v42, %v17313_v31  ;;  %v16316_v31 = vmul.f32 %v16076_v59, %v17320_v61  ;;  %v16371_v3 = vmul.f32 %v16070_v20, %v17323_v50 }
 0xdab   : > { %v8575_v40 = vmul.f32 %v16242_v48, %v17292_v41  ;;  %v16270_v46 = vmul.f32 %v16242_v48, %v17297_v47  ;;  %v16290_v25 = vmul.f32 %v16242_v48, %v17302_v52  ;;  %v16309_v52 = vmul.f32 %v16184_v34, %v17304_v38 }
 0xdac   : > { %v16324_v8 = vmul.f32 %v16242_v48, %v17304_v38  ;;  %v16359_v38 = vmul.f32 %v16184_v34, %v17307_v11  ;;  %v16379_v41 = vmul.f32 %v16155_v49, %v17323_v50  ;;  %v16383_v47 = vmul.f32 %v16242_v48, %v17307_v11 }
 0xdad   : > { %v11985_v24 = vpack.i.bf16 %v8575_v40, %v8574_v63  ;;  %v16303_v63 = vmul.f32 %v16070_v20, %v17320_v61  ;;  %17325 = vst [vmem:[#allocation10_spill] sm:$0xff] %v16309_v52  ;;  %v8793_v40 = vmul.f32 %v16164_v35, %v17301_v1  ;;  %v16367_v52 = vmul.f32 %v16065_v56, %v17314_v62 }
 0xdaf   : > { %11986 = vrot.lane.b32.xlu0 %v11985_v24, %s12252_s20  ;;  %v16320_v24 = vmul.f32 %v16155_v49, %v17320_v61  ;;  %11981 = vrot.lane.b32.xlu2 %v11980_v60, %s12252_s20  ;;  %v16343_v60 = vmul.f32 %v16164_v35, %v17307_v11  ;;  %v16355_v61 = vmul.f32 %v16078_v54, %v17314_v62 }
 0xdb0   : > { %12001 = vrot.lane.b32.xlu1 %v12000_v32, %s12251_s18  ;;  %v16347_v32 = vmul.f32 %v16076_v59, %v17323_v50  ;;  %v12005_v62 = vpack.i.bf16 %v8786_v17, %v16162_v43  ;;  %v11990_v9 = vpack.i.bf16 %v8788_v36, %v8793_v40  ;;  %v8784_v11 = vmul.f32 %v16242_v48, %v17301_v1  ;;  %v17329_v43 = vld [vmem:[#allocation14_spill] sm:$0xff] }
 0xdb1   : > { %17327 = vst [vmem:[#allocation17_spill] sm:$0xff] %v16343_v60  ;;  %v8933_v50 = vmul.f32 %v16070_v20, %v17329_v43  ;;  %v8787_v17 = vmul.f32 %v16184_v34, %v17301_v1  ;;  %v8782_v36 = vmul.f32 %v16078_v54, %v17305_v13  ;;  %v8936_v1 = vmul.f32 %v16037_v45, %v17329_v43 }
 0xdb2   : > { %v12015_v40 = vpack.i.bf16 %v8784_v11, %v8783_v5  ;;  %v8939_v4 = vmul.f32 %v16076_v59, %v17329_v43  ;;  %v8940_v60 = vmul.f32 %v16164_v35, %v17331_v26  ;;  %v8937_v13 = vmul.f32 %v16034_v51, %v17331_v26 }
 0xdb3   : > { %v8938_v11 = vmul.f32 %v16028_v44, %v17330_v7  ;;  %v8931_v45 = vmul.f32 %v16242_v48, %v17331_v26  ;;  %v9086_v51 = vmul.f32 %v16076_v59, %v17293_v21  ;;  %v9080_v59 = vmul.f32 %v16070_v20, %v17293_v21 }
 0xdb4   : > { %v9078_v20 = vmul.f32 %v16242_v48, %v17294_v6  ;;  %v17341_v48 = vpack.i.bf16 %v16210_v22, %v16219_v12  ;;  %v17353_v12 = vpack.i.bf16 %v16229_v29, %v16236_v14  ;;  %v17357_v14 = vpack.i.bf16 %v16101_v10, %v16204_v58 }
 0xdb5   : > { %v12055_v5 = vpack.i.bf16 %v8939_v4, %v8938_v11  ;;  %v17360_v58 = vpack.i.bf16 %v16324_v8, %v16320_v24  ;;  %v8566_v8 = vld [vmem:[#allocation3 + $0x6c8] sm:$0xff] }
 0xdb7   : > { %11996 = vrot.lane.b32.xlu0 %v17328_v33, %s12251_s18  ;;  %11991 = vrot.lane.b32.xlu2 %v11990_v9, %s12251_s18  ;;  %v8932_v33 = vmul.f32 %v16065_v56, %v17330_v7 }
 0xdb8   : > { %12006 = vrot.lane.b32.xlu1 %v12005_v62, %s12251_s18  ;;  %v12010_v62 = vpack.i.bf16 %v8782_v36, %v8787_v17  ;;  %v12025_v17 = vpack.i.bf16 %v8937_v13, %v8936_v1  ;;  %v8934_v36 = vmul.f32 %v16184_v34, %v17331_v26  ;;  %v9087_v26 = vmul.f32 %v16164_v35, %v17294_v6 }
 0xdb9   : > { %v12030_v9 = vpack.i.bf16 %v8933_v50, %v8932_v33  ;;  %v8935_v50 = vmul.f32 %v16063_v42, %v17330_v7 }
 0xdbb   : > { %v12020_v33 = vpack.i.bf16 %v8935_v50, %v8940_v60  ;;  %v17333_v50 = vpack.i.bf16 %v16050_v57, %v16046_v23  ;;  %v17334_v23 = vpack.i.bf16 %v16124_v27, %v16120_v19  ;;  %v17335_v57 = vld [vmem:[#allocation41_spill] sm:$0xff]  ;;  %v17342_v19 = vpack.i.bf16 %v16270_v46, %v16262_v15  ;;  %v17343_v27 = vld [vmem:[#allocation43_spill] sm:$0xff] }
 0xdbc   : > { %v17352_v46 = vpack.i.bf16 %v16254_v55, %v16196_v37  ;;  %v17354_v15 = vpack.i.bf16 %v16290_v25, %v16286_v28  ;;  %v17356_v55 = vpack.i.bf16 %v16192_v30, %v16250_v53  ;;  %v17358_v28 = vpack.i.bf16 %v16316_v31, %v16138_v39  ;;  %v8565_v25 = vld [vmem:[#allocation3 + $0x6c0] sm:$0xff]  ;;  %v17362_v39 = vld [vmem:[#allocation33_spill] sm:$0xff] }
 0xdbd   : > { %10398 = vmatmul.msk.f32.vlgmr.msra.gmra.mxu2 %vm418_vm8, %v8565_v25  ;;  %10402 = vmatmul.msk.f32.vlgmr.msra.gmra.mxu3 %vm418_vm8, %v8565_v25  ;;  %v17361_v53 = vpack.i.bf16 %v16347_v32, %v16142_v2  ;;  %v17363_v30 = vld [vmem:[#allocation10_spill] sm:$0xff] }
 0xdbe   : > { %v17365_v32 = vld [vmem:[#allocation38_spill] sm:$0xff] }
 0xdbf   : > { %12016 = vrot.lane.b32.xlu0 %v12015_v40, %s12251_s18  ;;  %12011 = vrot.lane.b32.xlu2 %v12010_v62, %s12251_s18  ;;  %v8930_v40 = vmul.f32 %v16155_v49, %v17329_v43  ;;  %v8929_v62 = vmul.f32 %v16078_v54, %v17330_v7 }
 0xdc0   : > { %12031 = vrot.lane.b32.xlu1 %v12030_v9, %s12254_s25  ;;  %v17332_v9 = vld [vmem:[#allocation16_spill] sm:$0xff] }
 0xdc1   : > { %v9085_v60 = vmul.f32 %v16028_v44, %v17332_v9  ;;  %v12040_v1 = vpack.i.bf16 %v8931_v45, %v8930_v40  ;;  %v12035_v13 = vpack.i.bf16 %v8929_v62, %v8934_v36  ;;  %v9079_v44 = vmul.f32 %v16065_v56, %v17332_v9  ;;  %v17347_v36 = vld [vmem:[#allocation34_spill] sm:$0xff] }
 0xdc2   : > { %v9082_v43 = vmul.f32 %v16063_v42, %v17332_v9  ;;  %v9081_v56 = vmul.f32 %v16184_v34, %v17294_v6  ;;  %v9077_v42 = vmul.f32 %v16155_v49, %v17293_v21  ;;  %v9076_v35 = vmul.f32 %v16078_v54, %v17332_v9  ;;  %v17336_v6 = vld [vmem:[#allocation39_spill] sm:$0xff]  ;;  %v17338_v21 = vld [vmem:[#allocation36_spill] sm:$0xff] }
 0xdc3   : > { %v12060_v4 = vpack.i.bf16 %v9086_v51, %v9085_v60  ;;  %v12065_v7 = vpack.i.bf16 %v9080_v59, %v9079_v44  ;;  %v17337_v34 = vpack.i.bf16 %v17335_v57, %v17336_v6  ;;  %v17339_v49 = vld [vmem:[#allocation40_spill] sm:$0xff]  ;;  %v17346_v51 = vld [vmem:[#allocation35_spill] sm:$0xff]  ;;  %v17350_v60 = vld [vmem:[#allocation37_spill] sm:$0xff]  ;;  %v17355_v62 = vpack.i.bf16 %v16303_v63, %v16200_v0 }
 0xdc4   : > { %v12045_v11 = vpack.i.bf16 %v9082_v43, %v9087_v26  ;;  %v17340_v54 = vpack.i.bf16 %v17338_v21, %v17339_v49  ;;  %v17348_v40 = vpack.i.bf16 %v17346_v51, %v17347_v36  ;;  %v17349_v9 = vld [vmem:[#allocation32_spill] sm:$0xff]  ;;  %v17359_v0 = vpack.i.bf16 %v16294_v18, %v16299_v16  ;;  %v8586_v36 = vld [vmem:[#allocation3 + $0x6e0] sm:$0xff] }
 0xdc5   : > { %v17351_v22 = vpack.i.bf16 %v17349_v9, %v17350_v60  ;;  %v17364_v18 = vpack.i.bf16 %v17362_v39, %v17363_v30  ;;  %10399 = vmatmul.msk.f32.gmra.mxu2 %vm418_vm8, %v8566_v8  ;;  %10403 = vmatmul.msk.f32.gmra.mxu3 %vm418_vm8, %v8566_v8  ;;  %v17366_v44 = vld [vmem:[#allocation20_spill] sm:$0xff]  ;;  %v17372_v21 = vpack.i.bf16 %v16383_v47, %v16379_v41 }
 0xdc6   : > { %v17367_v43 = vpack.i.bf16 %v17365_v32, %v17366_v44  ;;  %v8567_v6 = vld [vmem:[#allocation3 + $0x6d0] sm:$0xff]  ;;  %v17373_v49 = vpack.i.bf16 %v16355_v61, %v16359_v38  ;;  %v8589_v44 = vld [vmem:[#allocation3 + $0x6f8] sm:$0xff] }
 0xdc7   : > { %12026 = vrot.lane.b32.xlu0 %v12025_v17, %s12254_s25  ;;  %12021 = vrot.lane.b32.xlu2 %v12020_v33, %s12254_s25  ;;  %v12075_v17 = vpack.i.bf16 %v9078_v20, %v9077_v42  ;;  %v17344_v33 = vld [vmem:[#allocation42_spill] sm:$0xff]  ;;  %v17369_v20 = vld [vmem:[#allocation9_spill] sm:$0xff]  ;;  %v10464_v41 = vld [vmem:[%s16805_s2 + $0xd0] sm:$0xff] }
 0xdc8   : > { %12056 = vrot.lane.b32.xlu1 %v12055_v5, %s12254_s25  ;;  %v12070_v5 = vpack.i.bf16 %v9076_v35, %v9081_v56  ;;  %v17345_v45 = vpack.i.bf16 %v17343_v27, %v17344_v33  ;;  %v17370_v56 = vld [vmem:[#allocation17_spill] sm:$0xff] }
 0xdc9   : > { %v17371_v42 = vpack.i.bf16 %v17369_v20, %v17370_v56 }
 0xdcd   : > { %10400 = vmatmul.msk.f32.gmra.mxu2 %vm418_vm8, %v8567_v6  ;;  %10404 = vmatmul.msk.f32.gmra.mxu3 %vm418_vm8, %v8567_v6 }
 0xdcf   : > { %12041 = vrot.lane.b32.xlu0 %v12040_v1, %s12254_s25  ;;  %12036 = vrot.lane.b32.xlu2 %v12035_v13, %s12254_s25 }
 0xdd0   : > { %12061 = vrot.lane.b32.xlu1 %v12060_v4, %s12257_s7 }
 0xdd7   : > { %12051 = vrot.lane.b32.xlu0 %v17333_v50, %s12257_s7  ;;  %12046 = vrot.lane.b32.xlu2 %v12045_v11, %s12257_s7  ;;  %v17368_v11 = vpack.i.bf16 %v16371_v3, %v16367_v52  ;;  %v10462_v3 = vld [vmem:[%s16805_s2 + $0xc0] sm:$0xff] }
 0xdd8   : > { %12066 = vrot.lane.b32.xlu1 %v12065_v7, %s12257_s7 }
 0xddf   : > { %12076 = vrot.lane.b32.xlu0 %v12075_v17, %s12257_s7  ;;  %12071 = vrot.lane.b32.xlu2 %v12070_v5, %s12257_s7 }
 0xde0   : > { %12091 = vrot.lane.b32.xlu1 %v17334_v23, %s12258_s10 }
 0xde7   : > { %12086 = vrot.lane.b32.xlu0 %v17337_v34, %s12258_s10  ;;  %12081 = vrot.lane.b32.xlu2 %v17341_v48, %s12258_s10 }
 0xde8   : > { %12116 = vrot.lane.b32.xlu1 %v17340_v54, %s12258_s10 }
 0xdef   : > { %12101 = vrot.lane.b32.xlu0 %v17342_v19, %s12258_s10  ;;  %12096 = vrot.lane.b32.xlu2 %v17348_v40, %s12258_s10 }
 0xdf0   : > { %12121 = vrot.lane.b32.xlu1 %v17345_v45, %s12259_s11 }
 0xdf7   : > { %12111 = vrot.lane.b32.xlu0 %v17351_v22, %s12259_s11  ;;  %12106 = vrot.lane.b32.xlu2 %v17353_v12, %s12259_s11  ;;  %v10465_v22 = vld [vmem:[%s16805_s2 + $0xd8] sm:$0xff] }
 0xdf8   : > { %12126 = vrot.lane.b32.xlu1 %v17352_v46, %s12259_s11  ;;  %v10463_v46 = vld [vmem:[%s16805_s2 + $0xc8] sm:$0xff]  ;;  %v8568_v12 = vld [vmem:[#allocation3 + $0x6d8] sm:$0xff] }
 0xdf9   : > { %10401 = vmatmul.msk.f32.gmra.mxu2 %vm418_vm8, %v8568_v12  ;;  %10405 = vmatmul.msk.f32.gmra.mxu3 %vm418_vm8, %v8568_v12  ;;  %v8796_v12 = vld [vmem:[#allocation3 + $0x708] sm:$0xff] }
 0xdff   : > { %12136 = vrot.lane.b32.xlu0 %v17354_v15, %s12259_s11  ;;  %12131 = vrot.lane.b32.xlu2 %v17356_v55, %s12259_s11 }
 0xe00   : > { %12151 = vrot.lane.b32.xlu1 %v17355_v62, %s12260_s12 }
 0xe01   : > { %v11967_v37 = vpop.permute.xlu2 %11966 }
 0xe02   : > { %v11968_v63 = vunpack.i.l.bf16 %v11967_v37  ;;  %v11969_v59 = vunpack.i.h.bf16 %v11967_v37 }
 0xe07   : > { %12146 = vrot.lane.b32.xlu0 %v17357_v14, %s12260_s12  ;;  %12141 = vrot.lane.b32.xlu2 %v17359_v0, %s12260_s12 }
 0xe08   : > { %12176 = vrot.lane.b32.xlu1 %v17358_v28, %s12260_s12 }
 0xe09   : > { %v11982_v29 = vpop.permute.xlu2 %11981  ;;  %v11962_v10 = vpop.permute.xlu0 %11961 }
 0xe0a   : > { %v11963_v1 = vunpack.i.l.bf16 %v11962_v10  ;;  %v11964_v24 = vunpack.i.h.bf16 %v11962_v10  ;;  %v11983_v17 = vunpack.i.l.bf16 %v11982_v29  ;;  %v11984_v48 = vunpack.i.h.bf16 %v11982_v29  ;;  %v8587_v29 = vld [vmem:[#allocation3 + $0x6e8] sm:$0xff] }
 0xe0c   : > { %v8630_v7 = vsel %vm401_vm6, %v11969_v59, %v11963_v1  ;;  %v8631_v50 = vsel %vm401_vm6, %v11963_v1, %v11964_v24 }
 0xe0f   : > { %12161 = vrot.lane.b32.xlu0 %v17360_v58, %s12260_s12  ;;  %12156 = vrot.lane.b32.xlu2 %v17364_v18, %s12260_s12 }
 0xe10   : > { %12181 = vrot.lane.b32.xlu1 %v17361_v53, %s12261_s13 }
 0xe11   : > { %v16543_v31 = vpop.permute.xlu2 %11991 }
 0xe12   : > { %v11972_v16 = vpop.permute.xlu1 %11971  ;;  %v11993_v45 = vunpack.i.l.bf16 %v16543_v31  ;;  %v11994_v62 = vunpack.i.h.bf16 %v16543_v31 }
 0xe13   : > { %v11974_v4 = vunpack.i.h.bf16 %v11972_v16  ;;  %v11973_v13 = vunpack.i.l.bf16 %v11972_v16 }
 0xe15   : > { %v8632_v26 = vsel %vm401_vm6, %v11973_v13, %v11974_v4  ;;  %v8633_v2 = vsel %vm401_vm6, %v11974_v4, %v11968_v63  ;;  %v8588_v13 = vld [vmem:[#allocation3 + $0x6f0] sm:$0xff] }
 0xe16   : > { %8666 = vmatpush.msrb.mxu0 %v8632_v26  ;;  %8695 = vmatpush.msrb.mxu1 %v8633_v2 }
 0xe17   : > { %12171 = vrot.lane.b32.xlu0 %v17367_v43, %s12261_s13  ;;  %12166 = vrot.lane.b32.xlu2 %v17371_v42, %s12261_s13 }
 0xe18   : > { %12186 = vrot.lane.b32.xlu1 %v17368_v11, %s12261_s13  ;;  %8667 = vmatpush.msrb.mxu0 %v8630_v7 }
 0xe19   : > { %8696 = vmatpush.msrb.mxu1 %v8631_v50  ;;  %v16563_v5 = vpop.permute.xlu2 %12011 }
 0xe1a   : > { %v11977_v35 = vpop.permute.xlu1 %11976  ;;  %v12013_v28 = vunpack.i.l.bf16 %v16563_v5  ;;  %v12014_v16 = vunpack.i.h.bf16 %v16563_v5 }
 0xe1b   : > { %v11979_v23 = vunpack.i.h.bf16 %v11977_v35  ;;  %v11978_v57 = vunpack.i.l.bf16 %v11977_v35 }
 0xe1d   : > { %v8628_v34 = vsel %vm401_vm6, %v11978_v57, %v11979_v23  ;;  %v8629_v52 = vsel %vm401_vm6, %v11979_v23, %v11983_v17 }
 0xe1e   : > { %8668 = vmatpush.msrb.mxu0 %v8628_v34  ;;  %8697 = vmatpush.msrb.mxu1 %v8629_v52 }
 0xe1f   : > { %12196 = vrot.lane.b32.xlu0 %v17372_v21, %s12261_s13  ;;  %12191 = vrot.lane.b32.xlu2 %v17373_v49, %s12261_s13 }
 0xe20   : > { %9818 = vperm.xlu1 %10758, %v10462_v3  }
 0xe21   : > { %v11987_v54 = vpop.permute.xlu0 %11986  ;;  %v16581_v51 = vpop.permute.xlu2 %12021 }
 0xe22   : > { %v11989_v19 = vunpack.i.h.bf16 %v11987_v54  ;;  %v11988_v27 = vunpack.i.l.bf16 %v11987_v54  ;;  %v12002_v33 = vpop.permute.xlu1 %12001  ;;  %v12023_v2 = vunpack.i.l.bf16 %v16581_v51  ;;  %v12024_v42 = vunpack.i.h.bf16 %v16581_v51 }
 0xe23   : > { %v12004_v40 = vunpack.i.h.bf16 %v12002_v33  ;;  %v12003_v9 = vunpack.i.l.bf16 %v12002_v33 }
 0xe24   : > { %v8626_v47 = vsel %vm401_vm6, %v11984_v48, %v11988_v27  ;;  %v8627_v61 = vsel %vm401_vm6, %v11988_v27, %v11989_v19  ;;  %v8795_v27 = vld [vmem:[#allocation3 + $0x700] sm:$0xff] }
 0xe25   : > { %8669 = vmatpush.msrb.mxu0 %v8626_v47  ;;  %8698 = vmatpush.msrb.mxu1 %v8627_v61  ;;  %v8841_v38 = vsel %vm624_vm9, %v12003_v9, %v12004_v40  ;;  %v8842_v60 = vsel %vm624_vm9, %v12004_v40, %v11993_v45  ;;  %v8942_v40 = vld [vmem:[#allocation3 + $0x720] sm:$0xff] }
 0xe26   : > { %10390 = vmatmul.msk.f32.vlgmr.msrb.gmra.mxu0 %vm418_vm8, %v8586_v36  ;;  %10394 = vmatmul.msk.f32.vlgmr.msrb.gmra.mxu1 %vm418_vm8, %v8586_v36 }
 0xe27   : > { %9828 = vperm.xlu0 %10757, %v10464_v41   ;;  %8875 = vmatpush.msra.mxu0 %v8841_v38 }
 0xe28   : > { %8904 = vmatpush.msra.mxu1 %v8842_v60  ;;  %9833 = vperm.xlu1 %10758, %v10465_v22  }
 0xe29   : > { %9823 = vperm.xlu2 %10759, %v10463_v46   ;;  %v11997_v15 = vpop.permute.xlu0 %11996  ;;  %v16602_v0 = vpop.permute.xlu2 %12036 }
 0xe2a   : > { %v11999_v55 = vunpack.i.h.bf16 %v11997_v15  ;;  %v11998_v37 = vunpack.i.l.bf16 %v11997_v15  ;;  %v12007_v14 = vpop.permute.xlu1 %12006  ;;  %v12038_v5 = vunpack.i.l.bf16 %v16602_v0  ;;  %v12039_v6 = vunpack.i.h.bf16 %v16602_v0 }
 0xe2b   : > { %v12009_v25 = vunpack.i.h.bf16 %v12007_v14  ;;  %v12008_v58 = vunpack.i.l.bf16 %v12007_v14 }
 0xe2c   : > { %v8839_v10 = vsel %vm624_vm9, %v11994_v62, %v11998_v37  ;;  %v8840_v53 = vsel %vm624_vm9, %v11998_v37, %v11999_v55 }
 0xe2d   : > { %8876 = vmatpush.msra.mxu0 %v8839_v10  ;;  %8905 = vmatpush.msra.mxu1 %v8840_v53  ;;  %v8837_v39 = vsel %vm624_vm9, %v12008_v58, %v12009_v25  ;;  %v8838_v30 = vsel %vm624_vm9, %v12009_v25, %v12013_v28  ;;  %v8943_v28 = vld [vmem:[#allocation3 + $0x728] sm:$0xff] }
 0xe2e   : > { %10391 = vmatmul.msk.f32.gmra.mxu0 %vm418_vm8, %v8587_v29  ;;  %10395 = vmatmul.msk.f32.gmra.mxu1 %vm418_vm8, %v8587_v29 }
 0xe2f   : > { %8877 = vmatpush.msra.mxu0 %v8837_v39  ;;  %8906 = vmatpush.msra.mxu1 %v8838_v30  ;;  %v8797_v30 = vld [vmem:[#allocation3 + $0x710] sm:$0xff] }
 0xe31   : > { %v12017_v18 = vpop.permute.xlu0 %12016  ;;  %v16611_v4 = vpop.permute.xlu2 %12046 }
 0xe32   : > { %v12019_v63 = vunpack.i.h.bf16 %v12017_v18  ;;  %v12018_v31 = vunpack.i.l.bf16 %v12017_v18  ;;  %v12032_v1 = vpop.permute.xlu1 %12031  ;;  %v12048_v48 = vunpack.i.l.bf16 %v16611_v4  ;;  %v12049_v61 = vunpack.i.h.bf16 %v16611_v4 }
 0xe33   : > { %v12034_v35 = vunpack.i.h.bf16 %v12032_v1  ;;  %v12033_v17 = vunpack.i.l.bf16 %v12032_v1 }
 0xe34   : > { %v8835_v24 = vsel %vm624_vm9, %v12014_v16, %v12018_v31  ;;  %v8836_v8 = vsel %vm624_vm9, %v12018_v31, %v12019_v63  ;;  %v8944_v63 = vld [vmem:[#allocation3 + $0x730] sm:$0xff] }
 0xe35   : > { %8878 = vmatpush.msra.mxu0 %v8835_v24  ;;  %8907 = vmatpush.msra.mxu1 %v8836_v8  ;;  %v8984_v49 = vsel %vm784_vm10, %v12033_v17, %v12034_v35  ;;  %v8985_v54 = vsel %vm784_vm10, %v12034_v35, %v12038_v5  ;;  %v8798_v24 = vld [vmem:[#allocation3 + $0x718] sm:$0xff] }
 0xe36   : > { %10392 = vmatmul.msk.f32.gmra.mxu0 %vm418_vm8, %v8588_v13  ;;  %10396 = vmatmul.msk.f32.gmra.mxu1 %vm418_vm8, %v8588_v13 }
 0xe39   : > { %v12027_v59 = vpop.permute.xlu0 %12026  ;;  %v16618_v32 = vpop.permute.xlu2 %12071 }
 0xe3a   : > { %v12057_v26 = vpop.permute.xlu1 %12056  ;;  %v12029_v11 = vunpack.i.h.bf16 %v12027_v59  ;;  %v12028_v50 = vunpack.i.l.bf16 %v12027_v59  ;;  %v12073_v46 = vunpack.i.l.bf16 %v16618_v32  ;;  %v12074_v58 = vunpack.i.h.bf16 %v16618_v32 }
 0xe3b   : > { %v12059_v43 = vunpack.i.h.bf16 %v12057_v26  ;;  %v12058_v7 = vunpack.i.l.bf16 %v12057_v26  ;;  %v8945_v26 = vld [vmem:[#allocation3 + $0x738] sm:$0xff] }
 0xe3c   : > { %v8986_v23 = vsel %vm784_vm10, %v12024_v42, %v12028_v50  ;;  %v8987_v57 = vsel %vm784_vm10, %v12028_v50, %v12029_v11 }
 0xe3d   : > { %v8988_v20 = vsel %vm784_vm10, %v12058_v7, %v12059_v43  ;;  %v8989_v56 = vsel %vm784_vm10, %v12059_v43, %v12023_v2 }
 0xe3e   : > { %10393 = vmatmul.msk.f32.gmra.mxu0 %vm418_vm8, %v8589_v44  ;;  %10397 = vmatmul.msk.f32.gmra.mxu1 %vm418_vm8, %v8589_v44 }
 0xe3f   : > { %9022 = vmatpush.msrb.mxu2 %v8988_v20  ;;  %9051 = vmatpush.msrb.mxu3 %v8989_v56 }
 0xe41   : > { %v12042_v34 = vpop.permute.xlu0 %12041  ;;  %9023 = vmatpush.msrb.mxu2 %v8986_v23  ;;  %9052 = vmatpush.msrb.mxu3 %v8987_v57  ;;  %v16632_v19 = vpop.permute.xlu2 %12081 }
 0xe42   : > { %v12044_v52 = vunpack.i.h.bf16 %v12042_v34  ;;  %v12043_v3 = vunpack.i.l.bf16 %v12042_v34  ;;  %v12062_v21 = vpop.permute.xlu1 %12061  ;;  %v12083_v13 = vunpack.i.l.bf16 %v16632_v19  ;;  %v12084_v7 = vunpack.i.h.bf16 %v16632_v19  ;;  %v9089_v34 = vld [vmem:[#allocation3 + $0x740] sm:$0xff] }
 0xe43   : > { %v12064_v33 = vunpack.i.h.bf16 %v12062_v21  ;;  %v12063_v45 = vunpack.i.l.bf16 %v12062_v21  ;;  %9024 = vmatpush.msrb.mxu2 %v8984_v49  ;;  %9053 = vmatpush.msrb.mxu3 %v8985_v54 }
 0xe44   : > { %v8982_v51 = vsel %vm784_vm10, %v12039_v6, %v12043_v3  ;;  %v8983_v36 = vsel %vm784_vm10, %v12043_v3, %v12044_v52 }
 0xe45   : > { %9025 = vmatpush.msrb.mxu2 %v8982_v51  ;;  %9054 = vmatpush.msrb.mxu3 %v8983_v36  ;;  %v9135_v9 = vsel %vm943_vm11, %v12063_v45, %v12064_v33  ;;  %v9136_v41 = vsel %vm943_vm11, %v12064_v33, %v12048_v48 }
 0xe46   : > { %10406 = vmatmul.msk.f32.vlgmr.msra.gmra.mxu0 %vm418_vm8, %v8795_v27  ;;  %10410 = vmatmul.msk.f32.vlgmr.msra.gmra.mxu1 %vm418_vm8, %v8795_v27  ;;  %v9236_v27 = vld [vmem:[#allocation3 + $0x760] sm:$0xff] }
 0xe47   : > { %10414 = vmatmul.msk.f32.vlgmr.msrb.gmra.mxu2 %vm418_vm8, %v8942_v40  ;;  %10418 = vmatmul.msk.f32.vlgmr.msrb.gmra.mxu3 %vm418_vm8, %v8942_v40 }
 0xe48   : > { %9169 = vmatpush.msrb.mxu0 %v9135_v9  ;;  %9198 = vmatpush.msrb.mxu1 %v9136_v41 }
 0xe49   : > { %v12052_v47 = vpop.permute.xlu0 %12051  ;;  %v16644_v55 = vpop.permute.xlu2 %12096 }
 0xe4a   : > { %v12054_v38 = vunpack.i.h.bf16 %v12052_v47  ;;  %v12053_v60 = vunpack.i.l.bf16 %v12052_v47  ;;  %v12067_v22 = vpop.permute.xlu1 %12066  ;;  %v12098_v56 = vunpack.i.l.bf16 %v16644_v55  ;;  %v12099_v5 = vunpack.i.h.bf16 %v16644_v55 }
 0xe4b   : > { %v12069_v15 = vunpack.i.h.bf16 %v12067_v22  ;;  %v12068_v62 = vunpack.i.l.bf16 %v12067_v22 }
 0xe4c   : > { %v9133_v37 = vsel %vm943_vm11, %v12049_v61, %v12053_v60  ;;  %v9134_v14 = vsel %vm943_vm11, %v12053_v60, %v12054_v38  ;;  %v9090_v38 = vld [vmem:[#allocation3 + $0x748] sm:$0xff] }
 0xe4d   : > { %9170 = vmatpush.msrb.mxu0 %v9133_v37  ;;  %9199 = vmatpush.msrb.mxu1 %v9134_v14  ;;  %v9131_v0 = vsel %vm943_vm11, %v12068_v62, %v12069_v15  ;;  %v9132_v29 = vsel %vm943_vm11, %v12069_v15, %v12073_v46  ;;  %v9237_v15 = vld [vmem:[#allocation3 + $0x768] sm:$0xff] }
 0xe4e   : > { %10407 = vmatmul.msk.f32.gmra.mxu0 %vm418_vm8, %v8796_v12  ;;  %10411 = vmatmul.msk.f32.gmra.mxu1 %vm418_vm8, %v8796_v12 }
 0xe4f   : > { %10415 = vmatmul.msk.f32.gmra.mxu2 %vm418_vm8, %v8943_v28  ;;  %10419 = vmatmul.msk.f32.gmra.mxu3 %vm418_vm8, %v8943_v28 }
 0xe50   : > { %9171 = vmatpush.msrb.mxu0 %v9131_v0  ;;  %9200 = vmatpush.msrb.mxu1 %v9132_v29 }
 0xe51   : > { %v12077_v25 = vpop.permute.xlu0 %12076  ;;  %v16657_v31 = vpop.permute.xlu2 %12106 }
 0xe52   : > { %v12079_v10 = vunpack.i.h.bf16 %v12077_v25  ;;  %v12078_v53 = vunpack.i.l.bf16 %v12077_v25  ;;  %v12092_v39 = vpop.permute.xlu1 %12091  ;;  %v12108_v54 = vunpack.i.l.bf16 %v16657_v31  ;;  %v12109_v36 = vunpack.i.h.bf16 %v16657_v31  ;;  %v9091_v25 = vld [vmem:[#allocation3 + $0x750] sm:$0xff] }
 0xe53   : > { %v12094_v11 = vunpack.i.h.bf16 %v12092_v39  ;;  %v12093_v50 = vunpack.i.l.bf16 %v12092_v39  ;;  %v9238_v39 = vld [vmem:[#allocation3 + $0x770] sm:$0xff] }
 0xe54   : > { %v9129_v18 = vsel %vm943_vm11, %v12074_v58, %v12078_v53  ;;  %v9130_v16 = vsel %vm943_vm11, %v12078_v53, %v12079_v10 }
 0xe55   : > { %9172 = vmatpush.msrb.mxu0 %v9129_v18  ;;  %9201 = vmatpush.msrb.mxu1 %v9130_v16  ;;  %v9278_v21 = vsel %vm1103_vm13, %v12093_v50, %v12094_v11  ;;  %v9279_v49 = vsel %vm1103_vm13, %v12094_v11, %v12098_v56 }
 0xe56   : > { %10408 = vmatmul.msk.f32.gmra.mxu0 %vm418_vm8, %v8797_v30  ;;  %10412 = vmatmul.msk.f32.gmra.mxu1 %vm418_vm8, %v8797_v30 }
 0xe57   : > { %10416 = vmatmul.msk.f32.gmra.mxu2 %vm418_vm8, %v8944_v63  ;;  %10420 = vmatmul.msk.f32.gmra.mxu3 %vm418_vm8, %v8944_v63  ;;  %v9092_v63 = vld [vmem:[#allocation3 + $0x758] sm:$0xff] }
 0xe59   : > { %v12087_v1 = vpop.permute.xlu0 %12086  ;;  %v16671_v20 = vpop.permute.xlu2 %12131 }
 0xe5a   : > { %v12117_v4 = vpop.permute.xlu1 %12116  ;;  %v12089_v2 = vunpack.i.h.bf16 %v12087_v1  ;;  %v12088_v32 = vunpack.i.l.bf16 %v12087_v1  ;;  %v12133_v61 = vunpack.i.l.bf16 %v16671_v20  ;;  %v12134_v14 = vunpack.i.h.bf16 %v16671_v20 }
 0xe5b   : > { %v12119_v8 = vunpack.i.h.bf16 %v12117_v4  ;;  %v12118_v59 = vunpack.i.l.bf16 %v12117_v4 }
 0xe5c   : > { %v9280_v35 = vsel %vm1103_vm13, %v12084_v7, %v12088_v32  ;;  %v9281_v17 = vsel %vm1103_vm13, %v12088_v32, %v12089_v2 }
 0xe5d   : > { %v9282_v44 = vsel %vm1103_vm13, %v12118_v59, %v12119_v8  ;;  %v9283_v43 = vsel %vm1103_vm13, %v12119_v8, %v12083_v13 }
 0xe5e   : > { %10409 = vmatmul.msk.f32.gmra.mxu0 %vm418_vm8, %v8798_v24  ;;  %10413 = vmatmul.msk.f32.gmra.mxu1 %vm418_vm8, %v8798_v24  ;;  %v9239_v24 = vld [vmem:[#allocation3 + $0x778] sm:$0xff] }
 0xe5f   : > { %10417 = vmatmul.msk.f32.gmra.mxu2 %vm418_vm8, %v8945_v26  ;;  %10421 = vmatmul.msk.f32.gmra.mxu3 %vm418_vm8, %v8945_v26 }
 0xe60   : > { %9316 = vmatpush.msra.mxu2 %v9282_v44  ;;  %9345 = vmatpush.msra.mxu3 %v9283_v43 }
 0xe61   : > { %v12102_v42 = vpop.permute.xlu0 %12101  ;;  %v12142_v40 = vpop.permute.xlu2 %12141 }
 0xe62   : > { %v12104_v23 = vunpack.i.h.bf16 %v12102_v42  ;;  %v12103_v57 = vunpack.i.l.bf16 %v12102_v42  ;;  %9317 = vmatpush.msra.mxu2 %v9280_v35  ;;  %9346 = vmatpush.msra.mxu3 %v9281_v17  ;;  %v12122_v6 = vpop.permute.xlu1 %12121  ;;  %v12143_v16 = vunpack.i.l.bf16 %v12142_v40  ;;  %v12144_v26 = vunpack.i.h.bf16 %v12142_v40  ;;  %v9384_v40 = vld [vmem:[#allocation3 + $0x788] sm:$0xff] }
 0xe63   : > { %v12124_v52 = vunpack.i.h.bf16 %v12122_v6  ;;  %v12123_v3 = vunpack.i.l.bf16 %v12122_v6 }
 0xe64   : > { %9318 = vmatpush.msra.mxu2 %v9278_v21  ;;  %9347 = vmatpush.msra.mxu3 %v9279_v49  ;;  %v9276_v48 = vsel %vm1103_vm13, %v12099_v5, %v12103_v57  ;;  %v9277_v19 = vsel %vm1103_vm13, %v12103_v57, %v12104_v23  ;;  %v9383_v57 = vld [vmem:[#allocation3 + $0x780] sm:$0xff] }
 0xe65   : > { %v9429_v33 = vsel %vm1262_vm14, %v12123_v3, %v12124_v52  ;;  %v9430_v45 = vsel %vm1262_vm14, %v12124_v52, %v12108_v54  ;;  %v9530_v21 = vld [vmem:[#allocation3 + $0x7a0] sm:$0xff] }
 0xe66   : > { %10422 = vmatmul.msk.f32.vlgmr.msrb.gmra.mxu0 %vm418_vm8, %v9089_v34  ;;  %10426 = vmatmul.msk.f32.vlgmr.msrb.gmra.mxu1 %vm418_vm8, %v9089_v34 }
 0xe67   : > { %9319 = vmatpush.msra.mxu2 %v9276_v48  ;;  %9348 = vmatpush.msra.mxu3 %v9277_v19 }
 0xe68   : > { %10430 = vmatmul.msk.f32.vlgmr.msra.gmra.mxu2 %vm418_vm8, %v9236_v27  ;;  %10434 = vmatmul.msk.f32.vlgmr.msra.gmra.mxu3 %vm418_vm8, %v9236_v27 }
 0xe69   : > { %v12112_v51 = vpop.permute.xlu0 %12111  ;;  %9463 = vmatpush.msra.mxu0 %v9429_v33  ;;  %9492 = vmatpush.msra.mxu1 %v9430_v45  ;;  %v12157_v58 = vpop.permute.xlu2 %12156 }
 0xe6a   : > { %v12114_v9 = vunpack.i.h.bf16 %v12112_v51  ;;  %v12113_v41 = vunpack.i.l.bf16 %v12112_v51  ;;  %v12127_v47 = vpop.permute.xlu1 %12126  ;;  %v12158_v43 = vunpack.i.l.bf16 %v12157_v58  ;;  %v12159_v50 = vunpack.i.h.bf16 %v12157_v58  ;;  %v9533_v58 = vld [vmem:[#allocation3 + $0x7b8] sm:$0xff] }
 0xe6b   : > { %v12129_v60 = vunpack.i.h.bf16 %v12127_v47  ;;  %v12128_v22 = vunpack.i.l.bf16 %v12127_v47 }
 0xe6c   : > { %v9427_v46 = vsel %vm1262_vm14, %v12109_v36, %v12113_v41  ;;  %v9428_v12 = vsel %vm1262_vm14, %v12113_v41, %v12114_v9 }
 0xe6d   : > { %9464 = vmatpush.msra.mxu0 %v9427_v46  ;;  %9493 = vmatpush.msra.mxu1 %v9428_v12  ;;  %v9425_v62 = vsel %vm1262_vm14, %v12128_v22, %v12129_v60  ;;  %v9426_v55 = vsel %vm1262_vm14, %v12129_v60, %v12133_v61 }
 0xe6e   : > { %10423 = vmatmul.msk.f32.gmra.mxu0 %vm418_vm8, %v9090_v38  ;;  %10427 = vmatmul.msk.f32.gmra.mxu1 %vm418_vm8, %v9090_v38  ;;  %v9531_v38 = vld [vmem:[#allocation3 + $0x7a8] sm:$0xff] }
 0xe6f   : > { %9465 = vmatpush.msra.mxu0 %v9425_v62  ;;  %9494 = vmatpush.msra.mxu1 %v9426_v55  ;;  %v9385_v55 = vld [vmem:[#allocation3 + $0x790] sm:$0xff] }
 0xe70   : > { %10431 = vmatmul.msk.f32.gmra.mxu2 %vm418_vm8, %v9237_v15  ;;  %10435 = vmatmul.msk.f32.gmra.mxu3 %vm418_vm8, %v9237_v15 }
 0xe71   : > { %v12137_v37 = vpop.permute.xlu0 %12136  ;;  %v12167_v2 = vpop.permute.xlu2 %12166 }
 0xe72   : > { %v12139_v28 = vunpack.i.h.bf16 %v12137_v37  ;;  %v12138_v0 = vunpack.i.l.bf16 %v12137_v37  ;;  %v12152_v29 = vpop.permute.xlu1 %12151  ;;  %v12168_v23 = vunpack.i.l.bf16 %v12167_v2  ;;  %v12169_v27 = vunpack.i.h.bf16 %v12167_v2 }
 0xe73   : > { %v12154_v32 = vunpack.i.h.bf16 %v12152_v29  ;;  %v12153_v44 = vunpack.i.l.bf16 %v12152_v29  ;;  %v8741_v29 = vpop.f32.mrf.mxu2 }
 0xe74   : > { %v9423_v10 = vsel %vm1262_vm14, %v12134_v14, %v12138_v0  ;;  %v9424_v53 = vsel %vm1262_vm14, %v12138_v0, %v12139_v28  ;;  %v9532_v28 = vld [vmem:[#allocation3 + $0x7b0] sm:$0xff]  ;;  %v9386_v0 = vld [vmem:[#allocation3 + $0x798] sm:$0xff] }
 0xe75   : > { %9466 = vmatpush.msra.mxu0 %v9423_v10  ;;  %9495 = vmatpush.msra.mxu1 %v9424_v53  ;;  %v9572_v17 = vsel %vm1422_vm15, %v12153_v44, %v12154_v32  ;;  %v9573_v5 = vsel %vm1422_vm15, %v12154_v32, %v12158_v43  ;;  %v9679_v32 = vld [vmem:[#allocation3 + $0x7d0] sm:$0xff] }
 0xe76   : > { %10424 = vmatmul.msk.f32.gmra.mxu0 %vm418_vm8, %v9091_v25  ;;  %10428 = vmatmul.msk.f32.gmra.mxu1 %vm418_vm8, %v9091_v25  ;;  %v8770_v25 = vpop.f32.mrf.mxu3 }
 0xe78   : > { %10432 = vmatmul.msk.f32.gmra.mxu2 %vm418_vm8, %v9238_v39  ;;  %10436 = vmatmul.msk.f32.gmra.mxu3 %vm418_vm8, %v9238_v39  ;;  %v9677_v39 = vld [vmem:[#allocation3 + $0x7c0] sm:$0xff] }
 0xe79   : > { %v12147_v30 = vpop.permute.xlu0 %12146  ;;  %v12192_v48 = vpop.permute.xlu2 %12191 }
 0xe7a   : > { %v12177_v18 = vpop.permute.xlu1 %12176  ;;  %v12149_v4 = vunpack.i.h.bf16 %v12147_v30  ;;  %v12148_v13 = vunpack.i.l.bf16 %v12147_v30  ;;  %v12193_v36 = vunpack.i.l.bf16 %v12192_v48  ;;  %v12194_v12 = vunpack.i.h.bf16 %v12192_v48 }
 0xe7b   : > { %v12179_v31 = vunpack.i.h.bf16 %v12177_v18  ;;  %v12178_v1 = vunpack.i.l.bf16 %v12177_v18 }
 0xe7c   : > { %v9574_v7 = vsel %vm1422_vm15, %v12144_v26, %v12148_v13  ;;  %v9575_v11 = vsel %vm1422_vm15, %v12148_v13, %v12149_v4  ;;  %v9678_v4 = vld [vmem:[#allocation3 + $0x7c8] sm:$0xff] }
 0xe7d   : > { %v9576_v8 = vsel %vm1422_vm15, %v12178_v1, %v12179_v31  ;;  %v9577_v59 = vsel %vm1422_vm15, %v12179_v31, %v12143_v16  ;;  %v8744_v16 = vpop.f32.mrf.mxu2 }
 0xe7e   : > { %10425 = vmatmul.msk.f32.gmra.mxu0 %vm418_vm8, %v9092_v63  ;;  %10429 = vmatmul.msk.f32.gmra.mxu1 %vm418_vm8, %v9092_v63  ;;  %v8773_v63 = vpop.f32.mrf.mxu3 }
 0xe7f   : > { %9610 = vmatpush.msrb.mxu2 %v9576_v8  ;;  %9639 = vmatpush.msrb.mxu3 %v9577_v59 }
 0xe80   : > { %10433 = vmatmul.msk.f32.gmra.mxu2 %vm418_vm8, %v9239_v24  ;;  %10437 = vmatmul.msk.f32.gmra.mxu3 %vm418_vm8, %v9239_v24 }
 0xe81   : > { %v12162_v20 = vpop.permute.xlu0 %12161  ;;  %9611 = vmatpush.msrb.mxu2 %v9574_v7  ;;  %9640 = vmatpush.msrb.mxu3 %v9575_v11 }
 0xe82   : > { %v12164_v56 = vunpack.i.h.bf16 %v12162_v20  ;;  %v12163_v42 = vunpack.i.l.bf16 %v12162_v20  ;;  %v12182_v35 = vpop.permute.xlu1 %12181 }
 0xe83   : > { %v12184_v6 = vunpack.i.h.bf16 %v12182_v35  ;;  %v12183_v34 = vunpack.i.l.bf16 %v12182_v35  ;;  %9612 = vmatpush.msrb.mxu2 %v9572_v17  ;;  %9641 = vmatpush.msrb.mxu3 %v9573_v5 }
 0xe84   : > { %v9570_v52 = vsel %vm1422_vm15, %v12159_v50, %v12163_v42  ;;  %v9571_v3 = vsel %vm1422_vm15, %v12163_v42, %v12164_v56  ;;  %v9680_v56 = vld [vmem:[#allocation3 + $0x7d8] sm:$0xff] }
 0xe85   : > { %9613 = vmatpush.msrb.mxu2 %v9570_v52  ;;  %9642 = vmatpush.msrb.mxu3 %v9571_v3  ;;  %v9723_v49 = vsel %vm1581_vm0, %v12183_v34, %v12184_v6  ;;  %v9724_v54 = vsel %vm1581_vm0, %v12184_v6, %v12168_v23  ;;  %v8747_v8 = vpop.f32.mrf.mxu2 }
 0xe86   : > { %10438 = vmatmul.msk.f32.vlgmr.msra.gmra.mxu0 %vm418_vm8, %v9383_v57  ;;  %10442 = vmatmul.msk.f32.vlgmr.msra.gmra.mxu1 %vm418_vm8, %v9383_v57  ;;  %v8776_v59 = vpop.f32.mrf.mxu3 }
 0xe87   : > { %9757 = vmatpush.msrb.mxu0 %v9723_v49  ;;  %9786 = vmatpush.msrb.mxu1 %v9724_v54 }
 0xe88   : > { %10446 = vmatmul.msk.f32.vlgmr.msrb.gmra.mxu2 %vm418_vm8, %v9530_v21  ;;  %10450 = vmatmul.msk.f32.vlgmr.msrb.gmra.mxu3 %vm418_vm8, %v9530_v21 }
 0xe89   : > { %v12172_v19 = vpop.permute.xlu0 %12171 }
 0xe8a   : > { %v12174_v33 = vunpack.i.h.bf16 %v12172_v19  ;;  %v12173_v45 = vunpack.i.l.bf16 %v12172_v19  ;;  %v12187_v51 = vpop.permute.xlu1 %12186 }
 0xe8b   : > { %v12189_v9 = vunpack.i.h.bf16 %v12187_v51  ;;  %v12188_v41 = vunpack.i.l.bf16 %v12187_v51 }
 0xe8c   : > { %v9721_v47 = vsel %vm1581_vm0, %v12169_v27, %v12173_v45  ;;  %v9722_v61 = vsel %vm1581_vm0, %v12173_v45, %v12174_v33 }
 0xe8d   : > { %9758 = vmatpush.msrb.mxu0 %v9721_v47  ;;  %9787 = vmatpush.msrb.mxu1 %v9722_v61  ;;  %v9719_v60 = vsel %vm1581_vm0, %v12188_v41, %v12189_v9  ;;  %v9720_v22 = vsel %vm1581_vm0, %v12189_v9, %v12193_v36  ;;  %v8750_v7 = vpop.f32.mrf.mxu2 }
 0xe8e   : > { %10439 = vmatmul.msk.f32.gmra.mxu0 %vm418_vm8, %v9384_v40  ;;  %10443 = vmatmul.msk.f32.gmra.mxu1 %vm418_vm8, %v9384_v40  ;;  %v8779_v11 = vpop.f32.mrf.mxu3 }
 0xe8f   : > { %9759 = vmatpush.msrb.mxu0 %v9719_v60  ;;  %9788 = vmatpush.msrb.mxu1 %v9720_v22 }
 0xe90   : > { %10447 = vmatmul.msk.f32.gmra.mxu2 %vm418_vm8, %v9531_v38  ;;  %10451 = vmatmul.msk.f32.gmra.mxu3 %vm418_vm8, %v9531_v38 }
 0xe91   : > { %v12197_v46 = vpop.permute.xlu0 %12196 }
 0xe92   : > { %v12199_v15 = vunpack.i.h.bf16 %v12197_v46  ;;  %v12198_v62 = vunpack.i.l.bf16 %v12197_v46 }
 0xe94   : > { %v9717_v37 = vsel %vm1581_vm0, %v12194_v12, %v12198_v62  ;;  %v9718_v14 = vsel %vm1581_vm0, %v12198_v62, %v12199_v15 }
 0xe95   : > { %9760 = vmatpush.msrb.mxu0 %v9717_v37  ;;  %9789 = vmatpush.msrb.mxu1 %v9718_v14 }
 0xe96   : > { %10440 = vmatmul.msk.f32.gmra.mxu0 %vm418_vm8, %v9385_v55  ;;  %10444 = vmatmul.msk.f32.gmra.mxu1 %vm418_vm8, %v9385_v55 }
 0xe98   : > { %10448 = vmatmul.msk.f32.gmra.mxu2 %vm418_vm8, %v9532_v28  ;;  %10452 = vmatmul.msk.f32.gmra.mxu3 %vm418_vm8, %v9532_v28 }
 0xe9e   : > { %10441 = vmatmul.msk.f32.gmra.mxu0 %vm418_vm8, %v9386_v0  ;;  %10445 = vmatmul.msk.f32.gmra.mxu1 %vm418_vm8, %v9386_v0 }
 0xea0   : > { %10449 = vmatmul.msk.f32.gmra.mxu2 %vm418_vm8, %v9533_v58  ;;  %10453 = vmatmul.msk.f32.gmra.mxu3 %vm418_vm8, %v9533_v58 }
 0xea3   : > { %v8671_v10 = vpop.f32.mrf.mxu0  ;;  %v8700_v53 = vpop.f32.mrf.mxu1 }
 0xea4   : > { %v8742_v30 = vadd.f32 %v8741_v29, %v8671_v10  ;;  %v8771_v18 = vadd.f32 %v8770_v25, %v8700_v53 }
 0xea6   : > { %10454 = vmatmul.msk.f32.vlgmr.msrb.gmra.mxu0 %vm418_vm8, %v9677_v39  ;;  %10458 = vmatmul.msk.f32.vlgmr.msrb.gmra.mxu1 %vm418_vm8, %v9677_v39 }
 0xeab   : > { %v8674_v31 = vpop.f32.mrf.mxu0  ;;  %v8703_v1 = vpop.f32.mrf.mxu1 }
 0xeac   : > { %v8745_v13 = vadd.f32 %v8744_v16, %v8674_v31  ;;  %v8774_v24 = vadd.f32 %v8773_v63, %v8703_v1 }
 0xeae   : > { %10455 = vmatmul.msk.f32.gmra.mxu0 %vm418_vm8, %v9678_v4  ;;  %10459 = vmatmul.msk.f32.gmra.mxu1 %vm418_vm8, %v9678_v4 }
 0xeb3   : > { %v8677_v26 = vpop.f32.mrf.mxu0  ;;  %v8706_v2 = vpop.f32.mrf.mxu1 }
 0xeb4   : > { %v8748_v44 = vadd.f32 %v8747_v8, %v8677_v26  ;;  %v8777_v43 = vadd.f32 %v8776_v59, %v8706_v2 }
 0xeb6   : > { %10456 = vmatmul.msk.f32.gmra.mxu0 %vm418_vm8, %v9679_v32  ;;  %10460 = vmatmul.msk.f32.gmra.mxu1 %vm418_vm8, %v9679_v32 }
 0xebb   : > { %v8680_v50 = vpop.f32.mrf.mxu0  ;;  %v8709_v20 = vpop.f32.mrf.mxu1 }
 0xebc   : > { %v8751_v42 = vadd.f32 %v8750_v7, %v8680_v50  ;;  %v8780_v35 = vadd.f32 %v8779_v11, %v8709_v20 }
 0xebe   : > { %10457 = vmatmul.msk.f32.gmra.mxu0 %vm418_vm8, %v9680_v56  ;;  %10461 = vmatmul.msk.f32.gmra.mxu1 %vm418_vm8, %v9680_v56 }
 0xec3   : > { %v8880_v17 = vpop.f32.mrf.mxu0  ;;  %v8909_v5 = vpop.f32.mrf.mxu1 }
 0xec4   : > { %v8921_v23 = vadd.f32 %v8880_v17, %v8742_v30  ;;  %v8922_v57 = vadd.f32 %v8909_v5, %v8771_v18 }
 0xeca   : > { %v9027_v6 = vpop.f32.mrf.mxu2  ;;  %v9056_v34 = vpop.f32.mrf.mxu3 }
 0xecb   : > { %v8883_v52 = vpop.f32.mrf.mxu0  ;;  %v8912_v3 = vpop.f32.mrf.mxu1 }
 0xecc   : > { %v8923_v21 = vadd.f32 %v8883_v52, %v8745_v13  ;;  %v8924_v49 = vadd.f32 %v8912_v3, %v8774_v24  ;;  %v9068_v13 = vadd.f32 %v9027_v6, %v8921_v23  ;;  %v9069_v24 = vadd.f32 %v9056_v34, %v8922_v57  ;;  %v9819_v52 = vpop.permute.xlu1 %9818 }
 0xed2   : > { %v9030_v54 = vpop.f32.mrf.mxu2  ;;  %v9059_v48 = vpop.f32.mrf.mxu3 }
 0xed3   : > { %v8886_v19 = vpop.f32.mrf.mxu0  ;;  %v8915_v27 = vpop.f32.mrf.mxu1  ;;  %v9070_v11 = vadd.f32 %v9030_v54, %v8923_v21  ;;  %v9071_v50 = vadd.f32 %v9059_v48, %v8924_v49 }
 0xed4   : > { %v16749_v33 = vadd.f32 %v8886_v19, %v8748_v44  ;;  %v16751_v45 = vadd.f32 %v8915_v27, %v8777_v43 }
 0xeda   : > { %v9033_v41 = vpop.f32.mrf.mxu2  ;;  %v9062_v47 = vpop.f32.mrf.mxu3 }
 0xedb   : > { %v8889_v51 = vpop.f32.mrf.mxu0  ;;  %v8918_v36 = vpop.f32.mrf.mxu1  ;;  %v9072_v27 = vadd.f32 %v9033_v41, %v16749_v33 }
 0xedc   : > { %v16753_v40 = vadd.f32 %v8889_v51, %v8751_v42  ;;  %v16755_v9 = vadd.f32 %v8918_v36, %v8780_v35  ;;  %v9073_v51 = vadd.f32 %v9062_v47, %v16751_v45 }
 0xee2   : > { %v16757_v60 = vpop.f32.mrf.mxu2  ;;  %v16759_v22 = vpop.f32.mrf.mxu3 }
 0xee3   : > { %v9174_v61 = vpop.f32.mrf.mxu0  ;;  %v9203_v38 = vpop.f32.mrf.mxu1  ;;  %v9074_v45 = vadd.f32 %v16757_v60, %v16753_v40  ;;  %v9075_v47 = vadd.f32 %v16759_v22, %v16755_v9 }
 0xee4   : > { %v9215_v26 = vadd.f32 %v9174_v61, %v9068_v13  ;;  %v9216_v2 = vadd.f32 %v9203_v38, %v9069_v24 }
 0xeeb   : > { %v9177_v46 = vpop.f32.mrf.mxu0  ;;  %v9206_v12 = vpop.f32.mrf.mxu1 }
 0xeec   : > { %v9321_v15 = vpop.f32.mrf.mxu2  ;;  %v9350_v62 = vpop.f32.mrf.mxu3  ;;  %v9217_v23 = vadd.f32 %v9177_v46, %v9070_v11  ;;  %v9218_v57 = vadd.f32 %v9206_v12, %v9071_v50 }
 0xeed   : > { %v9362_v32 = vadd.f32 %v9321_v15, %v9215_v26  ;;  %v9363_v44 = vadd.f32 %v9350_v62, %v9216_v2  ;;  %v9824_v12 = vpop.permute.xlu2 %9823  ;;  %v9829_v26 = vpop.permute.xlu0 %9828 }
 0xef3   : > { %v9180_v55 = vpop.f32.mrf.mxu0  ;;  %v9209_v37 = vpop.f32.mrf.mxu1 }
 0xef4   : > { %v9324_v14 = vpop.f32.mrf.mxu2  ;;  %v9353_v28 = vpop.f32.mrf.mxu3  ;;  %v9219_v15 = vadd.f32 %v9180_v55, %v9072_v27  ;;  %v9220_v62 = vadd.f32 %v9209_v37, %v9073_v51 }
 0xef5   : > { %v9364_v3 = vadd.f32 %v9324_v14, %v9217_v23  ;;  %v9365_v21 = vadd.f32 %v9353_v28, %v9218_v57 }
 0xefb   : > { %v16761_v0 = vpop.f32.mrf.mxu0  ;;  %v16763_v29 = vpop.f32.mrf.mxu1 }
 0xefc   : > { %v9327_v10 = vpop.f32.mrf.mxu2  ;;  %v9356_v53 = vpop.f32.mrf.mxu3 }
 0xf03   : > { %v9468_v25 = vpop.f32.mrf.mxu0  ;;  %v9497_v58 = vpop.f32.mrf.mxu1 }
 0xf04   : > { %v16765_v18 = vpop.f32.mrf.mxu2  ;;  %v16767_v16 = vpop.f32.mrf.mxu3  ;;  %v9509_v43 = vadd.f32 %v9468_v25, %v9362_v32  ;;  %v9510_v7 = vadd.f32 %v9497_v58, %v9363_v44 }
 0xf0b   : > { %v9471_v39 = vpop.f32.mrf.mxu0  ;;  %v9500_v30 = vpop.f32.mrf.mxu1 }
 0xf0c   : > { %v9615_v1 = vpop.f32.mrf.mxu2  ;;  %v9644_v4 = vpop.f32.mrf.mxu3  ;;  %v9511_v48 = vadd.f32 %v9471_v39, %v9364_v3  ;;  %v9512_v19 = vadd.f32 %v9500_v30, %v9365_v21  ;;  %v9366_v39 = vadd.f32 %v9327_v10, %v9219_v15  ;;  %v9367_v30 = vadd.f32 %v9356_v53, %v9220_v62 }
 0xf0d   : > { %v9656_v20 = vadd.f32 %v9615_v1, %v9509_v43  ;;  %v9657_v56 = vadd.f32 %v9644_v4, %v9510_v7  ;;  %v9221_v10 = vadd.f32 %v16761_v0, %v9074_v45  ;;  %v9222_v53 = vadd.f32 %v16763_v29, %v9075_v47 }
 0xf0f   : > { %v9368_v2 = vadd.f32 %v16765_v18, %v9221_v10  ;;  %v9369_v40 = vadd.f32 %v16767_v16, %v9222_v53 }
 0xf13   : > { %v9474_v63 = vpop.f32.mrf.mxu0  ;;  %v9503_v31 = vpop.f32.mrf.mxu1 }
 0xf14   : > { %v9618_v42 = vpop.f32.mrf.mxu2  ;;  %v9647_v35 = vpop.f32.mrf.mxu3  ;;  %v9513_v33 = vadd.f32 %v9474_v63, %v9366_v39  ;;  %v9514_v41 = vadd.f32 %v9503_v31, %v9367_v30 }
 0xf15   : > { %v9658_v36 = vadd.f32 %v9618_v42, %v9511_v48  ;;  %v9659_v61 = vadd.f32 %v9647_v35, %v9512_v19 }
 0xf1b   : > { %v16769_v8 = vpop.f32.mrf.mxu0  ;;  %v16771_v59 = vpop.f32.mrf.mxu1 }
 0xf1c   : > { %v9621_v25 = vpop.f32.mrf.mxu2  ;;  %v9650_v58 = vpop.f32.mrf.mxu3  ;;  %v9515_v44 = vadd.f32 %v16769_v8, %v9368_v2  ;;  %v9516_v43 = vadd.f32 %v16771_v59, %v9369_v40 }
 0xf1d   : > { %v9660_v55 = vadd.f32 %v9621_v25, %v9513_v33  ;;  %v9661_v37 = vadd.f32 %v9650_v58, %v9514_v41 }
 0xf23   : > { %v9762_v17 = vpop.f32.mrf.mxu0  ;;  %v9791_v5 = vpop.f32.mrf.mxu1 }
 0xf24   : > { %v9803_v6 = vadd.f32 %v9762_v17, %v9656_v20  ;;  %v9804_v34 = vadd.f32 %v9791_v5, %v9657_v56  ;;  %v9624_v9 = vpop.f32.mrf.mxu2  ;;  %v9653_v22 = vpop.f32.mrf.mxu3 }
 0xf25   : > { %v9662_v0 = vadd.f32 %v9624_v9, %v9515_v44  ;;  %v9663_v29 = vadd.f32 %v9653_v22, %v9516_v43  ;;  %v9834_v20 = vpop.permute.xlu1 %9833 }
 0xf26   : > { %v9836_v49 = vadd.f32 %v9819_v52, %v9803_v6  ;;  %v9837_v54 = vadd.f32 %v9819_v52, %v9804_v34 }
 0xf28   : > { %9844 = vst [vmem:[%s16778_s27] sm:$0xff] %v9836_v49 }
 0xf29   : > { %9845 = vst [vmem:[%s16778_s27 + $0x8] sm:$0xff] %v9837_v54 }
 0xf2b   : > { %v9765_v38 = vpop.f32.mrf.mxu0  ;;  %v9794_v46 = vpop.f32.mrf.mxu1 }
 0xf2c   : > { %v9805_v14 = vadd.f32 %v9765_v38, %v9658_v36  ;;  %v9806_v28 = vadd.f32 %v9794_v46, %v9659_v61 }
 0xf2e   : > { %v9838_v1 = vadd.f32 %v9824_v12, %v9805_v14  ;;  %v9839_v4 = vadd.f32 %v9824_v12, %v9806_v28 }
 0xf30   : > { %9846 = vst [vmem:[%s16778_s27 + $0x10] sm:$0xff] %v9838_v1 }
 0xf31   : > { %9847 = vst [vmem:[%s16778_s27 + $0x18] sm:$0xff] %v9839_v4 }
 0xf33   : > { %v9768_v13 = vpop.f32.mrf.mxu0  ;;  %v9797_v24 = vpop.f32.mrf.mxu1 }
 0xf34   : > { %v9807_v63 = vadd.f32 %v9768_v13, %v9660_v55  ;;  %v9808_v31 = vadd.f32 %v9797_v24, %v9661_v37 }
 0xf36   : > { %v9840_v60 = vadd.f32 %v9829_v26, %v9807_v63  ;;  %v9841_v32 = vadd.f32 %v9829_v26, %v9808_v31 }
 0xf38   : > { %9848 = vst [vmem:[%s16778_s27 + $0x20] sm:$0xff] %v9840_v60 }
 0xf39   : > { %9849 = vst [vmem:[%s16778_s27 + $0x28] sm:$0xff] %v9841_v32 }
 0xf3b   : > { %v9771_v7 = vpop.f32.mrf.mxu0  ;;  %v9800_v11 = vpop.f32.mrf.mxu1 }
 0xf3c   : > { %v9809_v50 = vadd.f32 %v9771_v7, %v9662_v0  ;;  %v9810_v18 = vadd.f32 %v9800_v11, %v9663_v29 }
 0xf3e   : > { %v9842_v16 = vadd.f32 %v9834_v20, %v9809_v50  ;;  %v9843_v56 = vadd.f32 %v9834_v20, %v9810_v18 }
 0xf40   : > { %9850 = vst [vmem:[%s16778_s27 + $0x30] sm:$0xff] %v9842_v16 }
 0xf41   : > { %9851 = vst [vmem:[%s16778_s27 + $0x38] sm:$0xff] %v9843_v56 }
 0xf42 PF: > { %s15_s15 = sadd.s32 1, %s12240_s15  }
 0xf43   : > { %p12_p7 = scmp.ge.s32.totalorder %s15_s15, 4  }
 0xf45   :  { %14 = sbr.rel (!%p12_p7) target bundleno = 1 (0x1), region = 147 }
 0xf4a   :  { %9873 = vsyncpa [#allocation4], 1 }
 0xf4b   :  { %9875 = vsyncpa [#allocation4 + $0x1], 1 }

</bundles_post_ra>
